<compile_context>
chip_gen: v6e
topology: v6e:2x2x1
jax: 0.10.0
libtpu: 0.0.40
codegen_flags: <defaults>
</compile_context>

<pallas_src>
import jax
import jax.numpy as jnp
from jax import lax
from jax.experimental import pallas as pl
from jax.experimental.pallas import tpu as pltpu


def _residual_block_kernel(x_ref, w1_ref, w2_ref, b1_ref, b2_ref, out_ref,
                           pad_ref):
  """Fused residual block over one (Bblk, H, W, C) activation block.

  x_ref  : (Bblk, H, W, C)       f32   NHWC activations (identity path, exact f32)
  w1_ref : (9*C, C)              bf16  conv1 weights (ky,kx,cin)-major, BN1 folded
  w2_ref : (9*C, C)              bf16  conv2 weights, BN2 scale folded
  b1_ref : (1, C)                f32   folded BN1 bias
  b2_ref : (1, C)                f32   folded BN2 bias
  out_ref: (Bblk, H, W, C)       f32
  pad_ref: (Bblk, H+2, Wpad, C)  bf16  VMEM scratch: zero-ring padded activations
  """
  BB, H, W, C = x_ref.shape
  Wp = pad_ref.shape[2]
  cdt = pad_ref.dtype
  M = BB * H * W

  # Zero only the 1-pixel halo ring of the padded scratch (the interior is fully
  # overwritten before every conv).  Done every grid step so correctness never
  # depends on scratch persistence when the batch axis is sharded across cores.
  zrow = jnp.zeros((BB, 1, Wp, C), cdt)
  pad_ref[:, 0:1, :, :] = zrow
  pad_ref[:, H + 1:H + 2, :, :] = zrow
  zcol = jnp.zeros((BB, H + 2, 1, C), cdt)
  pad_ref[:, :, 0:1, :] = zcol
  pad_ref[:, :, W + 1:W + 2, :] = zcol
  # Columns beyond W+1 (sublane-alignment padding) are never read by the taps.

  x = x_ref[...]                                   # f32 identity kept exact

  def conv3x3(act_bf16, w_ref):
    # Store the bf16 activation interior once into the padded scratch, then
    # build im2col patches from 9 static taps of the sublane-aligned scratch ref
    # and run ONE long-K MXU matmul (K = 9*C) so the systolic array stays full.
    pad_ref[:, 1:H + 1, 1:W + 1, :] = act_bf16
    taps = [pad_ref[:, dy:dy + H, dx:dx + W, :]
            for dy in range(3) for dx in range(3)]
    patches = jnp.concatenate(taps, axis=-1).reshape(M, 9 * C)
    return jnp.dot(patches, w_ref[...], preferred_element_type=jnp.float32)

  # conv1 (BN1 scale pre-folded into weights) -> bias -> ReLU
  y = conv3x3(x.astype(cdt), w1_ref)               # (M, C) f32
  y = jnp.maximum(y + b1_ref[...], 0.0)

  # conv2 (BN2 scale pre-folded) -> bias -> +identity -> ReLU
  z = conv3x3(y.astype(cdt).reshape(BB, H, W, C), w2_ref)
  z = z + b2_ref[...] + x.reshape(M, C)
  out_ref[...] = jnp.maximum(z, 0.0).reshape(BB, H, W, C)


def _fold_bn(gamma, beta, mean, var, eps):
  scale = gamma / jnp.sqrt(var + eps)
  bias = beta - mean * scale
  return scale, bias


def _choose_batch_block(B, H, W):
  """Pick Bblk so the matmul M = Bblk*H*W fills the MXU (>= 256 rows) while
  keeping >= 2 grid steps when possible (both TensorCores busy on v7x)."""
  divisors = [d for d in range(1, B + 1) if B % d == 0]
  cands = [d for d in divisors if B // d >= 2] or divisors
  good = [d for d in cands if d * H * W >= 256]
  return min(good) if good else max(cands)


def residual_block_pallas_nhwc(x_nhwc, w1_oihw, w2_oihw,
                               g1, b1, m1, v1, g2, b2, m2, v2):
  """NHWC-resident residual block (primary entry point: no layout transposes)."""
  B, H, W, C = x_nhwc.shape
  eps = 1e-5
  compute_dtype = jnp.bfloat16        # MXU operands; accumulation/epilogue in f32

  s1, bb1 = _fold_bn(g1, b1, m1, v1, eps)
  s2, bb2 = _fold_bn(g2, b2, m2, v2, eps)

  def repack(w_oihw, scale):
    # (Cout, Cin, kh, kw) -> (kh, kw, Cin, Cout) -> (9*Cin, Cout),
    # with the per-Cout BN scale folded in before the bf16 cast.
    wk = jnp.transpose(w_oihw, (2, 3, 1, 0)).reshape(9 * C, C)
    return (wk * scale.reshape(1, C)).astype(compute_dtype)

  w1k = repack(w1_oihw, s1)
  w2k = repack(w2_oihw, s2)
  bb1 = bb1.reshape(1, C).astype(jnp.float32)
  bb2 = bb2.reshape(1, C).astype(jnp.float32)

  Bblk = _choose_batch_block(B, H, W)
  Wpad = ((W + 2 + 7) // 8) * 8       # scratch width: multiple of 8 sublanes

  # VMEM budget, re-derived from the block sizes (safe under v7x's 64 MiB VMEM).
  io_bytes = 2 * 2 * Bblk * H * W * C * 4              # in+out, double-buffered
  w_bytes = 2 * 2 * 9 * C * C * 2                      # weights (default 2 bufs)
  scratch_bytes = Bblk * (H + 2) * Wpad * C * 2
  patch_bytes = 2 * Bblk * H * W * 9 * C * 2           # im2col intermediates
  vmem_limit = int(min(48 * 1024 * 1024,
                       max(32 * 1024 * 1024,
                           2 * (io_bytes + w_bytes + scratch_bytes + patch_bytes))))

  flops = 4 * B * H * W * 9 * C * C                    # two 3x3 convs
  bytes_accessed = (B * H * W * C * 4 * 2              # x in + out
                    + 2 * 9 * C * C * 2                # bf16 weights
                    + 4 * C * 4)                       # biases

  return pl.pallas_call(
      _residual_block_kernel,
      grid=(B // Bblk,),
      in_specs=[
          pl.BlockSpec((Bblk, H, W, C), lambda b: (b, 0, 0, 0)),
          # TODO(synk): pipeline_mode=pl.Buffered(1) for these constant-index
          #             weight/bias blocks once activation tiles grow.
          pl.BlockSpec((9 * C, C), lambda b: (0, 0)),
          pl.BlockSpec((9 * C, C), lambda b: (0, 0)),
          pl.BlockSpec((1, C), lambda b: (0, 0)),
          pl.BlockSpec((1, C), lambda b: (0, 0)),
      ],
      out_specs=pl.BlockSpec((Bblk, H, W, C), lambda b: (b, 0, 0, 0)),
      out_shape=jax.ShapeDtypeStruct((B, H, W, C), jnp.float32),
      scratch_shapes=[pltpu.VMEM((Bblk, H + 2, Wpad, C), compute_dtype)],
      compiler_params=pltpu.CompilerParams(
          dimension_semantics=("parallel",),
          vmem_limit_bytes=vmem_limit),
      cost_estimate=pl.CostEstimate(flops=flops, transcendentals=0,
                                    bytes_accessed=bytes_accessed),
  )(x_nhwc, w1k, w2k, bb1, bb2)


@jax.jit
def residual_block_pallas(x_nchw, w1_oihw, w2_oihw,
                          g1, b1, m1, v1, g2, b2, m2, v2):
  """PyTorch-layout wrapper: (B, C, H, W) f32 in/out.

  The NCHW<->NHWC transposes live only at this boundary; a full ResNet trunk
  should call residual_block_pallas_nhwc and stay NHWC end-to-end so this HBM
  round trip happens once per network, not once per block.
  """
  x_nhwc = jnp.transpose(x_nchw, (0, 2, 3, 1)).astype(jnp.float32)
  out_nhwc = residual_block_pallas_nhwc(x_nhwc, w1_oihw, w2_oihw,
                                        g1, b1, m1, v1, g2, b2, m2, v2)
  return jnp.transpose(out_nhwc, (0, 3, 1, 2))


def _reference(x, w1, w2, g1, b1, m1, v1, g2, b2, m2, v2, eps=1e-5):
  """Pure-JAX NCHW f32 reference mirroring the PyTorch forward (eval-mode BN)."""
  dn = ('NCHW', 'OIHW', 'NCHW')

  def bn(y, g, b, m, v):
    g = g.reshape(1, -1, 1, 1)
    b = b.reshape(1, -1, 1, 1)
    m = m.reshape(1, -1, 1, 1)
    v = v.reshape(1, -1, 1, 1)
    return (y - m) / jnp.sqrt(v + eps) * g + b

  out = lax.conv_general_dilated(x, w1, (1, 1), 'SAME', dimension_numbers=dn)
  out = jax.nn.relu(bn(out, g1, b1, m1, v1))
  out = lax.conv_general_dilated(out, w2, (1, 1), 'SAME', dimension_numbers=dn)
  out = bn(out, g2, b2, m2, v2)
  return jax.nn.relu(out + x)


if __name__ == "__main__":
  key = jax.random.PRNGKey(0)
  # Lane-dense config (C = 128 on the lane axis); B = 8 so the batch-packed
  # grid is (2,) with M = 4*8*8 = 256 rows per im2col matmul.
  B, C, H, W = 8, 128, 8, 8

  keys = jax.random.split(key, 11)
  x = jax.random.normal(keys[0], (B, C, H, W), jnp.float32)
  fan_in = 9 * C
  w1 = jax.random.normal(keys[1], (C, C, 3, 3), jnp.float32) / jnp.sqrt(fan_in)
  w2 = jax.random.normal(keys[2], (C, C, 3, 3), jnp.float32) / jnp.sqrt(fan_in)
  g1 = 1.0 + 0.1 * jax.random.normal(keys[3], (C,), jnp.float32)
  b1 = 0.1 * jax.random.normal(keys[4], (C,), jnp.float32)
  m1 = 0.1 * jax.random.normal(keys[5], (C,), jnp.float32)
  v1 = 1.0 + 0.1 * jax.random.uniform(keys[6], (C,), jnp.float32)
  g2 = 1.0 + 0.1 * jax.random.normal(keys[7], (C,), jnp.float32)
  b2 = 0.1 * jax.random.normal(keys[8], (C,), jnp.float32)
  m2 = 0.1 * jax.random.normal(keys[9], (C,), jnp.float32)
  v2 = 1.0 + 0.1 * jax.random.uniform(keys[10], (C,), jnp.float32)

  out = jax.block_until_ready(
      residual_block_pallas(x, w1, w2, g1, b1, m1, v1, g2, b2, m2, v2))
  ref = _reference(x, w1, w2, g1, b1, m1, v1, g2, b2, m2, v2)

  assert out.shape == (B, C, H, W)
  max_err = float(jnp.max(jnp.abs(out - ref)))
  # bf16 MXU operands with f32 accumulation -> mixed-precision tolerance
  # against the exact f32 reference.
  assert jnp.allclose(out, ref, atol=5e-2, rtol=5e-2), max_err
  print("KERNEL_OK")
</pallas_src>

<mosaic_0001>
module attributes {stable_mosaic.version = 11 : i64} {
  func.func @_residual_block_kernel(%arg0: i32, %arg1: memref<4x8x8x128xf32, #tpu.memory_space<vmem>>, %arg2: memref<1152x128xbf16, #tpu.memory_space<vmem>>, %arg3: memref<1152x128xbf16, #tpu.memory_space<vmem>>, %arg4: memref<1x128xf32, #tpu.memory_space<vmem>>, %arg5: memref<1x128xf32, #tpu.memory_space<vmem>>, %arg6: memref<4x8x8x128xf32, #tpu.memory_space<vmem>>, %arg7: memref<4x10x16x128xbf16, #tpu.memory_space<vmem>>) attributes {dimension_semantics = [#tpu.dimension_semantics<parallel>], iteration_bounds = array<i64: 2>, scalar_prefetch = 0 : i64, scratch_operands = 1 : i64, tpu.core_type = #tpu.core_type<tc>, window_params = [{transform_indices = @transform_0, window_bounds = array<i64: 4, 8, 8, 128>}, {pipeline_mode = #tpu.pipeline_mode<synchronous>, transform_indices = @transform_1, window_bounds = array<i64: 1152, 128>}, {pipeline_mode = #tpu.pipeline_mode<synchronous>, transform_indices = @transform_2, window_bounds = array<i64: 1152, 128>}, {pipeline_mode = #tpu.pipeline_mode<synchronous>, transform_indices = @transform_3, window_bounds = array<i64: 1, 128>}, {pipeline_mode = #tpu.pipeline_mode<synchronous>, transform_indices = @transform_4, window_bounds = array<i64: 1, 128>}, {transform_indices = @transform_5, window_bounds = array<i64: 4, 8, 8, 128>}]} {
    %cst = arith.constant 0.000000e+00 : bf16
    %0 = vector.broadcast %cst : bf16 to vector<4x1x16x128xbf16>
    %c0 = arith.constant 0 : index
    %c0_0 = arith.constant 0 : index
    %c0_1 = arith.constant 0 : index
    %c0_2 = arith.constant 0 : index
    %1 = vector.load %arg7[%c0, %c0_0, %c0_1, %c0_2] : memref<4x10x16x128xbf16, #tpu.memory_space<vmem>>, vector<4x1x16x128xbf16>
    tpu.vector_store %arg7[%c0, %c0_0, %c0_1, %c0_2], %0 {strides = array<i32>} : memref<4x10x16x128xbf16, #tpu.memory_space<vmem>>, vector<4x1x16x128xbf16>,
    %c0_3 = arith.constant 0 : index
    %c9 = arith.constant 9 : index
    %c0_4 = arith.constant 0 : index
    %c0_5 = arith.constant 0 : index
    %2 = vector.load %arg7[%c0_3, %c9, %c0_4, %c0_5] : memref<4x10x16x128xbf16, #tpu.memory_space<vmem>>, vector<4x1x16x128xbf16>
    tpu.vector_store %arg7[%c0_3, %c9, %c0_4, %c0_5], %0 {strides = array<i32>} : memref<4x10x16x128xbf16, #tpu.memory_space<vmem>>, vector<4x1x16x128xbf16>,
    %cst_6 = arith.constant 0.000000e+00 : bf16
    %3 = vector.broadcast %cst_6 : bf16 to vector<4x10x1x128xbf16>
    %c0_7 = arith.constant 0 : index
    %c0_8 = arith.constant 0 : index
    %c0_9 = arith.constant 0 : index
    %c0_10 = arith.constant 0 : index
    %4 = vector.load %arg7[%c0_7, %c0_8, %c0_9, %c0_10] : memref<4x10x16x128xbf16, #tpu.memory_space<vmem>>, vector<4x10x1x128xbf16>
    tpu.vector_store %arg7[%c0_7, %c0_8, %c0_9, %c0_10], %3 {strides = array<i32>} : memref<4x10x16x128xbf16, #tpu.memory_space<vmem>>, vector<4x10x1x128xbf16>,
    %c0_11 = arith.constant 0 : index
    %c0_12 = arith.constant 0 : index
    %c9_13 = arith.constant 9 : index
    %c0_14 = arith.constant 0 : index
    %5 = vector.load %arg7[%c0_11, %c0_12, %c9_13, %c0_14] : memref<4x10x16x128xbf16, #tpu.memory_space<vmem>>, vector<4x10x1x128xbf16>
    tpu.vector_store %arg7[%c0_11, %c0_12, %c9_13, %c0_14], %3 {strides = array<i32>} : memref<4x10x16x128xbf16, #tpu.memory_space<vmem>>, vector<4x10x1x128xbf16>,
    %c0_15 = arith.constant 0 : index
    %c0_16 = arith.constant 0 : index
    %c0_17 = arith.constant 0 : index
    %c0_18 = arith.constant 0 : index
    %6 = vector.load %arg1[%c0_15, %c0_16, %c0_17, %c0_18] : memref<4x8x8x128xf32, #tpu.memory_space<vmem>>, vector<4x8x8x128xf32>
    %7 = arith.truncf %6 : vector<4x8x8x128xf32> to vector<4x8x8x128xbf16>
    %c0_19 = arith.constant 0 : index
    %c1 = arith.constant 1 : index
    %c1_20 = arith.constant 1 : index
    %c0_21 = arith.constant 0 : index
    %8 = vector.load %arg7[%c0_19, %c1, %c1_20, %c0_21] : memref<4x10x16x128xbf16, #tpu.memory_space<vmem>>, vector<4x8x8x128xbf16>
    tpu.vector_store %arg7[%c0_19, %c1, %c1_20, %c0_21], %7 {strides = array<i32>} : memref<4x10x16x128xbf16, #tpu.memory_space<vmem>>, vector<4x8x8x128xbf16>,
    %c0_22 = arith.constant 0 : index
    %c0_23 = arith.constant 0 : index
    %c0_24 = arith.constant 0 : index
    %c0_25 = arith.constant 0 : index
    %9 = vector.load %arg7[%c0_22, %c0_23, %c0_24, %c0_25] : memref<4x10x16x128xbf16, #tpu.memory_space<vmem>>, vector<4x8x8x128xbf16>
    %c0_26 = arith.constant 0 : index
    %c0_27 = arith.constant 0 : index
    %c1_28 = arith.constant 1 : index
    %c0_29 = arith.constant 0 : index
    %10 = vector.load %arg7[%c0_26, %c0_27, %c1_28, %c0_29] : memref<4x10x16x128xbf16, #tpu.memory_space<vmem>>, vector<4x8x8x128xbf16>
    %c0_30 = arith.constant 0 : index
    %c0_31 = arith.constant 0 : index
    %c2 = arith.constant 2 : index
    %c0_32 = arith.constant 0 : index
    %11 = vector.load %arg7[%c0_30, %c0_31, %c2, %c0_32] : memref<4x10x16x128xbf16, #tpu.memory_space<vmem>>, vector<4x8x8x128xbf16>
    %c0_33 = arith.constant 0 : index
    %c1_34 = arith.constant 1 : index
    %c0_35 = arith.constant 0 : index
    %c0_36 = arith.constant 0 : index
    %12 = vector.load %arg7[%c0_33, %c1_34, %c0_35, %c0_36] : memref<4x10x16x128xbf16, #tpu.memory_space<vmem>>, vector<4x8x8x128xbf16>
    %c0_37 = arith.constant 0 : index
    %c1_38 = arith.constant 1 : index
    %c1_39 = arith.constant 1 : index
    %c0_40 = arith.constant 0 : index
    %13 = vector.load %arg7[%c0_37, %c1_38, %c1_39, %c0_40] : memref<4x10x16x128xbf16, #tpu.memory_space<vmem>>, vector<4x8x8x128xbf16>
    %c0_41 = arith.constant 0 : index
    %c1_42 = arith.constant 1 : index
    %c2_43 = arith.constant 2 : index
    %c0_44 = arith.constant 0 : index
    %14 = vector.load %arg7[%c0_41, %c1_42, %c2_43, %c0_44] : memref<4x10x16x128xbf16, #tpu.memory_space<vmem>>, vector<4x8x8x128xbf16>
    %c0_45 = arith.constant 0 : index
    %c2_46 = arith.constant 2 : index
    %c0_47 = arith.constant 0 : index
    %c0_48 = arith.constant 0 : index
    %15 = vector.load %arg7[%c0_45, %c2_46, %c0_47, %c0_48] : memref<4x10x16x128xbf16, #tpu.memory_space<vmem>>, vector<4x8x8x128xbf16>
    %c0_49 = arith.constant 0 : index
    %c2_50 = arith.constant 2 : index
    %c1_51 = arith.constant 1 : index
    %c0_52 = arith.constant 0 : index
    %16 = vector.load %arg7[%c0_49, %c2_50, %c1_51, %c0_52] : memref<4x10x16x128xbf16, #tpu.memory_space<vmem>>, vector<4x8x8x128xbf16>
    %c0_53 = arith.constant 0 : index
    %c2_54 = arith.constant 2 : index
    %c2_55 = arith.constant 2 : index
    %c0_56 = arith.constant 0 : index
    %17 = vector.load %arg7[%c0_53, %c2_54, %c2_55, %c0_56] : memref<4x10x16x128xbf16, #tpu.memory_space<vmem>>, vector<4x8x8x128xbf16>
    %18 = tpu.concatenate %9, %10, %11, %12, %13, %14, %15, %16, %17 in 3 : vector<4x8x8x128xbf16>, vector<4x8x8x128xbf16>, vector<4x8x8x128xbf16>, vector<4x8x8x128xbf16>, vector<4x8x8x128xbf16>, vector<4x8x8x128xbf16>, vector<4x8x8x128xbf16>, vector<4x8x8x128xbf16>, vector<4x8x8x128xbf16> -> vector<4x8x8x1152xbf16>
    %19 = vector.shape_cast %18 : vector<4x8x8x1152xbf16> to vector<256x1152xbf16>
    %c0_57 = arith.constant 0 : index
    %c0_58 = arith.constant 0 : index
    %20 = vector.load %arg2[%c0_57, %c0_58] : memref<1152x128xbf16, #tpu.memory_space<vmem>>, vector<1152x128xbf16>
    %cst_59 = arith.constant dense<0.000000e+00> : vector<256x128xf32>
    %21 = tpu.matmul %19, %20, %cst_59 {dimension_numbers = #tpu.dot_dimension_numbers<[1], [0], [0], [1], [0, 0, 1, 1], [], []>} : vector<256x1152xbf16>, vector<1152x128xbf16>, vector<256x128xf32> -> vector<256x128xf32>
    %c0_60 = arith.constant 0 : index
    %c0_61 = arith.constant 0 : index
    %22 = vector.load %arg4[%c0_60, %c0_61] : memref<1x128xf32, #tpu.memory_space<vmem>>, vector<1x128xf32>
    %23 = vector.broadcast %22 : vector<1x128xf32> to vector<256x128xf32>
    %24 = arith.addf %21, %23 : vector<256x128xf32>
    %cst_62 = arith.constant 0.000000e+00 : f32
    %25 = vector.broadcast %cst_62 : f32 to vector<256x128xf32>
    %26 = arith.maximumf %24, %25 : vector<256x128xf32>
    %27 = arith.truncf %26 : vector<256x128xf32> to vector<256x128xbf16>
    %28 = vector.shape_cast %27 : vector<256x128xbf16> to vector<4x8x8x128xbf16>
    %c0_63 = arith.constant 0 : index
    %c1_64 = arith.constant 1 : index
    %c1_65 = arith.constant 1 : index
    %c0_66 = arith.constant 0 : index
    %29 = vector.load %arg7[%c0_63, %c1_64, %c1_65, %c0_66] : memref<4x10x16x128xbf16, #tpu.memory_space<vmem>>, vector<4x8x8x128xbf16>
    tpu.vector_store %arg7[%c0_63, %c1_64, %c1_65, %c0_66], %28 {strides = array<i32>} : memref<4x10x16x128xbf16, #tpu.memory_space<vmem>>, vector<4x8x8x128xbf16>,
    %c0_67 = arith.constant 0 : index
    %c0_68 = arith.constant 0 : index
    %c0_69 = arith.constant 0 : index
    %c0_70 = arith.constant 0 : index
    %30 = vector.load %arg7[%c0_67, %c0_68, %c0_69, %c0_70] : memref<4x10x16x128xbf16, #tpu.memory_space<vmem>>, vector<4x8x8x128xbf16>
    %c0_71 = arith.constant 0 : index
    %c0_72 = arith.constant 0 : index
    %c1_73 = arith.constant 1 : index
    %c0_74 = arith.constant 0 : index
    %31 = vector.load %arg7[%c0_71, %c0_72, %c1_73, %c0_74] : memref<4x10x16x128xbf16, #tpu.memory_space<vmem>>, vector<4x8x8x128xbf16>
    %c0_75 = arith.constant 0 : index
    %c0_76 = arith.constant 0 : index
    %c2_77 = arith.constant 2 : index
    %c0_78 = arith.constant 0 : index
    %32 = vector.load %arg7[%c0_75, %c0_76, %c2_77, %c0_78] : memref<4x10x16x128xbf16, #tpu.memory_space<vmem>>, vector<4x8x8x128xbf16>
    %c0_79 = arith.constant 0 : index
    %c1_80 = arith.constant 1 : index
    %c0_81 = arith.constant 0 : index
    %c0_82 = arith.constant 0 : index
    %33 = vector.load %arg7[%c0_79, %c1_80, %c0_81, %c0_82] : memref<4x10x16x128xbf16, #tpu.memory_space<vmem>>, vector<4x8x8x128xbf16>
    %c0_83 = arith.constant 0 : index
    %c1_84 = arith.constant 1 : index
    %c1_85 = arith.constant 1 : index
    %c0_86 = arith.constant 0 : index
    %34 = vector.load %arg7[%c0_83, %c1_84, %c1_85, %c0_86] : memref<4x10x16x128xbf16, #tpu.memory_space<vmem>>, vector<4x8x8x128xbf16>
    %c0_87 = arith.constant 0 : index
    %c1_88 = arith.constant 1 : index
    %c2_89 = arith.constant 2 : index
    %c0_90 = arith.constant 0 : index
    %35 = vector.load %arg7[%c0_87, %c1_88, %c2_89, %c0_90] : memref<4x10x16x128xbf16, #tpu.memory_space<vmem>>, vector<4x8x8x128xbf16>
    %c0_91 = arith.constant 0 : index
    %c2_92 = arith.constant 2 : index
    %c0_93 = arith.constant 0 : index
    %c0_94 = arith.constant 0 : index
    %36 = vector.load %arg7[%c0_91, %c2_92, %c0_93, %c0_94] : memref<4x10x16x128xbf16, #tpu.memory_space<vmem>>, vector<4x8x8x128xbf16>
    %c0_95 = arith.constant 0 : index
    %c2_96 = arith.constant 2 : index
    %c1_97 = arith.constant 1 : index
    %c0_98 = arith.constant 0 : index
    %37 = vector.load %arg7[%c0_95, %c2_96, %c1_97, %c0_98] : memref<4x10x16x128xbf16, #tpu.memory_space<vmem>>, vector<4x8x8x128xbf16>
    %c0_99 = arith.constant 0 : index
    %c2_100 = arith.constant 2 : index
    %c2_101 = arith.constant 2 : index
    %c0_102 = arith.constant 0 : index
    %38 = vector.load %arg7[%c0_99, %c2_100, %c2_101, %c0_102] : memref<4x10x16x128xbf16, #tpu.memory_space<vmem>>, vector<4x8x8x128xbf16>
    %39 = tpu.concatenate %30, %31, %32, %33, %34, %35, %36, %37, %38 in 3 : vector<4x8x8x128xbf16>, vector<4x8x8x128xbf16>, vector<4x8x8x128xbf16>, vector<4x8x8x128xbf16>, vector<4x8x8x128xbf16>, vector<4x8x8x128xbf16>, vector<4x8x8x128xbf16>, vector<4x8x8x128xbf16>, vector<4x8x8x128xbf16> -> vector<4x8x8x1152xbf16>
    %40 = vector.shape_cast %39 : vector<4x8x8x1152xbf16> to vector<256x1152xbf16>
    %c0_103 = arith.constant 0 : index
    %c0_104 = arith.constant 0 : index
    %41 = vector.load %arg3[%c0_103, %c0_104] : memref<1152x128xbf16, #tpu.memory_space<vmem>>, vector<1152x128xbf16>
    %cst_105 = arith.constant dense<0.000000e+00> : vector<256x128xf32>
    %42 = tpu.matmul %40, %41, %cst_105 {dimension_numbers = #tpu.dot_dimension_numbers<[1], [0], [0], [1], [0, 0, 1, 1], [], []>} : vector<256x1152xbf16>, vector<1152x128xbf16>, vector<256x128xf32> -> vector<256x128xf32>
    %c0_106 = arith.constant 0 : index
    %c0_107 = arith.constant 0 : index
    %43 = vector.load %arg5[%c0_106, %c0_107] : memref<1x128xf32, #tpu.memory_space<vmem>>, vector<1x128xf32>
    %44 = vector.broadcast %43 : vector<1x128xf32> to vector<256x128xf32>
    %45 = arith.addf %42, %44 : vector<256x128xf32>
    %46 = vector.shape_cast %6 : vector<4x8x8x128xf32> to vector<256x128xf32>
    %47 = arith.addf %45, %46 : vector<256x128xf32>
    %cst_108 = arith.constant 0.000000e+00 : f32
    %48 = vector.broadcast %cst_108 : f32 to vector<256x128xf32>
    %49 = arith.maximumf %47, %48 : vector<256x128xf32>
    %50 = vector.shape_cast %49 : vector<256x128xf32> to vector<4x8x8x128xf32>
    %c0_109 = arith.constant 0 : index
    %c0_110 = arith.constant 0 : index
    %c0_111 = arith.constant 0 : index
    %c0_112 = arith.constant 0 : index
    %51 = vector.load %arg6[%c0_109, %c0_110, %c0_111, %c0_112] : memref<4x8x8x128xf32, #tpu.memory_space<vmem>>, vector<4x8x8x128xf32>
    tpu.vector_store %arg6[%c0_109, %c0_110, %c0_111, %c0_112], %50 {strides = array<i32>} : memref<4x8x8x128xf32, #tpu.memory_space<vmem>>, vector<4x8x8x128xf32>,
    return
  }
  func.func @transform_0(%arg0: i32) -> (i32, i32, i32, i32) {
    %c0_i32 = arith.constant 0 : i32
    %c0_i32_0 = arith.constant 0 : i32
    %c0_i32_1 = arith.constant 0 : i32
    %c0_i32_2 = arith.constant 0 : i32
    return %arg0, %c0_i32, %c0_i32_0, %c0_i32_1 : i32, i32, i32, i32
  }
  func.func @transform_1(%arg0: i32) -> (i32, i32) {
    %c0_i32 = arith.constant 0 : i32
    %c0_i32_0 = arith.constant 0 : i32
    %c0_i32_1 = arith.constant 0 : i32
    return %c0_i32, %c0_i32_0 : i32, i32
  }
  func.func @transform_2(%arg0: i32) -> (i32, i32) {
    %c0_i32 = arith.constant 0 : i32
    %c0_i32_0 = arith.constant 0 : i32
    %c0_i32_1 = arith.constant 0 : i32
    return %c0_i32, %c0_i32_0 : i32, i32
  }
  func.func @transform_3(%arg0: i32) -> (i32, i32) {
    %c0_i32 = arith.constant 0 : i32
    %c0_i32_0 = arith.constant 0 : i32
    %c0_i32_1 = arith.constant 0 : i32
    return %c0_i32, %c0_i32_0 : i32, i32
  }
  func.func @transform_4(%arg0: i32) -> (i32, i32) {
    %c0_i32 = arith.constant 0 : i32
    %c0_i32_0 = arith.constant 0 : i32
    %c0_i32_1 = arith.constant 0 : i32
    return %c0_i32, %c0_i32_0 : i32, i32
  }
  func.func @transform_5(%arg0: i32) -> (i32, i32, i32, i32) {
    %c0_i32 = arith.constant 0 : i32
    %c0_i32_0 = arith.constant 0 : i32
    %c0_i32_1 = arith.constant 0 : i32
    %c0_i32_2 = arith.constant 0 : i32
    return %arg0, %c0_i32, %c0_i32_0, %c0_i32_1 : i32, i32, i32, i32
  }
}

</mosaic_0001>

<bundles_post_ra>
// kernel: residual_block_pallas.1
= control target key start
LH: loop header
LB: loop body
LE: loop exit
PB: predicated region body
PF: predicated region fallthrough
CT: control target
= control target key end

     0   :  { %10 = vsyncpa [#allocation4], 0  ;;  %s16688_s0 = inlined_call_operand.vmem [shape: f32[8,8,8,128], index: 0, kind: input, shape index: {}]   ;;  %s16689_s1 = inlined_call_operand.vmem [shape: bf16[1152,128], index: 1, kind: input, shape index: {}]   ;;  %s16690_s2 = inlined_call_operand.vmem [shape: bf16[1152,128], index: 2, kind: input, shape index: {}]   ;;  %s16691_s3 = inlined_call_operand.vmem [shape: f32[1,128], index: 3, kind: input, shape index: {}]   ;;  %s16692_s4 = inlined_call_operand.vmem [shape: f32[1,128], index: 4, kind: input, shape index: {}]   ;;  %s16693_s5 = inlined_call_operand.hbm [shape: f32[8,8,8,128], index: 5, kind: output, shape index: {}]  }
   0x1   :  { %12 = vsyncpa [#allocation4 + $0x1], 0  ;;  %s12235_s18 = smov 0   ;;  %s12237_s19 = smov 0  }
   0x2   :  { %s12239_s20 = smov 0   ;;  %s12241_s21 = smov 0  }
   0x3 LB: > { %s12256_s22 = sadd.s32 4294967295, %s12199_s21   ;;  %s9364_s23 = sadd.s32 4294967294, %s12199_s21   ;;  %s12199_s21 = sphi %s12241_s21, %s17241_s21   ;;  %s12195_s20 = sphi %s12239_s20, %s17240_s20   ;;  %s12191_s19 = sphi %s12237_s19, %s17239_s19   ;;  %s12187_s18 = sphi %s12235_s18, %s17238_s18  }
   0x4   : > { %s12260_s24 = sadd.s32 1, %s12199_s21   ;;  %s135_s25 = sadd.s32 1, %s12195_s20 }
   0x5   : > { %s132_s26 = ssub.s32 %s12199_s21, %s12260_s24  ;;  %p145_p0 = scmp.ne.s32.totalorder %s12195_s20, %s12191_s19 }
   0x6   : > { %p133_p1 = scmp.eq.s32.totalorder %s132_s26, 0  ;;  %p146_p2 = scmp.eq.s32.totalorder %s12256_s22, 1 }
   0x7   : > { %p151_p3 = scmp.ne.s32.totalorder %s12191_s19, %s12187_s18  ;;  %p152_p4 = scmp.eq.s32.totalorder %s9364_s23, 1 }
   0x8   : > { %s12271_s27 = scalar_select %p133_p1, %s12195_s20, %s135_s25  }
   0x9   : > { %p12273_p5 = por %p146_p2, %p145_p0  ;;  %p12277_p6 = por %p152_p4, %p151_p3 }
   0xa   : > { %p9367_p7 = scmp.ge.s32.totalorder %s12199_s21, 1  ;;  %p192_p8 = scmp.lt.s32.totalorder %s12199_s21, 3 }
   0xc   : > { %p193_p9 = pnand %p9367_p7, %p192_p8 }
   0xe   : > { %196 = sbr.rel (%p193_p9) target bundleno = 1211 (0x4bb), region = 40 }
  0x13   : > { %v11409_v0 = vld [vmem:[%s16689_s1 + $0x78] sm:$0xff]   ;;  %v11412_v3 = vld [vmem:[%s16689_s1 + $0x70] sm:$0xff]   ;;  %v12201_v4 = vmov 0   ;;  %v11416_v8 = vld [vmem:[%s16689_s1 + $0x68] sm:$0xff]   ;;  %s9369_s7 = sshll.u32 %s12256_s22, 2  ;;  %vm247_vm0 = vcmask 1040384  }
  0x14   : > { %v11410_v1 = vld [vmem:[%s16689_s1 + $0x38] sm:$0xff]   ;;  %10327 = vmatprep.subr.bf16.mxu0 %v11409_v0  ;;  %230 = vst [vmem:[#allocation2] sm:$0xf] %v12201_v4  ;;  %231 = vst [vmem:[#allocation2 + $0x4] sm:$0xf] %v12201_v4  ;;  %v11414_v6 = vld [vmem:[%s16689_s1 + $0x30] sm:$0xff]  }
  0x15   : > { %v11411_v2 = vld [vmem:[%s16689_s1 + $0xf8] sm:$0xff]   ;;  %10328 = vmatpush3.bf16.msra.mxu0 %v11410_v1  ;;  %232 = vst [vmem:[#allocation2 + $0x50] sm:$0xf] %v12201_v4  ;;  %233 = vst [vmem:[#allocation2 + $0x54] sm:$0xf] %v12201_v4  ;;  %v11415_v7 = vld [vmem:[%s16689_s1 + $0xf0] sm:$0xff]  }
  0x16   : > { %234 = vst [vmem:[#allocation2 + $0xa0] sm:$0xf] %v12201_v4  ;;  %235 = vst [vmem:[#allocation2 + $0xa4] sm:$0xf] %v12201_v4  ;;  %10439 = vmatprep.subr.bf16.mxu1 %v11411_v2  ;;  %v11413_v5 = vld [vmem:[%s16689_s1 + $0xb8] sm:$0xff]   ;;  %10329 = vmatprep.subr.bf16.mxu0 %v11412_v3  ;;  %v11417_v9 = vld [vmem:[%s16689_s1 + $0xb0] sm:$0xff]  }
  0x17   : > { %236 = vst [vmem:[#allocation2 + $0xf0] sm:$0xf] %v12201_v4  ;;  %237 = vst [vmem:[#allocation2 + $0xf4] sm:$0xf] %v12201_v4  ;;  %10440 = vmatpush3.bf16.msra.mxu1 %v11413_v5  ;;  %v11418_v10 = vld [vmem:[%s16689_s1 + $0x28] sm:$0xff]   ;;  %v11420_v12 = vld [vmem:[%s16689_s1 + $0x60] sm:$0xff]  }
  0x18   : > { %239 = vst [vmem:[#allocation2 + $0x48] sm:$0xf] %v12201_v4  ;;  %240 = vst [vmem:[#allocation2 + $0x4c] sm:$0xf] %v12201_v4  ;;  %10441 = vmatprep.subr.bf16.mxu1 %v11415_v7  ;;  %v11419_v11 = vld [vmem:[%s16689_s1 + $0xe8] sm:$0xff]   ;;  %v11422_v14 = vld [vmem:[%s16689_s1 + $0x20] sm:$0xff]  }
  0x19   : > { %241 = vst [vmem:[#allocation2 + $0x98] sm:$0xf] %v12201_v4  ;;  %242 = vst [vmem:[#allocation2 + $0x9c] sm:$0xf] %v12201_v4  ;;  %10330 = vmatpush3.bf16.msra.mxu0 %v11414_v6  ;;  %v11421_v13 = vld [vmem:[%s16689_s1 + $0xa8] sm:$0xff]   ;;  %v11423_v15 = vld [vmem:[%s16689_s1 + $0xe0] sm:$0xff]  }
  0x1a   : > { %243 = vst [vmem:[#allocation2 + $0xe8] sm:$0xf] %v12201_v4  ;;  %244 = vst [vmem:[#allocation2 + $0xec] sm:$0xf] %v12201_v4  ;;  %10331 = vmatprep.subr.bf16.mxu0 %v11416_v8  ;;  %v11424_v16 = vld [vmem:[%s16689_s1 + $0x58] sm:$0xff]   ;;  %v11425_v17 = vld [vmem:[%s16689_s1 + $0xa0] sm:$0xff]  }
  0x1b   : > { %245 = vst [vmem:[#allocation2 + $0x138] sm:$0xf] %v12201_v4  ;;  %246 = vst [vmem:[#allocation2 + $0x13c] sm:$0xf] %v12201_v4  ;;  %10442 = vmatpush3.bf16.msra.mxu1 %v11417_v9  ;;  %v11426_v18 = vld [vmem:[%s16689_s1 + $0x18] sm:$0xff]   ;;  %v11428_v20 = vld [vmem:[%s16689_s1 + $0x50] sm:$0xff]  }
  0x1c   : > { %10443 = vmatprep.subr.bf16.mxu1 %v11419_v11  ;;  %v11427_v19 = vld [vmem:[%s16689_s1 + $0xd8] sm:$0xff]   ;;  %p222_p10 = scmp.lt.s32.totalorder %s9369_s7, 7  ;;  %v11430_v22 = vld [vmem:[%s16689_s1 + $0x10] sm:$0xff]   ;;  %v11432_v24 = vld [vmem:[%s16689_s1 + $0x48] sm:$0xff]   ;;  %vm248_vm1 = vsmask.f32 256 }
  0x1d   : > { %10332 = vmatpush3.bf16.msra.mxu0 %v11418_v10  ;;  %v11429_v21 = vld [vmem:[%s16689_s1 + $0x98] sm:$0xff]   ;;  %v11431_v23 = vld [vmem:[%s16689_s1 + $0xd0] sm:$0xff]   ;;  %v11434_v26 = vld [vmem:[%s16689_s1 + $0x8] sm:$0xff]   ;;  %v16800_v34 = vmov 0  ;;  %vm370_vm3 = vsmask.f32 7938 }
  0x1e   : > { %10333 = vmatprep.subr.bf16.mxu0 %v11420_v12  ;;  %s17243_s7 = smov (!%p222_p10, %s9369_s7), 7  ;;  %v11433_v25 = vld [vmem:[%s16689_s1 + $0x90] sm:$0xff]   ;;  %v11435_v27 = vld [vmem:[%s16689_s1 + $0xc8] sm:$0xff]   ;;  %v11436_v28 = vld [vmem:[%s16689_s1 + $0x40] sm:$0xff]   ;;  %v16803_v39 = vmov 0  ;;  %vm973_vm5 = vcmask 1043456  }
  0x1f   : > { %10444 = vmatpush3.bf16.msra.mxu1 %v11421_v13  ;;  %s10260_s15 = sshll.u32 %s17243_s7, 6  ;;  %v11437_v29 = vld [vmem:[%s16689_s1 + $0x88] sm:$0xff]   ;;  %v11438_v30 = vld [vmem:[%s16689_s1] sm:$0xff]   ;;  %vm12383_vm2 = vmand %vm247_vm0, %vm248_vm1  ;;  %v16806_v51 = vmov 0  ;;  %s218_s23 = sand.u32 1, %s12191_s19  }
  0x20   : > { %10445 = vmatprep.subr.bf16.mxu1 %v11423_v15  ;;  %v11439_v31 = vld [vmem:[%s16689_s1 + $0xc0] sm:$0xff]   ;;  %s12380_s7 = scalar_lea.vmem %s16688_s0, %s10260_s15  ;;  %v253_v33 = vld [vmem:[#allocation2 + $0x8] sm:$0x1]  ;;  %v16801_v34 = vsel %vm12383_vm2, 4294967295, %v16800_v34  ;;  %v375_v36 = vld [vmem:[#allocation2 + $0xc] sm:$0x1] }
  0x21   : > { %10334 = vmatpush3.bf16.msra.mxu0 %v11422_v14  ;;  %v250_v32 = vld [vmem:[#allocation2] sm:$0x1]  ;;  %16802 = vst [vmem:[#allocation6_spill] sm:$0xff] %v16801_v34  ;;  %v372_v35 = vld [vmem:[#allocation2 + $0x4] sm:$0x1]  ;;  %v254_v38 = vsel %vm12383_vm2, 0, %v253_v33  ;;  %vm12393_vm4 = vmand %vm247_vm0, %vm370_vm3 }
  0x22   : > { %10335 = vmatprep.subr.bf16.mxu0 %v11424_v16  ;;  %v251_v37 = vsel %vm12383_vm2, 0, %v250_v32  ;;  %v16804_v39 = vsel %vm12393_vm4, 4294967295, %v16803_v39  ;;  %v492_v40 = vld [vmem:[%s12380_s7] sm:$0xff]  ;;  %255 = vst [vmem:[#allocation2 + $0x8] sm:$0x1] %v254_v38  ;;  %v373_v41 = vsel %vm12393_vm4, 0, %v372_v35  ;;  %vm12409_vm6 = vmand %vm973_vm5, %vm370_vm3 }
  0x23   : > { %10446 = vmatpush3.bf16.msra.mxu1 %v11425_v17  ;;  %16805 = vst [vmem:[#allocation7_spill] sm:$0xff] %v16804_v39  ;;  %252 = vst [vmem:[#allocation2] sm:$0x1] %v251_v37  ;;  %v376_v42 = vsel %vm12393_vm4, 0, %v375_v36  ;;  %v10261_v43 = vpack.c.bf16 %v492_v40, %v492_v40  ;;  %v11442_v44 = vld [vmem:[%s16689_s1 + $0x80] sm:$0xff]   ;;  %v11443_v45 = vld [vmem:[%s16689_s1 + $0x178] sm:$0xff]  }
  0x24   : > { %10447 = vmatprep.subr.bf16.mxu1 %v11427_v19  ;;  %374 = vst [vmem:[#allocation2 + $0x4] sm:$0x1] %v373_v41  ;;  %377 = vst [vmem:[#allocation2 + $0xc] sm:$0x1] %v376_v42  ;;  %v256_v48 = vld [vmem:[#allocation2 + $0x10] sm:$0x1] }
  0x25   : > { %10336 = vmatpush3.bf16.msra.mxu0 %v11426_v18  ;;  %v653_v46 = vshrl.u32 %v10261_v43, 16  ;;  %v656_v47 = vshll.u32 %v10261_v43, 16  ;;  %v378_v49 = vld [vmem:[#allocation2 + $0x14] sm:$0x1]  ;;  %v16807_v51 = vsel %vm12409_vm6, 4294967295, %v16806_v51  ;;  %v257_v52 = vsel %vm12383_vm2, 0, %v256_v48 }
  0x26   : > { %10337 = vmatprep.subr.bf16.mxu0 %v11428_v20  ;;  %16808 = vst [vmem:[#allocation8_spill] sm:$0xff] %v16807_v51  ;;  %v379_v53 = vsel %vm12393_vm4, 0, %v378_v49  ;;  %v493_v54 = vld [vmem:[%s12380_s7 + $0x8] sm:$0xff]  ;;  %258 = vst [vmem:[#allocation2 + $0x10] sm:$0x1] %v257_v52  ;;  %v494_v58 = vld [vmem:[%s12380_s7 + $0x10] sm:$0xff] }
  0x27   : > { %10448 = vmatpush3.bf16.msra.mxu1 %v11429_v21  ;;  %v655_v50 = vrot.slane %v653_v46, 7  ;;  %380 = vst [vmem:[#allocation2 + $0x14] sm:$0x1] %v379_v53  ;;  %v10262_v55 = vpack.c.bf16 %v493_v54, %v493_v54  ;;  %v259_v56 = vld [vmem:[#allocation2 + $0x18] sm:$0x1]  ;;  %v10263_v5 = vpack.c.bf16 %v494_v58, %v494_v58  ;;  %s9368_s25 = sshll.u32 %s218_s23, 8 }
  0x28   : > { %10449 = vmatprep.subr.bf16.mxu1 %v11431_v23  ;;  %v381_v57 = vld [vmem:[#allocation2 + $0x1c] sm:$0x1]  ;;  %v260_v61 = vsel %vm12383_vm2, 0, %v259_v56  ;;  %v262_v63 = vld [vmem:[#allocation2 + $0x20] sm:$0x1]  ;;  %s16476_s26 = scalar_lea.vmem [#allocation3], %s9368_s25 }
  0x29   : > { %10338 = vmatpush3.bf16.msra.mxu0 %v11430_v22  ;;  %v658_v59 = vor.u32 %v656_v47, %v655_v50  ;;  %v659_v60 = vrot.slane %v655_v50, 4  ;;  %v382_v62 = vsel %vm12393_vm4, 0, %v381_v57  ;;  %v495_v0 = vld [vmem:[%s12380_s7 + $0x18] sm:$0xff]  ;;  %v975_v1 = vld [vmem:[#allocation2 + $0x8] sm:$0xf]  ;;  %v661_v3 = vshrl.u32 %v10262_v55, 16 }
  0x2a   : > { %10339 = vmatprep.subr.bf16.mxu0 %v11432_v24  ;;  %v12424_v2 = vld [vmem:[#allocation2] sm:$0xf]  ;;  %v664_v4 = vshll.u32 %v10262_v55, 16  ;;  %261 = vst [vmem:[#allocation2 + $0x18] sm:$0x1] %v260_v61  ;;  %v10264_v6 = vpack.c.bf16 %v495_v0, %v495_v0  ;;  %v263_v10 = vsel %vm12383_vm2, 0, %v262_v63 }
  0x2b   : > { %10450 = vmatpush3.bf16.msra.mxu1 %v11433_v25  ;;  %383 = vst [vmem:[#allocation2 + $0x1c] sm:$0x1] %v382_v62  ;;  %v976_v7 = vsel %vm12409_vm6, %v658_v59, %v975_v1  ;;  %v978_v8 = vld [vmem:[#allocation2 + $0xc] sm:$0x1]  ;;  %v1199_v9 = vld [vmem:[#allocation2 + $0x4] sm:$0x1] }
  0x2c   : > { %10451 = vmatprep.subr.bf16.mxu1 %v11435_v27  ;;  %977 = vst [vmem:[#allocation2 + $0x8] sm:$0xf] %v976_v7  ;;  %v979_v11 = vsel %vm12383_vm2, %v659_v60, %v978_v8  ;;  %v12433_v12 = vcombine.low %v12424_v2, %v1199_v9  ;;  %v663_v13 = vrot.slane %v661_v3, 7  ;;  %v1231_v14 = vld [vmem:[#allocation2] sm:$0xe]  ;;  %v669_v16 = vshrl.u32 %v10263_v5, 16 }
  0x2d   : > { %10340 = vmatpush3.bf16.msra.mxu0 %v11434_v26  ;;  %264 = vst [vmem:[#allocation2 + $0x20] sm:$0x1] %v263_v10  ;;  %v384_v15 = vld [vmem:[#allocation2 + $0x24] sm:$0x1]  ;;  %980 = vst [vmem:[#allocation2 + $0xc] sm:$0x1] %v979_v11  ;;  %v9436_v32 = vcombine.low %v1231_v14, %v1199_v9 }
  0x2e   : > { %10341 = vmatprep.subr.bf16.mxu0 %v11436_v28  ;;  %v672_v17 = vshll.u32 %v10263_v5, 16  ;;  %v385_v18 = vsel %vm12393_vm4, 0, %v384_v15  ;;  %v677_v19 = vshrl.u32 %v10264_v6, 16  ;;  %v265_v20 = vld [vmem:[#allocation2 + $0x28] sm:$0x1]  ;;  %v666_v21 = vor.u32 %v664_v4, %v663_v13  ;;  %v496_v27 = vld [vmem:[%s12380_s7 + $0x20] sm:$0xff] }
  0x2f   : > { %10452 = vmatpush3.bf16.msra.mxu1 %v11437_v29  ;;  %v667_v22 = vrot.slane %v663_v13, 4  ;;  %386 = vst [vmem:[#allocation2 + $0x24] sm:$0x1] %v385_v18  ;;  %v387_v23 = vld [vmem:[#allocation2 + $0x2c] sm:$0x1]  ;;  %v671_v26 = vrot.slane %v669_v16, 7  ;;  %v10265_v43 = vpack.c.bf16 %v496_v27, %v496_v27 }
  0x30   : > { %10453 = vmatprep.subr.bf16.mxu1 %v11439_v31  ;;  %v981_v24 = vld [vmem:[#allocation2 + $0x10] sm:$0xf]  ;;  %v984_v25 = vld [vmem:[#allocation2 + $0x14] sm:$0x1]  ;;  %v1619_v28 = vshll.u32 %v12433_v12, 16  ;;  %v679_v31 = vrot.slane %v677_v19, 7 }
  0x31   : > { %10342 = vmatpush3.bf16.msra.mxu0 %v11438_v30  ;;  %v982_v29 = vsel %vm12409_vm6, %v666_v21, %v981_v24  ;;  %v985_v30 = vsel %vm12383_vm2, %v667_v22, %v984_v25  ;;  %v674_v33 = vor.u32 %v672_v17, %v671_v26  ;;  %v675_v35 = vrot.slane %v671_v26, 4  ;;  %v987_v36 = vld [vmem:[#allocation2 + $0x18] sm:$0xf]  ;;  %v268_v58 = vld [vmem:[#allocation2 + $0x30] sm:$0x1]  ;;  %v497_v15 = vld [vmem:[%s12380_s7 + $0x28] sm:$0xff] }
  0x32   : > { %10551 = vmatprep.subr.bf16.mxu0 %v11443_v45  ;;  %983 = vst [vmem:[#allocation2 + $0x10] sm:$0xf] %v982_v29  ;;  %986 = vst [vmem:[#allocation2 + $0x14] sm:$0x1] %v985_v30  ;;  %v990_v37 = vld [vmem:[#allocation2 + $0x1c] sm:$0x1] }
  0x33   : > { %10454 = vmatpush3.bf16.msra.mxu1 %v11442_v44  ;;  %v680_v38 = vshll.u32 %v10264_v6, 16  ;;  %v683_v40 = vrot.slane %v679_v31, 4  ;;  %v266_v41 = vsel %vm12383_vm2, 0, %v265_v20  ;;  %v388_v42 = vsel %vm12393_vm4, 0, %v387_v23  ;;  %v12447_v44 = vld [vmem:[#allocation2 + $0x8] sm:$0xf] }
  0x34   : > { %v1232_v45 = vld [vmem:[#allocation2 + $0x8] sm:$0xe]  ;;  %v988_v46 = vsel %vm12409_vm6, %v674_v33, %v987_v36  ;;  %v991_v47 = vsel %vm12383_vm2, %v675_v35, %v990_v37  ;;  %267 = vst [vmem:[#allocation2 + $0x28] sm:$0x1] %v266_v41  ;;  %389 = vst [vmem:[#allocation2 + $0x2c] sm:$0x1] %v388_v42  ;;  %v9597_v17 = vcombine.low %v12424_v2, %v12447_v44 }
  0x35   : > { %v682_v48 = vor.u32 %v680_v38, %v679_v31  ;;  %v1200_v49 = vld [vmem:[#allocation2 + $0xc] sm:$0x1]  ;;  %v1617_v50 = vshrl.u32 %v12433_v12, 16  ;;  %989 = vst [vmem:[#allocation2 + $0x18] sm:$0xf] %v988_v46  ;;  %v1621_v54 = vrot.slane %v1619_v28, 1  ;;  %v12474_v33 = vpack.c.bf16 %v497_v15, %v497_v15 }
  0x36   : > { %992 = vst [vmem:[#allocation2 + $0x1c] sm:$0x1] %v991_v47  ;;  %v993_v52 = vld [vmem:[#allocation2 + $0x20] sm:$0xf]  ;;  %v9405_v53 = vcombine.low %v12447_v44, %v1200_v49  ;;  %v9437_v55 = vcombine.low %v1232_v45, %v1200_v49  ;;  %v996_v57 = vld [vmem:[#allocation2 + $0x24] sm:$0x1] }
  0x37   : > { %v994_v56 = vsel %vm12409_vm6, %v682_v48, %v993_v52  ;;  %v1263_v59 = vld [vmem:[#allocation2 + $0x8] sm:$0xf]  ;;  %v1936_v60 = vrot.slane %v9436_v32, 1  ;;  %v997_v61 = vsel %vm12383_vm2, %v683_v40, %v996_v57  ;;  %v685_v62 = vshrl.u32 %v10265_v43, 16  ;;  %v11445_v18 = vld [vmem:[%s16689_s1 + $0x138] sm:$0xff]   ;;  %v498_v28 = vld [vmem:[%s12380_s7 + $0x30] sm:$0xff] }
  0x38   : > { %995 = vst [vmem:[#allocation2 + $0x20] sm:$0xf] %v994_v56  ;;  %v269_v63 = vsel %vm12383_vm2, 0, %v268_v58  ;;  %v1624_v0 = vshrl.u32 %v9405_v53, 16  ;;  %v1626_v1 = vshll.u32 %v9405_v53, 16  ;;  %v688_v3 = vshll.u32 %v10265_v43, 16 }
  0x39   : > { %998 = vst [vmem:[#allocation2 + $0x24] sm:$0x1] %v997_v61  ;;  %270 = vst [vmem:[#allocation2 + $0x30] sm:$0x1] %v269_v63  ;;  %v1264_v4 = vld [vmem:[#allocation2 + $0x10] sm:$0xf]  ;;  %v1622_v7 = vor.u32 %v1621_v54, %v1617_v50  ;;  %v12481_v46 = vpack.c.bf16 %v498_v28, %v498_v28 }
  0x3a   : > { %v1937_v5 = vrot.slane %v9437_v55, 1  ;;  %v687_v6 = vrot.slane %v685_v62, 7  ;;  %v1628_v8 = vrot.slane %v1626_v1, 1  ;;  %v9600_v9 = vcombine.low %v1263_v59, %v1264_v4  ;;  %v12461_v10 = vld [vmem:[#allocation2 + $0x10] sm:$0xf]  ;;  %v500_v15 = vld [vmem:[%s12380_s7 + $0x40] sm:$0xff] }
  0x3b   : > { %v1201_v11 = vld [vmem:[#allocation2 + $0x14] sm:$0x1]  ;;  %v1233_v14 = vld [vmem:[#allocation2 + $0x10] sm:$0xe]  ;;  %v999_v32 = vld [vmem:[#allocation2 + $0x28] sm:$0xf] }
  0x3c   : > { %v9599_v12 = vcombine.low %v1936_v60, %v1937_v5  ;;  %v9406_v13 = vcombine.low %v12461_v10, %v1201_v11  ;;  %v1629_v16 = vor.u32 %v1628_v8, %v1624_v0  ;;  %4248 = vmatprep.mubr.bf16.mxu1 %v9600_v9  ;;  %v12470_v19 = vld [vmem:[#allocation2 + $0x18] sm:$0xf]  ;;  %v690_v21 = vor.u32 %v688_v3, %v687_v6  ;;  %v390_v27 = vld [vmem:[#allocation2 + $0x34] sm:$0x1]  ;;  %v1002_v44 = vld [vmem:[#allocation2 + $0x2c] sm:$0x1] }
  0x3d   : > { %v1202_v20 = vld [vmem:[#allocation2 + $0x1c] sm:$0x1]  ;;  %v1265_v25 = vld [vmem:[#allocation2 + $0x18] sm:$0xf]  ;;  %v691_v26 = vrot.slane %v687_v6, 4  ;;  %v9438_v31 = vcombine.low %v1233_v14, %v1201_v11  ;;  %v11461_v40 = vld [vmem:[%s16689_s1 + $0x170] sm:$0xff]   ;;  %v9606_v54 = vcombine.low %v12461_v10, %v12470_v19 }
  0x3e   : > { %4249 = vmatmul.mubr.bf16.vlgmr.msra.gmra.mxu1 %v9599_v12  ;;  %v9407_v22 = vcombine.low %v12470_v19, %v1202_v20  ;;  %v1631_v23 = vshrl.u32 %v9406_v13, 16  ;;  %v1633_v24 = vshll.u32 %v9406_v13, 16  ;;  %v9598_v29 = vcombine.low %v1622_v7, %v1629_v16  ;;  %v1234_v30 = vld [vmem:[#allocation2 + $0x18] sm:$0xe]  ;;  %v271_v41 = vld [vmem:[#allocation2 + $0x38] sm:$0x1] }
  0x3f   : > { %v1266_v2 = vld [vmem:[#allocation2 + $0x20] sm:$0xf]  ;;  %v9439_v42 = vcombine.low %v1234_v30, %v1202_v20  ;;  %v1938_v43 = vrot.slane %v9438_v31, 1  ;;  %v1000_v49 = vsel %vm12409_vm6, %v690_v21, %v999_v32  ;;  %v1003_v50 = vsel %vm12383_vm2, %v691_v26, %v1002_v44  ;;  %v393_v53 = vld [vmem:[#allocation2 + $0x3c] sm:$0x1]  ;;  %v11463_v57 = vld [vmem:[%s16689_s1 + $0x130] sm:$0xff]  }
  0x40   : > { %v1635_v35 = vrot.slane %v1633_v24, 1  ;;  %v1638_v36 = vshrl.u32 %v9407_v22, 16  ;;  %v1640_v37 = vshll.u32 %v9407_v22, 16  ;;  %v9609_v38 = vcombine.low %v1265_v25, %v1266_v2  ;;  %4087 = vmatprep.mubr.bf16.mxu0 %v9598_v29  ;;  %v12479_v45 = vld [vmem:[#allocation2 + $0x20] sm:$0xf]  ;;  %v11479_v60 = vld [vmem:[%s16689_s1 + $0x168] sm:$0xff]  }
  0x41   : > { %4088 = vmatmul.mubr.bf16.vlgmr.msra.gmra.mxu0 %v9597_v17  ;;  %v1203_v52 = vld [vmem:[#allocation2 + $0x24] sm:$0x1]  ;;  %v1939_v55 = vrot.slane %v9439_v42, 1  ;;  %1001 = vst [vmem:[#allocation2 + $0x28] sm:$0xf] %v1000_v49  ;;  %v391_v58 = vsel %vm12393_vm4, 0, %v390_v27 }
  0x42   : > { %v1636_v47 = vor.u32 %v1635_v35, %v1631_v23  ;;  %v1642_v48 = vrot.slane %v1640_v37, 1  ;;  %4256 = vmatprep.mubr.bf16.mxu1 %v9609_v38  ;;  %10552 = vmatpush3.bf16.msra.mxu0 %v11445_v18  ;;  %1004 = vst [vmem:[#allocation2 + $0x2c] sm:$0x1] %v1003_v50  ;;  %v12490_v56 = vcombine.low %v12479_v45, %v1203_v52  ;;  %v1235_v59 = vld [vmem:[#allocation2 + $0x20] sm:$0xe]  ;;  %v693_v62 = vshrl.u32 %v12474_v33, 16 }
  0x43   : > { %10553 = vmatprep.subr.bf16.mxu0 %v11461_v40  ;;  %392 = vst [vmem:[#allocation2 + $0x34] sm:$0x1] %v391_v58  ;;  %v696_v63 = vshll.u32 %v12474_v33, 16  ;;  %v9440_v0 = vcombine.low %v1235_v59, %v1203_v52  ;;  %v274_v1 = vld [vmem:[#allocation2 + $0x40] sm:$0x1]  ;;  %v9608_v4 = vcombine.low %v1938_v43, %v1939_v55  ;;  %v272_v7 = vsel %vm12383_vm2, 0, %v271_v41 }
  0x44   : > { %v1643_v61 = vor.u32 %v1642_v48, %v1638_v36  ;;  %v396_v3 = vld [vmem:[#allocation2 + $0x44] sm:$0x1]  ;;  %v1645_v5 = vshrl.u32 %v12490_v56, 16  ;;  %v1647_v6 = vshll.u32 %v12490_v56, 16  ;;  %v499_v8 = vld [vmem:[%s12380_s7 + $0x38] sm:$0xff]  ;;  %v695_v11 = vrot.slane %v693_v62, 7 }
  0x45   : > { %v280_v9 = vld [vmem:[#allocation2 + $0x50] sm:$0x1]  ;;  %v12507_v12 = vrot.slane %v9440_v0, 1  ;;  %273 = vst [vmem:[#allocation2 + $0x38] sm:$0x1] %v272_v7  ;;  %v394_v13 = vsel %vm12393_vm4, 0, %v393_v53  ;;  %v10268_v26 = vpack.c.bf16 %v499_v8, %v499_v8  ;;  %v10269_v38 = vpack.c.bf16 %v500_v15, %v500_v15 }
  0x46   : > { %v9607_v10 = vcombine.low %v1636_v47, %v1643_v61  ;;  %v283_v14 = vld [vmem:[#allocation2 + $0x58] sm:$0x1]  ;;  %v11481_v16 = vld [vmem:[%s16689_s1 + $0x128] sm:$0xff]   ;;  %4257 = vmatmul.mubr.bf16.gmra.mxu1 %v9608_v4  ;;  %v1649_v17 = vrot.slane %v1647_v6, 1  ;;  %10554 = vmatpush3.bf16.msra.mxu0 %v11463_v57  ;;  %v1005_v18 = vld [vmem:[#allocation2 + $0x30] sm:$0xf]  ;;  %v698_v22 = vor.u32 %v696_v63, %v695_v11 }
  0x47   : > { %395 = vst [vmem:[#allocation2 + $0x3c] sm:$0x1] %v394_v13  ;;  %v701_v19 = vshrl.u32 %v12481_v46, 16  ;;  %v704_v20 = vshll.u32 %v12481_v46, 16  ;;  %v275_v21 = vsel %vm12383_vm2, 0, %v274_v1  ;;  %v699_v23 = vrot.slane %v695_v11, 4  ;;  %10555 = vmatprep.subr.bf16.mxu0 %v11479_v60 }
  0x48   : > { %4095 = vmatprep.mubr.bf16.mxu0 %v9607_v10  ;;  %276 = vst [vmem:[#allocation2 + $0x40] sm:$0x1] %v275_v21  ;;  %v397_v24 = vsel %vm12393_vm4, 0, %v396_v3  ;;  %v281_v27 = vsel %vm12383_vm2, 0, %v280_v9  ;;  %v284_v28 = vsel %vm12383_vm2, 0, %v283_v14  ;;  %v1006_v30 = vsel %vm12409_vm6, %v698_v22, %v1005_v18  ;;  %v501_v40 = vld [vmem:[%s12380_s7 + $0x48] sm:$0xff] }
  0x49   : > { %v703_v25 = vrot.slane %v701_v19, 7  ;;  %398 = vst [vmem:[#allocation2 + $0x44] sm:$0x1] %v397_v24  ;;  %4096 = vmatmul.mubr.bf16.gmra.mxu0 %v9606_v54  ;;  %v12525_v29 = vld [vmem:[#allocation2 + $0x28] sm:$0xf]  ;;  %v1650_v41 = vor.u32 %v1649_v17, %v1645_v5  ;;  %v11497_v47 = vld [vmem:[%s16689_s1 + $0x160] sm:$0xff]   ;;  %v12549_v6 = vpack.c.bf16 %v501_v40, %v501_v40 }
  0x4a   : > { %v1204_v2 = vld [vmem:[#allocation2 + $0x2c] sm:$0x1]  ;;  %282 = vst [vmem:[#allocation2 + $0x50] sm:$0x1] %v281_v27  ;;  %285 = vst [vmem:[#allocation2 + $0x58] sm:$0x1] %v284_v28  ;;  %10556 = vmatpush3.bf16.msra.mxu0 %v11481_v16  ;;  %v9615_v13 = vcombine.low %v12479_v45, %v12525_v29 }
  0x4b   : > { %v402_v31 = vld [vmem:[#allocation2 + $0x54] sm:$0x1]  ;;  %v9409_v32 = vcombine.low %v12525_v29, %v1204_v2  ;;  %1007 = vst [vmem:[#allocation2 + $0x30] sm:$0xf] %v1006_v30  ;;  %v1236_v35 = vld [vmem:[#allocation2 + $0x28] sm:$0xe]  ;;  %v706_v36 = vor.u32 %v704_v20, %v703_v25  ;;  %10557 = vmatprep.subr.bf16.mxu0 %v11497_v47 }
  0x4c   : > { %v1008_v33 = vld [vmem:[#allocation2 + $0x34] sm:$0x1]  ;;  %v405_v37 = vld [vmem:[#allocation2 + $0x5c] sm:$0x1]  ;;  %v9441_v43 = vcombine.low %v1236_v35, %v1204_v2  ;;  %v707_v44 = vrot.slane %v703_v25, 4  ;;  %v709_v52 = vshrl.u32 %v10268_v26, 16 }
  0x4d   : > { %v1009_v42 = vsel %vm12383_vm2, %v699_v23, %v1008_v33  ;;  %v286_v46 = vld [vmem:[#allocation2 + $0x60] sm:$0x1]  ;;  %v1652_v48 = vshrl.u32 %v9409_v32, 16  ;;  %v1654_v49 = vshll.u32 %v9409_v32, 16  ;;  %v1011_v50 = vld [vmem:[#allocation2 + $0x38] sm:$0xf] }
  0x4e   : > { %1010 = vst [vmem:[#allocation2 + $0x34] sm:$0x1] %v1009_v42  ;;  %v712_v53 = vshll.u32 %v10268_v26, 16  ;;  %v1941_v54 = vrot.slane %v9441_v43, 1  ;;  %v1012_v55 = vsel %vm12409_vm6, %v706_v36, %v1011_v50  ;;  %v1014_v56 = vld [vmem:[#allocation2 + $0x3c] sm:$0x1] }
  0x4f   : > { %v403_v57 = vsel %vm12393_vm4, 0, %v402_v31  ;;  %v406_v58 = vsel %vm12393_vm4, 0, %v405_v37  ;;  %v11499_v59 = vld [vmem:[%s16689_s1 + $0x120] sm:$0xff]   ;;  %v1656_v60 = vrot.slane %v1654_v49, 1  ;;  %v1267_v61 = vld [vmem:[#allocation2 + $0x28] sm:$0xf]  ;;  %v1015_v62 = vsel %vm12383_vm2, %v707_v44, %v1014_v56 }
  0x50   : > { %1013 = vst [vmem:[#allocation2 + $0x38] sm:$0xf] %v1012_v55  ;;  %v711_v63 = vrot.slane %v709_v52, 7  ;;  %404 = vst [vmem:[#allocation2 + $0x54] sm:$0x1] %v403_v57  ;;  %v717_v0 = vshrl.u32 %v10269_v38, 16  ;;  %10558 = vmatpush3.bf16.msra.mxu0 %v11499_v59  ;;  %v9617_v15 = vcombine.low %v12507_v12, %v1941_v54 }
  0x51   : > { %407 = vst [vmem:[#allocation2 + $0x5c] sm:$0x1] %v406_v58  ;;  %1016 = vst [vmem:[#allocation2 + $0x3c] sm:$0x1] %v1015_v62  ;;  %v1017_v1 = vld [vmem:[#allocation2 + $0x40] sm:$0xf]  ;;  %v1657_v7 = vor.u32 %v1656_v60, %v1652_v48 }
  0x52   : > { %v1020_v3 = vld [vmem:[#allocation2 + $0x44] sm:$0x1]  ;;  %v720_v4 = vshll.u32 %v10269_v38, 16  ;;  %v287_v5 = vsel %vm12383_vm2, 0, %v286_v46  ;;  %v714_v8 = vor.u32 %v712_v53, %v711_v63  ;;  %v715_v9 = vrot.slane %v711_v63, 4  ;;  %v502_v33 = vld [vmem:[%s12380_s7 + $0x50] sm:$0xff] }
  0x53   : > { %v719_v10 = vrot.slane %v717_v0, 7  ;;  %288 = vst [vmem:[#allocation2 + $0x60] sm:$0x1] %v287_v5  ;;  %v408_v11 = vld [vmem:[#allocation2 + $0x64] sm:$0x1]  ;;  %v9616_v18 = vcombine.low %v1650_v41, %v1657_v7  ;;  %v725_v27 = vshrl.u32 %v12549_v6, 16  ;;  %v10271_v59 = vpack.c.bf16 %v502_v33, %v502_v33 }
  0x54   : > { %v1268_v14 = vld [vmem:[#allocation2 + $0x30] sm:$0xf]  ;;  %v1018_v20 = vsel %vm12409_vm6, %v714_v8, %v1017_v1  ;;  %v1021_v21 = vsel %vm12383_vm2, %v715_v9, %v1020_v3  ;;  %v1023_v22 = vld [vmem:[#allocation2 + $0x58] sm:$0xf]  ;;  %v409_v45 = vsel %vm12393_vm4, 0, %v408_v11  ;;  %v728_v53 = vshll.u32 %v12549_v6, 16 }
  0x55   : > { %v12554_v16 = vld [vmem:[#allocation2 + $0x30] sm:$0xf]  ;;  %v9618_v19 = vcombine.low %v1267_v61, %v1268_v14  ;;  %v1205_v23 = vld [vmem:[#allocation2 + $0x34] sm:$0x1]  ;;  %1019 = vst [vmem:[#allocation2 + $0x40] sm:$0xf] %v1018_v20  ;;  %v722_v24 = vor.u32 %v720_v4, %v719_v10  ;;  %4103 = vmatprep.mubr.bf16.mxu0 %v9616_v18 }
  0x56   : > { %v1237_v17 = vld [vmem:[#allocation2 + $0x30] sm:$0xe]  ;;  %1022 = vst [vmem:[#allocation2 + $0x44] sm:$0x1] %v1021_v21  ;;  %v9410_v12 = vcombine.low %v12554_v16, %v1205_v23  ;;  %v723_v26 = vrot.slane %v719_v10, 4  ;;  %4104 = vmatmul.mubr.bf16.gmra.mxu0 %v9615_v13  ;;  %v727_v47 = vrot.slane %v725_v27, 7 }
  0x57   : > { %4264 = vmatprep.mubr.bf16.mxu1 %v9618_v19  ;;  %v9442_v25 = vcombine.low %v1237_v17, %v1205_v23  ;;  %410 = vst [vmem:[#allocation2 + $0x64] sm:$0x1] %v409_v45  ;;  %v12564_v28 = vld [vmem:[#allocation2 + $0x38] sm:$0xf]  ;;  %v1024_v2 = vsel %vm12409_vm6, %v722_v24, %v1023_v22  ;;  %v12568_v30 = vld [vmem:[#allocation2 + $0x50] sm:$0xf] }
  0x58   : > { %4265 = vmatmul.mubr.bf16.gmra.mxu1 %v9617_v15  ;;  %v1238_v29 = vld [vmem:[#allocation2 + $0x38] sm:$0xe]  ;;  %v1206_v31 = vld [vmem:[#allocation2 + $0x3c] sm:$0x1]  ;;  %v1661_v32 = vshll.u32 %v9410_v12, 16  ;;  %v1659_v36 = vshrl.u32 %v9410_v12, 16  ;;  %v730_v4 = vor.u32 %v728_v53, %v727_v47  ;;  %v9624_v14 = vcombine.low %v12554_v16, %v12564_v28 }
  0x59   : > { %1025 = vst [vmem:[#allocation2 + $0x58] sm:$0xf] %v1024_v2  ;;  %v9411_v35 = vcombine.low %v12564_v28, %v1206_v31  ;;  %v9443_v37 = vcombine.low %v1238_v29, %v1206_v31  ;;  %v1942_v38 = vrot.slane %v9442_v25, 1  ;;  %v1026_v40 = vld [vmem:[#allocation2 + $0x5c] sm:$0x1]  ;;  %v504_v1 = vld [vmem:[%s12380_s7 + $0x60] sm:$0xff] }
  0x5a   : > { %v1207_v41 = vld [vmem:[#allocation2 + $0x54] sm:$0x1]  ;;  %v1663_v42 = vrot.slane %v1661_v32, 1  ;;  %v1269_v43 = vld [vmem:[#allocation2 + $0x38] sm:$0xf]  ;;  %v1027_v44 = vsel %vm12383_vm2, %v723_v26, %v1026_v40  ;;  %v731_v5 = vrot.slane %v727_v47, 4  ;;  %v12592_v19 = vpack.c.bf16 %v504_v1, %v504_v1 }
  0x5b   : > { %v12575_v46 = vcombine.low %v12568_v30, %v1207_v41  ;;  %v503_v48 = vld [vmem:[%s12380_s7 + $0x58] sm:$0xff]  ;;  %v1666_v49 = vshrl.u32 %v9411_v35, 16  ;;  %v1668_v50 = vshll.u32 %v9411_v35, 16  ;;  %v1943_v52 = vrot.slane %v9443_v37, 1  ;;  %1028 = vst [vmem:[#allocation2 + $0x5c] sm:$0x1] %v1027_v44 }
  0x5c   : > { %v1239_v54 = vld [vmem:[#allocation2 + $0x50] sm:$0xe]  ;;  %v1270_v55 = vld [vmem:[#allocation2 + $0x40] sm:$0xf]  ;;  %v289_v57 = vld [vmem:[#allocation2 + $0x68] sm:$0x1]  ;;  %v1664_v60 = vor.u32 %v1663_v42, %v1659_v36  ;;  %v10272_v13 = vpack.c.bf16 %v503_v48, %v503_v48 }
  0x5d   : > { %v1029_v56 = vld [vmem:[#allocation2 + $0x60] sm:$0xf]  ;;  %v411_v58 = vld [vmem:[#allocation2 + $0x6c] sm:$0x1]  ;;  %v1670_v61 = vrot.slane %v1668_v50, 1  ;;  %v9627_v62 = vcombine.low %v1269_v43, %v1270_v55  ;;  %v9626_v63 = vcombine.low %v1942_v38, %v1943_v52  ;;  %v1675_v3 = vshll.u32 %v12575_v46, 16 }
  0x5e   : > { %v1032_v0 = vld [vmem:[#allocation2 + $0x64] sm:$0x1]  ;;  %v11515_v6 = vld [vmem:[%s16689_s1 + $0x158] sm:$0xff]   ;;  %v9444_v9 = vcombine.low %v1239_v54, %v1207_v41  ;;  %v292_v10 = vld [vmem:[#allocation2 + $0x70] sm:$0x1]  ;;  %v1030_v15 = vsel %vm12409_vm6, %v730_v4, %v1029_v56  ;;  %v290_v21 = vsel %vm12383_vm2, 0, %v289_v57 }
  0x5f   : > { %v1671_v7 = vor.u32 %v1670_v61, %v1666_v49  ;;  %4272 = vmatprep.mubr.bf16.mxu1 %v9627_v62  ;;  %v414_v11 = vld [vmem:[#allocation2 + $0x74] sm:$0x1]  ;;  %v1033_v17 = vsel %vm12383_vm2, %v731_v5, %v1032_v0  ;;  %1031 = vst [vmem:[#allocation2 + $0x60] sm:$0xf] %v1030_v15  ;;  %v412_v22 = vsel %vm12393_vm4, 0, %v411_v58  ;;  %v733_v16 = vshrl.u32 %v10271_v59, 16  ;;  %10559 = vmatprep.subr.bf16.mxu0 %v11515_v6 }
  0x60   : > { %v12584_v8 = vld [vmem:[#allocation2 + $0x58] sm:$0xf]  ;;  %4273 = vmatmul.mubr.bf16.gmra.mxu1 %v9626_v63  ;;  %1034 = vst [vmem:[#allocation2 + $0x64] sm:$0x1] %v1033_v17  ;;  %v1673_v12 = vshrl.u32 %v12575_v46, 16  ;;  %v1677_v25 = vrot.slane %v1675_v3, 1 }
  0x61   : > { %v1240_v18 = vld [vmem:[#allocation2 + $0x58] sm:$0xe]  ;;  %v9625_v20 = vcombine.low %v1664_v60, %v1671_v7  ;;  %v295_v23 = vld [vmem:[#allocation2 + $0x78] sm:$0x1]  ;;  %291 = vst [vmem:[#allocation2 + $0x68] sm:$0x1] %v290_v21  ;;  %v9633_v61 = vcombine.low %v12568_v30, %v12584_v8 }
  0x62   : > { %v11517_v24 = vld [vmem:[%s16689_s1 + $0x118] sm:$0xff]   ;;  %413 = vst [vmem:[#allocation2 + $0x6c] sm:$0x1] %v412_v22  ;;  %v736_v26 = vshll.u32 %v10271_v59, 16  ;;  %v293_v27 = vsel %vm12383_vm2, 0, %v292_v10  ;;  %v1944_v2 = vrot.slane %v9444_v9, 1  ;;  %v1678_v50 = vor.u32 %v1677_v25, %v1673_v12 }
  0x63   : > { %v1208_v45 = vld [vmem:[#allocation2 + $0x5c] sm:$0x1]  ;;  %4111 = vmatprep.mubr.bf16.mxu0 %v9625_v20  ;;  %v735_v31 = vrot.slane %v733_v16, 7  ;;  %294 = vst [vmem:[#allocation2 + $0x70] sm:$0x1] %v293_v27  ;;  %10560 = vmatpush3.bf16.msra.mxu0 %v11517_v24  ;;  %v415_v33 = vsel %vm12393_vm4, 0, %v414_v11 }
  0x64   : > { %v9413_v28 = vcombine.low %v12584_v8, %v1208_v45  ;;  %v9445_v29 = vcombine.low %v1240_v18, %v1208_v45  ;;  %v417_v32 = vld [vmem:[#allocation2 + $0x7c] sm:$0x1]  ;;  %4112 = vmatmul.mubr.bf16.gmra.mxu0 %v9624_v14  ;;  %v741_v35 = vshrl.u32 %v10272_v13, 16  ;;  %v744_v36 = vshll.u32 %v10272_v13, 16  ;;  %v298_v38 = vld [vmem:[#allocation2 + $0x80] sm:$0x1] }
  0x65   : > { %v296_v37 = vsel %vm12383_vm2, 0, %v295_v23  ;;  %416 = vst [vmem:[#allocation2 + $0x74] sm:$0x1] %v415_v33  ;;  %v1271_v43 = vld [vmem:[#allocation2 + $0x58] sm:$0xf]  ;;  %v738_v44 = vor.u32 %v736_v26, %v735_v31  ;;  %v739_v46 = vrot.slane %v735_v31, 4 }
  0x66   : > { %v1680_v40 = vshrl.u32 %v9413_v28, 16  ;;  %v1682_v41 = vshll.u32 %v9413_v28, 16  ;;  %v1945_v42 = vrot.slane %v9445_v29, 1  ;;  %297 = vst [vmem:[#allocation2 + $0x78] sm:$0x1] %v296_v37  ;;  %v743_v47 = vrot.slane %v741_v35, 7 }
  0x67   : > { %v418_v48 = vsel %vm12393_vm4, 0, %v417_v32  ;;  %v505_v49 = vld [vmem:[%s12380_s7 + $0x68] sm:$0xff]  ;;  %v749_v53 = vshrl.u32 %v12592_v19, 16  ;;  %v299_v54 = vsel %vm12383_vm2, 0, %v298_v38  ;;  %v1272_v55 = vld [vmem:[#allocation2 + $0x60] sm:$0xf] }
  0x68   : > { %v1684_v52 = vrot.slane %v1682_v41, 1  ;;  %419 = vst [vmem:[#allocation2 + $0x7c] sm:$0x1] %v418_v48  ;;  %v9635_v56 = vcombine.low %v1944_v2, %v1945_v42  ;;  %v12615_v57 = vld [vmem:[#allocation2 + $0x60] sm:$0xf]  ;;  %v746_v58 = vor.u32 %v744_v36, %v743_v47  ;;  %v752_v59 = vshll.u32 %v12592_v19, 16 }
  0x69   : > { %300 = vst [vmem:[#allocation2 + $0x80] sm:$0x1] %v299_v54  ;;  %v9636_v62 = vcombine.low %v1271_v43, %v1272_v55  ;;  %v1035_v63 = vld [vmem:[#allocation2 + $0x68] sm:$0xf]  ;;  %v1038_v0 = vld [vmem:[#allocation2 + $0x6c] sm:$0x1]  ;;  %v10274_v3 = vpack.c.bf16 %v505_v49, %v505_v49 }
  0x6a   : > { %v1685_v60 = vor.u32 %v1684_v52, %v1680_v40  ;;  %v12620_v1 = vld [vmem:[#allocation2 + $0x64] sm:$0x1]  ;;  %v1036_v4 = vsel %vm12409_vm6, %v738_v44, %v1035_v63  ;;  %v1039_v5 = vsel %vm12383_vm2, %v739_v46, %v1038_v0  ;;  %v747_v7 = vrot.slane %v743_v47, 4  ;;  %v1041_v9 = vld [vmem:[#allocation2 + $0x70] sm:$0xf]  ;;  %v507_v33 = vld [vmem:[%s12380_s7 + $0x78] sm:$0xff] }
  0x6b   : > { %v12628_v6 = vcombine.low %v12615_v57, %v12620_v1  ;;  %v420_v10 = vld [vmem:[#allocation2 + $0x84] sm:$0x1]  ;;  %v506_v30 = vld [vmem:[%s12380_s7 + $0x70] sm:$0xff]  ;;  %4280 = vmatprep.mubr.bf16.mxu1 %v9636_v62  ;;  %1037 = vst [vmem:[#allocation2 + $0x68] sm:$0xf] %v1036_v4  ;;  %v1042_v11 = vsel %vm12409_vm6, %v746_v58, %v1041_v9  ;;  %v751_v13 = vrot.slane %v749_v53, 7 }
  0x6c   : > { %v9634_v8 = vcombine.low %v1678_v50, %v1685_v60  ;;  %1040 = vst [vmem:[#allocation2 + $0x6c] sm:$0x1] %v1039_v5  ;;  %v301_v14 = vld [vmem:[#allocation2 + $0x88] sm:$0x1]  ;;  %v423_v15 = vld [vmem:[#allocation2 + $0x8c] sm:$0x1]  ;;  %4281 = vmatmul.mubr.bf16.gmra.mxu1 %v9635_v56  ;;  %v12638_v45 = vpack.c.bf16 %v506_v30, %v506_v30  ;;  %v12665_v50 = vpack.c.bf16 %v507_v33, %v507_v33 }
  0x6d   : > { %v11533_v17 = vld [vmem:[%s16689_s1 + $0x150] sm:$0xff]   ;;  %1043 = vst [vmem:[#allocation2 + $0x70] sm:$0xf] %v1042_v11  ;;  %v1241_v19 = vld [vmem:[#allocation2 + $0x60] sm:$0xe]  ;;  %v754_v23 = vor.u32 %v752_v59, %v751_v13  ;;  %v755_v24 = vrot.slane %v751_v13, 4 }
  0x6e   : > { %v1044_v18 = vld [vmem:[#allocation2 + $0x74] sm:$0x1]  ;;  %v1047_v20 = vld [vmem:[#allocation2 + $0x78] sm:$0xf]  ;;  %v304_v21 = vld [vmem:[#allocation2 + $0x90] sm:$0x1]  ;;  %4119 = vmatprep.mubr.bf16.mxu0 %v9634_v8  ;;  %10561 = vmatprep.subr.bf16.mxu0 %v11533_v17  ;;  %v9446_v36 = vcombine.low %v1241_v19, %v12620_v1 }
  0x6f   : > { %v426_v22 = vld [vmem:[#allocation2 + $0x94] sm:$0x1]  ;;  %v1045_v16 = vsel %vm12383_vm2, %v747_v7, %v1044_v18  ;;  %4120 = vmatmul.mubr.bf16.gmra.mxu0 %v9633_v61  ;;  %v1689_v12 = vshll.u32 %v12628_v6, 16  ;;  %v1050_v25 = vld [vmem:[#allocation2 + $0x7c] sm:$0x1]  ;;  %v421_v26 = vsel %vm12393_vm4, 0, %v420_v10  ;;  %v1048_v29 = vsel %vm12409_vm6, %v754_v23, %v1047_v20 }
  0x70   : > { %1046 = vst [vmem:[#allocation2 + $0x74] sm:$0x1] %v1045_v16  ;;  %v757_v27 = vshrl.u32 %v10274_v3, 16  ;;  %v760_v28 = vshll.u32 %v10274_v3, 16  ;;  %v1051_v2 = vsel %vm12383_vm2, %v755_v24, %v1050_v25  ;;  %422 = vst [vmem:[#allocation2 + $0x84] sm:$0x1] %v421_v26 }
  0x71   : > { %v302_v31 = vsel %vm12383_vm2, 0, %v301_v14  ;;  %v424_v32 = vsel %vm12393_vm4, 0, %v423_v15  ;;  %v508_v35 = vld [vmem:[%s12380_s7 + $0x80] sm:$0xff]  ;;  %1049 = vst [vmem:[#allocation2 + $0x78] sm:$0xf] %v1048_v29  ;;  %v509_v38 = vld [vmem:[%s12380_s7 + $0x88] sm:$0xff] }
  0x72   : > { %1052 = vst [vmem:[#allocation2 + $0x7c] sm:$0x1] %v1051_v2  ;;  %v759_v37 = vrot.slane %v757_v27, 7  ;;  %303 = vst [vmem:[#allocation2 + $0x88] sm:$0x1] %v302_v31  ;;  %v11535_v40 = vld [vmem:[%s16689_s1 + $0x110] sm:$0xff]   ;;  %v12667_v52 = vpack.c.bf16 %v508_v35, %v508_v35  ;;  %v12671_v59 = vpack.c.bf16 %v509_v38, %v509_v38 }
  0x73   : > { %425 = vst [vmem:[#allocation2 + $0x8c] sm:$0x1] %v424_v32  ;;  %v1687_v41 = vshrl.u32 %v12628_v6, 16  ;;  %v1053_v42 = vld [vmem:[#allocation2 + $0x80] sm:$0xf]  ;;  %v305_v43 = vsel %vm12383_vm2, 0, %v304_v21  ;;  %10562 = vmatpush3.bf16.msra.mxu0 %v11535_v40 }
  0x74   : > { %v427_v44 = vsel %vm12393_vm4, 0, %v426_v22  ;;  %v12663_v46 = vld [vmem:[#allocation2 + $0x68] sm:$0xf]  ;;  %v1210_v47 = vld [vmem:[#allocation2 + $0x6c] sm:$0x1]  ;;  %v762_v49 = vor.u32 %v760_v28, %v759_v37  ;;  %v1691_v54 = vrot.slane %v1689_v12, 1 }
  0x75   : > { %v1273_v48 = vld [vmem:[#allocation2 + $0x68] sm:$0xf]  ;;  %306 = vst [vmem:[#allocation2 + $0x90] sm:$0x1] %v305_v43  ;;  %428 = vst [vmem:[#allocation2 + $0x94] sm:$0x1] %v427_v44  ;;  %v9415_v53 = vcombine.low %v12663_v46, %v1210_v47 }
  0x76   : > { %v1274_v55 = vld [vmem:[#allocation2 + $0x70] sm:$0xf]  ;;  %v1242_v56 = vld [vmem:[#allocation2 + $0x68] sm:$0xe]  ;;  %v765_v58 = vshrl.u32 %v12638_v45, 16  ;;  %v1946_v62 = vrot.slane %v9446_v36, 1  ;;  %v1054_v6 = vsel %vm12409_vm6, %v762_v49, %v1053_v42  ;;  %v1692_v13 = vor.u32 %v1691_v54, %v1687_v41 }
  0x77   : > { %v9645_v60 = vcombine.low %v1273_v48, %v1274_v55  ;;  %v9447_v61 = vcombine.low %v1242_v56, %v1210_v47  ;;  %v12673_v63 = vld [vmem:[#allocation2 + $0x70] sm:$0xf]  ;;  %v763_v0 = vrot.slane %v759_v37, 4  ;;  %v1694_v3 = vshrl.u32 %v9415_v53, 16  ;;  %v1211_v5 = vld [vmem:[#allocation2 + $0x74] sm:$0x1] }
  0x78   : > { %v1243_v1 = vld [vmem:[#allocation2 + $0x70] sm:$0xe]  ;;  %v1696_v4 = vshll.u32 %v9415_v53, 16  ;;  %v768_v7 = vshll.u32 %v12638_v45, 16  ;;  %v9416_v10 = vcombine.low %v12673_v63, %v1211_v5  ;;  %1055 = vst [vmem:[#allocation2 + $0x80] sm:$0xf] %v1054_v6  ;;  %v9642_v45 = vcombine.low %v12615_v57, %v12663_v46 }
  0x79   : > { %4288 = vmatprep.mubr.bf16.mxu1 %v9645_v60  ;;  %v1947_v9 = vrot.slane %v9447_v61, 1  ;;  %v1056_v30 = vld [vmem:[#allocation2 + $0x84] sm:$0x1]  ;;  %v9448_v8 = vcombine.low %v1243_v1, %v1211_v5  ;;  %v773_v11 = vshrl.u32 %v12665_v50, 16  ;;  %v12680_v15 = vld [vmem:[#allocation2 + $0x78] sm:$0xf] }
  0x7a   : > { %v1698_v14 = vrot.slane %v1696_v4, 1  ;;  %v1212_v17 = vld [vmem:[#allocation2 + $0x7c] sm:$0x1]  ;;  %v1057_v18 = vsel %vm12383_vm2, %v763_v0, %v1056_v30  ;;  %v767_v19 = vrot.slane %v765_v58, 7  ;;  %v1701_v22 = vshrl.u32 %v9416_v10, 16  ;;  %v11553_v61 = vld [vmem:[%s16689_s1 + $0x108] sm:$0xff]  }
  0x7b   : > { %v9644_v20 = vcombine.low %v1946_v62, %v1947_v9  ;;  %v9417_v21 = vcombine.low %v12680_v15, %v1212_v17  ;;  %v1703_v16 = vshll.u32 %v9416_v10, 16  ;;  %1058 = vst [vmem:[#allocation2 + $0x84] sm:$0x1] %v1057_v18  ;;  %v310_v23 = vld [vmem:[#allocation2 + $0xa0] sm:$0x1]  ;;  %v12687_v25 = vrot.slane %v9448_v8, 1 }
  0x7c   : > { %v1699_v24 = vor.u32 %v1698_v14, %v1694_v3  ;;  %v1244_v12 = vld [vmem:[#allocation2 + $0x78] sm:$0xe]  ;;  %v1059_v26 = vld [vmem:[#allocation2 + $0x88] sm:$0xf]  ;;  %v776_v27 = vshll.u32 %v12665_v50, 16  ;;  %v770_v40 = vor.u32 %v768_v7, %v767_v19  ;;  %v771_v41 = vrot.slane %v767_v19, 4 }
  0x7d   : > { %v313_v28 = vld [vmem:[#allocation2 + $0xa8] sm:$0x1]  ;;  %4289 = vmatmul.mubr.bf16.gmra.mxu1 %v9644_v20  ;;  %v1705_v29 = vrot.slane %v1703_v16, 1  ;;  %v1708_v2 = vshrl.u32 %v9417_v21, 16  ;;  %v1710_v31 = vshll.u32 %v9417_v21, 16  ;;  %v9449_v32 = vcombine.low %v1244_v12, %v1212_v17  ;;  %v510_v8 = vld [vmem:[%s12380_s7 + $0x90] sm:$0xff] }
  0x7e   : > { %v1062_v33 = vld [vmem:[#allocation2 + $0x8c] sm:$0x1]  ;;  %v432_v35 = vld [vmem:[#allocation2 + $0xa4] sm:$0x1]  ;;  %v9643_v37 = vcombine.low %v1692_v13, %v1699_v24  ;;  %v1275_v38 = vld [vmem:[#allocation2 + $0x78] sm:$0xf]  ;;  %v1060_v54 = vsel %vm12409_vm6, %v770_v40, %v1059_v26  ;;  %v9651_v16 = vcombine.low %v12673_v63, %v12680_v15 }
  0x7f   : > { %v435_v36 = vld [vmem:[#allocation2 + $0xac] sm:$0x1]  ;;  %v775_v57 = vrot.slane %v773_v11, 7  ;;  %v1065_v42 = vld [vmem:[#allocation2 + $0x90] sm:$0xf]  ;;  %v1706_v43 = vor.u32 %v1705_v29, %v1701_v22  ;;  %v1712_v44 = vrot.slane %v1710_v31, 1  ;;  %v1063_v55 = vsel %vm12383_vm2, %v771_v41, %v1062_v33 }
  0x80   : > { %v1949_v46 = vrot.slane %v9449_v32, 1  ;;  %v1068_v47 = vld [vmem:[#allocation2 + $0x94] sm:$0x1]  ;;  %v311_v48 = vsel %vm12383_vm2, 0, %v310_v23  ;;  %v316_v49 = vld [vmem:[#allocation2 + $0xb0] sm:$0x1]  ;;  %4127 = vmatprep.mubr.bf16.mxu0 %v9643_v37 }
  0x81   : > { %v11551_v50 = vld [vmem:[%s16689_s1 + $0x148] sm:$0xff]   ;;  %v1276_v53 = vld [vmem:[#allocation2 + $0x80] sm:$0xf]  ;;  %v778_v58 = vor.u32 %v776_v27, %v775_v57  ;;  %v779_v60 = vrot.slane %v775_v57, 4  ;;  %312 = vst [vmem:[#allocation2 + $0xa0] sm:$0x1] %v311_v48  ;;  %4128 = vmatmul.mubr.bf16.gmra.mxu0 %v9642_v45  ;;  %v1713_v62 = vor.u32 %v1712_v44, %v1708_v2  ;;  %v12729_v45 = vpack.c.bf16 %v510_v8, %v510_v8 }
  0x82   : > { %v12699_v56 = vld [vmem:[#allocation2 + $0x80] sm:$0xf]  ;;  %v9654_v0 = vcombine.low %v1275_v38, %v1276_v53  ;;  %v9653_v1 = vcombine.low %v12687_v25, %v1949_v46  ;;  %1061 = vst [vmem:[#allocation2 + $0x88] sm:$0xf] %v1060_v54  ;;  %1064 = vst [vmem:[#allocation2 + $0x8c] sm:$0x1] %v1063_v55  ;;  %10563 = vmatprep.subr.bf16.mxu0 %v11551_v50 }
  0x83   : > { %v1245_v3 = vld [vmem:[#allocation2 + $0x80] sm:$0xe]  ;;  %v314_v4 = vsel %vm12383_vm2, 0, %v313_v28  ;;  %v438_v5 = vld [vmem:[#allocation2 + $0xb4] sm:$0x1]  ;;  %v1066_v7 = vsel %vm12409_vm6, %v778_v58, %v1065_v42  ;;  %v1069_v9 = vsel %vm12383_vm2, %v779_v60, %v1068_v47  ;;  %v433_v10 = vsel %vm12393_vm4, 0, %v432_v35  ;;  %10564 = vmatpush3.bf16.msra.mxu0 %v11553_v61 }
  0x84   : > { %v1213_v6 = vld [vmem:[#allocation2 + $0x84] sm:$0x1]  ;;  %315 = vst [vmem:[#allocation2 + $0xa8] sm:$0x1] %v314_v4  ;;  %v436_v30 = vsel %vm12393_vm4, 0, %v435_v36  ;;  %v9652_v11 = vcombine.low %v1706_v43, %v1713_v62  ;;  %4296 = vmatprep.mubr.bf16.mxu1 %v9654_v0  ;;  %v781_v19 = vshrl.u32 %v12667_v52, 16 }
  0x85   : > { %v12717_v13 = vcombine.low %v12699_v56, %v1213_v6  ;;  %1067 = vst [vmem:[#allocation2 + $0x90] sm:$0xf] %v1066_v7  ;;  %1070 = vst [vmem:[#allocation2 + $0x94] sm:$0x1] %v1069_v9  ;;  %v9450_v14 = vcombine.low %v1245_v3, %v1213_v6  ;;  %v319_v17 = vld [vmem:[#allocation2 + $0xb8] sm:$0x1]  ;;  %4297 = vmatmul.mubr.bf16.gmra.mxu1 %v9653_v1 }
  0x86   : > { %434 = vst [vmem:[#allocation2 + $0xa4] sm:$0x1] %v433_v10  ;;  %437 = vst [vmem:[#allocation2 + $0xac] sm:$0x1] %v436_v30  ;;  %v441_v18 = vld [vmem:[#allocation2 + $0xbc] sm:$0x1]  ;;  %4135 = vmatprep.mubr.bf16.mxu0 %v9652_v11 }
  0x87   : > { %v784_v20 = vshll.u32 %v12667_v52, 16  ;;  %v317_v21 = vsel %vm12383_vm2, 0, %v316_v49  ;;  %v439_v22 = vsel %vm12393_vm4, 0, %v438_v5  ;;  %v1717_v23 = vshll.u32 %v12717_v13, 16  ;;  %v511_v29 = vld [vmem:[%s12380_s7 + $0x98] sm:$0xff]  ;;  %v512_v38 = vld [vmem:[%s12380_s7 + $0xa0] sm:$0xff] }
  0x88   : > { %318 = vst [vmem:[#allocation2 + $0xb0] sm:$0x1] %v317_v21  ;;  %440 = vst [vmem:[#allocation2 + $0xb4] sm:$0x1] %v439_v22  ;;  %v789_v24 = vshrl.u32 %v12671_v59, 16  ;;  %v783_v52 = vrot.slane %v781_v19, 7  ;;  %v12753_v60 = vpack.c.bf16 %v511_v29, %v511_v29 }
  0x89   : > { %v792_v12 = vshll.u32 %v12671_v59, 16  ;;  %v320_v25 = vsel %vm12383_vm2, 0, %v319_v17  ;;  %v442_v26 = vsel %vm12393_vm4, 0, %v441_v18  ;;  %v1715_v63 = vshrl.u32 %v12717_v13, 16  ;;  %v12738_v2 = vld [vmem:[#allocation2 + $0x88] sm:$0xf]  ;;  %4136 = vmatmul.mubr.bf16.gmra.mxu0 %v9651_v16 }
  0x8a   : > { %v1719_v15 = vrot.slane %v1717_v23, 1  ;;  %v1950_v27 = vrot.slane %v9450_v14, 1  ;;  %v791_v28 = vrot.slane %v789_v24, 7  ;;  %321 = vst [vmem:[#allocation2 + $0xb8] sm:$0x1] %v320_v25  ;;  %v786_v59 = vor.u32 %v784_v20, %v783_v52  ;;  %v11559_v40 = vld [vmem:[%s16689_s1 + $0x1f8] sm:$0xff]  }
  0x8b   : > { %443 = vst [vmem:[#allocation2 + $0xbc] sm:$0x1] %v442_v26  ;;  %v1214_v31 = vld [vmem:[#allocation2 + $0x8c] sm:$0x1]  ;;  %v1277_v32 = vld [vmem:[#allocation2 + $0x88] sm:$0xf]  ;;  %10663 = vmatprep.subr.bf16.mxu1 %v11559_v40  ;;  %v9660_v8 = vcombine.low %v12699_v56, %v12738_v2  ;;  %v12770_v18 = vpack.c.bf16 %v512_v38, %v512_v38 }
  0x8c   : > { %v9419_v33 = vcombine.low %v12738_v2, %v1214_v31  ;;  %v1246_v35 = vld [vmem:[#allocation2 + $0x88] sm:$0xe]  ;;  %v787_v36 = vrot.slane %v783_v52, 4  ;;  %v12741_v37 = vld [vmem:[#allocation2 + $0xa0] sm:$0xf]  ;;  %v794_v43 = vor.u32 %v792_v12, %v791_v28  ;;  %v797_v44 = vshrl.u32 %v12729_v45, 16 }
  0x8d   : > { %v1278_v41 = vld [vmem:[#allocation2 + $0x90] sm:$0xf]  ;;  %v9451_v57 = vcombine.low %v1246_v35, %v1214_v31  ;;  %v1071_v42 = vld [vmem:[#allocation2 + $0xa8] sm:$0xf]  ;;  %v800_v46 = vshll.u32 %v12729_v45, 16  ;;  %v11560_v6 = vld [vmem:[%s16689_s1 + $0x1b8] sm:$0xff]   ;;  %v1720_v7 = vor.u32 %v1719_v15, %v1715_v63 }
  0x8e   : > { %v322_v47 = vld [vmem:[#allocation2 + $0xc0] sm:$0x1]  ;;  %v1722_v48 = vshrl.u32 %v9419_v33, 16  ;;  %v1724_v49 = vshll.u32 %v9419_v33, 16  ;;  %v9663_v50 = vcombine.low %v1277_v32, %v1278_v41  ;;  %v1074_v53 = vld [vmem:[#allocation2 + $0xac] sm:$0x1]  ;;  %v1072_v62 = vsel %vm12409_vm6, %v786_v59, %v1071_v42  ;;  %10664 = vmatpush3.bf16.msra.mxu1 %v11560_v6 }
  0x8f   : > { %v12749_v54 = vld [vmem:[#allocation2 + $0xa4] sm:$0x1]  ;;  %v12751_v55 = vld [vmem:[#allocation2 + $0xa0] sm:$0xe]  ;;  %v1951_v61 = vrot.slane %v9451_v57, 1  ;;  %v1075_v0 = vsel %vm12383_vm2, %v787_v36, %v1074_v53  ;;  %v795_v10 = vrot.slane %v791_v28, 4 }
  0x90   : > { %v444_v58 = vld [vmem:[#allocation2 + $0xc4] sm:$0x1]  ;;  %v12761_v1 = vcombine.low %v12741_v37, %v12749_v54  ;;  %v1077_v3 = vld [vmem:[#allocation2 + $0xb0] sm:$0xf]  ;;  %v1080_v4 = vld [vmem:[#allocation2 + $0xb4] sm:$0x1]  ;;  %4304 = vmatprep.mubr.bf16.mxu1 %v9663_v50  ;;  %v9452_v23 = vcombine.low %v12751_v55, %v12749_v54 }
  0x91   : > { %v325_v5 = vld [vmem:[#allocation2 + $0xc8] sm:$0x1]  ;;  %v1726_v9 = vrot.slane %v1724_v49, 1  ;;  %1073 = vst [vmem:[#allocation2 + $0xa8] sm:$0xf] %v1072_v62  ;;  %v1078_v30 = vsel %vm12409_vm6, %v794_v43, %v1077_v3  ;;  %v9662_v11 = vcombine.low %v1950_v27, %v1951_v61  ;;  %v799_v13 = vrot.slane %v797_v44, 7 }
  0x92   : > { %1076 = vst [vmem:[#allocation2 + $0xac] sm:$0x1] %v1075_v0  ;;  %1079 = vst [vmem:[#allocation2 + $0xb0] sm:$0xf] %v1078_v30  ;;  %v1083_v14 = vld [vmem:[#allocation2 + $0xb8] sm:$0xf]  ;;  %v1081_v22 = vsel %vm12383_vm2, %v795_v10, %v1080_v4 }
  0x93   : > { %v447_v17 = vld [vmem:[#allocation2 + $0xcc] sm:$0x1]  ;;  %v11561_v19 = vld [vmem:[%s16689_s1 + $0x1f0] sm:$0xff]   ;;  %v1727_v20 = vor.u32 %v1726_v9, %v1722_v48  ;;  %v1731_v21 = vshll.u32 %v12761_v1, 16  ;;  %v1086_v16 = vld [vmem:[#allocation2 + $0xbc] sm:$0x1]  ;;  %4305 = vmatmul.mubr.bf16.gmra.mxu1 %v9662_v11  ;;  %v802_v24 = vor.u32 %v800_v46, %v799_v13 }
  0x94   : > { %v323_v56 = vsel %vm12383_vm2, 0, %v322_v47  ;;  %1082 = vst [vmem:[#allocation2 + $0xb4] sm:$0x1] %v1081_v22  ;;  %v803_v45 = vrot.slane %v799_v13, 4  ;;  %v445_v52 = vsel %vm12393_vm4, 0, %v444_v58  ;;  %10665 = vmatprep.subr.bf16.mxu1 %v11561_v19  ;;  %v805_v26 = vshrl.u32 %v12753_v60, 16 }
  0x95   : > { %324 = vst [vmem:[#allocation2 + $0xc0] sm:$0x1] %v323_v56  ;;  %v328_v12 = vld [vmem:[#allocation2 + $0xd0] sm:$0x1]  ;;  %v9661_v25 = vcombine.low %v1720_v7, %v1727_v20  ;;  %446 = vst [vmem:[#allocation2 + $0xc4] sm:$0x1] %v445_v52  ;;  %v1084_v28 = vsel %vm12409_vm6, %v802_v24, %v1083_v14 }
  0x96   : > { %v808_v63 = vshll.u32 %v12753_v60, 16  ;;  %v326_v15 = vsel %vm12383_vm2, 0, %v325_v5  ;;  %v11564_v27 = vld [vmem:[%s16689_s1 + $0x1b0] sm:$0xff]   ;;  %v1087_v29 = vsel %vm12383_vm2, %v803_v45, %v1086_v16  ;;  %v448_v2 = vsel %vm12393_vm4, 0, %v447_v17  ;;  %1085 = vst [vmem:[#allocation2 + $0xb8] sm:$0xf] %v1084_v28 }
  0x97   : > { %327 = vst [vmem:[#allocation2 + $0xc8] sm:$0x1] %v326_v15  ;;  %4143 = vmatprep.mubr.bf16.mxu0 %v9661_v25  ;;  %v1729_v31 = vshrl.u32 %v12761_v1, 16  ;;  %v1733_v32 = vrot.slane %v1731_v21, 1  ;;  %1088 = vst [vmem:[#allocation2 + $0xbc] sm:$0x1] %v1087_v29  ;;  %10666 = vmatpush3.bf16.msra.mxu1 %v11564_v27 }
  0x98   : > { %v807_v59 = vrot.slane %v805_v26, 7  ;;  %449 = vst [vmem:[#allocation2 + $0xcc] sm:$0x1] %v448_v2  ;;  %v329_v33 = vsel %vm12383_vm2, 0, %v328_v12  ;;  %4144 = vmatmul.mubr.bf16.gmra.mxu0 %v9660_v8  ;;  %v12800_v35 = vld [vmem:[#allocation2 + $0xa8] sm:$0xf] }
  0x99   : > { %v1216_v36 = vld [vmem:[#allocation2 + $0xac] sm:$0x1]  ;;  %v1279_v38 = vld [vmem:[#allocation2 + $0xa8] sm:$0xf]  ;;  %330 = vst [vmem:[#allocation2 + $0xd0] sm:$0x1] %v329_v33  ;;  %v1734_v0 = vor.u32 %v1733_v32, %v1729_v31  ;;  %v9669_v45 = vcombine.low %v12741_v37, %v12800_v35 }
  0x9a   : > { %v9421_v40 = vcombine.low %v12800_v35, %v1216_v36  ;;  %v1280_v41 = vld [vmem:[#allocation2 + $0xb0] sm:$0xf]  ;;  %v1248_v57 = vld [vmem:[#allocation2 + $0xa8] sm:$0xe]  ;;  %v1952_v42 = vrot.slane %v9452_v23, 1  ;;  %v810_v43 = vor.u32 %v808_v63, %v807_v59  ;;  %v813_v44 = vshrl.u32 %v12770_v18, 16 }
  0x9b   : > { %v513_v46 = vld [vmem:[%s12380_s7 + $0xa8] sm:$0xff]  ;;  %v9672_v47 = vcombine.low %v1279_v38, %v1280_v41  ;;  %v9453_v48 = vcombine.low %v1248_v57, %v1216_v36  ;;  %v12805_v49 = vld [vmem:[#allocation2 + $0xb0] sm:$0xf]  ;;  %v811_v50 = vrot.slane %v807_v59, 4  ;;  %v1217_v60 = vld [vmem:[#allocation2 + $0xb4] sm:$0x1] }
  0x9c   : > { %v1249_v53 = vld [vmem:[#allocation2 + $0xb0] sm:$0xe]  ;;  %v11571_v54 = vld [vmem:[%s16689_s1 + $0x1e8] sm:$0xff]   ;;  %v1736_v55 = vshrl.u32 %v9421_v40, 16  ;;  %v1738_v58 = vshll.u32 %v9421_v40, 16  ;;  %v816_v61 = vshll.u32 %v12770_v18, 16  ;;  %v9422_v3 = vcombine.low %v12805_v49, %v1217_v60 }
  0x9d   : > { %v514_v62 = vld [vmem:[%s12380_s7 + $0xb0] sm:$0xff]  ;;  %4312 = vmatprep.mubr.bf16.mxu1 %v9672_v47  ;;  %v1953_v1 = vrot.slane %v9453_v48, 1  ;;  %v1089_v4 = vld [vmem:[#allocation2 + $0xc0] sm:$0xf]  ;;  %v1092_v5 = vld [vmem:[#allocation2 + $0xc4] sm:$0x1]  ;;  %v9454_v6 = vcombine.low %v1249_v53, %v1217_v60  ;;  %10667 = vmatprep.subr.bf16.mxu1 %v11571_v54  ;;  %v12822_v19 = vpack.c.bf16 %v513_v46, %v513_v46 }
  0x9e   : > { %v11572_v7 = vld [vmem:[%s16689_s1 + $0x1a8] sm:$0xff]   ;;  %v1740_v9 = vrot.slane %v1738_v58, 1  ;;  %v1090_v10 = vsel %vm12409_vm6, %v810_v43, %v1089_v4  ;;  %v1093_v30 = vsel %vm12383_vm2, %v811_v50, %v1092_v5  ;;  %v815_v8 = vrot.slane %v813_v44, 7  ;;  %v12820_v13 = vld [vmem:[#allocation2 + $0xb8] sm:$0xf]  ;;  %v11573_v31 = vld [vmem:[%s16689_s1 + $0x1e0] sm:$0xff]  }
  0x9f   : > { %v9671_v11 = vcombine.low %v1952_v42, %v1953_v1  ;;  %v1218_v14 = vld [vmem:[#allocation2 + $0xbc] sm:$0x1]  ;;  %v1743_v17 = vshrl.u32 %v9422_v3, 16  ;;  %v1745_v18 = vshll.u32 %v9422_v3, 16  ;;  %1091 = vst [vmem:[#allocation2 + $0xc0] sm:$0xf] %v1090_v10  ;;  %10668 = vmatpush3.bf16.msra.mxu1 %v11572_v7  ;;  %v12825_v24 = vpack.c.bf16 %v514_v62, %v514_v62 }
  0xa0   : > { %1094 = vst [vmem:[#allocation2 + $0xc4] sm:$0x1] %v1093_v30  ;;  %v1741_v20 = vor.u32 %v1740_v9, %v1736_v55  ;;  %v9423_v21 = vcombine.low %v12820_v13, %v1218_v14  ;;  %v1250_v22 = vld [vmem:[#allocation2 + $0xb8] sm:$0xe]  ;;  %v818_v16 = vor.u32 %v816_v61, %v815_v8  ;;  %v1095_v56 = vld [vmem:[#allocation2 + $0xc8] sm:$0xf]  ;;  %10669 = vmatprep.subr.bf16.mxu1 %v11573_v31 }
  0xa1   : > { %v450_v23 = vld [vmem:[#allocation2 + $0xd4] sm:$0x1]  ;;  %4313 = vmatmul.mubr.bf16.gmra.mxu1 %v9671_v11  ;;  %v1747_v52 = vrot.slane %v1745_v18, 1  ;;  %v9455_v12 = vcombine.low %v1250_v22, %v1218_v14  ;;  %v1954_v25 = vrot.slane %v9454_v6, 1  ;;  %v1098_v26 = vld [vmem:[#allocation2 + $0xcc] sm:$0x1]  ;;  %v9678_v9 = vcombine.low %v12805_v49, %v12820_v13 }
  0xa2   : > { %v331_v63 = vld [vmem:[#allocation2 + $0xd8] sm:$0x1]  ;;  %v9670_v15 = vcombine.low %v1734_v0, %v1741_v20  ;;  %v1750_v27 = vshrl.u32 %v9423_v21, 16  ;;  %v1752_v28 = vshll.u32 %v9423_v21, 16  ;;  %v819_v29 = vrot.slane %v815_v8, 4  ;;  %v11576_v46 = vld [vmem:[%s16689_s1 + $0x140] sm:$0xff]  }
  0xa3   : > { %v453_v2 = vld [vmem:[#allocation2 + $0xdc] sm:$0x1]  ;;  %v1748_v32 = vor.u32 %v1747_v52, %v1743_v17  ;;  %v1955_v59 = vrot.slane %v9455_v12, 1  ;;  %v1096_v37 = vsel %vm12409_vm6, %v818_v16, %v1095_v56  ;;  %v451_v33 = vsel %vm12393_vm4, 0, %v450_v23  ;;  %v1281_v36 = vld [vmem:[#allocation2 + $0xb8] sm:$0xf]  ;;  %10565 = vmatprep.subr.bf16.mxu0 %v11576_v46 }
  0xa4   : > { %4151 = vmatprep.mubr.bf16.mxu0 %v9670_v15  ;;  %v1754_v35 = vrot.slane %v1752_v28, 1  ;;  %1097 = vst [vmem:[#allocation2 + $0xc8] sm:$0xf] %v1096_v37  ;;  %v1099_v38 = vsel %vm12383_vm2, %v819_v29, %v1098_v26  ;;  %452 = vst [vmem:[#allocation2 + $0xd4] sm:$0x1] %v451_v33  ;;  %v821_v40 = vshrl.u32 %v12822_v19, 16 }
  0xa5   : > { %v824_v41 = vshll.u32 %v12822_v19, 16  ;;  %v334_v57 = vld [vmem:[#allocation2 + $0xe0] sm:$0x1]  ;;  %4152 = vmatmul.mubr.bf16.gmra.mxu0 %v9669_v45  ;;  %1100 = vst [vmem:[#allocation2 + $0xcc] sm:$0x1] %v1099_v38  ;;  %v332_v42 = vsel %vm12383_vm2, 0, %v331_v63  ;;  %v9680_v50 = vcombine.low %v1954_v25, %v1955_v59 }
  0xa6   : > { %v454_v43 = vsel %vm12393_vm4, 0, %v453_v2  ;;  %v829_v44 = vshrl.u32 %v12825_v24, 16  ;;  %v1755_v47 = vor.u32 %v1754_v35, %v1750_v27  ;;  %v1282_v48 = vld [vmem:[#allocation2 + $0xc0] sm:$0xf]  ;;  %v1101_v54 = vld [vmem:[#allocation2 + $0xd0] sm:$0xf] }
  0xa7   : > { %v12848_v53 = vld [vmem:[#allocation2 + $0xc0] sm:$0xf]  ;;  %333 = vst [vmem:[#allocation2 + $0xd8] sm:$0x1] %v332_v42  ;;  %455 = vst [vmem:[#allocation2 + $0xdc] sm:$0x1] %v454_v43  ;;  %v9681_v58 = vcombine.low %v1281_v36, %v1282_v48 }
  0xa8   : > { %v515_v55 = vld [vmem:[%s12380_s7 + $0xb8] sm:$0xff]  ;;  %v1219_v60 = vld [vmem:[#allocation2 + $0xc4] sm:$0x1]  ;;  %v823_v61 = vrot.slane %v821_v40, 7  ;;  %v1251_v62 = vld [vmem:[#allocation2 + $0xc0] sm:$0xe]  ;;  %v9679_v3 = vcombine.low %v1748_v32, %v1755_v47 }
  0xa9   : > { %v831_v0 = vrot.slane %v829_v44, 7  ;;  %v456_v1 = vld [vmem:[#allocation2 + $0xe4] sm:$0x1]  ;;  %v9424_v4 = vcombine.low %v12848_v53, %v1219_v60  ;;  %v9456_v5 = vcombine.low %v1251_v62, %v1219_v60  ;;  %v832_v6 = vshll.u32 %v12825_v24, 16  ;;  %4320 = vmatprep.mubr.bf16.mxu1 %v9681_v58  ;;  %v340_v16 = vld [vmem:[#allocation2 + $0xf0] sm:$0x1] }
  0xaa   : > { %v11577_v7 = vld [vmem:[%s16689_s1 + $0x1a0] sm:$0xff]   ;;  %v826_v10 = vor.u32 %v824_v41, %v823_v61  ;;  %v827_v30 = vrot.slane %v823_v61, 4  ;;  %v335_v8 = vsel %vm12383_vm2, 0, %v334_v57  ;;  %4159 = vmatprep.mubr.bf16.mxu0 %v9679_v3  ;;  %4321 = vmatmul.mubr.bf16.gmra.mxu1 %v9680_v50  ;;  %v10284_v22 = vpack.c.bf16 %v515_v55, %v515_v55  ;;  %v343_v56 = vld [vmem:[#allocation2 + $0xf8] sm:$0x1]  ;;  %v517_v55 = vld [vmem:[%s12380_s7 + $0xc8] sm:$0xff] }
  0xab   : > { %v11579_v11 = vld [vmem:[%s16689_s1 + $0x100] sm:$0xff]   ;;  %v1757_v14 = vshrl.u32 %v9424_v4, 16  ;;  %v1759_v17 = vshll.u32 %v9424_v4, 16  ;;  %v834_v18 = vor.u32 %v832_v6, %v831_v0  ;;  %v835_v19 = vrot.slane %v831_v0, 4  ;;  %336 = vst [vmem:[#allocation2 + $0xe0] sm:$0x1] %v335_v8  ;;  %10670 = vmatpush3.bf16.msra.mxu1 %v11577_v7 }
  0xac   : > { %v516_v20 = vld [vmem:[%s12380_s7 + $0xc0] sm:$0xff]  ;;  %v12864_v21 = vld [vmem:[#allocation2 + $0xc8] sm:$0xf]  ;;  %v1102_v49 = vsel %vm12409_vm6, %v826_v10, %v1101_v54  ;;  %v1104_v13 = vld [vmem:[#allocation2 + $0xd4] sm:$0x1]  ;;  %10566 = vmatpush3.bf16.msra.mxu0 %v11579_v11  ;;  %v12870_v12 = vrot.slane %v9456_v5, 1 }
  0xad   : > { %v462_v23 = vld [vmem:[#allocation2 + $0xf4] sm:$0x1]  ;;  %v1220_v24 = vld [vmem:[#allocation2 + $0xcc] sm:$0x1]  ;;  %v1761_v45 = vrot.slane %v1759_v17, 1  ;;  %v1105_v52 = vsel %vm12383_vm2, %v827_v30, %v1104_v13  ;;  %v457_v25 = vsel %vm12393_vm4, 0, %v456_v1  ;;  %4160 = vmatmul.mubr.bf16.gmra.mxu0 %v9678_v9  ;;  %v10285_v29 = vpack.c.bf16 %v516_v20, %v516_v20 }
  0xae   : > { %1103 = vst [vmem:[#allocation2 + $0xd0] sm:$0xf] %v1102_v49  ;;  %v465_v26 = vld [vmem:[#allocation2 + $0xfc] sm:$0x1]  ;;  %v9425_v63 = vcombine.low %v12864_v21, %v1220_v24  ;;  %1106 = vst [vmem:[#allocation2 + $0xd4] sm:$0x1] %v1105_v52  ;;  %v9687_v9 = vcombine.low %v12848_v53, %v12864_v21 }
  0xaf   : > { %v1252_v15 = vld [vmem:[#allocation2 + $0xc8] sm:$0xe]  ;;  %v1107_v27 = vld [vmem:[#allocation2 + $0xd8] sm:$0xf]  ;;  %v1110_v28 = vld [vmem:[#allocation2 + $0xdc] sm:$0x1]  ;;  %v1762_v2 = vor.u32 %v1761_v45, %v1757_v14 }
  0xb0   : > { %458 = vst [vmem:[#allocation2 + $0xe4] sm:$0x1] %v457_v25  ;;  %v9457_v31 = vcombine.low %v1252_v15, %v1220_v24  ;;  %v1108_v32 = vsel %vm12409_vm6, %v834_v18, %v1107_v27  ;;  %v1111_v59 = vsel %vm12383_vm2, %v835_v19, %v1110_v28  ;;  %v346_v37 = vld [vmem:[#allocation2 + $0x100] sm:$0x1]  ;;  %v468_v33 = vld [vmem:[#allocation2 + $0x104] sm:$0x1] }
  0xb1   : > { %v1764_v35 = vshrl.u32 %v9425_v63, 16  ;;  %v1766_v36 = vshll.u32 %v9425_v63, 16  ;;  %v12879_v38 = vld [vmem:[#allocation2 + $0xc8] sm:$0xf]  ;;  %1109 = vst [vmem:[#allocation2 + $0xd8] sm:$0xf] %v1108_v32 }
  0xb2   : > { %1112 = vst [vmem:[#allocation2 + $0xdc] sm:$0x1] %v1111_v59  ;;  %v837_v40 = vshrl.u32 %v10284_v22, 16  ;;  %v840_v41 = vshll.u32 %v10284_v22, 16  ;;  %v1957_v57 = vrot.slane %v9457_v31, 1  ;;  %v341_v42 = vsel %vm12383_vm2, 0, %v340_v16 }
  0xb3   : > { %v344_v43 = vsel %vm12383_vm2, 0, %v343_v56  ;;  %v463_v44 = vsel %vm12393_vm4, 0, %v462_v23  ;;  %v1768_v46 = vrot.slane %v1766_v36, 1  ;;  %v1113_v48 = vld [vmem:[#allocation2 + $0xe0] sm:$0xf]  ;;  %v466_v50 = vsel %vm12393_vm4, 0, %v465_v26 }
  0xb4   : > { %v839_v47 = vrot.slane %v837_v40, 7  ;;  %342 = vst [vmem:[#allocation2 + $0xf0] sm:$0x1] %v341_v42  ;;  %345 = vst [vmem:[#allocation2 + $0xf8] sm:$0x1] %v344_v43  ;;  %v845_v54 = vshrl.u32 %v10285_v29, 16  ;;  %v9689_v58 = vcombine.low %v12870_v12, %v1957_v57  ;;  %v10286_v22 = vpack.c.bf16 %v517_v55, %v517_v55 }
  0xb5   : > { %464 = vst [vmem:[#allocation2 + $0xf4] sm:$0x1] %v463_v44  ;;  %467 = vst [vmem:[#allocation2 + $0xfc] sm:$0x1] %v466_v50  ;;  %v848_v60 = vshll.u32 %v10285_v29, 16  ;;  %v347_v61 = vsel %vm12383_vm2, 0, %v346_v37  ;;  %v1769_v1 = vor.u32 %v1768_v46, %v1764_v35 }
  0xb6   : > { %v469_v62 = vsel %vm12393_vm4, 0, %v468_v33  ;;  %v11585_v0 = vld [vmem:[%s16689_s1 + $0x1d8] sm:$0xff]   ;;  %v12898_v3 = vld [vmem:[#allocation2 + $0xd0] sm:$0xf]  ;;  %v842_v5 = vor.u32 %v840_v41, %v839_v47  ;;  %v843_v6 = vrot.slane %v839_v47, 4  ;;  %v847_v7 = vrot.slane %v845_v54, 7 }
  0xb7   : > { %v12900_v4 = vld [vmem:[#allocation2 + $0xd0] sm:$0xf]  ;;  %348 = vst [vmem:[#allocation2 + $0x100] sm:$0x1] %v347_v61  ;;  %470 = vst [vmem:[#allocation2 + $0x104] sm:$0x1] %v469_v62  ;;  %v9690_v10 = vcombine.low %v12879_v38, %v12898_v3  ;;  %10671 = vmatprep.subr.bf16.mxu1 %v11585_v0  ;;  %v9688_v14 = vcombine.low %v1762_v2, %v1769_v1 }
  0xb8   : > { %v1221_v30 = vld [vmem:[#allocation2 + $0xd4] sm:$0x1]  ;;  %v1116_v8 = vld [vmem:[#allocation2 + $0xe4] sm:$0x1]  ;;  %v1114_v18 = vsel %vm12409_vm6, %v842_v5, %v1113_v48  ;;  %v1253_v19 = vld [vmem:[#allocation2 + $0xd0] sm:$0xe]  ;;  %v850_v13 = vor.u32 %v848_v60, %v847_v7 }
  0xb9   : > { %v518_v11 = vld [vmem:[%s12380_s7 + $0xd0] sm:$0xff]  ;;  %v9426_v17 = vcombine.low %v12900_v4, %v1221_v30  ;;  %4328 = vmatprep.mubr.bf16.mxu1 %v9690_v10  ;;  %v12910_v20 = vld [vmem:[#allocation2 + $0xd8] sm:$0xf]  ;;  %v1222_v49 = vld [vmem:[#allocation2 + $0xdc] sm:$0x1]  ;;  %v1117_v53 = vsel %vm12383_vm2, %v843_v6, %v1116_v8  ;;  %v9458_v21 = vcombine.low %v1253_v19, %v1221_v30  ;;  %4167 = vmatprep.mubr.bf16.mxu0 %v9688_v14  ;;  %v851_v12 = vrot.slane %v847_v7, 4 }
  0xba   : > { %1115 = vst [vmem:[#allocation2 + $0xe0] sm:$0xf] %v1114_v18  ;;  %4329 = vmatmul.mubr.bf16.gmra.mxu1 %v9689_v58  ;;  %v9427_v16 = vcombine.low %v12910_v20, %v1222_v49  ;;  %1118 = vst [vmem:[#allocation2 + $0xe4] sm:$0x1] %v1117_v53  ;;  %v1254_v24 = vld [vmem:[#allocation2 + $0xd8] sm:$0xe]  ;;  %4168 = vmatmul.mubr.bf16.gmra.mxu0 %v9687_v9  ;;  %v12919_v15 = vpack.c.bf16 %v518_v11, %v518_v11 }
  0xbb   : > { %v1771_v56 = vshrl.u32 %v9426_v17, 16  ;;  %v1773_v23 = vshll.u32 %v9426_v17, 16  ;;  %v9459_v45 = vcombine.low %v1254_v24, %v1222_v49  ;;  %v1958_v52 = vrot.slane %v9458_v21, 1  ;;  %v1119_v25 = vld [vmem:[#allocation2 + $0xf8] sm:$0xf]  ;;  %v11587_v40 = vld [vmem:[%s16689_s1 + $0x1d0] sm:$0xff]  }
  0xbc   : > { %v12915_v26 = vld [vmem:[#allocation2 + $0xf0] sm:$0xf]  ;;  %v1778_v28 = vshrl.u32 %v9427_v16, 16  ;;  %v1780_v29 = vshll.u32 %v9427_v16, 16  ;;  %v1120_v2 = vsel %vm12409_vm6, %v850_v13, %v1119_v25  ;;  %v1122_v31 = vld [vmem:[#allocation2 + $0xfc] sm:$0x1]  ;;  %v9696_v47 = vcombine.low %v12900_v4, %v12910_v20 }
  0xbd   : > { %v12917_v63 = vld [vmem:[#allocation2 + $0xf0] sm:$0xe]  ;;  %v1775_v27 = vrot.slane %v1773_v23, 1  ;;  %v11586_v32 = vld [vmem:[%s16689_s1 + $0x198] sm:$0xff]   ;;  %v1959_v59 = vrot.slane %v9459_v45, 1  ;;  %v1123_v37 = vsel %vm12383_vm2, %v851_v12, %v1122_v31  ;;  %v853_v35 = vshrl.u32 %v10286_v22, 16 }
  0xbe   : > { %1121 = vst [vmem:[#allocation2 + $0xf8] sm:$0xf] %v1120_v2  ;;  %v1223_v33 = vld [vmem:[#allocation2 + $0xf4] sm:$0x1]  ;;  %v856_v36 = vshll.u32 %v10286_v22, 16  ;;  %v1782_v57 = vrot.slane %v1780_v29, 1  ;;  %10672 = vmatpush3.bf16.msra.mxu1 %v11586_v32 }
  0xbf   : > { %v1776_v41 = vor.u32 %v1775_v27, %v1771_v56  ;;  %v12931_v42 = vld [vmem:[#allocation2 + $0xd8] sm:$0xf]  ;;  %1124 = vst [vmem:[#allocation2 + $0xfc] sm:$0x1] %v1123_v37  ;;  %v12934_v43 = vcombine.low %v12915_v26, %v1223_v33  ;;  %v1125_v44 = vld [vmem:[#allocation2 + $0x100] sm:$0xf]  ;;  %10673 = vmatprep.subr.bf16.mxu1 %v11587_v40  ;;  %v9698_v61 = vcombine.low %v1958_v52, %v1959_v59 }
  0xc0   : > { %v519_v46 = vld [vmem:[%s12380_s7 + $0xd8] sm:$0xff]  ;;  %v855_v48 = vrot.slane %v853_v35, 7  ;;  %v349_v50 = vld [vmem:[#allocation2 + $0x108] sm:$0x1]  ;;  %v471_v54 = vld [vmem:[#allocation2 + $0x10c] sm:$0x1]  ;;  %v1783_v58 = vor.u32 %v1782_v57, %v1778_v28  ;;  %v9460_v1 = vcombine.low %v12917_v63, %v1223_v33 }
  0xc1   : > { %v861_v55 = vshrl.u32 %v12919_v15, 16  ;;  %v1286_v60 = vld [vmem:[#allocation2 + $0xe0] sm:$0xf]  ;;  %v1787_v62 = vshll.u32 %v12934_v43, 16  ;;  %v1128_v0 = vld [vmem:[#allocation2 + $0x104] sm:$0x1]  ;;  %v10288_v11 = vpack.c.bf16 %v519_v46, %v519_v46 }
  0xc2   : > { %v11590_v5 = vld [vmem:[%s16689_s1 + $0x190] sm:$0xff]   ;;  %v9699_v4 = vcombine.low %v12931_v42, %v1286_v60  ;;  %v858_v6 = vor.u32 %v856_v36, %v855_v48  ;;  %v859_v7 = vrot.slane %v855_v48, 4  ;;  %v350_v9 = vsel %vm12383_vm2, 0, %v349_v50  ;;  %v520_v24 = vld [vmem:[%s12380_s7 + $0xe0] sm:$0xff]  ;;  %v12964_v27 = vld [vmem:[#allocation2 + $0xc] sm:$0x1] }
  0xc3   : > { %v9697_v10 = vcombine.low %v1776_v41, %v1783_v58  ;;  %351 = vst [vmem:[#allocation2 + $0x108] sm:$0x1] %v350_v9  ;;  %v472_v30 = vsel %vm12393_vm4, 0, %v471_v54  ;;  %v352_v8 = vld [vmem:[#allocation2 + $0x110] sm:$0x1]  ;;  %10674 = vmatpush3.bf16.msra.mxu1 %v11590_v5  ;;  %v863_v18 = vrot.slane %v861_v55, 7  ;;  %v10289_v33 = vpack.c.bf16 %v520_v24, %v520_v24 }
  0xc4   : > { %4336 = vmatprep.mubr.bf16.mxu1 %v9699_v4  ;;  %v1126_v14 = vsel %vm12409_vm6, %v858_v6, %v1125_v44  ;;  %v1129_v17 = vsel %vm12383_vm2, %v859_v7, %v1128_v0  ;;  %473 = vst [vmem:[#allocation2 + $0x10c] sm:$0x1] %v472_v30  ;;  %v864_v19 = vshll.u32 %v12919_v15, 16  ;;  %v474_v20 = vld [vmem:[#allocation2 + $0x114] sm:$0x1]  ;;  %v1785_v53 = vshrl.u32 %v12934_v43, 16 }
  0xc5   : > { %4175 = vmatprep.mubr.bf16.mxu0 %v9697_v10  ;;  %4337 = vmatmul.mubr.bf16.gmra.mxu1 %v9698_v61  ;;  %v12955_v49 = vld [vmem:[#allocation2 + $0xf8] sm:$0xf]  ;;  %1127 = vst [vmem:[#allocation2 + $0x100] sm:$0xf] %v1126_v14  ;;  %1130 = vst [vmem:[#allocation2 + $0x104] sm:$0x1] %v1129_v17 }
  0xc6   : > { %v1256_v21 = vld [vmem:[#allocation2 + $0xf8] sm:$0xe]  ;;  %4176 = vmatmul.mubr.bf16.gmra.mxu0 %v9696_v47  ;;  %v1224_v13 = vld [vmem:[#allocation2 + $0xfc] sm:$0x1]  ;;  %v1789_v22 = vrot.slane %v1787_v62, 1  ;;  %v1960_v16 = vrot.slane %v9460_v1, 1  ;;  %v866_v56 = vor.u32 %v864_v19, %v863_v18  ;;  %v9705_v4 = vcombine.low %v12915_v26, %v12955_v49 }
  0xc7   : > { %v353_v23 = vsel %vm12383_vm2, 0, %v352_v8  ;;  %v9429_v45 = vcombine.low %v12955_v49, %v1224_v13  ;;  %v9461_v52 = vcombine.low %v1256_v21, %v1224_v13  ;;  %v867_v12 = vrot.slane %v863_v18, 4  ;;  %v12966_v2 = vld [vmem:[#allocation2 + $0xf8] sm:$0xf]  ;;  %v11597_v43 = vld [vmem:[%s16689_s1 + $0x1c8] sm:$0xff]   ;;  %s10326_s30 = sshll.u32 %s12256_s22, 12 }
  0xc8   : > { %354 = vst [vmem:[#allocation2 + $0x110] sm:$0x1] %v353_v23  ;;  %v475_v25 = vsel %vm12393_vm4, 0, %v474_v20  ;;  %v869_v63 = vshrl.u32 %v10288_v11, 16  ;;  %v872_v15 = vshll.u32 %v10288_v11, 16  ;;  %v1790_v35 = vor.u32 %v1789_v22, %v1785_v53  ;;  %v521_v54 = vld [vmem:[%s12380_s7 + $0xe8] sm:$0xff]  ;;  %10675 = vmatprep.subr.bf16.mxu1 %v11597_v43  ;;  %s16640_s10 = scalar_lea.hbm %s16693_s5, %s10326_s30 }
  0xc9   : > { %476 = vst [vmem:[#allocation2 + $0x114] sm:$0x1] %v475_v25  ;;  %v1792_v28 = vshrl.u32 %v9429_v45, 16  ;;  %v1794_v29 = vshll.u32 %v9429_v45, 16  ;;  %v1961_v31 = vrot.slane %v9461_v52, 1  ;;  %v11598_v0 = vld [vmem:[%s16689_s1 + $0x188] sm:$0xff]   ;;  %v12995_v17 = vpack.c.bf16 %v521_v54, %v521_v54 }
  0xca   : > { %v1131_v32 = vld [vmem:[#allocation2 + $0x108] sm:$0xf]  ;;  %v871_v59 = vrot.slane %v869_v63, 7  ;;  %v355_v37 = vld [vmem:[#allocation2 + $0x118] sm:$0x1]  ;;  %v877_v10 = vshrl.u32 %v10289_v33, 16  ;;  %10676 = vmatpush3.bf16.msra.mxu1 %v11598_v0 }
  0xcb   : > { %v1796_v36 = vrot.slane %v1794_v29, 1  ;;  %v1132_v40 = vsel %vm12409_vm6, %v866_v56, %v1131_v32  ;;  %v1134_v41 = vld [vmem:[#allocation2 + $0x10c] sm:$0x1]  ;;  %v356_v57 = vsel %vm12383_vm2, 0, %v355_v37  ;;  %v9707_v46 = vcombine.low %v1960_v16, %v1961_v31  ;;  %v12033_v1 = vld [vmem:[#allocation2 + $0x8] sm:$0xf] }
  0xcc   : > { %v12975_v44 = vld [vmem:[#allocation2 + $0x100] sm:$0xf]  ;;  %1133 = vst [vmem:[#allocation2 + $0x108] sm:$0xf] %v1132_v40  ;;  %v1135_v47 = vsel %vm12383_vm2, %v867_v12, %v1134_v41  ;;  %v874_v50 = vor.u32 %v872_v15, %v871_v59  ;;  %357 = vst [vmem:[#allocation2 + $0x118] sm:$0x1] %v356_v57  ;;  %v12988_v5 = vcombine.low %v12033_v1, %v12964_v27 }
  0xcd   : > { %v12979_v48 = vld [vmem:[#allocation2 + $0x100] sm:$0xf]  ;;  %v1797_v55 = vor.u32 %v1796_v36, %v1792_v28  ;;  %v9708_v58 = vcombine.low %v12966_v2, %v12975_v44  ;;  %1136 = vst [vmem:[#allocation2 + $0x10c] sm:$0x1] %v1135_v47  ;;  %v1225_v60 = vld [vmem:[#allocation2 + $0x104] sm:$0x1] }
  0xce   : > { %v875_v61 = vrot.slane %v871_v59, 4  ;;  %v1257_v62 = vld [vmem:[#allocation2 + $0x100] sm:$0xe]  ;;  %v9430_v6 = vcombine.low %v12979_v48, %v1225_v60  ;;  %v477_v9 = vld [vmem:[#allocation2 + $0x11c] sm:$0x1]  ;;  %v880_v14 = vshll.u32 %v10289_v33, 16 }
  0xcf   : > { %v1137_v7 = vld [vmem:[#allocation2 + $0x110] sm:$0xf]  ;;  %v9706_v30 = vcombine.low %v1790_v35, %v1797_v55  ;;  %4344 = vmatprep.mubr.bf16.mxu1 %v9708_v58  ;;  %v9462_v19 = vcombine.low %v1257_v62, %v1225_v60  ;;  %v11599_v20 = vld [vmem:[%s16689_s1 + $0x1c0] sm:$0xff]   ;;  %v13002_v49 = vld [vmem:[#allocation2 + $0x14] sm:$0x1]  ;;  %v478_v53 = vsel %vm12393_vm4, 0, %v477_v9 }
  0xd0   : > { %v1138_v8 = vsel %vm12409_vm6, %v874_v50, %v1137_v7  ;;  %v1140_v11 = vld [vmem:[#allocation2 + $0x114] sm:$0x1]  ;;  %4345 = vmatmul.mubr.bf16.gmra.mxu1 %v9707_v46  ;;  %v1801_v18 = vshll.u32 %v9430_v6, 16  ;;  %v879_v21 = vrot.slane %v877_v10, 7  ;;  %v2131_v13 = vshll.u32 %v12988_v5, 16  ;;  %10677 = vmatprep.subr.bf16.mxu1 %v11599_v20  ;;  %v523_v10 = vld [vmem:[%s12380_s7 + $0xf8] sm:$0xff] }
  0xd1   : > { %1139 = vst [vmem:[#allocation2 + $0x110] sm:$0xf] %v1138_v8  ;;  %v1141_v26 = vsel %vm12383_vm2, %v875_v61, %v1140_v11  ;;  %4183 = vmatprep.mubr.bf16.mxu0 %v9706_v30  ;;  %479 = vst [vmem:[#allocation2 + $0x11c] sm:$0x1] %v478_v53  ;;  %v1799_v16 = vshrl.u32 %v9430_v6, 16  ;;  %v885_v24 = vshrl.u32 %v12995_v17, 16 }
  0xd2   : > { %1142 = vst [vmem:[#allocation2 + $0x114] sm:$0x1] %v1141_v26  ;;  %4184 = vmatmul.mubr.bf16.gmra.mxu0 %v9705_v4  ;;  %v882_v23 = vor.u32 %v880_v14, %v879_v21  ;;  %v12034_v45 = vld [vmem:[#allocation2 + $0x10] sm:$0xf]  ;;  %v1803_v25 = vrot.slane %v1801_v18, 1  ;;  %v1962_v15 = vrot.slane %v9462_v19, 1 }
  0xd3   : > { %v13007_v22 = vld [vmem:[#allocation2 + $0x108] sm:$0xf]  ;;  %v13011_v52 = vcombine.low %v12034_v45, %v13002_v49  ;;  %v1143_v31 = vld [vmem:[#allocation2 + $0x118] sm:$0xf]  ;;  %v358_v32 = vld [vmem:[#allocation2 + $0x120] sm:$0x1] }
  0xd4   : > { %v1258_v56 = vld [vmem:[#allocation2 + $0x108] sm:$0xe]  ;;  %v1226_v12 = vld [vmem:[#allocation2 + $0x10c] sm:$0x1]  ;;  %v883_v59 = vrot.slane %v879_v21, 4  ;;  %v1144_v37 = vsel %vm12409_vm6, %v882_v23, %v1143_v31  ;;  %v359_v33 = vsel %vm12383_vm2, 0, %v358_v32  ;;  %v1804_v61 = vor.u32 %v1803_v25, %v1799_v16 }
  0xd5   : > { %v13013_v63 = vld [vmem:[#allocation2 + $0x108] sm:$0xf]  ;;  %v9431_v28 = vcombine.low %v13007_v22, %v1226_v12  ;;  %v9463_v29 = vcombine.low %v1258_v56, %v1226_v12  ;;  %v480_v35 = vld [vmem:[#allocation2 + $0x124] sm:$0x1]  ;;  %1145 = vst [vmem:[#allocation2 + $0x118] sm:$0xf] %v1144_v37  ;;  %v9714_v26 = vcombine.low %v12979_v48, %v13007_v22  ;;  %v13049_v16 = vpack.c.bf16 %v523_v10, %v523_v10 }
  0xd6   : > { %360 = vst [vmem:[#allocation2 + $0x120] sm:$0x1] %v359_v33  ;;  %v13022_v57 = vrot.slane %v885_v24, 7  ;;  %v888_v43 = vshll.u32 %v12995_v17, 16  ;;  %v2138_v46 = vshll.u32 %v13011_v52, 16  ;;  %v481_v55 = vsel %vm12393_vm4, 0, %v480_v35 }
  0xd7   : > { %v1806_v36 = vshrl.u32 %v9431_v28, 16  ;;  %v1808_v40 = vshll.u32 %v9431_v28, 16  ;;  %v1963_v50 = vrot.slane %v9463_v29, 1  ;;  %v522_v58 = vld [vmem:[%s12380_s7 + $0xf0] sm:$0xff]  ;;  %v2129_v60 = vshrl.u32 %v12988_v5, 16  ;;  %v11602_v56 = vld [vmem:[%s16689_s1 + $0x180] sm:$0xff]  }
  0xd8   : > { %v13020_v41 = vld [vmem:[#allocation2 + $0x110] sm:$0xf]  ;;  %v1146_v0 = vld [vmem:[#allocation2 + $0x11c] sm:$0x1]  ;;  %482 = vst [vmem:[#allocation2 + $0x124] sm:$0x1] %v481_v55  ;;  %v890_v5 = vor.u32 %v888_v43, %v13022_v57  ;;  %v10291_v14 = vpack.c.bf16 %v522_v58, %v522_v58  ;;  %10678 = vmatpush3.bf16.msra.mxu1 %v11602_v56 }
  0xd9   : > { %v9717_v47 = vcombine.low %v13013_v63, %v13020_v41  ;;  %v13028_v54 = vld [vmem:[#allocation2 + $0x110] sm:$0xf]  ;;  %v1810_v62 = vrot.slane %v1808_v40, 1  ;;  %v1227_v1 = vld [vmem:[#allocation2 + $0x114] sm:$0x1]  ;;  %v2133_v4 = vrot.slane %v2131_v13, 1  ;;  %v9716_v6 = vcombine.low %v1962_v15, %v1963_v50 }
  0xda   : > { %v1147_v7 = vsel %vm12383_vm2, %v883_v59, %v1146_v0  ;;  %v13037_v9 = vcombine.low %v13028_v54, %v1227_v1  ;;  %v13040_v30 = vld [vmem:[#allocation2 + $0x1c] sm:$0x1]  ;;  %v1259_v11 = vld [vmem:[#allocation2 + $0x110] sm:$0xe]  ;;  %v2136_v17 = vshrl.u32 %v13011_v52, 16  ;;  %v2140_v18 = vrot.slane %v2138_v46, 1 }
  0xdb   : > { %4352 = vmatprep.mubr.bf16.mxu1 %v9717_v47  ;;  %v1811_v8 = vor.u32 %v1810_v62, %v1806_v36  ;;  %1148 = vst [vmem:[#allocation2 + $0x11c] sm:$0x1] %v1147_v7  ;;  %v361_v19 = vld [vmem:[#allocation2 + $0x128] sm:$0x1]  ;;  %v891_v53 = vrot.slane %v13022_v57, 4  ;;  %v9464_v45 = vcombine.low %v1259_v11, %v1227_v1  ;;  %v893_v29 = vshrl.u32 %v10291_v14, 16 }
  0xdc   : > { %4353 = vmatmul.mubr.bf16.gmra.mxu1 %v9716_v6  ;;  %v362_v21 = vsel %vm12383_vm2, 0, %v361_v19  ;;  %v483_v13 = vld [vmem:[#allocation2 + $0x12c] sm:$0x1]  ;;  %v13054_v23 = vld [vmem:[#allocation2 + $0x24] sm:$0x1]  ;;  %v1813_v24 = vshrl.u32 %v13037_v9, 16  ;;  %v13064_v32 = vor.u32 %v2133_v4, %v2129_v60  ;;  %v13069_v36 = vor.u32 %v2140_v18, %v2136_v17 }
  0xdd   : > { %v9715_v20 = vcombine.low %v1804_v61, %v1811_v8  ;;  %v1815_v48 = vshll.u32 %v13037_v9, 16  ;;  %v1149_v22 = vld [vmem:[#allocation2 + $0x120] sm:$0xf]  ;;  %363 = vst [vmem:[#allocation2 + $0x128] sm:$0x1] %v362_v21  ;;  %v484_v52 = vsel %vm12393_vm4, 0, %v483_v13 }
  0xde   : > { %v1319_v12 = vld [vmem:[#allocation2 + $0xfc] sm:$0x1]  ;;  %v13060_v25 = vld [vmem:[#allocation2 + $0x118] sm:$0xf]  ;;  %v1150_v15 = vsel %vm12409_vm6, %v890_v5, %v1149_v22  ;;  %485 = vst [vmem:[#allocation2 + $0x12c] sm:$0x1] %v484_v52 }
  0xdf   : > { %4191 = vmatprep.mubr.bf16.mxu0 %v9715_v20  ;;  %v1260_v28 = vld [vmem:[#allocation2 + $0x118] sm:$0xe]  ;;  %v896_v31 = vshll.u32 %v10291_v14, 16  ;;  %v1320_v33 = vld [vmem:[#allocation2 + $0x104] sm:$0x1]  ;;  %v895_v43 = vrot.slane %v893_v29, 7  ;;  %v13089_v10 = vcombine.low %v12966_v2, %v1319_v12 }
  0xe0   : > { %v12035_v59 = vld [vmem:[#allocation2 + $0x18] sm:$0xf]  ;;  %4192 = vmatmul.mubr.bf16.gmra.mxu0 %v9714_v26  ;;  %1151 = vst [vmem:[#allocation2 + $0x120] sm:$0xf] %v1150_v15  ;;  %v1152_v35 = vld [vmem:[#allocation2 + $0x124] sm:$0x1]  ;;  %v13104_v2 = vcombine.low %v12975_v44, %v1320_v33 }
  0xe1   : > { %v13067_v37 = vcombine.low %v12035_v59, %v13040_v30  ;;  %v13071_v40 = vld [vmem:[#allocation2 + $0x2c] sm:$0x1]  ;;  %v1153_v57 = vsel %vm12383_vm2, %v891_v53, %v1152_v35  ;;  %v364_v46 = vld [vmem:[#allocation2 + $0x130] sm:$0x1]  ;;  %v486_v47 = vld [vmem:[#allocation2 + $0x134] sm:$0x1]  ;;  %v898_v9 = vor.u32 %v896_v31, %v895_v43 }
  0xe2   : > { %v901_v50 = vshrl.u32 %v13049_v16, 16  ;;  %v1228_v55 = vld [vmem:[#allocation2 + $0x11c] sm:$0x1]  ;;  %v1817_v58 = vrot.slane %v1815_v48, 1  ;;  %1154 = vst [vmem:[#allocation2 + $0x124] sm:$0x1] %v1153_v57 }
  0xe3   : > { %v13076_v60 = vrot.slane %v9464_v45, 1  ;;  %v365_v61 = vsel %vm12383_vm2, 0, %v364_v46  ;;  %v487_v62 = vsel %vm12393_vm4, 0, %v486_v47  ;;  %v12036_v0 = vld [vmem:[#allocation2 + $0x20] sm:$0xf]  ;;  %v9433_v6 = vcombine.low %v13060_v25, %v1228_v55  ;;  %16809 = vst [vmem:[#allocation9_spill] sm:$0xff] %v13089_v10 }
  0xe4   : > { %v13083_v1 = vcombine.low %v12036_v0, %v13054_v23  ;;  %v13085_v4 = vld [vmem:[#allocation2 + $0x34] sm:$0x1]  ;;  %v9465_v7 = vcombine.low %v1260_v28, %v1228_v55  ;;  %366 = vst [vmem:[#allocation2 + $0x130] sm:$0x1] %v365_v61  ;;  %488 = vst [vmem:[#allocation2 + $0x134] sm:$0x1] %v487_v62  ;;  %v1818_v22 = vor.u32 %v1817_v58, %v1813_v24 }
  0xe5   : > { %v1321_v8 = vld [vmem:[#allocation2 + $0x10c] sm:$0x1]  ;;  %v899_v5 = vrot.slane %v895_v43, 4  ;;  %v903_v11 = vrot.slane %v901_v50, 7  ;;  %v904_v14 = vshll.u32 %v13049_v16, 16  ;;  %v13095_v17 = vld [vmem:[%s16689_s1 + $0x238] sm:$0xff]  }
  0xe6   : > { %v13099_v26 = vld [vmem:[#allocation2 + $0x3c] sm:$0x1]  ;;  %v13101_v19 = vld [vmem:[#allocation2 + $0x44] sm:$0x1]  ;;  %16810 = vst [vmem:[#allocation10_spill] sm:$0xff] %v13104_v2  ;;  %v1820_v20 = vshrl.u32 %v9433_v6, 16  ;;  %11271 = vmatprep.subr.bf16.mxu0 %v13095_v17  ;;  %v13142_v0 = vcombine.low %v13013_v63, %v1321_v8  ;;  %v9723_v63 = vcombine.low %v13028_v54, %v13060_v25 }
  0xe7   : > { %v1822_v53 = vshll.u32 %v9433_v6, 16  ;;  %v13106_v21 = vld [vmem:[#allocation2 + $0x118] sm:$0xf]  ;;  %v1155_v13 = vld [vmem:[#allocation2 + $0x128] sm:$0xf]  ;;  %v1965_v45 = vrot.slane %v9465_v7, 1  ;;  %v906_v59 = vor.u32 %v904_v14, %v903_v11 }
  0xe8   : > { %v12037_v16 = vld [vmem:[#allocation2 + $0x28] sm:$0xf]  ;;  %v13111_v48 = vld [vmem:[#allocation2 + $0x5c] sm:$0x1]  ;;  %v1156_v52 = vsel %vm12409_vm6, %v898_v9, %v1155_v13  ;;  %v1158_v12 = vld [vmem:[#allocation2 + $0x12c] sm:$0x1] }
  0xe9   : > { %v13109_v56 = vcombine.low %v12037_v16, %v13071_v40  ;;  %v13116_v44 = vld [vmem:[#allocation2 + $0x64] sm:$0x1]  ;;  %v1824_v15 = vrot.slane %v1822_v53, 1  ;;  %v13118_v28 = vld [vmem:[#allocation2 + $0x120] sm:$0xf]  ;;  %v1159_v29 = vsel %vm12383_vm2, %v899_v5, %v1158_v12  ;;  %v907_v24 = vrot.slane %v903_v11, 4 }
  0xea   : > { %16811 = vst [vmem:[#allocation11_spill] sm:$0xff] %v13118_v28  ;;  %1157 = vst [vmem:[#allocation2 + $0x128] sm:$0xf] %v1156_v52  ;;  %v13122_v31 = vld [vmem:[#allocation2 + $0x120] sm:$0xf]  ;;  %v2299_v43 = vshll.u32 %v13089_v10, 16  ;;  %v9726_v46 = vcombine.low %v13106_v21, %v13118_v28  ;;  %v9725_v47 = vcombine.low %v13076_v60, %v1965_v45 }
  0xeb   : > { %v12038_v33 = vld [vmem:[#allocation2 + $0x30] sm:$0xf]  ;;  %v13127_v57 = vld [vmem:[#allocation2 + $0x6c] sm:$0x1]  ;;  %1160 = vst [vmem:[#allocation2 + $0x12c] sm:$0x1] %v1159_v29  ;;  %v1825_v6 = vor.u32 %v1824_v15, %v1820_v20 }
  0xec   : > { %v13125_v35 = vcombine.low %v12038_v33, %v13085_v4  ;;  %v13133_v50 = vld [vmem:[#allocation2 + $0x74] sm:$0x1]  ;;  %v13135_v55 = vld [vmem:[#allocation2 + $0x7c] sm:$0x1]  ;;  %v13137_v58 = vld [vmem:[#allocation2 + $0x84] sm:$0x1]  ;;  %4360 = vmatprep.mubr.bf16.mxu1 %v9726_v46 }
  0xed   : > { %16812 = vst [vmem:[#allocation12_spill] sm:$0xff] %v13135_v55  ;;  %16813 = vst [vmem:[#allocation13_spill] sm:$0xff] %v13137_v58  ;;  %v2306_v62 = vshll.u32 %v13104_v2, 16  ;;  %v13144_v7 = vld [vmem:[#allocation2 + $0x124] sm:$0x1]  ;;  %v9724_v15 = vcombine.low %v1818_v22, %v1825_v6  ;;  %4361 = vmatmul.mubr.bf16.gmra.mxu1 %v9725_v47  ;;  %v13179_v61 = vrot.slane %v2299_v43, 1 }
  0xee   : > { %16814 = vst [vmem:[#allocation14_spill] sm:$0xff] %v13142_v0  ;;  %v13146_v9 = vld [vmem:[#allocation2 + $0x120] sm:$0xe]  ;;  %v12039_v60 = vld [vmem:[#allocation2 + $0x38] sm:$0xf]  ;;  %v13164_v8 = vcombine.low %v13122_v31, %v13144_v7  ;;  %s9302_s6 = sshll.u32 %s16476_s26, 4  ;;  %s16642_s6 = int_to_ptr.vmem [resolvable:$true] %s9302_s6 }
  0xef   : > { %v13149_v5 = vcombine.low %v12039_v60, %v13099_v26  ;;  %v12040_v11 = vld [vmem:[#allocation2 + $0x40] sm:$0xf]  ;;  %v13154_v53 = vld [vmem:[#allocation2 + $0x8c] sm:$0x1]  ;;  %v13156_v13 = vld [vmem:[#allocation2 + $0x94] sm:$0x1]  ;;  %4199 = vmatprep.mubr.bf16.mxu0 %v9724_v15 }
  0xf0   : > { %v13152_v14 = vcombine.low %v12040_v11, %v13101_v19  ;;  %16815 = vst [vmem:[#allocation15_spill] sm:$0xff] %v13154_v53  ;;  %16816 = vst [vmem:[#allocation16_spill] sm:$0xff] %v13156_v13  ;;  %v13158_v16 = vld [vmem:[#allocation2 + $0xac] sm:$0x1]  ;;  %v1161_v20 = vld [vmem:[#allocation2 + $0x130] sm:$0xf]  ;;  %4200 = vmatmul.mubr.bf16.gmra.mxu0 %v9723_v63 }
  0xf1   : > { %16817 = vst [vmem:[#allocation17_spill] sm:$0xff] %v13158_v16  ;;  %v1164_v45 = vld [vmem:[#allocation2 + $0x134] sm:$0x1]  ;;  %v12041_v52 = vld [vmem:[#allocation2 + $0x58] sm:$0xf]  ;;  %v1162_v29 = vsel %vm12409_vm6, %v906_v59, %v1161_v20  ;;  %16818 = vst [vmem:[#allocation18_spill] sm:$0xff] %v13179_v61  ;;  %v9466_v20 = vcombine.low %v13146_v9, %v13144_v7 }
  0xf2   : > { %v13167_v12 = vcombine.low %v12041_v52, %v13111_v48  ;;  %v1165_v33 = vsel %vm12383_vm2, %v907_v24, %v1164_v45  ;;  %v1327_v54 = vld [vmem:[#allocation2 + $0x8] sm:$0xe]  ;;  %v12042_v25 = vld [vmem:[#allocation2 + $0x60] sm:$0xf]  ;;  %v1829_v22 = vshll.u32 %v13164_v8, 16  ;;  %v13183_v6 = vrot.slane %v2306_v62, 1 }
  0xf3   : > { %v13174_v46 = vcombine.low %v12042_v25, %v13116_v44  ;;  %v12043_v60 = vld [vmem:[#allocation2 + $0x68] sm:$0xf]  ;;  %1163 = vst [vmem:[#allocation2 + $0x130] sm:$0xf] %v1162_v29  ;;  %1166 = vst [vmem:[#allocation2 + $0x134] sm:$0x1] %v1165_v33  ;;  %v9500_v15 = vcombine.low %v1327_v54, %v12964_v27 }
  0xf4   : > { %v13177_v11 = vcombine.low %v12043_v60, %v13127_v57  ;;  %v1328_v47 = vld [vmem:[#allocation2 + $0x10] sm:$0xe]  ;;  %16819 = vst [vmem:[#allocation19_spill] sm:$0xff] %v13183_v6  ;;  %v2313_v24 = vshll.u32 %v13142_v0, 16  ;;  %v12045_v43 = vld [vmem:[#allocation2 + $0x78] sm:$0xf] }
  0xf5   : > { %v12044_v45 = vld [vmem:[#allocation2 + $0x70] sm:$0xf]  ;;  %v13192_v25 = vcombine.low %v12045_v43, %v13135_v55  ;;  %v12046_v29 = vld [vmem:[#allocation2 + $0x80] sm:$0xf]  ;;  %v13197_v62 = vld [vmem:[#allocation2 + $0xb4] sm:$0x1]  ;;  %v9501_v27 = vcombine.low %v1328_v47, %v13002_v49 }
  0xf6   : > { %v13189_v52 = vcombine.low %v12044_v45, %v13133_v50  ;;  %v13195_v33 = vcombine.low %v12046_v29, %v13137_v58  ;;  %v13199_v60 = vld [vmem:[#allocation2 + $0x128] sm:$0xf]  ;;  %v13202_v7 = vld [vmem:[#allocation2 + $0x10] sm:$0xf]  ;;  %v13204_v9 = vld [vmem:[#allocation2 + $0x18] sm:$0xf] }
  0xf7   : > { %16821 = vst [vmem:[#allocation21_spill] sm:$0xff] %v13192_v25  ;;  %v12047_v45 = vld [vmem:[#allocation2 + $0x88] sm:$0xf]  ;;  %v12048_v43 = vld [vmem:[#allocation2 + $0x90] sm:$0xf]  ;;  %v1827_v61 = vshrl.u32 %v13164_v8, 16 }
  0xf8   : > { %16820 = vst [vmem:[#allocation20_spill] sm:$0xff] %v13189_v52  ;;  %16822 = vst [vmem:[#allocation22_spill] sm:$0xff] %v13195_v33  ;;  %v13207_v59 = vcombine.low %v12047_v45, %v13154_v53  ;;  %v13210_v18 = vcombine.low %v12048_v43, %v13156_v13  ;;  %v12049_v29 = vld [vmem:[#allocation2 + $0xa8] sm:$0xf]  ;;  %v1322_v63 = vld [vmem:[#allocation2 + $0x114] sm:$0x1] }
  0xf9   : > { %v13213_v51 = vcombine.low %v12049_v29, %v13158_v16  ;;  %v1230_v6 = vld [vmem:[#allocation2 + $0x12c] sm:$0x1]  ;;  %v1262_v2 = vld [vmem:[#allocation2 + $0x128] sm:$0xe]  ;;  %v1831_v10 = vrot.slane %v1829_v22, 1  ;;  %v1966_v13 = vrot.slane %v9466_v20, 1  ;;  %v13229_v22 = vcombine.low %v13020_v41, %v1322_v63 }
  0xfa   : > { %16823 = vst [vmem:[#allocation23_spill] sm:$0xff] %v13207_v59  ;;  %16824 = vst [vmem:[#allocation24_spill] sm:$0xff] %v13210_v18  ;;  %v9435_v54 = vcombine.low %v13199_v60, %v1230_v6  ;;  %v9467_v45 = vcombine.low %v1262_v2, %v1230_v6  ;;  %v1392_v28 = vld [vmem:[#allocation2 + $0x14] sm:$0x1]  ;;  %v1393_v53 = vld [vmem:[#allocation2 + $0x1c] sm:$0x1]  ;;  %v9732_v41 = vcombine.low %v13122_v31, %v13199_v60 }
  0xfb   : > { %16825 = vst [vmem:[#allocation25_spill] sm:$0xff] %v13213_v51  ;;  %v1293_v18 = vld [vmem:[#allocation2 + $0x128] sm:$0xf]  ;;  %v9532_v29 = vcombine.low %v13202_v7, %v1392_v28  ;;  %v9533_v51 = vcombine.low %v13204_v9, %v1393_v53  ;;  %v13221_v16 = vld [vmem:[#allocation2 + $0xbc] sm:$0x1]  ;;  %v13223_v59 = vrot.slane %v2313_v24, 1  ;;  %v1832_v0 = vor.u32 %v1831_v10, %v1827_v61 }
  0xfc   : > { %v1834_v49 = vshrl.u32 %v9435_v54, 16  ;;  %v1836_v47 = vshll.u32 %v9435_v54, 16  ;;  %v2448_v33 = vrot.slane %v9500_v15, 1  ;;  %v12050_v8 = vld [vmem:[#allocation2 + $0xb0] sm:$0xf]  ;;  %16828 = vst [vmem:[#allocation28_spill] sm:$0xff] %v13229_v22 }
  0xfd   : > { %16826 = vst [vmem:[#allocation26_spill] sm:$0xff] %v13223_v59  ;;  %v13226_v2 = vcombine.low %v12050_v8, %v13197_v62  ;;  %v1294_v6 = vld [vmem:[#allocation2 + $0x130] sm:$0xf]  ;;  %v1967_v20 = vrot.slane %v9467_v45, 1  ;;  %v2449_v43 = vrot.slane %v9501_v27, 1  ;;  %v2641_v58 = vshrl.u32 %v9532_v29, 16 }
  0xfe   : > { %v1329_v28 = vld [vmem:[#allocation2 + $0x18] sm:$0xe]  ;;  %v1838_v53 = vrot.slane %v1836_v47, 1  ;;  %v9735_v25 = vcombine.low %v1293_v18, %v1294_v6  ;;  %v1330_v24 = vld [vmem:[#allocation2 + $0x20] sm:$0xe]  ;;  %v2643_v55 = vshll.u32 %v9532_v29, 16 }
  0xff   : > { %16827 = vst [vmem:[#allocation27_spill] sm:$0xff] %v13226_v2  ;;  %v9734_v59 = vcombine.low %v1966_v13, %v1967_v20  ;;  %v2648_v54 = vshrl.u32 %v9533_v51, 16  ;;  %v2650_v15 = vshll.u32 %v9533_v51, 16  ;;  %v12051_v52 = vld [vmem:[#allocation2 + $0xb8] sm:$0xf]  ;;  %v9502_v63 = vcombine.low %v1329_v28, %v13040_v30  ;;  %s16648_s22 = scalar_lea.sflag [#allocation4], %s218_s23 }
 0x100   : > { %v13232_v8 = vcombine.low %v12051_v52, %v13221_v16  ;;  %v1839_v2 = vor.u32 %v1838_v53, %v1834_v49  ;;  %4368 = vmatprep.mubr.bf16.mxu1 %v9735_v25  ;;  %v13237_v10 = vld [vmem:[#allocation2 + $0x20] sm:$0xf]  ;;  %v13239_v18 = vld [vmem:[#allocation2 + $0x28] sm:$0xf]  ;;  %v1394_v61 = vld [vmem:[#allocation2 + $0x24] sm:$0x1]  ;;  %v9503_v51 = vcombine.low %v1330_v24, %v13054_v23  ;;  %v9602_v25 = vcombine.low %v2448_v33, %v2449_v43 }
 0x101   : > { %4369 = vmatmul.mubr.bf16.gmra.mxu1 %v9734_v59  ;;  %v2645_v13 = vrot.slane %v2643_v55, 1  ;;  %v2652_v27 = vrot.slane %v2650_v15, 1  ;;  %v2145_v52 = vshll.u32 %v13067_v37, 16  ;;  %v1395_v45 = vld [vmem:[#allocation2 + $0x2c] sm:$0x1]  ;;  %v2320_v31 = vshll.u32 %v13229_v22, 16 }
 0x102   : > { %v13243_v29 = vld [vmem:[#allocation2 + $0xc4] sm:$0x1]  ;;  %v13245_v49 = vld [vmem:[#allocation2 + $0xcc] sm:$0x1]  ;;  %v9733_v30 = vcombine.low %v1832_v0, %v1839_v2  ;;  %v2152_v60 = vshll.u32 %v13083_v1, 16  ;;  %v2143_v55 = vshrl.u32 %v13067_v37, 16  ;;  %v9534_v24 = vcombine.low %v13237_v10, %v1394_v61 }
 0x103   : > { %16829 = vst [vmem:[#allocation29_spill] sm:$0xff] %v13245_v49  ;;  %v2646_v47 = vor.u32 %v2645_v13, %v2641_v58  ;;  %v2653_v6 = vor.u32 %v2652_v27, %v2648_v54  ;;  %v2150_v59 = vshrl.u32 %v13083_v1, 16  ;;  %v13251_v23 = vld [vmem:[#allocation2 + $0xd4] sm:$0x1]  ;;  %v13253_v20 = vld [vmem:[#allocation2 + $0xdc] sm:$0x1]  ;;  %v9535_v0 = vcombine.low %v13239_v18, %v1395_v45 }
 0x104   : > { %16830 = vst [vmem:[#allocation30_spill] sm:$0xff] %v13251_v23  ;;  %16831 = vst [vmem:[#allocation31_spill] sm:$0xff] %v13253_v20  ;;  %4207 = vmatprep.mubr.bf16.mxu0 %v9733_v30  ;;  %v2147_v28 = vrot.slane %v2145_v52, 1  ;;  %v2154_v53 = vrot.slane %v2152_v60, 1  ;;  %v1323_v33 = vld [vmem:[#allocation2 + $0x11c] sm:$0x1]  ;;  %v9603_v58 = vcombine.low %v13202_v7, %v13204_v9  ;;  %v13264_v15 = vcombine.low %v12879_v38, %v13245_v49 }
 0x105   : > { %4208 = vmatmul.mubr.bf16.gmra.mxu0 %v9732_v41  ;;  %v9604_v43 = vcombine.low %v2646_v47, %v2653_v6  ;;  %v2450_v37 = vrot.slane %v9502_v63, 1  ;;  %v2451_v2 = vrot.slane %v9503_v51, 1  ;;  %v12052_v1 = vld [vmem:[#allocation2 + $0xc0] sm:$0xf]  ;;  %v2655_v61 = vshrl.u32 %v9534_v24, 16  ;;  %s12139_s11 = scalar_lea.vmem %s16642_s6, 4096 }
 0x106   : > { %v13260_v54 = vcombine.low %v12052_v1, %v13243_v29  ;;  %16832 = vst [vmem:[#allocation32_spill] sm:$0xff] %v13264_v15  ;;  %4409 = vmatprep.mubr.bf16.mxu0 %v9602_v25  ;;  %v2657_v13 = vshll.u32 %v9534_v24, 16  ;;  %v1331_v27 = vld [vmem:[#allocation2 + $0x28] sm:$0xe]  ;;  %v1332_v52 = vld [vmem:[#allocation2 + $0x30] sm:$0xe]  ;;  %v13268_v41 = vcombine.low %v12898_v3, %v13251_v23  ;;  %v13272_v7 = vcombine.low %v12931_v42, %v13253_v20  ;;  %p12140_p11 = scmp.ne.s32.totalorder %s16642_s6, %s12139_s11 }
 0x107   : > { %4570 = vmatprep.mubr.bf16.mxu1 %v9604_v43  ;;  %v2662_v9 = vshrl.u32 %v9535_v0, 16  ;;  %v2664_v63 = vshll.u32 %v9535_v0, 16  ;;  %v13274_v51 = vld [vmem:[#allocation2 + $0x30] sm:$0xf]  ;;  %v1396_v38 = vld [vmem:[#allocation2 + $0x34] sm:$0x1]  ;;  %v13277_v30 = vor.u32 %v2147_v28, %v2143_v55  ;;  %v13279_v25 = vor.u32 %v2154_v53, %v2150_v59 }
 0x108   : > { %16833 = vst [vmem:[#allocation33_spill] sm:$0xff] %v13268_v41  ;;  %16834 = vst [vmem:[#allocation34_spill] sm:$0xff] %v13272_v7  ;;  %v2659_v60 = vrot.slane %v2657_v13, 1  ;;  %v13281_v47 = vld [vmem:[#allocation2 + $0x38] sm:$0xf]  ;;  %v13283_v6 = vrot.slane %v2320_v31, 1  ;;  %v13286_v42 = vcombine.low %v13106_v21, %v1323_v33  ;;  %v9504_v0 = vcombine.low %v1331_v27, %v13071_v40  ;;  %p12141_p12 = pnand %p12140_p11, %p12273_p5 }
 0x109   : > { %v1397_v3 = vld [vmem:[#allocation2 + $0x3c] sm:$0x1]  ;;  %4571 = vmatmul.mubr.bf16.vlgmr.msra.gmra.mxu1 %v9603_v58  ;;  %v2666_v24 = vrot.slane %v2664_v63, 1  ;;  %v9611_v43 = vcombine.low %v2450_v37, %v2451_v2  ;;  %v9505_v55 = vcombine.low %v1332_v52, %v13085_v4  ;;  %v11616_v59 = vld [vmem:[%s16689_s1 + $0x230] sm:$0xff]   ;;  %v9536_v28 = vcombine.low %v13274_v51, %v1396_v38  ;;  %v1333_v58 = vld [vmem:[#allocation2 + $0x38] sm:$0xe] }
 0x10a   : > { %16835 = vst [vmem:[#allocation35_spill] sm:$0xff] %v13283_v6  ;;  %16836 = vst [vmem:[#allocation36_spill] sm:$0xff] %v13286_v42  ;;  %v2660_v1 = vor.u32 %v2659_v60, %v2655_v61  ;;  %v2159_v31 = vshll.u32 %v13109_v56, 16  ;;  %v2166_v21 = vshll.u32 %v13125_v35, 16  ;;  %v9537_v33 = vcombine.low %v13281_v47, %v1397_v3  ;;  %v1334_v13 = vld [vmem:[#allocation2 + $0x40] sm:$0xe]  ;;  %p12142_p13 = pneg %p12141_p12 }
 0x10b   : > { %v2667_v53 = vor.u32 %v2666_v24, %v2662_v9  ;;  %v9610_v40 = vcombine.low %v13277_v30, %v13279_v25  ;;  %v9612_v4 = vcombine.low %v13237_v10, %v13239_v18  ;;  %v2669_v37 = vshrl.u32 %v9536_v28, 16  ;;  %v277_v61 = vld [vmem:[#allocation2 + $0x48] sm:$0x1]  ;;  %v399_v60 = vld [vmem:[#allocation2 + $0x4c] sm:$0x1]  ;;  %v16839_v41 = vld [vmem:[#allocation12_spill] sm:$0xff] }
 0x10c   : > { %v2671_v2 = vshll.u32 %v9536_v28, 16  ;;  %v16837_v27 = vcombine.low %v13064_v32, %v13069_v36  ;;  %v2452_v9 = vrot.slane %v9504_v0, 1  ;;  %v2676_v63 = vshrl.u32 %v9537_v33, 16  ;;  %v11627_v3 = vld [vmem:[%s16689_s1 + $0x228] sm:$0xff]   ;;  %v13310_v32 = vld [vmem:[#allocation2 + $0x40] sm:$0xf] }
 0x10d   : > { %v9613_v52 = vcombine.low %v2660_v1, %v2667_v53  ;;  %v2678_v38 = vshll.u32 %v9537_v33, 16  ;;  %v2453_v10 = vrot.slane %v9505_v55, 1  ;;  %v2157_v18 = vshrl.u32 %v13109_v56, 16  ;;  %v1398_v28 = vld [vmem:[#allocation2 + $0x44] sm:$0x1] }
 0x10e   : > { %4410 = vmatmul.mubr.bf16.vlgmr.msra.gmra.mxu0 %v16837_v27  ;;  %v2164_v30 = vshrl.u32 %v13125_v35, 16  ;;  %v2673_v25 = vrot.slane %v2671_v2, 1  ;;  %v2161_v36 = vrot.slane %v2159_v31, 1  ;;  %v2168_v24 = vrot.slane %v2166_v21, 1  ;;  %v1335_v55 = vld [vmem:[#allocation2 + $0x58] sm:$0xe] }
 0x10f   : > { %11272 = vmatpush3.bf16.msra.mxu0 %v13095_v17  ;;  %4417 = vmatprep.mubr.bf16.mxu0 %v9611_v43  ;;  %v2680_v0 = vrot.slane %v2678_v38, 1  ;;  %v2173_v1 = vshll.u32 %v13149_v5, 16  ;;  %v9506_v17 = vcombine.low %v1333_v58, %v13099_v26  ;;  %v9507_v43 = vcombine.low %v1334_v13, %v13101_v19  ;;  %v1336_v21 = vld [vmem:[#allocation2 + $0x60] sm:$0xe]  ;;  %v13327_v58 = vld [vmem:[#allocation2 + $0x68] sm:$0xf] }
 0x110   : > { %4578 = vmatprep.mubr.bf16.mxu1 %v9613_v52  ;;  %11273 = vmatprep.subr.bf16.mxu0 %v11616_v59  ;;  %v2674_v53 = vor.u32 %v2673_v25, %v2669_v37  ;;  %v2171_v56 = vshrl.u32 %v13149_v5, 16  ;;  %v2180_v2 = vshll.u32 %v13152_v14, 16  ;;  %v278_v31 = vsel %vm12383_vm2, 0, %v277_v61  ;;  %v13325_v5 = vld [vmem:[#allocation2 + $0x60] sm:$0xf] }
 0x111   : > { %4579 = vmatmul.mubr.bf16.gmra.mxu1 %v9612_v4  ;;  %v2681_v35 = vor.u32 %v2680_v0, %v2676_v63  ;;  %v2175_v33 = vrot.slane %v2173_v1, 1  ;;  %v9620_v27 = vcombine.low %v2452_v9, %v2453_v10  ;;  %v2178_v37 = vshrl.u32 %v13152_v14, 16  ;;  %279 = vst [vmem:[#allocation2 + $0x48] sm:$0x1] %v278_v31  ;;  %v1400_v14 = vld [vmem:[#allocation2 + $0x64] sm:$0x1]  ;;  %v13340_v0 = vpop.f32.mrf.mxu1 }
 0x112   : > { %v400_v26 = vsel %vm12393_vm4, 0, %v399_v60  ;;  %v13323_v19 = vcombine.low %v13310_v32, %v1398_v28  ;;  %v9621_v4 = vcombine.low %v13274_v51, %v13281_v47  ;;  %v2182_v61 = vrot.slane %v2180_v2, 1  ;;  %v1401_v52 = vld [vmem:[#allocation2 + $0x6c] sm:$0x1]  ;;  %v11638_v9 = vld [vmem:[%s16689_s1 + $0x220] sm:$0xff]  }
 0x113   : > { %11274 = vmatpush3.bf16.msra.mxu0 %v11616_v59  ;;  %v9622_v13 = vcombine.low %v2674_v53, %v2681_v35  ;;  %401 = vst [vmem:[#allocation2 + $0x4c] sm:$0x1] %v400_v26  ;;  %v9508_v59 = vcombine.low %v1335_v55, %v13111_v48  ;;  %v2162_v63 = vor.u32 %v2161_v36, %v2157_v18  ;;  %v2454_v51 = vrot.slane %v9506_v17, 1  ;;  %v11649_v53 = vld [vmem:[%s16689_s1 + $0x218] sm:$0xff]   ;;  %v13355_v17 = vpop.f32.mrf.mxu1  ;;  %v1337_v35 = vld [vmem:[#allocation2 + $0x68] sm:$0xe] }
 0x114   : > { %11275 = vmatprep.subr.bf16.mxu0 %v11627_v3  ;;  %v2169_v38 = vor.u32 %v2168_v24, %v2164_v30  ;;  %v2685_v60 = vshll.u32 %v13323_v19, 16  ;;  %v9509_v10 = vcombine.low %v1336_v21, %v13116_v44  ;;  %v2455_v47 = vrot.slane %v9507_v43, 1  ;;  %v1405_v15 = vld [vmem:[#allocation2 + $0x8c] sm:$0x1]  ;;  %v1346_v39 = vld [vmem:[#allocation2 + $0xc0] sm:$0xe] }
 0x115   : > { %4586 = vmatprep.mubr.bf16.mxu1 %v9622_v13  ;;  %v13337_v25 = vor.u32 %v2175_v33, %v2171_v56  ;;  %v2187_v48 = vshll.u32 %v13167_v12, 16  ;;  %v13343_v28 = vor.u32 %v2182_v61, %v2178_v37  ;;  %v9540_v18 = vcombine.low %v13325_v5, %v1400_v14  ;;  %v13361_v37 = vpop.f32.mrf.mxu0  ;;  %v13363_v26 = vpop.f32.mrf.mxu1 }
 0x116   : > { %4418 = vmatmul.mubr.bf16.gmra.mxu0 %v9610_v40  ;;  %v9541_v44 = vcombine.low %v13327_v58, %v1401_v52  ;;  %v2683_v40 = vshrl.u32 %v13323_v19, 16  ;;  %v13348_v30 = vrot.slane %v9508_v59, 1  ;;  %v2185_v36 = vshrl.u32 %v13167_v12, 16 }
 0x117   : > { %4425 = vmatprep.mubr.bf16.mxu0 %v9620_v27  ;;  %11276 = vmatpush3.bf16.msra.mxu0 %v11627_v3  ;;  %v2194_v24 = vshll.u32 %v13174_v46, 16  ;;  %v2687_v3 = vrot.slane %v2685_v60, 1  ;;  %v13357_v43 = vrot.slane %v9509_v10, 1  ;;  %v2189_v56 = vrot.slane %v2187_v48, 1  ;;  %v1338_v27 = vld [vmem:[#allocation2 + $0x70] sm:$0xe] }
 0x118   : > { %11277 = vmatprep.subr.bf16.mxu0 %v11638_v9  ;;  %v2699_v55 = vshll.u32 %v9540_v18, 16  ;;  %v9619_v33 = vcombine.low %v2162_v63, %v2169_v38  ;;  %v9629_v2 = vcombine.low %v2454_v51, %v2455_v47  ;;  %v13359_v31 = vld [vmem:[#allocation2 + $0x48] sm:$0xf]  ;;  %v2697_v12 = vshrl.u32 %v9540_v18, 16  ;;  %v13373_v10 = vld [vmem:[#allocation2 + $0x70] sm:$0xf]  ;;  %v13375_v47 = vpop.f32.mrf.mxu0 }
 0x119   : > { %4587 = vmatmul.mubr.bf16.gmra.mxu1 %v9621_v4  ;;  %v2706_v21 = vshll.u32 %v9541_v44, 16  ;;  %v2192_v61 = vshrl.u32 %v13174_v46, 16  ;;  %v2704_v14 = vshrl.u32 %v9541_v44, 16  ;;  %v11660_v4 = vld [vmem:[%s16689_s1 + $0x210] sm:$0xff]   ;;  %v2196_v63 = vrot.slane %v2194_v24, 1  ;;  %v13377_v46 = vpop.f32.mrf.mxu1 }
 0x11a   : > { %v1399_v13 = vld [vmem:[#allocation2 + $0x4c] sm:$0x1]  ;;  %v2701_v59 = vrot.slane %v2699_v55, 1  ;;  %v9510_v60 = vcombine.low %v1337_v35, %v13127_v57  ;;  %v1402_v51 = vld [vmem:[#allocation2 + $0x74] sm:$0x1]  ;;  %v2688_v48 = vor.u32 %v2687_v3, %v2683_v40  ;;  %v13381_v18 = vor.u32 %v2189_v56, %v2185_v36  ;;  %v13390_v45 = vpop.f32.mrf.mxu0 }
 0x11b   : > { %11278 = vmatpush3.bf16.msra.mxu0 %v11638_v9  ;;  %v9539_v52 = vcombine.low %v13359_v31, %v1399_v13  ;;  %v2708_v38 = vrot.slane %v2706_v21, 1  ;;  %v9511_v44 = vcombine.low %v1338_v27, %v13133_v50  ;;  %v13384_v24 = vld [vmem:[#allocation2 + $0x78] sm:$0xf]  ;;  %v1403_v55 = vld [vmem:[#allocation2 + $0x7c] sm:$0x1]  ;;  %v9630_v21 = vcombine.low %v13310_v32, %v13359_v31  ;;  %v16838_v3 = vld [vmem:[#allocation20_spill] sm:$0xff]  ;;  %v13395_v27 = vpop.f32.mrf.mxu1 }
 0x11c   : > { %11279 = vmatprep.subr.bf16.mxu0 %v11649_v53  ;;  %v13388_v13 = vor.u32 %v2701_v59, %v2697_v12  ;;  %v2201_v36 = vshll.u32 %v13177_v11, 16  ;;  %v2208_v56 = vshll.u32 %v16838_v3, 16  ;;  %v9542_v50 = vcombine.low %v13373_v10, %v1402_v51  ;;  %v1339_v59 = vld [vmem:[#allocation2 + $0x78] sm:$0xe]  ;;  %v1340_v9 = vld [vmem:[#allocation2 + $0x80] sm:$0xe] }
 0x11d   : > { %v2690_v57 = vshrl.u32 %v9539_v52, 16  ;;  %v2692_v35 = vshll.u32 %v9539_v52, 16  ;;  %v2709_v40 = vor.u32 %v2708_v38, %v2704_v14  ;;  %v13400_v31 = vor.u32 %v2196_v63, %v2192_v61  ;;  %v13405_v14 = vpop.f32.mrf.mxu0 }
 0x11e   : > { %4426 = vmatmul.mubr.bf16.gmra.mxu0 %v9619_v33  ;;  %v11671_v33 = vld [vmem:[%s16689_s1 + $0x208] sm:$0xff]   ;;  %v13402_v12 = vrot.slane %v9510_v60, 1  ;;  %v13407_v52 = vrot.slane %v9511_v44, 1  ;;  %v2206_v38 = vshrl.u32 %v16838_v3, 16  ;;  %v2713_v51 = vshll.u32 %v9542_v50, 16 }
 0x11f   : > { %4433 = vmatprep.mubr.bf16.mxu0 %v9629_v2  ;;  %11280 = vmatpush3.bf16.msra.mxu0 %v11649_v53  ;;  %v2694_v32 = vrot.slane %v2692_v35, 1  ;;  %v9543_v2 = vcombine.low %v13384_v24, %v1403_v55  ;;  %v2199_v53 = vshrl.u32 %v13177_v11, 16  ;;  %v2711_v35 = vshrl.u32 %v9542_v50, 16  ;;  %v13411_v60 = vld [vmem:[#allocation2 + $0x80] sm:$0xf]  ;;  %v13413_v1 = vpop.f32.mrf.mxu0  ;;  %v13415_v55 = vpop.f32.mrf.mxu1  ;;  %v16840_v50 = vld [vmem:[#allocation13_spill] sm:$0xff] }
 0x120   : > { %11281 = vmatprep.subr.bf16.mxu0 %v11660_v4  ;;  %v9640_v6 = vcombine.low %v13388_v13, %v2709_v40  ;;  %v2203_v44 = vrot.slane %v2201_v36, 1  ;;  %v2210_v22 = vrot.slane %v2208_v56, 1  ;;  %v2715_v7 = vrot.slane %v2713_v51, 1  ;;  %v1404_v11 = vld [vmem:[#allocation2 + $0x84] sm:$0x1] }
 0x121   : > { %v2695_v19 = vor.u32 %v2694_v32, %v2690_v57  ;;  %v2718_v61 = vshrl.u32 %v9543_v2, 16  ;;  %v2720_v63 = vshll.u32 %v9543_v2, 16  ;;  %v9512_v57 = vcombine.low %v1339_v59, %v16839_v41  ;;  %v13420_v2 = vld [vmem:[#allocation2 + $0x88] sm:$0xf]  ;;  %v13422_v23 = vpop.f32.mrf.mxu0  ;;  %v11682_v41 = vld [vmem:[%s16689_s1 + $0x200] sm:$0xff]  }
 0x122   : > { %v9513_v32 = vcombine.low %v1340_v9, %v16840_v50  ;;  %v16841_v13 = vshll.u32 %v13286_v42, 16  ;;  %v16844_v9 = vcombine.low %v13337_v25, %v13343_v28  ;;  %v13438_v36 = vor.u32 %v2715_v7, %v2711_v35  ;;  %v16845_v59 = vld [vmem:[#allocation22_spill] sm:$0xff]  ;;  %v1341_v35 = vld [vmem:[#allocation2 + $0x88] sm:$0xe]  ;;  %v13486_v42 = vld [vmem:[#allocation2 + $0x90] sm:$0xf] }
 0x123   : > { %11282 = vmatpush3.bf16.msra.mxu0 %v11660_v4  ;;  %v9631_v3 = vcombine.low %v2688_v48, %v2695_v19  ;;  %v2722_v20 = vrot.slane %v2720_v63, 1  ;;  %v16843_v4 = vld [vmem:[#allocation21_spill] sm:$0xff]  ;;  %v2222_v51 = vshll.u32 %v16845_v59, 16  ;;  %v13444_v63 = vcombine.low %v13411_v60, %v1404_v11  ;;  %v13446_v50 = vpop.f32.mrf.mxu0  ;;  %v16854_v19 = vld [vmem:[#allocation24_spill] sm:$0xff] }
 0x124   : > { %11283 = vmatprep.subr.bf16.mxu0 %v11671_v33  ;;  %v13427_v40 = vrot.slane %v16841_v13, 1  ;;  %v2215_v48 = vshll.u32 %v16843_v4, 16  ;;  %v13448_v13 = vpop.f32.mrf.mxu1  ;;  %v16847_v49 = vcombine.low %v13348_v30, %v13357_v43  ;;  %v9637_v7 = vcombine.low %v13381_v18, %v13400_v31  ;;  %v13469_v43 = vld [vmem:[#allocation2 + $0xe4] sm:$0x1] }
 0x125   : > { %4594 = vmatprep.mubr.bf16.mxu1 %v9631_v3  ;;  %v13440_v56 = vor.u32 %v2722_v20, %v2718_v61  ;;  %16846 = vst [vmem:[#allocation12_spill] sm:$0xff] %v13448_v13  ;;  %v9647_v20 = vcombine.low %v13402_v12, %v13407_v52  ;;  %v2213_v25 = vshrl.u32 %v16843_v4, 16  ;;  %v13459_v28 = vcombine.low %v13420_v2, %v1405_v15  ;;  %v1342_v61 = vld [vmem:[#allocation2 + $0x90] sm:$0xe]  ;;  %v307_v52 = vld [vmem:[#allocation2 + $0x98] sm:$0x1]  ;;  %v13478_v3 = vpop.f32.mrf.mxu0 }
 0x126   : > { %16842 = vst [vmem:[#allocation20_spill] sm:$0xff] %v13427_v40  ;;  %4434 = vmatmul.mubr.bf16.gmra.mxu0 %v16844_v9  ;;  %4595 = vmatmul.mubr.bf16.gmra.mxu1 %v9630_v21  ;;  %v13461_v11 = vor.u32 %v2203_v44, %v2199_v53  ;;  %v13463_v21 = vor.u32 %v2210_v22, %v2206_v38  ;;  %v13465_v30 = vrot.slane %v9512_v57, 1  ;;  %16848 = vst [vmem:[#allocation13_spill] sm:$0xff] %v13469_v43  ;;  %v16849_v53 = vld [vmem:[#allocation23_spill] sm:$0xff]  ;;  %v13480_v57 = vpop.f32.mrf.mxu1  ;;  %v16853_v9 = vld [vmem:[#allocation16_spill] sm:$0xff] }
 0x127   : > { %4441 = vmatprep.mubr.bf16.mxu0 %v16847_v49  ;;  %4602 = vmatprep.mubr.bf16.mxu1 %v9640_v6  ;;  %v13467_v49 = vrot.slane %v9513_v32, 1  ;;  %v2217_v18 = vrot.slane %v2215_v48, 1  ;;  %v2220_v31 = vshrl.u32 %v16845_v59, 16  ;;  %v2727_v15 = vshll.u32 %v13444_v63, 16  ;;  %16850 = vst [vmem:[#allocation21_spill] sm:$0xff] %v13478_v3  ;;  %16851 = vst [vmem:[#allocation22_spill] sm:$0xff] %v13480_v57 }
 0x128   : > { %11284 = vmatpush3.bf16.msra.mxu0 %v11671_v33  ;;  %v2734_v12 = vshll.u32 %v13459_v28, 16  ;;  %v9649_v22 = vcombine.low %v13438_v36, %v13440_v56  ;;  %v2224_v6 = vrot.slane %v2222_v51, 1  ;;  %v2227_v38 = vshrl.u32 %v16849_v53, 16  ;;  %v429_v33 = vld [vmem:[#allocation2 + $0x9c] sm:$0x1]  ;;  %v16852_v4 = vld [vmem:[#allocation15_spill] sm:$0xff] }
 0x129   : > { %11285 = vmatprep.subr.bf16.mxu0 %v11682_v41  ;;  %v2229_v44 = vshll.u32 %v16849_v53, 16  ;;  %v2725_v32 = vshrl.u32 %v13444_v63, 16  ;;  %v9514_v48 = vcombine.low %v1341_v35, %v16852_v4  ;;  %v9515_v59 = vcombine.low %v1342_v61, %v16853_v9  ;;  %v1406_v36 = vld [vmem:[#allocation2 + $0x94] sm:$0x1]  ;;  %v13488_v56 = vld [vmem:[#allocation2 + $0x124] sm:$0x1] }
 0x12a   : > { %v2236_v40 = vshll.u32 %v16854_v19, 16  ;;  %16855 = vst [vmem:[#allocation23_spill] sm:$0xff] %v13488_v56  ;;  %v2729_v51 = vrot.slane %v2727_v15, 1  ;;  %v2732_v53 = vshrl.u32 %v13459_v28, 16  ;;  %v2736_v13 = vrot.slane %v2734_v12, 1 }
 0x12b   : > { %v308_v57 = vsel %vm12383_vm2, 0, %v307_v52  ;;  %v2231_v63 = vrot.slane %v2229_v44, 1  ;;  %v2234_v35 = vshrl.u32 %v16854_v19, 16  ;;  %v430_v61 = vsel %vm12393_vm4, 0, %v429_v33  ;;  %v12053_v9 = vld [vmem:[#allocation2 + $0xe0] sm:$0xf]  ;;  %v13510_v52 = vpop.f32.mrf.mxu0  ;;  %v13512_v44 = vpop.f32.mrf.mxu1 }
 0x12c   : > { %11286 = vmatpush3.bf16.msra.mxu0 %v11682_v41  ;;  %v2238_v4 = vrot.slane %v2236_v40, 1  ;;  %309 = vst [vmem:[#allocation2 + $0x98] sm:$0x1] %v308_v57  ;;  %v13497_v3 = vcombine.low %v12053_v9, %v13469_v43  ;;  %v13499_v15 = vor.u32 %v2217_v18, %v2213_v25  ;;  %v13501_v28 = vor.u32 %v2224_v6, %v2220_v31  ;;  %v1343_v12 = vld [vmem:[#allocation2 + $0xa8] sm:$0xe] }
 0x12d   : > { %431 = vst [vmem:[#allocation2 + $0x9c] sm:$0x1] %v430_v61  ;;  %v13504_v41 = vcombine.low %v13486_v42, %v1406_v36  ;;  %v13506_v19 = vld [vmem:[#allocation2 + $0xb0] sm:$0xf]  ;;  %v13508_v40 = vld [vmem:[#allocation2 + $0xb8] sm:$0xf]  ;;  %v16858_v25 = vcombine.low %v13325_v5, %v13327_v58  ;;  %v9648_v18 = vcombine.low %v13373_v10, %v13384_v24  ;;  %v9646_v61 = vcombine.low %v13461_v11, %v13463_v21 }
 0x12e   : > { %16856 = vst [vmem:[#allocation15_spill] sm:$0xff] %v13497_v3  ;;  %4442 = vmatmul.mubr.bf16.gmra.mxu0 %v9637_v7  ;;  %v16857_v33 = vld [vmem:[#allocation11_spill] sm:$0xff]  ;;  %v13523_v31 = vrot.slane %v9514_v48, 1  ;;  %v13525_v6 = vrot.slane %v9515_v59, 1  ;;  %v1408_v57 = vld [vmem:[#allocation2 + $0xb4] sm:$0x1]  ;;  %v9656_v9 = vcombine.low %v13465_v30, %v13467_v49  ;;  %v2737_v5 = vor.u32 %v2736_v13, %v2732_v53 }
 0x12f   : > { %v13516_v7 = vcombine.low %v16857_v33, %v13488_v56  ;;  %4603 = vmatmul.mubr.bf16.gmra.mxu1 %v16858_v25  ;;  %4449 = vmatprep.mubr.bf16.mxu0 %v9647_v20  ;;  %v1409_v36 = vld [vmem:[#allocation2 + $0xbc] sm:$0x1]  ;;  %v2730_v33 = vor.u32 %v2729_v51, %v2725_v32  ;;  %v1344_v58 = vld [vmem:[#allocation2 + $0xb0] sm:$0xe]  ;;  %v13531_v20 = vpop.f32.mrf.mxu0  ;;  %v13533_v25 = vpop.f32.mrf.mxu1  ;;  %v13535_v10 = vor.u32 %v2231_v63, %v2227_v38  ;;  %v2741_v48 = vshll.u32 %v13504_v41, 16 }
 0x130   : > { %4610 = vmatprep.mubr.bf16.mxu1 %v9649_v22  ;;  %v13537_v24 = vor.u32 %v2238_v4, %v2234_v35  ;;  %v16859_v59 = vld [vmem:[#allocation17_spill] sm:$0xff]  ;;  %v13546_v13 = vcombine.low %v13506_v19, %v1408_v57  ;;  %v13549_v30 = vcombine.low %v13508_v40, %v1409_v36  ;;  %v9517_v38 = vcombine.low %v1344_v58, %v13197_v62  ;;  %v13560_v53 = vld [vmem:[%s16691_s3] ss:$0 sm:$0xff]  ;;  %v16862_v62 = vld [vmem:[#allocation27_spill] sm:$0xff] }
 0x131   : > { %v9516_v56 = vcombine.low %v1343_v12, %v16859_v59  ;;  %v13551_v49 = vpop.f32.mrf.mxu1  ;;  %v16861_v32 = vld [vmem:[#allocation25_spill] sm:$0xff]  ;;  %v10345_v63 = vadd.f32 %v13375_v47, %v13361_v37  ;;  %v13564_v35 = vpop.f32.mrf.mxu0  ;;  %v9658_v4 = vcombine.low %v2730_v33, %v2737_v5  ;;  %v2739_v57 = vshrl.u32 %v13504_v41, 16 }
 0x132   : > { %16860 = vst [vmem:[#allocation16_spill] sm:$0xff] %v13551_v49  ;;  %v2243_v51 = vshll.u32 %v16861_v32, 16  ;;  %v2241_v36 = vshrl.u32 %v16861_v32, 16  ;;  %v2250_v58 = vshll.u32 %v16862_v62, 16  ;;  %v2743_v11 = vrot.slane %v2741_v48, 1 }
 0x133   : > { %v13566_v12 = vld [vmem:[#allocation2 + $0x98] sm:$0xf]  ;;  %v13571_v59 = vpop.f32.mrf.mxu1  ;;  %v13575_v3 = vrot.slane %v9516_v56, 1  ;;  %v2755_v37 = vshll.u32 %v13546_v13, 16  ;;  %v2762_v41 = vshll.u32 %v13549_v30, 16  ;;  %v4090_v33 = vadd.f32 %v10345_v63, %v13560_v53  ;;  %v13590_v43 = vpop.f32.mrf.mxu0 }
 0x134   : > { %16863 = vst [vmem:[#allocation24_spill] sm:$0xff] %v13571_v59  ;;  %v1407_v21 = vld [vmem:[#allocation2 + $0x9c] sm:$0x1]  ;;  %v10457_v5 = vadd.f32 %v13355_v17, %v13340_v0  ;;  %v1345_v32 = vld [vmem:[#allocation2 + $0xb8] sm:$0xe]  ;;  %v13583_v22 = vrot.slane %v9517_v38, 1 }
 0x135   : > { %v9547_v47 = vcombine.low %v13566_v12, %v1407_v21  ;;  %v2245_v48 = vrot.slane %v2243_v51, 1  ;;  %v2248_v56 = vshrl.u32 %v16862_v62, 16  ;;  %v13588_v21 = vld [vmem:[#allocation2 + $0xc0] sm:$0xf]  ;;  %v13592_v63 = vpop.f32.mrf.mxu1  ;;  %v13596_v38 = vld [vmem:[#allocation2 + $0xc8] sm:$0xf]  ;;  %v2744_v62 = vor.u32 %v2743_v11, %v2739_v57  ;;  %v13612_v57 = vpop.f32.mrf.mxu0 }
 0x136   : > { %4450 = vmatmul.mubr.bf16.gmra.mxu0 %v9646_v61  ;;  %v10348_v61 = vadd.f32 %v13405_v14, %v13390_v45  ;;  %16864 = vst [vmem:[#allocation11_spill] sm:$0xff] %v13592_v63  ;;  %v1410_v51 = vld [vmem:[#allocation2 + $0xc4] sm:$0x1]  ;;  %v2753_v34 = vshrl.u32 %v13546_v13, 16  ;;  %v2760_v45 = vshrl.u32 %v13549_v30, 16  ;;  %v2757_v63 = vrot.slane %v2755_v37, 1 }
 0x137   : > { %4611 = vmatmul.mubr.bf16.gmra.mxu1 %v9648_v18  ;;  %4457 = vmatprep.mubr.bf16.mxu0 %v9656_v9  ;;  %v2746_v0 = vshrl.u32 %v9547_v47, 16  ;;  %v2748_v17 = vshll.u32 %v9547_v47, 16  ;;  %v2252_v18 = vrot.slane %v2250_v58, 1  ;;  %v13594_v9 = vadd.f32 %v10457_v5, %v4090_v33  ;;  %v13601_v59 = vpop.f32.mrf.mxu1  ;;  %v1411_v47 = vld [vmem:[#allocation2 + $0xcc] sm:$0x1] }
 0x138   : > { %4618 = vmatprep.mubr.bf16.mxu1 %v9658_v4  ;;  %v4093_v14 = vadd.f32 %v10348_v61, %v13560_v53  ;;  %v2764_v4 = vrot.slane %v2762_v41, 1  ;;  %v10460_v58 = vadd.f32 %v13377_v46, %v13363_v26  ;;  %v13609_v13 = vor.u32 %v2245_v48, %v2241_v36  ;;  %v13741_v33 = vld [vmem:[#allocation2 + $0x100] sm:$0xf] }
 0x139   : > { %v2750_v49 = vrot.slane %v2748_v17, 1  ;;  %v9518_v30 = vcombine.low %v1345_v32, %v13221_v16  ;;  %v13614_v5 = vpop.f32.mrf.mxu1  ;;  %v9519_v41 = vcombine.low %v1346_v39, %v13243_v29  ;;  %v9550_v26 = vcombine.low %v13588_v21, %v1410_v51  ;;  %v13625_v32 = vpop.f32.mrf.mxu0 }
 0x13a   : > { %v13617_v61 = vadd.f32 %v10460_v58, %v4093_v14  ;;  %v2257_v46 = vshll.u32 %v13232_v8, 16  ;;  %v2264_v17 = vshll.u32 %v13260_v54, 16  ;;  %v9551_v36 = vcombine.low %v13596_v38, %v1411_v47 }
 0x13b   : > { %v2751_v37 = vor.u32 %v2750_v49, %v2746_v0  ;;  %v10351_v16 = vadd.f32 %v13422_v23, %v13413_v1  ;;  %v16865_v49 = vcombine.low %v13499_v15, %v13501_v28  ;;  %v13630_v29 = vor.u32 %v2252_v18, %v2248_v56  ;;  %v1347_v28 = vld [vmem:[#allocation2 + $0xc8] sm:$0xe]  ;;  %v13643_v56 = vpop.f32.mrf.mxu1  ;;  %v13652_v18 = vld [vmem:[#allocation2 + $0xd0] sm:$0xf] }
 0x13c   : > { %v2758_v48 = vor.u32 %v2757_v63, %v2753_v34  ;;  %v2765_v0 = vor.u32 %v2764_v4, %v2760_v45  ;;  %v16866_v51 = vcombine.low %v13411_v60, %v13420_v2  ;;  %v16867_v14 = vcombine.low %v13523_v31, %v13525_v6  ;;  %v16868_v31 = vld [vmem:[#allocation21_spill] sm:$0xff]  ;;  %v1348_v63 = vld [vmem:[#allocation2 + $0xd0] sm:$0xe] }
 0x13d   : > { %v9667_v39 = vcombine.low %v2744_v62, %v2751_v37  ;;  %v13638_v23 = vrot.slane %v9518_v30, 1  ;;  %v2769_v1 = vshll.u32 %v9550_v26, 16  ;;  %v2776_v58 = vshll.u32 %v9551_v36, 16  ;;  %v13641_v62 = vpop.f32.mrf.mxu0  ;;  %v13655_v37 = vld [vmem:[#allocation2 + $0xd8] sm:$0xf]  ;;  %v13666_v11 = vpop.f32.mrf.mxu1 }
 0x13e   : > { %4458 = vmatmul.mubr.bf16.gmra.mxu0 %v16865_v49  ;;  %v4098_v15 = vadd.f32 %v10351_v16, %v13560_v53  ;;  %v13645_v34 = vrot.slane %v9519_v41, 1  ;;  %v2255_v60 = vshrl.u32 %v13232_v8, 16  ;;  %v10463_v2 = vadd.f32 %v13415_v55, %v13395_v27  ;;  %v16869_v55 = vld [vmem:[#allocation12_spill] sm:$0xff]  ;;  %v16870_v49 = vld [vmem:[#allocation22_spill] sm:$0xff] }
 0x13f   : > { %4619 = vmatmul.mubr.bf16.gmra.mxu1 %v16866_v51  ;;  %4465 = vmatprep.mubr.bf16.mxu0 %v16867_v14  ;;  %v10354_v6 = vadd.f32 %v16868_v31, %v13446_v50  ;;  %v2259_v45 = vrot.slane %v2257_v46, 1  ;;  %v2262_v4 = vshrl.u32 %v13260_v54, 16  ;;  %v2266_v47 = vrot.slane %v2264_v17, 1  ;;  %v13657_v41 = vpop.f32.mrf.mxu0  ;;  %v1413_v51 = vld [vmem:[#allocation2 + $0xdc] sm:$0x1]  ;;  %v16872_v17 = vld [vmem:[#allocation30_spill] sm:$0xff] }
 0x140   : > { %4626 = vmatprep.mubr.bf16.mxu1 %v9667_v39  ;;  %v2767_v30 = vshrl.u32 %v9550_v26, 16  ;;  %v2774_v16 = vshrl.u32 %v9551_v36, 16  ;;  %v13659_v8 = vadd.f32 %v10463_v2, %v4098_v15  ;;  %v10466_v50 = vadd.f32 %v16870_v49, %v16869_v55  ;;  %v1412_v39 = vld [vmem:[#allocation2 + $0xd4] sm:$0x1]  ;;  %v16871_v31 = vld [vmem:[#allocation29_spill] sm:$0xff] }
 0x141   : > { %v4101_v27 = vadd.f32 %v10354_v6, %v13560_v53  ;;  %v2771_v14 = vrot.slane %v2769_v1, 1  ;;  %v2778_v46 = vrot.slane %v2776_v58, 1  ;;  %v9520_v54 = vcombine.low %v1347_v28, %v16871_v31  ;;  %v13683_v28 = vpop.f32.mrf.mxu0  ;;  %v16879_v31 = vld [vmem:[#allocation16_spill] sm:$0xff] }
 0x142   : > { %v9521_v26 = vcombine.low %v1348_v63, %v16872_v17  ;;  %v9676_v36 = vcombine.low %v2758_v48, %v2765_v0  ;;  %v9675_v15 = vcombine.low %v13506_v19, %v13508_v40  ;;  %v13673_v6 = vor.u32 %v2259_v45, %v2255_v60  ;;  %v13685_v63 = vpop.f32.mrf.mxu1  ;;  %v16886_v45 = vld [vmem:[#allocation15_spill] sm:$0xff] }
 0x143   : > { %v13671_v2 = vadd.f32 %v10466_v50, %v4101_v27  ;;  %v13675_v55 = vor.u32 %v2266_v47, %v2262_v4  ;;  %v13678_v1 = vcombine.low %v13652_v18, %v1412_v39  ;;  %v13681_v58 = vcombine.low %v13655_v37, %v1413_v51  ;;  %v1350_v50 = vld [vmem:[#allocation2 + $0xe0] sm:$0xe]  ;;  %v13719_v39 = vpop.f32.mrf.mxu0 }
 0x144   : > { %v16873_v48 = vcombine.low %v13535_v10, %v13537_v24  ;;  %v9673_v0 = vcombine.low %v13609_v13, %v13630_v29  ;;  %v9683_v60 = vcombine.low %v13638_v23, %v13645_v34  ;;  %v10357_v4 = vadd.f32 %v13531_v20, %v13510_v52  ;;  %v1349_v23 = vld [vmem:[#allocation2 + $0xd8] sm:$0xe]  ;;  %v13721_v51 = vpop.f32.mrf.mxu1 }
 0x145   : > { %v16874_v47 = vcombine.low %v13486_v42, %v13566_v12  ;;  %v16875_v10 = vcombine.low %v13575_v3, %v13583_v22  ;;  %v2772_v24 = vor.u32 %v2771_v14, %v2767_v30  ;;  %v2779_v27 = vor.u32 %v2778_v46, %v2774_v16  ;;  %v16876_v22 = vld [vmem:[#allocation32_spill] sm:$0xff]  ;;  %v16877_v30 = vld [vmem:[#allocation33_spill] sm:$0xff] }
 0x146   : > { %4466 = vmatmul.mubr.bf16.gmra.mxu0 %v16873_v48  ;;  %v13704_v13 = vrot.slane %v9520_v54, 1  ;;  %v13706_v29 = vrot.slane %v9521_v26, 1  ;;  %v2783_v34 = vshll.u32 %v13678_v1, 16  ;;  %v2790_v52 = vshll.u32 %v13681_v58, 16  ;;  %v16880_v54 = vld [vmem:[#allocation24_spill] sm:$0xff] }
 0x147   : > { %4627 = vmatmul.mubr.bf16.gmra.mxu1 %v16874_v47  ;;  %4473 = vmatprep.mubr.bf16.mxu0 %v16875_v10  ;;  %v4106_v20 = vadd.f32 %v10357_v4, %v13560_v53  ;;  %v10469_v42 = vadd.f32 %v13533_v25, %v13512_v44  ;;  %v2271_v12 = vshll.u32 %v16876_v22, 16  ;;  %v2278_v16 = vshll.u32 %v16877_v30, 16  ;;  %v16878_v44 = vld [vmem:[#allocation31_spill] sm:$0xff]  ;;  %v13733_v47 = vld [vmem:[#allocation2 + $0xe0] sm:$0xf] }
 0x148   : > { %4634 = vmatprep.mubr.bf16.mxu1 %v9676_v36  ;;  %v10360_v49 = vadd.f32 %v13590_v43, %v13564_v35  ;;  %v2269_v14 = vshrl.u32 %v16876_v22, 16  ;;  %v9522_v25 = vcombine.low %v1349_v23, %v16878_v44  ;;  %v10472_v17 = vadd.f32 %v16880_v54, %v16879_v31  ;;  %v337_v26 = vld [vmem:[#allocation2 + $0xe8] sm:$0x1]  ;;  %v459_v36 = vld [vmem:[#allocation2 + $0xec] sm:$0x1]  ;;  %v16882_v43 = vld [vmem:[#allocation13_spill] sm:$0xff] }
 0x149   : > { %v13724_v46 = vadd.f32 %v10469_v42, %v4106_v20  ;;  %v9685_v48 = vcombine.low %v2772_v24, %v2779_v27  ;;  %v2276_v35 = vshrl.u32 %v16877_v30, 16  ;;  %v1414_v10 = vld [vmem:[#allocation2 + $0xe4] sm:$0x1]  ;;  %v2781_v20 = vshrl.u32 %v13678_v1, 16  ;;  %v13743_v30 = vpop.f32.mrf.mxu0 }
 0x14a   : > { %v4109_v4 = vadd.f32 %v10360_v49, %v13560_v53  ;;  %v2785_v42 = vrot.slane %v2783_v34, 1  ;;  %v2788_v23 = vshrl.u32 %v13681_v58, 16  ;;  %v2792_v22 = vrot.slane %v2790_v52, 1  ;;  %v13745_v49 = vpop.f32.mrf.mxu1 }
 0x14b   : > { %v2273_v44 = vrot.slane %v2271_v12, 1  ;;  %v2280_v31 = vrot.slane %v2278_v16, 1  ;;  %v338_v27 = vsel %vm12383_vm2, 0, %v337_v26  ;;  %v9523_v1 = vcombine.low %v1350_v50, %v16882_v43  ;;  %v13755_v16 = vld [vmem:[#allocation2 + $0x108] sm:$0xf] }
 0x14c   : > { %v13737_v54 = vadd.f32 %v10472_v17, %v4109_v4  ;;  %v13748_v34 = vrot.slane %v9522_v25, 1  ;;  %339 = vst [vmem:[#allocation2 + $0xe8] sm:$0x1] %v338_v27  ;;  %v460_v52 = vsel %vm12393_vm4, 0, %v459_v36  ;;  %v13753_v12 = vcombine.low %v13733_v47, %v1414_v10  ;;  %v1416_v17 = vld [vmem:[#allocation2 + $0x104] sm:$0x1] }
 0x14d   : > { %v1417_v26 = vld [vmem:[#allocation2 + $0x10c] sm:$0x1]  ;;  %461 = vst [vmem:[#allocation2 + $0xec] sm:$0x1] %v460_v52  ;;  %v10363_v25 = vadd.f32 %v13625_v32, %v13612_v57  ;;  %v10366_v4 = vadd.f32 %v13657_v41, %v13641_v62  ;;  %v2786_v10 = vor.u32 %v2785_v42, %v2781_v20  ;;  %v2793_v27 = vor.u32 %v2792_v22, %v2788_v23  ;;  %v10371_v32 = vpop.f32.mrf.mxu0  ;;  %v1351_v42 = vld [vmem:[#allocation2 + $0xf8] sm:$0xe] }
 0x14e   : > { %4474 = vmatmul.mubr.bf16.gmra.mxu0 %v9673_v0  ;;  %v16884_v0 = vld [vmem:[#allocation34_spill] sm:$0xff]  ;;  %v16885_v43 = vld [vmem:[#allocation11_spill] sm:$0xff]  ;;  %v2292_v3 = vshll.u32 %v16886_v45, 16  ;;  %v2797_v19 = vshll.u32 %v13753_v12, 16  ;;  %v13769_v40 = vor.u32 %v2273_v44, %v2269_v14  ;;  %v13777_v52 = vrot.slane %v9523_v1, 1 }
 0x14f   : > { %4635 = vmatmul.mubr.bf16.gmra.mxu1 %v9675_v15  ;;  %4481 = vmatprep.mubr.bf16.mxu0 %v9683_v60  ;;  %v2285_v50 = vshll.u32 %v16884_v0, 16  ;;  %v10475_v36 = vadd.f32 %v13601_v59, %v16885_v43  ;;  %v13771_v15 = vor.u32 %v2280_v31, %v2276_v35  ;;  %v4114_v60 = vadd.f32 %v10363_v25, %v13560_v53  ;;  %v13775_v59 = vpop.f32.mrf.mxu1 }
 0x150   : > { %4642 = vmatprep.mubr.bf16.mxu1 %v9685_v48  ;;  %v4117_v57 = vadd.f32 %v10366_v4, %v13560_v53  ;;  %v2283_v62 = vshrl.u32 %v16884_v0, 16  ;;  %v10478_v41 = vadd.f32 %v13643_v56, %v13614_v5  ;;  %v13783_v48 = vcombine.low %v13741_v33, %v1416_v17  ;;  %v13794_v0 = vld [vmem:[#allocation2 + $0x100] sm:$0xe] }
 0x151   : > { %v2287_v14 = vrot.slane %v2285_v50, 1  ;;  %v2290_v35 = vshrl.u32 %v16886_v45, 16  ;;  %v13786_v20 = vadd.f32 %v10475_v36, %v4114_v60  ;;  %v13789_v23 = vcombine.low %v13755_v16, %v1417_v26  ;;  %v13791_v22 = vpop.f32.mrf.mxu1  ;;  %v10373_v26 = vpop.f32.mrf.mxu0 }
 0x152   : > { %v9694_v44 = vcombine.low %v2786_v10, %v2793_v27  ;;  %v2294_v31 = vrot.slane %v2292_v3, 1  ;;  %v2795_v1 = vshrl.u32 %v13753_v12, 16  ;;  %v13796_v5 = vadd.f32 %v10478_v41, %v4117_v57  ;;  %v13814_v27 = vld [vmem:[#allocation2 + $0x110] sm:$0xf] }
 0x153   : > { %v13798_v56 = vld [vmem:[#allocation2 + $0xe8] sm:$0xf]  ;;  %v2799_v17 = vrot.slane %v2797_v19, 1  ;;  %v2809_v45 = vshrl.u32 %v13783_v48, 16  ;;  %v10369_v50 = vadd.f32 %v13719_v39, %v13683_v28  ;;  %v13803_v25 = vpop.f32.mrf.mxu1  ;;  %v16887_v3 = vcombine.low %v13673_v6, %v13675_v55  ;;  %v13816_v28 = vld [vmem:[#allocation2 + $0x118] sm:$0xf]  ;;  %v10374_v60 = vpop.f32.mrf.mxu0 }
 0x154   : > { %v9693_v12 = vcombine.low %v13652_v18, %v13655_v37  ;;  %v1415_v43 = vld [vmem:[#allocation2 + $0xec] sm:$0x1]  ;;  %v2811_v36 = vshll.u32 %v13783_v48, 16  ;;  %v2818_v4 = vshll.u32 %v13789_v23, 16  ;;  %v10481_v10 = vadd.f32 %v13685_v63, %v13666_v11  ;;  %v1418_v39 = vld [vmem:[#allocation2 + $0x114] sm:$0x1] }
 0x155   : > { %v1419_v19 = vld [vmem:[#allocation2 + $0x11c] sm:$0x1]  ;;  %v16888_v6 = vcombine.low %v13588_v21, %v13596_v38  ;;  %v16889_v18 = vcombine.low %v13704_v13, %v13706_v29  ;;  %v9555_v37 = vcombine.low %v13798_v56, %v1415_v43  ;;  %v2816_v55 = vshrl.u32 %v13789_v23, 16  ;;  %v10489_v57 = vpop.f32.mrf.mxu1 }
 0x156   : > { %4482 = vmatmul.mubr.bf16.gmra.mxu0 %v16887_v3  ;;  %v4122_v11 = vadd.f32 %v10369_v50, %v13560_v53  ;;  %v10372_v63 = vadd.f32 %v10371_v32, %v13743_v30  ;;  %v9691_v41 = vcombine.low %v13769_v40, %v13771_v15  ;;  %v9701_v21 = vcombine.low %v13748_v34, %v13777_v52  ;;  %v12054_v38 = vld [vmem:[#allocation2 + $0xfc] sm:$0x1]  ;;  %v12055_v3 = vld [vmem:[#allocation2 + $0x104] sm:$0x1]  ;;  %v10376_v32 = vpop.f32.mrf.mxu0 }
 0x157   : > { %4643 = vmatmul.mubr.bf16.gmra.mxu1 %v16888_v6  ;;  %4489 = vmatprep.mubr.bf16.mxu0 %v16889_v18  ;;  %v9524_v13 = vcombine.low %v1351_v42, %v12054_v38  ;;  %v10484_v29 = vadd.f32 %v13745_v49, %v13721_v51  ;;  %v2802_v48 = vshrl.u32 %v9555_v37, 16  ;;  %v2804_v23 = vshll.u32 %v9555_v37, 16  ;;  %v13837_v43 = vpop.f32.mrf.mxu1  ;;  %v1353_v37 = vld [vmem:[#allocation2 + $0x108] sm:$0xe] }
 0x158   : > { %4650 = vmatprep.mubr.bf16.mxu1 %v9694_v44  ;;  %v9525_v50 = vcombine.low %v13794_v0, %v12055_v3  ;;  %v13835_v30 = vadd.f32 %v10481_v10, %v4122_v11  ;;  %v2800_v40 = vor.u32 %v2799_v17, %v2795_v1  ;;  %v2813_v15 = vrot.slane %v2811_v36, 1  ;;  %v10377_v6 = vpop.f32.mrf.mxu0  ;;  %v1354_v11 = vld [vmem:[#allocation2 + $0x110] sm:$0xe] }
 0x159   : > { %v2820_v44 = vrot.slane %v2818_v4, 1  ;;  %v4125_v34 = vadd.f32 %v10372_v63, %v13560_v53  ;;  %v2806_v52 = vrot.slane %v2804_v23, 1  ;;  %v13841_v42 = vcombine.low %v13814_v27, %v1418_v39  ;;  %v10492_v0 = vpop.f32.mrf.mxu1  ;;  %v13852_v63 = vld [vmem:[#allocation2 + $0x120] sm:$0xf] }
 0x15a   : > { %v13844_v51 = vcombine.low %v13816_v28, %v1419_v19  ;;  %v10375_v49 = vadd.f32 %v10374_v60, %v10373_v26  ;;  %v2288_v10 = vor.u32 %v2287_v14, %v2283_v62  ;;  %v2295_v18 = vor.u32 %v2294_v31, %v2290_v35  ;;  %v10379_v39 = vpop.f32.mrf.mxu0  ;;  %v13854_v19 = vld [vmem:[#allocation2 + $0x128] sm:$0xf]  ;;  %v13856_v26 = vld [vmem:[#allocation2 + $0x124] sm:$0x1]  ;;  %v13858_v62 = vld [vmem:[#allocation2 + $0x12c] sm:$0x1] }
 0x15b   : > { %v13846_v38 = vadd.f32 %v10484_v29, %v4125_v34  ;;  %v2807_v17 = vor.u32 %v2806_v52, %v2802_v48  ;;  %v13849_v36 = vrot.slane %v9524_v13, 1  ;;  %v10494_v14 = vpop.f32.mrf.mxu1  ;;  %v2473_v35 = vrot.slane %v9525_v50, 1 }
 0x15c   : > { %v4130_v4 = vadd.f32 %v10375_v49, %v13560_v53  ;;  %v2814_v31 = vor.u32 %v2813_v15, %v2809_v45  ;;  %v10487_v60 = vadd.f32 %v13791_v22, %v13775_v59  ;;  %v10378_v13 = vadd.f32 %v10377_v6, %v10376_v32  ;;  %v10380_v34 = vpop.f32.mrf.mxu0  ;;  %v12056_v59 = vld [vmem:[#allocation2 + $0x10c] sm:$0x1] }
 0x15d   : > { %16890 = vst [vmem:[#allocation17_spill] sm:$0xff] %v13846_v38  ;;  %v9703_v29 = vcombine.low %v2800_v40, %v2807_v17  ;;  %v2821_v48 = vor.u32 %v2820_v44, %v2816_v55  ;;  %v2825_v23 = vshll.u32 %v13841_v42, 16  ;;  %v2832_v3 = vshll.u32 %v13844_v51, 16  ;;  %v10495_v50 = vpop.f32.mrf.mxu1  ;;  %v13895_v38 = vld [vmem:[#allocation2 + $0x134] sm:$0x1] }
 0x15e   : > { %4490 = vmatmul.mubr.bf16.gmra.mxu0 %v9691_v41  ;;  %v9700_v52 = vcombine.low %v2288_v10, %v2295_v18  ;;  %v13864_v49 = vadd.f32 %v10487_v60, %v4130_v4  ;;  %v4133_v41 = vadd.f32 %v10378_v13, %v13560_v53  ;;  %v10490_v45 = vadd.f32 %v10489_v57, %v13803_v25  ;;  %v10382_v40 = vpop.f32.mrf.mxu0  ;;  %v367_v60 = vld [vmem:[#allocation2 + $0x138] sm:$0x1]  ;;  %v489_v13 = vld [vmem:[#allocation2 + $0x13c] sm:$0x1] }
 0x15f   : > { %4651 = vmatmul.mubr.bf16.gmra.mxu1 %v9693_v12  ;;  %4497 = vmatprep.mubr.bf16.mxu0 %v9701_v21  ;;  %v9526_v22 = vcombine.low %v1353_v37, %v12056_v59  ;;  %v12057_v12 = vld [vmem:[#allocation2 + $0x114] sm:$0x1]  ;;  %v2823_v55 = vshrl.u32 %v13841_v42, 16  ;;  %v2830_v32 = vshrl.u32 %v13844_v51, 16  ;;  %v13874_v44 = vcombine.low %v13852_v63, %v13856_v26  ;;  %v13883_v51 = vld [vmem:[#allocation2 + $0x12c] sm:$0x1] }
 0x160   : > { %16891 = vst [vmem:[#allocation25_spill] sm:$0xff] %v13864_v49  ;;  %4658 = vmatprep.mubr.bf16.mxu1 %v9703_v29  ;;  %v9527_v21 = vcombine.low %v1354_v11, %v12057_v12  ;;  %v13870_v15 = vadd.f32 %v10490_v45, %v4133_v41  ;;  %v13878_v25 = vcombine.low %v13854_v19, %v13858_v62  ;;  %v10383_v18 = vpop.f32.mrf.mxu0  ;;  %v2827_v37 = vrot.slane %v2825_v23, 1  ;;  %v10497_v29 = vpop.f32.mrf.mxu1  ;;  %v16893_v41 = vld [vmem:[#allocation9_spill] sm:$0xff] }
 0x161   : > { %v10381_v57 = vadd.f32 %v10380_v34, %v10379_v39  ;;  %v9702_v6 = vcombine.low %v13733_v47, %v13798_v56  ;;  %v9710_v10 = vcombine.low %v13849_v36, %v2473_v35  ;;  %v9712_v42 = vcombine.low %v2814_v31, %v2821_v48  ;;  %v16895_v34 = vld [vmem:[#allocation18_spill] sm:$0xff]  ;;  %v1355_v47 = vld [vmem:[#allocation2 + $0x118] sm:$0xe] }
 0x162   : > { %16892 = vst [vmem:[#allocation27_spill] sm:$0xff] %v13870_v15  ;;  %v2834_v11 = vrot.slane %v2832_v3, 1  ;;  %v2839_v17 = vshll.u32 %v13874_v44, 16  ;;  %v2846_v4 = vshll.u32 %v13878_v25, 16  ;;  %v16894_v39 = vshrl.u32 %v16893_v41, 16  ;;  %v16896_v48 = vld [vmem:[#allocation10_spill] sm:$0xff]  ;;  %v10498_v49 = vpop.f32.mrf.mxu1 }
 0x163   : > { %v1356_v56 = vld [vmem:[#allocation2 + $0x120] sm:$0xe]  ;;  %v4138_v36 = vadd.f32 %v10381_v57, %v13560_v53  ;;  %v10493_v35 = vadd.f32 %v10492_v0, %v13837_v43  ;;  %v10384_v31 = vadd.f32 %v10383_v18, %v10382_v40  ;;  %v16897_v23 = vshrl.u32 %v16896_v48, 16  ;;  %v16898_v3 = vld [vmem:[#allocation19_spill] sm:$0xff]  ;;  %v13902_v0 = vld [vmem:[#allocation2 + $0x130] sm:$0xf]  ;;  %v10385_v40 = vpop.f32.mrf.mxu0 }
 0x164   : > { %v2302_v45 = vor.u32 %v16895_v34, %v16894_v39  ;;  %v2474_v12 = vrot.slane %v9526_v22, 1  ;;  %v2475_v1 = vrot.slane %v9527_v21, 1  ;;  %v10496_v15 = vadd.f32 %v10495_v50, %v10494_v14  ;;  %v12060_v48 = vld [vmem:[#allocation2 + $0x130] sm:$0xf] }
 0x165   : > { %v2309_v59 = vor.u32 %v16898_v3, %v16897_v23  ;;  %v2837_v41 = vshrl.u32 %v13874_v44, 16  ;;  %v2844_v57 = vshrl.u32 %v13878_v25, 16  ;;  %v13899_v39 = vadd.f32 %v10493_v35, %v4138_v36 }
 0x166   : > { %4498 = vmatmul.mubr.bf16.gmra.mxu0 %v9700_v52  ;;  %v4141_v43 = vadd.f32 %v10384_v31, %v13560_v53  ;;  %v13904_v52 = vld [vmem:[#allocation2 + $0x134] sm:$0x1]  ;;  %v2828_v22 = vor.u32 %v2827_v37, %v2823_v55  ;;  %v2835_v14 = vor.u32 %v2834_v11, %v2830_v32  ;;  %v2841_v50 = vrot.slane %v2839_v17, 1  ;;  %v16899_v32 = vld [vmem:[#allocation23_spill] sm:$0xff]  ;;  %v10386_v11 = vpop.f32.mrf.mxu0 }
 0x167   : > { %4659 = vmatmul.mubr.bf16.gmra.mxu1 %v9702_v6  ;;  %4505 = vmatprep.mubr.bf16.mxu0 %v9710_v10  ;;  %v2848_v21 = vrot.slane %v2846_v4, 1  ;;  %v10500_v6 = vpop.f32.mrf.mxu1  ;;  %v12058_v10 = vld [vmem:[#allocation2 + $0x128] sm:$0xf]  ;;  %v368_v18 = vsel %vm12383_vm2, 0, %v367_v60  ;;  %v490_v34 = vsel %vm12393_vm4, 0, %v489_v13  ;;  %v9709_v36 = vcombine.low %v2302_v45, %v2309_v59  ;;  %v16901_v13 = vld [vmem:[#allocation14_spill] sm:$0xff] }
 0x168   : > { %4666 = vmatprep.mubr.bf16.mxu1 %v9712_v42  ;;  %v13907_v44 = vcombine.low %v12058_v10, %v13883_v51  ;;  %v13909_v25 = vadd.f32 %v10496_v15, %v4141_v43  ;;  %v12059_v42 = vld [vmem:[#allocation2 + $0x11c] sm:$0x1]  ;;  %v9529_v37 = vcombine.low %v1356_v56, %v16899_v32  ;;  %369 = vst [vmem:[#allocation2 + $0x138] sm:$0x1] %v368_v18  ;;  %491 = vst [vmem:[#allocation2 + $0x13c] sm:$0x1] %v490_v34 }
 0x169   : > { %v9528_v55 = vcombine.low %v1355_v47, %v12059_v42  ;;  %v10499_v17 = vadd.f32 %v10498_v49, %v10497_v29  ;;  %v16900_v4 = vshll.u32 %v13516_v7, 16  ;;  %v9711_v15 = vcombine.low %v13741_v33, %v13755_v16  ;;  %v16903_v47 = vld [vmem:[#allocation26_spill] sm:$0xff]  ;;  %v10388_v29 = vpop.f32.mrf.mxu0  ;;  %v10501_v3 = vpop.f32.mrf.mxu1  ;;  %v16904_v16 = vld [vmem:[#allocation28_spill] sm:$0xff]  ;;  %v1357_v34 = vld [vmem:[#allocation2 + $0x128] sm:$0xe] }
 0x16a   : > { %v9719_v31 = vcombine.low %v2474_v12, %v2475_v1  ;;  %v10387_v60 = vadd.f32 %v10386_v11, %v10385_v40  ;;  %v13921_v58 = vcombine.low %v12060_v48, %v13895_v38  ;;  %v16902_v45 = vshrl.u32 %v16901_v13, 16  ;;  %v16906_v12 = vld [vmem:[#allocation35_spill] sm:$0xff]  ;;  %v1358_v32 = vld [vmem:[#allocation2 + $0x130] sm:$0xe] }
 0x16b   : > { %v2336_v35 = vrot.slane %v16900_v4, 1  ;;  %v9721_v23 = vcombine.low %v2828_v22, %v2835_v14  ;;  %v13928_v49 = vcombine.low %v13902_v0, %v13904_v52  ;;  %v2339_v59 = vshrl.u32 %v13907_v44, 16  ;;  %v10389_v42 = vpop.f32.mrf.mxu0 }
 0x16c   : > { %v2316_v56 = vor.u32 %v16903_v47, %v16902_v45  ;;  %v2341_v33 = vshll.u32 %v13907_v44, 16  ;;  %v16905_v1 = vshrl.u32 %v16904_v16, 16  ;;  %v4146_v40 = vadd.f32 %v10387_v60, %v13560_v53  ;;  %v10503_v60 = vpop.f32.mrf.mxu1 }
 0x16d   : > { %v2476_v10 = vrot.slane %v9528_v55, 1  ;;  %v2477_v18 = vrot.slane %v9529_v37, 1  ;;  %v2842_v22 = vor.u32 %v2841_v50, %v2837_v41  ;;  %v2849_v14 = vor.u32 %v2848_v21, %v2844_v57 }
 0x16e   : > { %v2323_v43 = vor.u32 %v16906_v12, %v16905_v1  ;;  %4506 = vmatmul.mubr.bf16.gmra.mxu0 %v9709_v36  ;;  %v13936_v11 = vadd.f32 %v10499_v17, %v4146_v40  ;;  %v10390_v4 = vadd.f32 %v10389_v42, %v10388_v29  ;;  %v10502_v48 = vadd.f32 %v10501_v3, %v10500_v6  ;;  %v10504_v17 = vpop.f32.mrf.mxu1  ;;  %v10391_v1 = vpop.f32.mrf.mxu0  ;;  %v1424_v12 = vld [vmem:[#allocation2 + $0x10] sm:$0xe] }
 0x16f   : > { %4667 = vmatmul.mubr.bf16.gmra.mxu1 %v9711_v15  ;;  %4513 = vmatprep.mubr.bf16.mxu0 %v9719_v31  ;;  %v2348_v13 = vshll.u32 %v13921_v58, 16  ;;  %v2853_v45 = vshll.u32 %v13928_v49, 16  ;;  %v13940_v55 = vld [vmem:[#allocation2 + $0x138] sm:$0xf]  ;;  %v13942_v41 = vld [vmem:[#allocation2 + $0x13c] sm:$0x1]  ;;  %v9720_v50 = vcombine.low %v13814_v27, %v13816_v28  ;;  %v9728_v21 = vcombine.low %v2476_v10, %v2477_v18 }
 0x170   : > { %4674 = vmatprep.mubr.bf16.mxu1 %v9721_v23  ;;  %v9718_v36 = vcombine.low %v2316_v56, %v2323_v43  ;;  %v4149_v57 = vadd.f32 %v10390_v4, %v13560_v53  ;;  %v9530_v37 = vcombine.low %v1357_v34, %v13883_v51  ;;  %v9563_v6 = vcombine.low %v13940_v55, %v13942_v41  ;;  %v11721_v23 = vld [vmem:[%s16690_s2 + $0x78] sm:$0xff]   ;;  %v13959_v28 = vld [vmem:[#allocation2 + $0x20] sm:$0xe]  ;;  %v16907_v10 = vld [vmem:[#allocation36_spill] sm:$0xff]  ;;  %v10392_v4 = vpop.f32.mrf.mxu0 }
 0x171   : > { %v9730_v15 = vcombine.low %v2842_v22, %v2849_v14  ;;  %v9531_v31 = vcombine.low %v1358_v32, %v13895_v38  ;;  %v10505_v56 = vadd.f32 %v10504_v17, %v10503_v60  ;;  %v11722_v27 = vld [vmem:[%s16690_s2 + $0x38] sm:$0xff]   ;;  %v2851_v51 = vshrl.u32 %v13928_v49, 16  ;;  %v10506_v38 = vpop.f32.mrf.mxu1  ;;  %10799 = vmatprep.subr.bf16.mxu1 %v11721_v23  ;;  %v16909_v22 = vld [vmem:[#allocation20_spill] sm:$0xff]  ;;  %v12061_v23 = vld [vmem:[#allocation2 + $0x24] sm:$0x1] }
 0x172   : > { %v13951_v47 = vadd.f32 %v10502_v48, %v4149_v57  ;;  %v2855_v29 = vrot.slane %v2853_v45, 1  ;;  %v2858_v3 = vshrl.u32 %v9563_v6, 16  ;;  %v2860_v16 = vshll.u32 %v9563_v6, 16  ;;  %v1425_v43 = vld [vmem:[#allocation2 + $0x18] sm:$0xe]  ;;  %10800 = vmatpush3.bf16.msra.mxu1 %v11722_v27  ;;  %v10394_v17 = vpop.f32.mrf.mxu0 }
 0x173   : > { %v2343_v40 = vrot.slane %v2341_v33, 1  ;;  %v16908_v18 = vshrl.u32 %v16907_v10, 16  ;;  %v16910_v34 = vshrl.u32 %v13516_v7, 16  ;;  %v10507_v49 = vpop.f32.mrf.mxu1  ;;  %v2478_v48 = vrot.slane %v9530_v37, 1  ;;  %v1427_v10 = vld [vmem:[#allocation2 + $0x28] sm:$0xe] }
 0x174   : > { %v2862_v32 = vrot.slane %v2860_v16, 1  ;;  %v2479_v45 = vrot.slane %v9531_v31, 1  ;;  %v10393_v60 = vadd.f32 %v10392_v4, %v10391_v1  ;;  %v2346_v57 = vshrl.u32 %v13921_v58, 16  ;;  %v12063_v31 = vld [vmem:[#allocation2 + $0x1c] sm:$0x1] }
 0x175   : > { %v2330_v14 = vor.u32 %v16909_v22, %v16908_v18  ;;  %v2337_v42 = vor.u32 %v2336_v35, %v16910_v34  ;;  %v2350_v33 = vrot.slane %v2348_v13, 1  ;;  %v9566_v7 = vcombine.low %v13959_v28, %v12061_v23  ;;  %v10509_v16 = vpop.f32.mrf.mxu1  ;;  %v10395_v13 = vpop.f32.mrf.mxu0  ;;  %v1429_v1 = vld [vmem:[#allocation2 + $0x38] sm:$0xe]  ;;  %v1430_v18 = vld [vmem:[#allocation2 + $0x40] sm:$0xe] }
 0x176   : > { %4514 = vmatmul.mubr.bf16.gmra.mxu0 %v9718_v36  ;;  %v2856_v36 = vor.u32 %v2855_v29, %v2851_v51  ;;  %v2863_v6 = vor.u32 %v2862_v32, %v2858_v3  ;;  %v4154_v35 = vadd.f32 %v10393_v60, %v13560_v53  ;;  %v9565_v58 = vcombine.low %v1425_v43, %v12063_v31  ;;  %v1428_v3 = vld [vmem:[#allocation2 + $0x30] sm:$0xe]  ;;  %v1431_v53 = vld [vmem:[#allocation2 + $0x48] sm:$0xe]  ;;  %v1432_v32 = vld [vmem:[#allocation2 + $0x60] sm:$0xe] }
 0x177   : > { %4675 = vmatmul.mubr.bf16.gmra.mxu1 %v9720_v50  ;;  %4521 = vmatprep.mubr.bf16.mxu0 %v9728_v21  ;;  %v9727_v27 = vcombine.low %v2330_v14, %v2337_v42  ;;  %v9729_v50 = vcombine.low %v13852_v63, %v13854_v19  ;;  %v12062_v21 = vld [vmem:[#allocation2 + $0x14] sm:$0x1]  ;;  %v10396_v29 = vadd.f32 %v10395_v13, %v10394_v17  ;;  %v10510_v22 = vpop.f32.mrf.mxu1  ;;  %v10397_v14 = vpop.f32.mrf.mxu0  ;;  %v1433_v63 = vld [vmem:[#allocation2 + $0x68] sm:$0xe]  ;;  %v12064_v19 = vld [vmem:[#allocation2 + $0x2c] sm:$0x1] }
 0x178   : > { %4682 = vmatprep.mubr.bf16.mxu1 %v9730_v15  ;;  %v9564_v37 = vcombine.low %v1424_v12, %v12062_v21  ;;  %v9737_v15 = vcombine.low %v2478_v48, %v2479_v45  ;;  %v13972_v51 = vadd.f32 %v10505_v56, %v4154_v35  ;;  %v10508_v28 = vadd.f32 %v10507_v49, %v10506_v38  ;;  %v13977_v43 = vld [vmem:[%s16691_s3] ss:$0 sm:$0xff]  ;;  %v12066_v23 = vld [vmem:[#allocation2 + $0x34] sm:$0x1]  ;;  %v12068_v21 = vld [vmem:[#allocation2 + $0x44] sm:$0x1] }
 0x179   : > { %v9739_v34 = vcombine.low %v2856_v36, %v2863_v6  ;;  %v10511_v42 = vadd.f32 %v10510_v22, %v10509_v16  ;;  %v9567_v12 = vcombine.low %v1427_v10, %v12064_v19  ;;  %v4157_v56 = vadd.f32 %v13977_v43, %v10396_v29  ;;  %v10512_v4 = vpop.f32.mrf.mxu1  ;;  %v10398_v60 = vpop.f32.mrf.mxu0  ;;  %v12067_v16 = vld [vmem:[#allocation2 + $0x3c] sm:$0x1]  ;;  %v12069_v31 = vld [vmem:[#allocation2 + $0x4c] sm:$0x1]  ;;  %v11724_v22 = vld [vmem:[%s16690_s2 + $0x30] sm:$0xff]  }
 0x17a   : > { %v2344_v38 = vor.u32 %v2343_v40, %v2339_v59  ;;  %v2351_v49 = vor.u32 %v2350_v33, %v2346_v57  ;;  %v2960_v48 = vrot.slane %v9564_v37, 1  ;;  %v2961_v45 = vrot.slane %v9565_v58, 1  ;;  %v12071_v37 = vld [vmem:[#allocation2 + $0x6c] sm:$0x1] }
 0x17b   : > { %v2962_v36 = vrot.slane %v9566_v7, 1  ;;  %v13982_v6 = vadd.f32 %v10508_v28, %v4157_v56  ;;  %v10399_v17 = vadd.f32 %v10398_v60, %v10397_v14  ;;  %v9568_v35 = vcombine.low %v1428_v3, %v12066_v23  ;;  %v10400_v59 = vpop.f32.mrf.mxu0  ;;  %v10513_v40 = vpop.f32.mrf.mxu1  ;;  %v12070_v7 = vld [vmem:[#allocation2 + $0x64] sm:$0x1] }
 0x17c   : > { %v9569_v10 = vcombine.low %v1429_v1, %v12067_v16  ;;  %v9571_v44 = vcombine.low %v1431_v53, %v12069_v31  ;;  %v2963_v57 = vrot.slane %v9567_v12, 1  ;;  %v9573_v58 = vcombine.low %v1433_v63, %v12071_v37  ;;  %v11723_v53 = vld [vmem:[%s16690_s2 + $0x70] sm:$0xff]  }
 0x17d   : > { %v4162_v33 = vadd.f32 %v13977_v43, %v10399_v17  ;;  %v9736_v13 = vcombine.low %v2344_v38, %v2351_v49  ;;  %v10401_v29 = vpop.f32.mrf.mxu0  ;;  %v9738_v3 = vcombine.low %v13902_v0, %v13940_v55  ;;  %10801 = vmatprep.subr.bf16.mxu1 %v11723_v53  ;;  %v10515_v55 = vpop.f32.mrf.mxu1  ;;  %v12072_v37 = vld [vmem:[#allocation2 + $0x74] sm:$0x1] }
 0x17e   : > { %4522 = vmatmul.mubr.bf16.gmra.mxu0 %v9727_v27  ;;  %v9570_v27 = vcombine.low %v1430_v18, %v12068_v21  ;;  %v10402_v28 = vadd.f32 %v10401_v29, %v10400_v59  ;;  %v10514_v18 = vadd.f32 %v10513_v40, %v10512_v4  ;;  %v2965_v14 = vrot.slane %v9569_v10, 1  ;;  %10802 = vmatpush3.bf16.msra.mxu1 %v11724_v22  ;;  %v1434_v10 = vld [vmem:[#allocation2 + $0x70] sm:$0xe]  ;;  %v1435_v21 = vld [vmem:[#allocation2 + $0x78] sm:$0xe] }
 0x17f   : > { %4683 = vmatmul.mubr.bf16.gmra.mxu1 %v9729_v50  ;;  %4529 = vmatprep.mubr.bf16.mxu0 %v9737_v15  ;;  %v9572_v50 = vcombine.low %v1432_v32, %v12070_v7  ;;  %v9605_v15 = vcombine.low %v2960_v48, %v2961_v45  ;;  %v13987_v1 = vadd.f32 %v10511_v42, %v4162_v33  ;;  %v2967_v63 = vrot.slane %v9571_v44, 1  ;;  %v10403_v42 = vpop.f32.mrf.mxu0  ;;  %v10516_v4 = vpop.f32.mrf.mxu1  ;;  %v1436_v33 = vld [vmem:[#allocation2 + $0x80] sm:$0xe]  ;;  %v12075_v22 = vld [vmem:[#allocation2 + $0x8c] sm:$0x1] }
 0x180   : > { %4690 = vmatprep.mubr.bf16.mxu1 %v9739_v34  ;;  %v2964_v34 = vrot.slane %v9568_v35, 1  ;;  %v2966_v32 = vrot.slane %v9570_v27, 1  ;;  %v4165_v19 = vadd.f32 %v13977_v43, %v10402_v28  ;;  %v2969_v0 = vrot.slane %v9573_v58, 1 }
 0x181   : > { %v2968_v12 = vrot.slane %v9572_v50, 1  ;;  %v10404_v38 = vpop.f32.mrf.mxu0  ;;  %v10517_v49 = vadd.f32 %v10516_v4, %v10515_v55  ;;  %v9614_v48 = vcombine.low %v2962_v36, %v2963_v57  ;;  %v10518_v60 = vpop.f32.mrf.mxu1  ;;  %v1437_v36 = vld [vmem:[#allocation2 + $0x88] sm:$0xe]  ;;  %v9574_v58 = vcombine.low %v1434_v10, %v12072_v37  ;;  %v1440_v10 = vld [vmem:[#allocation2 + $0xb0] sm:$0xe] }
 0x182   : > { %v13996_v56 = vadd.f32 %v10514_v18, %v4165_v19  ;;  %v10405_v45 = vadd.f32 %v10404_v38, %v10403_v42  ;;  %v9623_v17 = vcombine.low %v2964_v34, %v2965_v14  ;;  %v9632_v50 = vcombine.low %v2966_v32, %v2967_v63  ;;  %v12074_v18 = vld [vmem:[#allocation2 + $0x84] sm:$0x1]  ;;  %v11725_v55 = vld [vmem:[%s16690_s2 + $0x68] sm:$0xff]  }
 0x183   : > { %v10406_v23 = vpop.f32.mrf.mxu0  ;;  %v10519_v16 = vpop.f32.mrf.mxu1  ;;  %v9641_v28 = vcombine.low %v2968_v12, %v2969_v0  ;;  %v9576_v53 = vcombine.low %v1436_v33, %v12074_v18  ;;  %v9577_v34 = vcombine.low %v1437_v36, %v12075_v22  ;;  %v11726_v32 = vld [vmem:[%s16690_s2 + $0x28] sm:$0xff]   ;;  %10803 = vmatprep.subr.bf16.mxu1 %v11725_v55  ;;  %v2970_v12 = vrot.slane %v9574_v58, 1  ;;  %v12077_v33 = vld [vmem:[#allocation2 + $0x9c] sm:$0x1]  ;;  %v1442_v55 = vld [vmem:[#allocation2 + $0xc0] sm:$0xe] }
 0x184   : > { %v4170_v35 = vadd.f32 %v13977_v43, %v10405_v45  ;;  %v10520_v59 = vadd.f32 %v10519_v16, %v10518_v60  ;;  %10804 = vmatpush3.bf16.msra.mxu1 %v11726_v32  ;;  %v1438_v60 = vld [vmem:[#allocation2 + $0x90] sm:$0xe]  ;;  %v12079_v58 = vld [vmem:[#allocation2 + $0xbc] sm:$0x1]  ;;  %v1443_v32 = vld [vmem:[#allocation2 + $0xc8] sm:$0xe] }
 0x185   : > { %v10407_v27 = vpop.f32.mrf.mxu0  ;;  %v10521_v57 = vpop.f32.mrf.mxu1  ;;  %v2973_v45 = vrot.slane %v9577_v34, 1 }
 0x186   : > { %4530 = vmatmul.mubr.bf16.gmra.mxu0 %v9736_v13  ;;  %v13999_v31 = vadd.f32 %v10517_v49, %v4170_v35  ;;  %v10408_v44 = vadd.f32 %v10407_v27, %v10406_v23  ;;  %v12073_v13 = vld [vmem:[#allocation2 + $0x7c] sm:$0x1] }
 0x187   : > { %4691 = vmatmul.mubr.bf16.gmra.mxu1 %v9738_v3  ;;  %11287 = vmatprep.mubr.bf16.mxu0 %v9605_v15  ;;  %v10409_v7 = vpop.f32.mrf.mxu0  ;;  %v9575_v15 = vcombine.low %v1435_v21, %v12073_v13  ;;  %v10522_v3 = vpop.f32.mrf.mxu1  ;;  %v1441_v21 = vld [vmem:[#allocation2 + $0xb8] sm:$0xe] }
 0x188   : > { %v4173_v40 = vadd.f32 %v13977_v43, %v10408_v44  ;;  %v10523_v19 = vadd.f32 %v10522_v3, %v10521_v57  ;;  %v9581_v13 = vcombine.low %v1441_v21, %v12079_v58 }
 0x189   : > { %v10410_v14 = vpop.f32.mrf.mxu0  ;;  %v10524_v42 = vpop.f32.mrf.mxu1  ;;  %v2971_v0 = vrot.slane %v9575_v15, 1 }
 0x18a   : > { %v14002_v29 = vadd.f32 %v10520_v59, %v4173_v40  ;;  %v10411_v63 = vadd.f32 %v10410_v14, %v10409_v7  ;;  %v12076_v59 = vld [vmem:[#allocation2 + $0x94] sm:$0x1] }
 0x18b   : > { %v10412_v4 = vpop.f32.mrf.mxu0  ;;  %v10525_v49 = vpop.f32.mrf.mxu1  ;;  %v9650_v44 = vcombine.low %v2970_v12, %v2971_v0  ;;  %v9578_v40 = vcombine.low %v1438_v60, %v12076_v59  ;;  %v1444_v12 = vld [vmem:[#allocation2 + $0xd0] sm:$0xe]  ;;  %v1445_v0 = vld [vmem:[#allocation2 + $0xd8] sm:$0xe]  ;;  %v12083_v59 = vld [vmem:[#allocation2 + $0xdc] sm:$0x1] }
 0x18c   : > { %v4178_v38 = vadd.f32 %v13977_v43, %v10411_v63  ;;  %v10526_v27 = vadd.f32 %v10525_v49, %v10524_v42 }
 0x18d   : > { %v10413_v23 = vpop.f32.mrf.mxu0 }
 0x18e   : > { %11288 = vmatmul.mubr.bf16.vlgmr.msra.gmra.mxu0 %v9614_v48  ;;  %v2972_v48 = vrot.slane %v9576_v53, 1  ;;  %v14011_v35 = vadd.f32 %v10523_v19, %v4178_v38  ;;  %v10414_v16 = vadd.f32 %v10413_v23, %v10412_v4  ;;  %v2974_v53 = vrot.slane %v9578_v40, 1 }
 0x18f   : > { %11291 = vmatprep.mubr.bf16.mxu0 %v9623_v17  ;;  %v1439_v17 = vld [vmem:[#allocation2 + $0x98] sm:$0xe]  ;;  %v2977_v19 = vrot.slane %v9581_v13, 1  ;;  %v9585_v40 = vcombine.low %v1445_v0, %v12083_v59 }
 0x190   : > { %v9579_v36 = vcombine.low %v1439_v17, %v12077_v33  ;;  %v4181_v57 = vadd.f32 %v13977_v43, %v10414_v16  ;;  %v9659_v7 = vcombine.low %v2972_v48, %v2973_v45  ;;  %v10527_v15 = vpop.f32.mrf.mxu1  ;;  %v12080_v45 = vld [vmem:[#allocation2 + $0xc4] sm:$0x1]  ;;  %v12081_v17 = vld [vmem:[#allocation2 + $0xcc] sm:$0x1] }
 0x191   : > { %v9582_v60 = vcombine.low %v1442_v55, %v12080_v45  ;;  %v9583_v23 = vcombine.low %v1443_v32, %v12081_v17  ;;  %v11727_v33 = vld [vmem:[%s16690_s2 + $0x60] sm:$0xff]   ;;  %v12087_v17 = vld [vmem:[#allocation2 + $0x10c] sm:$0x1] }
 0x192   : > { %v14014_v3 = vadd.f32 %v10526_v27, %v4181_v57  ;;  %v10528_v18 = vpop.f32.mrf.mxu1  ;;  %v2975_v22 = vrot.slane %v9579_v36, 1  ;;  %v12082_v27 = vld [vmem:[#allocation2 + $0xd4] sm:$0x1]  ;;  %v11728_v36 = vld [vmem:[%s16690_s2 + $0x20] sm:$0xff]   ;;  %10805 = vmatprep.subr.bf16.mxu1 %v11727_v33 }
 0x193   : > { %v10529_v34 = vadd.f32 %v10528_v18, %v10527_v15  ;;  %v2979_v58 = vrot.slane %v9583_v23, 1  ;;  %v1446_v15 = vld [vmem:[#allocation2 + $0xe0] sm:$0xe]  ;;  %10806 = vmatpush3.bf16.msra.mxu1 %v11728_v36  ;;  %v12084_v55 = vld [vmem:[#allocation2 + $0xe4] sm:$0x1] }
 0x194   : > { %v10530_v42 = vpop.f32.mrf.mxu1  ;;  %v9668_v48 = vcombine.low %v2974_v53, %v2975_v22  ;;  %v2981_v53 = vrot.slane %v9585_v40, 1  ;;  %v9586_v32 = vcombine.low %v1446_v15, %v12084_v55  ;;  %v12086_v45 = vld [vmem:[#allocation2 + $0x104] sm:$0x1] }
 0x196   : > { %11292 = vmatmul.mubr.bf16.gmra.mxu0 %v9632_v50  ;;  %v12078_v50 = vld [vmem:[#allocation2 + $0xb4] sm:$0x1]  ;;  %v10531_v49 = vpop.f32.mrf.mxu1 }
 0x197   : > { %11295 = vmatprep.mubr.bf16.mxu0 %v9641_v28  ;;  %v9580_v37 = vcombine.low %v1440_v10, %v12078_v50  ;;  %v10415_v28 = vpop.f32.mrf.mxu0  ;;  %v10532_v50 = vadd.f32 %v10531_v49, %v10530_v42 }
 0x199   : > { %v2976_v14 = vrot.slane %v9580_v37, 1  ;;  %v10416_v63 = vpop.f32.mrf.mxu0  ;;  %v2978_v37 = vrot.slane %v9582_v60, 1 }
 0x19a   : > { %v10417_v4 = vadd.f32 %v10416_v63, %v10415_v28  ;;  %v1447_v28 = vld [vmem:[#allocation2 + $0xe8] sm:$0xe]  ;;  %v12085_v63 = vld [vmem:[#allocation2 + $0xec] sm:$0x1] }
 0x19b   : > { %v10418_v38 = vpop.f32.mrf.mxu0  ;;  %v9677_v10 = vcombine.low %v2976_v14, %v2977_v19  ;;  %v1448_v19 = vld [vmem:[#allocation2 + $0x100] sm:$0xe]  ;;  %v9587_v42 = vcombine.low %v1447_v28, %v12085_v63  ;;  %v12088_v28 = vld [vmem:[#allocation2 + $0x114] sm:$0x1] }
 0x19c   : > { %v4186_v16 = vadd.f32 %v13977_v43, %v10417_v4  ;;  %v10533_v22 = vpop.f32.mrf.mxu1  ;;  %v9588_v60 = vcombine.low %v1448_v19, %v12086_v45 }
 0x19d   : > { %v10419_v21 = vpop.f32.mrf.mxu0 }
 0x19e   : > { %11296 = vmatmul.mubr.bf16.gmra.mxu0 %v9650_v44  ;;  %v9584_v44 = vcombine.low %v1444_v12, %v12082_v27  ;;  %v14023_v57 = vadd.f32 %v10529_v34, %v4186_v16  ;;  %v1449_v34 = vld [vmem:[#allocation2 + $0x108] sm:$0xe]  ;;  %v10534_v4 = vpop.f32.mrf.mxu1  ;;  %v9686_v12 = vcombine.low %v2978_v37, %v2979_v58  ;;  %v2982_v16 = vrot.slane %v9586_v32, 1  ;;  %v1452_v37 = vld [vmem:[#allocation2 + $0x120] sm:$0xe] }
 0x19f   : > { %11299 = vmatprep.mubr.bf16.mxu0 %v9659_v7  ;;  %v10420_v7 = vadd.f32 %v10419_v21, %v10418_v38  ;;  %v10535_v0 = vadd.f32 %v10534_v4, %v10533_v22  ;;  %v9589_v23 = vcombine.low %v1449_v34, %v12087_v17  ;;  %v2984_v40 = vrot.slane %v9588_v60, 1  ;;  %v1453_v58 = vld [vmem:[#allocation2 + $0x128] sm:$0xe]  ;;  %v12089_v34 = vld [vmem:[#allocation2 + $0x11c] sm:$0x1] }
 0x1a0   : > { %v2980_v18 = vrot.slane %v9584_v44, 1  ;;  %v10421_v49 = vpop.f32.mrf.mxu0  ;;  %v1450_v44 = vld [vmem:[#allocation2 + $0x110] sm:$0xe]  ;;  %v9592_v63 = vcombine.low %v1452_v37, %v13856_v26  ;;  %v11729_v4 = vld [vmem:[%s16690_s2 + $0x58] sm:$0xff]  }
 0x1a1   : > { %v4189_v13 = vadd.f32 %v13977_v43, %v10420_v7  ;;  %v2985_v33 = vrot.slane %v9589_v23, 1  ;;  %v1451_v7 = vld [vmem:[#allocation2 + $0x118] sm:$0xe]  ;;  %10807 = vmatprep.subr.bf16.mxu1 %v11729_v4  ;;  %v1454_v60 = vld [vmem:[#allocation2 + $0x130] sm:$0xe] }
 0x1a2   : > { %v9695_v38 = vcombine.low %v2980_v18, %v2981_v53  ;;  %v10422_v21 = vpop.f32.mrf.mxu0  ;;  %v9590_v18 = vcombine.low %v1450_v44, %v12088_v28  ;;  %v9591_v55 = vcombine.low %v1451_v7, %v12089_v34  ;;  %v2988_v26 = vrot.slane %v9592_v63, 1  ;;  %v1455_v17 = vld [vmem:[#allocation2 + $0x138] sm:$0xe]  ;;  %v11731_v34 = vld [vmem:[%s16690_s2 + $0x50] sm:$0xff]  }
 0x1a3   : > { %v14026_v14 = vadd.f32 %v10532_v50, %v4189_v13  ;;  %v10423_v27 = vadd.f32 %v10422_v21, %v10421_v49  ;;  %v9713_v32 = vcombine.low %v2984_v40, %v2985_v33  ;;  %v9594_v44 = vcombine.low %v1454_v60, %v13904_v52  ;;  %v11733_v60 = vld [vmem:[%s16690_s2 + $0xf8] sm:$0xff]  }
 0x1a4   : > { %v10424_v59 = vpop.f32.mrf.mxu0  ;;  %v2986_v49 = vrot.slane %v9590_v18, 1  ;;  %10911 = vmatprep.subr.bf16.mxu0 %v11733_v60 }
 0x1a5   : > { %v4194_v50 = vadd.f32 %v13977_v43, %v10423_v27 }
 0x1a6   : > { %11300 = vmatmul.mubr.bf16.gmra.mxu0 %v9668_v48  ;;  %v10536_v48 = vpop.f32.mrf.mxu1  ;;  %v10425_v15 = vpop.f32.mrf.mxu0 }
 0x1a7   : > { %11303 = vmatprep.mubr.bf16.mxu0 %v9677_v10  ;;  %v2983_v10 = vrot.slane %v9587_v42, 1  ;;  %v14029_v53 = vadd.f32 %v10535_v0, %v4194_v50  ;;  %v10426_v22 = vadd.f32 %v10425_v15, %v10424_v59  ;;  %v9593_v42 = vcombine.low %v1453_v58, %v13858_v62 }
 0x1a8   : > { %v10537_v36 = vpop.f32.mrf.mxu1  ;;  %v9595_v59 = vcombine.low %v1455_v17, %v13942_v41  ;;  %v2990_v58 = vrot.slane %v9594_v44, 1 }
 0x1a9   : > { %v9704_v13 = vcombine.low %v2982_v16, %v2983_v10  ;;  %v10538_v19 = vadd.f32 %v10537_v36, %v10536_v48  ;;  %v4197_v0 = vadd.f32 %v13977_v43, %v10426_v22  ;;  %v2987_v48 = vrot.slane %v9591_v55, 1  ;;  %v11732_v55 = vld [vmem:[%s16690_s2 + $0x10] sm:$0xff]  }
 0x1aa   : > { %v2989_v62 = vrot.slane %v9593_v42, 1 }
 0x1ab   : > { %v9722_v21 = vcombine.low %v2986_v49, %v2987_v48 }
 0x1ac   : > { %v9731_v33 = vcombine.low %v2988_v26, %v2989_v62 }
 0x1ad   : > { %v10539_v45 = vpop.f32.mrf.mxu1 }
 0x1ae   : > { %11304 = vmatmul.mubr.bf16.gmra.mxu0 %v9686_v12  ;;  %v11730_v12 = vld [vmem:[%s16690_s2 + $0x18] sm:$0xff]  }
 0x1af   : > { %11307 = vmatprep.mubr.bf16.mxu0 %v9695_v38  ;;  %v14040_v38 = vadd.f32 %v10538_v19, %v4197_v0  ;;  %10808 = vmatpush3.bf16.msra.mxu1 %v11730_v12  ;;  %v10540_v23 = vpop.f32.mrf.mxu1 }
 0x1b0   : > { %v10427_v16 = vpop.f32.mrf.mxu0  ;;  %v10541_v10 = vadd.f32 %v10540_v23, %v10539_v45  ;;  %10809 = vmatprep.subr.bf16.mxu1 %v11731_v34 }
 0x1b1   : > { %v10542_v27 = vpop.f32.mrf.mxu1 }
 0x1b2   : > { %v10428_v40 = vpop.f32.mrf.mxu0 }
 0x1b3   : > { %v10429_v36 = vadd.f32 %v10428_v40, %v10427_v16  ;;  %v10543_v50 = vpop.f32.mrf.mxu1  ;;  %10810 = vmatpush3.bf16.msra.mxu1 %v11732_v55  ;;  %v11734_v16 = vld [vmem:[%s16690_s2 + $0xb8] sm:$0xff]   ;;  %v11740_v55 = vld [vmem:[%s16690_s2 + $0xa8] sm:$0xff]  }
 0x1b4   : > { %v10430_v7 = vpop.f32.mrf.mxu0  ;;  %v10544_v22 = vadd.f32 %v10543_v50, %v10542_v27  ;;  %10912 = vmatpush3.bf16.msra.mxu0 %v11734_v16  ;;  %v11735_v16 = vld [vmem:[%s16690_s2 + $0x48] sm:$0xff]  }
 0x1b5   : > { %v4202_v37 = vadd.f32 %v13977_v43, %v10429_v36  ;;  %10811 = vmatprep.subr.bf16.mxu1 %v11735_v16 }
 0x1b6   : > { %11308 = vmatmul.mubr.bf16.gmra.mxu0 %v9704_v13  ;;  %v2991_v13 = vrot.slane %v9595_v59, 1  ;;  %v10431_v15 = vpop.f32.mrf.mxu0 }
 0x1b7   : > { %11311 = vmatprep.mubr.bf16.mxu0 %v9713_v32  ;;  %v14045_v28 = vadd.f32 %v10541_v10, %v4202_v37  ;;  %v10432_v18 = vadd.f32 %v10431_v15, %v10430_v7 }
 0x1b8   : > { %v9740_v19 = vcombine.low %v2990_v58, %v2991_v13  ;;  %v11738_v58 = vld [vmem:[%s16690_s2 + $0xb0] sm:$0xff]  }
 0x1b9   : > { %v4205_v52 = vadd.f32 %v13977_v43, %v10432_v18 }
 0x1bb   : > { %v14054_v32 = vadd.f32 %v10544_v22, %v4205_v52  ;;  %v11739_v52 = vld [vmem:[%s16690_s2 + $0xe8] sm:$0xff]  }
 0x1be   : > { %11312 = vmatmul.mubr.bf16.gmra.mxu0 %v9722_v21 }
 0x1bf   : > { %11315 = vmatprep.mubr.bf16.mxu0 %v9731_v33  ;;  %v11737_v33 = vld [vmem:[%s16690_s2 + $0xf0] sm:$0xff]  }
 0x1c0   : > { %10913 = vmatprep.subr.bf16.mxu0 %v11737_v33  ;;  %v11744_v33 = vld [vmem:[%s16690_s2 + $0x98] sm:$0xff]  }
 0x1c1   : > { %v10545_v41 = vpop.f32.mrf.mxu1  ;;  %10914 = vmatpush3.bf16.msra.mxu0 %v11738_v58 }
 0x1c2   : > { %10915 = vmatprep.subr.bf16.mxu0 %v11739_v52 }
 0x1c3   : > { %v10546_v63 = vpop.f32.mrf.mxu1 }
 0x1c4   : > { %v10547_v42 = vadd.f32 %v10546_v63, %v10545_v41 }
 0x1c5   : > { %v10433_v4 = vpop.f32.mrf.mxu0  ;;  %v10548_v12 = vpop.f32.mrf.mxu1  ;;  %10916 = vmatpush3.bf16.msra.mxu0 %v11740_v55 }
 0x1c6   : > { %11316 = vmatmul.mubr.bf16.gmra.mxu0 %v9740_v19 }
 0x1c7   : > { %v10434_v0 = vpop.f32.mrf.mxu0  ;;  %v10549_v49 = vpop.f32.mrf.mxu1 }
 0x1c8   : > { %v10435_v48 = vadd.f32 %v10434_v0, %v10433_v4  ;;  %v10550_v27 = vadd.f32 %v10549_v49, %v10548_v12  ;;  %v11741_v12 = vld [vmem:[%s16690_s2 + $0xe0] sm:$0xff]  }
 0x1c9   : > { %v10436_v45 = vpop.f32.mrf.mxu0  ;;  %v14056_v26 = vpop.f32.mrf.mxu1  ;;  %10917 = vmatprep.subr.bf16.mxu0 %v11741_v12 }
 0x1ca   : > { %v4210_v62 = vadd.f32 %v13977_v43, %v10435_v48 }
 0x1cb   : > { %v10437_v17 = vpop.f32.mrf.mxu0  ;;  %v14062_v23 = vpop.f32.mrf.mxu1 }
 0x1cc   : > { %v14067_v10 = vadd.f32 %v10547_v42, %v4210_v62  ;;  %v10438_v21 = vadd.f32 %v10437_v17, %v10436_v45 }
 0x1cd   : > { %v14069_v59 = vpop.f32.mrf.mxu1 }
 0x1ce   : > { %v10567_v44 = vpop.f32.mrf.mxu0  ;;  %v4213_v40 = vadd.f32 %v13977_v43, %v10438_v21 }
 0x1cf   : > { %v14075_v7 = vpop.f32.mrf.mxu1 }
 0x1d0   : > { %v10568_v36 = vpop.f32.mrf.mxu0  ;;  %v14077_v50 = vadd.f32 %v10550_v27, %v4213_v40 }
 0x1d1   : > { %v10569_v37 = vadd.f32 %v10568_v36, %v10567_v44  ;;  %v14082_v15 = vpop.f32.mrf.mxu1  ;;  %v11743_v44 = vld [vmem:[%s16690_s2 + $0xd8] sm:$0xff]  }
 0x1d2   : > { %16911 = vst [vmem:[#allocation21_spill] sm:$0xff] %v14077_v50  ;;  %v10570_v13 = vpop.f32.mrf.mxu0  ;;  %v16920_v50 = vld [vmem:[#allocation27_spill] sm:$0xff] }
 0x1d3   : > { %v14085_v43 = vadd.f32 %v10569_v37, %v13594_v9  ;;  %v14087_v22 = vpop.f32.mrf.mxu1 }
 0x1d4   : > { %v10571_v18 = vpop.f32.mrf.mxu0 }
 0x1d5   : > { %v10572_v19 = vadd.f32 %v10571_v18, %v10570_v13  ;;  %v14092_v34 = vpop.f32.mrf.mxu1  ;;  %v11747_v13 = vld [vmem:[%s16690_s2 + $0xd0] sm:$0xff]  }
 0x1d6   : > { %v10573_v41 = vpop.f32.mrf.mxu0 }
 0x1d7   : > { %v14098_v9 = vadd.f32 %v10572_v19, %v13617_v61  ;;  %v14100_v42 = vpop.f32.mrf.mxu1  ;;  %v11742_v61 = vld [vmem:[%s16690_s2 + $0xa0] sm:$0xff]   ;;  %v11748_v19 = vld [vmem:[%s16690_s2 + $0x90] sm:$0xff]  }
 0x1d8   : > { %v10574_v63 = vpop.f32.mrf.mxu0  ;;  %10918 = vmatpush3.bf16.msra.mxu0 %v11742_v61 }
 0x1d9   : > { %v10575_v4 = vadd.f32 %v10574_v63, %v10573_v41  ;;  %v14105_v49 = vpop.f32.mrf.mxu1  ;;  %10919 = vmatprep.subr.bf16.mxu0 %v11743_v44  ;;  %v11751_v44 = vld [vmem:[%s16690_s2 + $0xc0] sm:$0xff]  }
 0x1da   : > { %v10576_v0 = vpop.f32.mrf.mxu0 }
 0x1db   : > { %v14108_v48 = vadd.f32 %v10575_v4, %v13659_v8  ;;  %v14113_v62 = vpop.f32.mrf.mxu1  ;;  %v11736_v8 = vld [vmem:[%s16690_s2 + $0x8] sm:$0xff]  }
 0x1dc   : > { %v10577_v45 = vpop.f32.mrf.mxu0  ;;  %10812 = vmatpush3.bf16.msra.mxu1 %v11736_v8  ;;  %10920 = vmatpush3.bf16.msra.mxu0 %v11744_v33  ;;  %v11749_v4 = vld [vmem:[%s16690_s2 + $0xc8] sm:$0xff]  }
 0x1dd   : > { %v10578_v60 = vadd.f32 %v10577_v45, %v10576_v0  ;;  %v14124_v27 = vpop.f32.mrf.mxu1  ;;  %10921 = vmatprep.subr.bf16.mxu0 %v11747_v13  ;;  %v11750_v45 = vld [vmem:[%s16690_s2 + $0x88] sm:$0xff]  }
 0x1de   : > { %v10579_v17 = vpop.f32.mrf.mxu0 }
 0x1df   : > { %v14122_v21 = vadd.f32 %v10578_v60, %v13671_v2  ;;  %v14135_v58 = vpop.f32.mrf.mxu1 }
 0x1e0   : > { %v10580_v40 = vpop.f32.mrf.mxu0  ;;  %10922 = vmatpush3.bf16.msra.mxu0 %v11748_v19 }
 0x1e1   : > { %v10581_v36 = vadd.f32 %v10580_v40, %v10579_v17  ;;  %10923 = vmatprep.subr.bf16.mxu0 %v11749_v4 }
 0x1e2   : > { %v10582_v37 = vpop.f32.mrf.mxu0 }
 0x1e3   : > { %v14133_v2 = vadd.f32 %v10581_v36, %v13724_v46 }
 0x1e4   : > { %v10583_v18 = vpop.f32.mrf.mxu0  ;;  %10924 = vmatpush3.bf16.msra.mxu0 %v11750_v45 }
 0x1e5   : > { %v10584_v52 = vadd.f32 %v10583_v18, %v10582_v37  ;;  %10925 = vmatprep.subr.bf16.mxu0 %v11751_v44  ;;  %v11752_v37 = vld [vmem:[%s16690_s2 + $0x80] sm:$0xff]  }
 0x1e6   : > { %v10585_v41 = vpop.f32.mrf.mxu0  ;;  %v14146_v63 = vpop.f32.mrf.mxu1  ;;  %v11746_v18 = vld [vmem:[%s16690_s2] sm:$0xff]  }
 0x1e7   : > { %v14144_v55 = vadd.f32 %v10584_v52, %v13737_v54 }
 0x1e8   : > { %v10586_v46 = vpop.f32.mrf.mxu0  ;;  %v14151_v0 = vpop.f32.mrf.mxu1  ;;  %10926 = vmatpush3.bf16.msra.mxu0 %v11752_v37 }
 0x1e9   : > { %v10587_v12 = vadd.f32 %v10586_v46, %v10585_v41 }
 0x1ea   : > { %v10588_v61 = vpop.f32.mrf.mxu0  ;;  %v14159_v60 = vpop.f32.mrf.mxu1 }
 0x1eb   : > { %v14157_v54 = vadd.f32 %v10587_v12, %v13786_v20  ;;  %v11745_v20 = vld [vmem:[%s16690_s2 + $0x40] sm:$0xff]  }
 0x1ec   : > { %v10589_v17 = vpop.f32.mrf.mxu0  ;;  %v14161_v8 = vpop.f32.mrf.mxu1  ;;  %10813 = vmatprep.subr.bf16.mxu1 %v11745_v20 }
 0x1ed   : > { %v10590_v16 = vadd.f32 %v10589_v17, %v10588_v61  ;;  %10814 = vmatpush3.bf16.msra.mxu1 %v11746_v18  ;;  %v16914_v17 = vld [vmem:[#allocation17_spill] sm:$0xff] }
 0x1ee   : > { %v10591_v40 = vpop.f32.mrf.mxu0  ;;  %v16916_v18 = vld [vmem:[#allocation25_spill] sm:$0xff] }
 0x1ef   : > { %v14167_v33 = vadd.f32 %v10590_v16, %v13796_v5  ;;  %v14169_v36 = vpop.f32.mrf.mxu1 }
 0x1f0   : > { %v10592_v13 = vpop.f32.mrf.mxu0 }
 0x1f1   : > { %16912 = vst [vmem:[#allocation12_spill] sm:$0xff] %v14167_v33  ;;  %v10593_v52 = vadd.f32 %v10592_v13, %v10591_v40  ;;  %v14180_v19 = vpop.f32.mrf.mxu1 }
 0x1f2   : > { %v10594_v5 = vpop.f32.mrf.mxu0 }
 0x1f3   : > { %v14183_v41 = vadd.f32 %v10593_v52, %v13835_v30  ;;  %v14185_v46 = vpop.f32.mrf.mxu1 }
 0x1f4   : > { %v10595_v4 = vpop.f32.mrf.mxu0 }
 0x1f5   : > { %16913 = vst [vmem:[#allocation22_spill] sm:$0xff] %v14183_v41  ;;  %v10596_v12 = vadd.f32 %v10595_v4, %v10594_v5  ;;  %v14187_v61 = vpop.f32.mrf.mxu1 }
 0x1f6   : > { %v10597_v45 = vpop.f32.mrf.mxu0 }
 0x1f7   : > { %v14190_v16 = vadd.f32 %v10596_v12, %v16914_v17  ;;  %v14192_v44 = vpop.f32.mrf.mxu1 }
 0x1f8   : > { %v10598_v40 = vpop.f32.mrf.mxu0 }
 0x1f9   : > { %16915 = vst [vmem:[#allocation29_spill] sm:$0xff] %v14190_v16  ;;  %v10599_v20 = vadd.f32 %v10598_v40, %v10597_v45  ;;  %v14194_v37 = vpop.f32.mrf.mxu1 }
 0x1fa   : > { %v10600_v13 = vpop.f32.mrf.mxu0 }
 0x1fb   : > { %v14197_v30 = vadd.f32 %v10599_v20, %v16916_v18  ;;  %v14199_v52 = vpop.f32.mrf.mxu1 }
 0x1fc   : > { %16918 = vst [vmem:[#allocation32_spill] sm:$0xff] %v14199_v52  ;;  %v10601_v24 = vpop.f32.mrf.mxu0 }
 0x1fd   : > { %16917 = vst [vmem:[#allocation30_spill] sm:$0xff] %v14197_v30  ;;  %v10602_v5 = vadd.f32 %v10601_v24, %v10600_v13  ;;  %v14201_v4 = vpop.f32.mrf.mxu1 }
 0x1fe   : > { %16919 = vst [vmem:[#allocation33_spill] sm:$0xff] %v14201_v4  ;;  %v10603_v41 = vpop.f32.mrf.mxu0 }
 0x1ff   : > { %v14204_v12 = vadd.f32 %v10602_v5, %v16920_v50  ;;  %v14206_v33 = vpop.f32.mrf.mxu1 }
 0x200   : > { %v10604_v17 = vpop.f32.mrf.mxu0 }
 0x201   : > { %16921 = vst [vmem:[#allocation31_spill] sm:$0xff] %v14204_v12  ;;  %v10605_v16 = vadd.f32 %v10604_v17, %v10603_v41  ;;  %v14211_v18 = vpop.f32.mrf.mxu1 }
 0x202   : > { %v10606_v45 = vpop.f32.mrf.mxu0 }
 0x203   : > { %v14209_v40 = vadd.f32 %v10605_v16, %v13899_v39  ;;  %v14216_v4 = vpop.f32.mrf.mxu1 }
 0x204   : > { %v10607_v20 = vpop.f32.mrf.mxu0 }
 0x205   : > { %16922 = vst [vmem:[#allocation16_spill] sm:$0xff] %v14209_v40  ;;  %v10608_v30 = vadd.f32 %v10607_v20, %v10606_v45  ;;  %v14221_v12 = vpop.f32.mrf.mxu1 }
 0x206   : > { %v10609_v52 = vpop.f32.mrf.mxu0 }
 0x207   : > { %v14214_v24 = vadd.f32 %v10608_v30, %v13909_v25  ;;  %v11764_v25 = vld [vmem:[%s16690_s2 + $0x178] sm:$0xff]   ;;  %v14229_v30 = vpop.f32.mrf.mxu1 }
 0x208   : > { %v10610_v13 = vpop.f32.mrf.mxu0  ;;  %11023 = vmatprep.subr.bf16.mxu1 %v11764_v25 }
 0x209   : > { %16923 = vst [vmem:[#allocation24_spill] sm:$0xff] %v14214_v24  ;;  %v10611_v50 = vadd.f32 %v10610_v13, %v10609_v52 }
 0x20a   : > { %v10612_v5 = vpop.f32.mrf.mxu0 }
 0x20b   : > { %v14219_v41 = vadd.f32 %v10611_v50, %v13936_v11  ;;  %v14234_v50 = vpop.f32.mrf.mxu1 }
 0x20c   : > { %v10613_v17 = vpop.f32.mrf.mxu0 }
 0x20d   : > { %16924 = vst [vmem:[#allocation13_spill] sm:$0xff] %v14219_v41  ;;  %v10614_v39 = vadd.f32 %v10613_v17, %v10612_v5 }
 0x20e   : > { %v10615_v16 = vpop.f32.mrf.mxu0 }
 0x20f   : > { %v14224_v40 = vadd.f32 %v10614_v39, %v13951_v47 }
 0x210   : > { %v10616_v45 = vpop.f32.mrf.mxu0 }
 0x211   : > { %16925 = vst [vmem:[#allocation7_spill] sm:$0xff] %v14224_v40  ;;  %v10617_v52 = vadd.f32 %v10616_v45, %v10615_v16  ;;  %v14239_v40 = vpop.f32.mrf.mxu1 }
 0x212   : > { %v10618_v20 = vpop.f32.mrf.mxu0 }
 0x213   : > { %v14232_v11 = vadd.f32 %v10617_v52, %v13972_v51  ;;  %v14244_v25 = vpop.f32.mrf.mxu1 }
 0x214   : > { %v10619_v13 = vpop.f32.mrf.mxu0 }
 0x215   : > { %16926 = vst [vmem:[#allocation34_spill] sm:$0xff] %v14232_v11  ;;  %v10620_v5 = vadd.f32 %v10619_v13, %v10618_v20  ;;  %v14249_v13 = vpop.f32.mrf.mxu1 }
 0x216   : > { %v10621_v17 = vpop.f32.mrf.mxu0 }
 0x217   : > { %v14237_v47 = vadd.f32 %v10620_v5, %v13982_v6 }
 0x218   : > { %v10622_v39 = vpop.f32.mrf.mxu0 }
 0x219   : > { %16927 = vst [vmem:[#allocation11_spill] sm:$0xff] %v14237_v47  ;;  %v10623_v41 = vadd.f32 %v10622_v39, %v10621_v17  ;;  %v14254_v39 = vpop.f32.mrf.mxu1 }
 0x21a   : > { %v10624_v24 = vpop.f32.mrf.mxu0 }
 0x21b   : > { %v14242_v16 = vadd.f32 %v10623_v41, %v13987_v1 }
 0x21c   : > { %v10625_v45 = vpop.f32.mrf.mxu0 }
 0x21d   : > { %16928 = vst [vmem:[#allocation15_spill] sm:$0xff] %v14242_v16  ;;  %v10626_v51 = vadd.f32 %v10625_v45, %v10624_v24  ;;  %v14259_v45 = vpop.f32.mrf.mxu1 }
 0x21e   : > { %v10627_v52 = vpop.f32.mrf.mxu0 }
 0x21f   : > { %v14247_v11 = vadd.f32 %v10626_v51, %v13996_v56 }
 0x220   : > { %v10628_v20 = vpop.f32.mrf.mxu0 }
 0x221   : > { %16929 = vst [vmem:[#allocation9_spill] sm:$0xff] %v14247_v11  ;;  %v10629_v6 = vadd.f32 %v10628_v20, %v10627_v52  ;;  %v14264_v20 = vpop.f32.mrf.mxu1 }
 0x222   : > { %v10630_v5 = vpop.f32.mrf.mxu0 }
 0x223   : > { %v14252_v47 = vadd.f32 %v10629_v6, %v13999_v31 }
 0x224   : > { %v10631_v17 = vpop.f32.mrf.mxu0 }
 0x225   : > { %16930 = vst [vmem:[#allocation18_spill] sm:$0xff] %v14252_v47  ;;  %v10632_v1 = vadd.f32 %v10631_v17, %v10630_v5  ;;  %v14269_v17 = vpop.f32.mrf.mxu1 }
 0x226   : > { %v10633_v41 = vpop.f32.mrf.mxu0 }
 0x227   : > { %v14257_v16 = vadd.f32 %v10632_v1, %v14002_v29 }
 0x228   : > { %v10634_v24 = vpop.f32.mrf.mxu0 }
 0x229   : > { %16931 = vst [vmem:[#allocation10_spill] sm:$0xff] %v14257_v16  ;;  %v10635_v56 = vadd.f32 %v10634_v24, %v10633_v41  ;;  %v14274_v24 = vpop.f32.mrf.mxu1 }
 0x22a   : > { %v10636_v51 = vpop.f32.mrf.mxu0 }
 0x22b   : > { %v14262_v11 = vadd.f32 %v10635_v56, %v14011_v35 }
 0x22c   : > { %v10637_v52 = vpop.f32.mrf.mxu0 }
 0x22d   : > { %16932 = vst [vmem:[#allocation19_spill] sm:$0xff] %v14262_v11  ;;  %v10638_v31 = vadd.f32 %v10637_v52, %v10636_v51  ;;  %v14279_v52 = vpop.f32.mrf.mxu1 }
 0x22e   : > { %v10639_v6 = vpop.f32.mrf.mxu0 }
 0x22f   : > { %v14267_v47 = vadd.f32 %v10638_v31, %v14014_v3 }
 0x230   : > { %v10640_v5 = vpop.f32.mrf.mxu0 }
 0x231   : > { %16933 = vst [vmem:[#allocation23_spill] sm:$0xff] %v14267_v47  ;;  %v10641_v29 = vadd.f32 %v10640_v5, %v10639_v6  ;;  %v14284_v5 = vpop.f32.mrf.mxu1 }
 0x232   : > { %v10642_v1 = vpop.f32.mrf.mxu0 }
 0x233   : > { %v14272_v16 = vadd.f32 %v10641_v29, %v14023_v57 }
 0x234   : > { %v10643_v41 = vpop.f32.mrf.mxu0 }
 0x235   : > { %16934 = vst [vmem:[#allocation14_spill] sm:$0xff] %v14272_v16  ;;  %v10644_v35 = vadd.f32 %v10643_v41, %v10642_v1  ;;  %v14289_v41 = vpop.f32.mrf.mxu1 }
 0x236   : > { %v10645_v56 = vpop.f32.mrf.mxu0 }
 0x237   : > { %v14277_v11 = vadd.f32 %v10644_v35, %v14026_v14 }
 0x238   : > { %v10646_v51 = vpop.f32.mrf.mxu0 }
 0x239   : > { %16935 = vst [vmem:[#allocation26_spill] sm:$0xff] %v14277_v11  ;;  %v10647_v3 = vadd.f32 %v10646_v51, %v10645_v56  ;;  %v14294_v51 = vpop.f32.mrf.mxu1 }
 0x23a   : > { %v10648_v31 = vpop.f32.mrf.mxu0 }
 0x23b   : > { %v14282_v47 = vadd.f32 %v10647_v3, %v14029_v53  ;;  %v5531_v3 = vld [vmem:[#allocation2 + $0x4] sm:$0x1] }
 0x23c   : > { %v10649_v6 = vpop.f32.mrf.mxu0 }
 0x23d   : > { %16936 = vst [vmem:[#allocation28_spill] sm:$0xff] %v14282_v47  ;;  %v10650_v57 = vadd.f32 %v10649_v6, %v10648_v31  ;;  %v14296_v47 = vld [vmem:[#allocation2] sm:$0xf]  ;;  %v10681_v31 = vadd.f32 %v14062_v23, %v14056_v26  ;;  %v10684_v6 = vadd.f32 %v14075_v7, %v14069_v59  ;;  %v10699_v59 = vadd.f32 %v14151_v0, %v14146_v63  ;;  %v14316_v7 = vpop.f32.mrf.mxu1 }
 0x23e   : > { %v10651_v29 = vpop.f32.mrf.mxu0  ;;  %v9845_v23 = vcombine.low %v14296_v47, %v5531_v3 }
 0x23f   : > { %v14287_v16 = vadd.f32 %v10650_v57, %v14040_v38  ;;  %v10687_v57 = vadd.f32 %v14087_v22, %v14082_v15 }
 0x240   : > { %v10652_v1 = vpop.f32.mrf.mxu0 }
 0x241   : > { %v10653_v14 = vadd.f32 %v10652_v1, %v10651_v29  ;;  %v10690_v29 = vadd.f32 %v14100_v42, %v14092_v34  ;;  %v10693_v1 = vadd.f32 %v14113_v62, %v14105_v49  ;;  %v4573_v34 = vadd.f32 %v10681_v31, %v14085_v43 }
 0x242   : > { %v10654_v35 = vpop.f32.mrf.mxu0  ;;  %v10705_v42 = vadd.f32 %v14180_v19, %v14169_v36  ;;  %v4581_v62 = vadd.f32 %v10687_v57, %v14108_v48  ;;  %v5950_v43 = vshll.u32 %v9845_v23, 16  ;;  %v14339_v48 = vpop.f32.mrf.mxu1  ;;  %v4597_v36 = vadd.f32 %v10699_v59, %v14157_v54  ;;  %v16937_v19 = vld [vmem:[#allocation32_spill] sm:$0xff]  ;;  %v16943_v59 = vld [vmem:[#allocation29_spill] sm:$0xff] }
 0x243   : > { %v14292_v11 = vadd.f32 %v10653_v14, %v14045_v28  ;;  %v10696_v14 = vadd.f32 %v14135_v58, %v14124_v27  ;;  %v4576_v27 = vadd.f32 %v10684_v6, %v14098_v9  ;;  %v5563_v58 = vld [vmem:[#allocation2] sm:$0xe]  ;;  %v4584_v0 = vadd.f32 %v10690_v29, %v14122_v21  ;;  %v16938_v21 = vld [vmem:[#allocation33_spill] sm:$0xff] }
 0x244   : > { %v10655_v56 = vpop.f32.mrf.mxu0  ;;  %v16941_v6 = vld [vmem:[#allocation22_spill] sm:$0xff]  ;;  %v10723_v57 = vadd.f32 %v14234_v50, %v14229_v30  ;;  %v5948_v29 = vshrl.u32 %v9845_v23, 16  ;;  %v16944_v30 = vld [vmem:[#allocation31_spill] sm:$0xff] }
 0x245   : > { %v10656_v53 = vadd.f32 %v10655_v56, %v10654_v35  ;;  %v14330_v35 = vadd.f32 %v10693_v1, %v14133_v2  ;;  %v10714_v56 = vadd.f32 %v16938_v21, %v16937_v19  ;;  %v10717_v2 = vadd.f32 %v14211_v18, %v14206_v33 }
 0x246   : > { %v10657_v38 = vpop.f32.mrf.mxu0  ;;  %v14355_v54 = vadd.f32 %v10705_v42, %v16941_v6  ;;  %v10726_v33 = vadd.f32 %v14244_v25, %v14239_v40  ;;  %v5952_v1 = vrot.slane %v5950_v43, 1  ;;  %v16945_v40 = vld [vmem:[#allocation16_spill] sm:$0xff]  ;;  %v14382_v43 = vadd.f32 %v14254_v39, %v14249_v13 }
 0x247   : > { %v14305_v28 = vadd.f32 %v10656_v53, %v14054_v32  ;;  %v10702_v32 = vadd.f32 %v14161_v8, %v14159_v60  ;;  %v14333_v60 = vadd.f32 %v10696_v14, %v14144_v55  ;;  %v10708_v8 = vadd.f32 %v14187_v61, %v14185_v46  ;;  %v16939_v53 = vld [vmem:[#allocation12_spill] sm:$0xff]  ;;  %v16940_v61 = vld [vmem:[#allocation21_spill] sm:$0xff] }
 0x248   : > { %v10658_v26 = vpop.f32.mrf.mxu0  ;;  %v10720_v46 = vadd.f32 %v14221_v12, %v14216_v4  ;;  %v16942_v4 = vld [vmem:[#allocation30_spill] sm:$0xff]  ;;  %v14370_v50 = vadd.f32 %v10714_v56, %v16944_v30  ;;  %v14373_v25 = vadd.f32 %v10717_v2, %v16945_v40  ;;  %v14390_v19 = vor.u32 %v5952_v1, %v5948_v29 }
 0x249   : > { %v10659_v15 = vadd.f32 %v10658_v26, %v10657_v38  ;;  %v14347_v31 = vadd.f32 %v10702_v32, %v16939_v53  ;;  %v9877_v38 = vcombine.low %v5563_v58, %v5531_v3  ;;  %v10745_v3 = vpop.f32.mrf.mxu1  ;;  %v10735_v32 = vadd.f32 %v14274_v24, %v14269_v17  ;;  %v16946_v58 = vld [vmem:[#allocation24_spill] sm:$0xff]  ;;  %v16947_v24 = vld [vmem:[#allocation13_spill] sm:$0xff] }
 0x24a   : > { %v10660_v22 = vpop.f32.mrf.mxu0  ;;  %v14394_v21 = vadd.f32 %v14264_v20, %v14259_v45  ;;  %v14398_v13 = vadd.f32 %v14284_v5, %v14279_v52  ;;  %v14402_v39 = vadd.f32 %v14294_v51, %v14289_v41 }
 0x24b   : > { %v14324_v49 = vadd.f32 %v10659_v15, %v14067_v10  ;;  %v10711_v10 = vadd.f32 %v14194_v37, %v14192_v44  ;;  %v14365_v15 = vadd.f32 %v10708_v8, %v16943_v59  ;;  %v14375_v23 = vrot.slane %v9877_v38, 1 }
 0x24c   : > { %v10661_v63 = vpop.f32.mrf.mxu0  ;;  %v14385_v8 = vadd.f32 %v10723_v57, %v16947_v24 }
 0x24d   : > { %v10662_v9 = vadd.f32 %v10661_v63, %v10660_v22  ;;  %v14362_v12 = vadd.f32 %v10711_v10, %v16942_v4  ;;  %v14378_v63 = vadd.f32 %v10720_v46, %v16946_v58  ;;  %v16948_v10 = vld [vmem:[#allocation7_spill] sm:$0xff] }
 0x24e   : > { %v11289_v55 = vpop.f32.mrf.mxu0  ;;  %v16949_v46 = vld [vmem:[#allocation15_spill] sm:$0xff] }
 0x24f   : > { %v14352_v44 = vadd.f32 %v10662_v9, %v16940_v61  ;;  %v4742_v37 = vadd.f32 %v11289_v55, %v4581_v62  ;;  %v14388_v9 = vadd.f32 %v10726_v33, %v16948_v10  ;;  %v14405_v61 = vadd.f32 %v10735_v32, %v16949_v46  ;;  %v5319_v33 = vld [vmem:[#allocation2 + $0x18] sm:$0xf] }
 0x250   : > { %v4733_v18 = vpop.f32.mrf.mxu0 }
 0x251   : > { %v4862_v14 = vmax.f32 %v4742_v37, 0.0  ;;  %v4734_v26 = vadd.f32 %v4733_v18, %v4573_v34  ;;  %v5322_v18 = vld [vmem:[#allocation2 + $0x1c] sm:$0x1] }
 0x252   : > { %v11290_v22 = vpop.f32.mrf.mxu0 }
 0x253   : > { %v10295_v42 = vpack.c.bf16 %v4862_v14, %v4862_v14  ;;  %v4860_v34 = vmax.f32 %v4734_v26, 0.0  ;;  %v4745_v62 = vadd.f32 %v11290_v22, %v4584_v0  ;;  %v10746_v0 = vpop.f32.mrf.mxu1  ;;  %v5310_v26 = vld [vmem:[#allocation2 + $0xc] sm:$0x1] }
 0x254   : > { %v4736_v17 = vpop.f32.mrf.mxu0  ;;  %v14407_v57 = vadd.f32 %v10746_v0, %v10745_v3 }
 0x255   : > { %v5005_v56 = vshrl.u32 %v10295_v42, 16  ;;  %v10293_v2 = vpack.c.bf16 %v4860_v34, %v4860_v34  ;;  %v4863_v55 = vmax.f32 %v4745_v62, 0.0  ;;  %v4737_v53 = vadd.f32 %v4736_v17, %v4576_v27 }
 0x256   : > { %v11293_v38 = vpop.f32.mrf.mxu0  ;;  %v5008_v45 = vshll.u32 %v10295_v42, 16 }
 0x257   : > { %v5007_v37 = vrot.slane %v5005_v56, 7  ;;  %v4989_v20 = vshrl.u32 %v10293_v2, 16  ;;  %v10296_v6 = vpack.c.bf16 %v4863_v55, %v4863_v55  ;;  %v4992_v29 = vshll.u32 %v10293_v2, 16  ;;  %v12090_v56 = vld [vmem:[#allocation2 + $0x8] sm:$0xf] }
 0x258   : > { %v4861_v52 = vmax.f32 %v4737_v53, 0.0  ;;  %v4758_v5 = vadd.f32 %v11293_v38, %v4597_v36  ;;  %v4749_v1 = vpop.f32.mrf.mxu0  ;;  %v5325_v55 = vld [vmem:[#allocation2 + $0x20] sm:$0xf]  ;;  %v5328_v53 = vld [vmem:[#allocation2 + $0x24] sm:$0x1] }
 0x259   : > { %v5010_v14 = vor.u32 %v5008_v45, %v5007_v37  ;;  %v5011_v41 = vrot.slane %v5007_v37, 4  ;;  %v4991_v51 = vrot.slane %v4989_v20, 7  ;;  %v5013_v27 = vshrl.u32 %v10296_v6, 16 }
 0x25a   : > { %v5016_v4 = vshll.u32 %v10296_v6, 16  ;;  %v10294_v59 = vpack.c.bf16 %v4861_v52, %v4861_v52  ;;  %v4866_v32 = vmax.f32 %v4758_v5, 0.0  ;;  %v4750_v22 = vadd.f32 %v4749_v1, %v14330_v35  ;;  %v11294_v30 = vpop.f32.mrf.mxu0 }
 0x25b   : > { %v5320_v3 = vsel %vm12409_vm6, %v5010_v14, %v5319_v33  ;;  %v5323_v34 = vsel %vm12383_vm2, %v5011_v41, %v5322_v18  ;;  %v4994_v62 = vor.u32 %v4992_v29, %v4991_v51  ;;  %v4995_v36 = vrot.slane %v4991_v51, 4  ;;  %v5313_v18 = vld [vmem:[#allocation2 + $0x10] sm:$0xf]  ;;  %v5316_v29 = vld [vmem:[#allocation2 + $0x14] sm:$0x1] }
 0x25c   : > { %5324 = vst [vmem:[#allocation2 + $0x1c] sm:$0x1] %v5323_v34  ;;  %5321 = vst [vmem:[#allocation2 + $0x18] sm:$0xf] %v5320_v3  ;;  %v5015_v58 = vrot.slane %v5013_v27, 7  ;;  %v4997_v17 = vshrl.u32 %v10294_v59, 16  ;;  %v10299_v10 = vpack.c.bf16 %v4866_v32, %v4866_v32  ;;  %v4752_v0 = vpop.f32.mrf.mxu0  ;;  %v4761_v46 = vadd.f32 %v11294_v30, %v14347_v31  ;;  %v14424_v30 = vpop.f32.mrf.mxu1 }
 0x25d   : > { %v5000_v24 = vshll.u32 %v10294_v59, 16  ;;  %v5308_v35 = vsel %vm12409_vm6, %v4994_v62, %v12090_v56  ;;  %v5311_v2 = vsel %vm12383_vm2, %v4995_v36, %v5310_v26  ;;  %v4864_v38 = vmax.f32 %v4750_v22, 0.0  ;;  %v5343_v34 = vld [vmem:[#allocation2 + $0x38] sm:$0xf]  ;;  %v5346_v62 = vld [vmem:[#allocation2 + $0x3c] sm:$0x1] }
 0x25e   : > { %5309 = vst [vmem:[#allocation2 + $0x8] sm:$0xf] %v5308_v35  ;;  %5312 = vst [vmem:[#allocation2 + $0xc] sm:$0x1] %v5311_v2  ;;  %v5018_v37 = vor.u32 %v5016_v4, %v5015_v58  ;;  %v5019_v45 = vrot.slane %v5015_v58, 4  ;;  %v4999_v20 = vrot.slane %v4997_v17, 7  ;;  %v11297_v33 = vpop.f32.mrf.mxu0  ;;  %v4753_v14 = vadd.f32 %v4752_v0, %v14333_v60 }
 0x25f   : > { %v5037_v6 = vshrl.u32 %v10299_v10, 16  ;;  %v5040_v52 = vshll.u32 %v10299_v10, 16  ;;  %v10297_v5 = vpack.c.bf16 %v4864_v38, %v4864_v38  ;;  %v4867_v1 = vmax.f32 %v4761_v46, 0.0  ;;  %v5331_v2 = vld [vmem:[#allocation2 + $0x28] sm:$0xf] }
 0x260   : > { %v5326_v41 = vsel %vm12409_vm6, %v5018_v37, %v5325_v55  ;;  %v5329_v31 = vsel %vm12383_vm2, %v5019_v45, %v5328_v53  ;;  %v5002_v51 = vor.u32 %v5000_v24, %v4999_v20  ;;  %v5003_v27 = vrot.slane %v4999_v20, 4  ;;  %v4765_v26 = vpop.f32.mrf.mxu0  ;;  %v11830_v24 = vld [vmem:[%s16690_s2 + $0x1f8] sm:$0xff]   ;;  %v5334_v55 = vld [vmem:[#allocation2 + $0x2c] sm:$0x1] }
 0x261   : > { %5330 = vst [vmem:[#allocation2 + $0x24] sm:$0x1] %v5329_v31  ;;  %5327 = vst [vmem:[#allocation2 + $0x20] sm:$0xf] %v5326_v41  ;;  %v5039_v4 = vrot.slane %v5037_v6, 7  ;;  %v5021_v59 = vshrl.u32 %v10297_v5, 16  ;;  %v10300_v22 = vpack.c.bf16 %v4867_v1, %v4867_v1  ;;  %v4774_v58 = vadd.f32 %v11297_v33, %v14362_v12  ;;  %11135 = vmatprep.subr.bf16.mxu0 %v11830_v24 }
 0x262   : > { %v5024_v32 = vshll.u32 %v10297_v5, 16  ;;  %v5314_v60 = vsel %vm12409_vm6, %v5002_v51, %v5313_v18  ;;  %v5317_v3 = vsel %vm12383_vm2, %v5003_v27, %v5316_v29  ;;  %v4865_v36 = vmax.f32 %v4753_v14, 0.0  ;;  %v11298_v17 = vpop.f32.mrf.mxu0  ;;  %v14439_v18 = vpop.f32.mrf.mxu1  ;;  %v5349_v31 = vld [vmem:[#allocation2 + $0x40] sm:$0xf]  ;;  %v5352_v51 = vld [vmem:[#allocation2 + $0x44] sm:$0x1] }
 0x263   : > { %5318 = vst [vmem:[#allocation2 + $0x14] sm:$0x1] %v5317_v3  ;;  %5315 = vst [vmem:[#allocation2 + $0x10] sm:$0xf] %v5314_v60  ;;  %v5042_v10 = vor.u32 %v5040_v52, %v5039_v4  ;;  %v5043_v0 = vrot.slane %v5039_v4, 4  ;;  %v5023_v56 = vrot.slane %v5021_v59, 7  ;;  %v4766_v37 = vadd.f32 %v4765_v26, %v14355_v54 }
 0x264   : > { %v5045_v35 = vshrl.u32 %v10300_v22, 16  ;;  %v5048_v53 = vshll.u32 %v10300_v22, 16  ;;  %v10298_v38 = vpack.c.bf16 %v4865_v36, %v4865_v36  ;;  %v4870_v46 = vmax.f32 %v4774_v58, 0.0  ;;  %v4768_v45 = vpop.f32.mrf.mxu0  ;;  %v5337_v3 = vld [vmem:[#allocation2 + $0x30] sm:$0xf] }
 0x265   : > { %v5344_v12 = vsel %vm12409_vm6, %v5042_v10, %v5343_v34  ;;  %v5347_v20 = vsel %vm12383_vm2, %v5043_v0, %v5346_v62  ;;  %v5026_v6 = vor.u32 %v5024_v32, %v5023_v56  ;;  %v5027_v33 = vrot.slane %v5023_v56, 4  ;;  %v5340_v34 = vld [vmem:[#allocation2 + $0x34] sm:$0x1]  ;;  %v14447_v10 = vpop.f32.mrf.mxu1 }
 0x266   : > { %5348 = vst [vmem:[#allocation2 + $0x3c] sm:$0x1] %v5347_v20  ;;  %5345 = vst [vmem:[#allocation2 + $0x38] sm:$0xf] %v5344_v12  ;;  %v5047_v29 = vrot.slane %v5045_v35, 7  ;;  %v5029_v52 = vshrl.u32 %v10298_v38, 16  ;;  %v10303_v1 = vpack.c.bf16 %v4870_v46, %v4870_v46  ;;  %v11301_v14 = vpop.f32.mrf.mxu0  ;;  %v4777_v26 = vadd.f32 %v11298_v17, %v14370_v50 }
 0x267   : > { %v5032_v5 = vshll.u32 %v10298_v38, 16  ;;  %v5332_v54 = vsel %vm12409_vm6, %v5026_v6, %v5331_v2  ;;  %v5335_v41 = vsel %vm12383_vm2, %v5027_v33, %v5334_v55  ;;  %v4868_v27 = vmax.f32 %v4766_v37, 0.0  ;;  %v5367_v46 = vld [vmem:[#allocation2 + $0x68] sm:$0xf]  ;;  %v5370_v37 = vld [vmem:[#allocation2 + $0x6c] sm:$0x1] }
 0x268   : > { %5336 = vst [vmem:[#allocation2 + $0x2c] sm:$0x1] %v5335_v41  ;;  %5333 = vst [vmem:[#allocation2 + $0x28] sm:$0xf] %v5332_v54  ;;  %v5050_v4 = vor.u32 %v5048_v53, %v5047_v29  ;;  %v5051_v59 = vrot.slane %v5047_v29, 4  ;;  %v5031_v32 = vrot.slane %v5029_v52, 7  ;;  %v4781_v60 = vpop.f32.mrf.mxu0  ;;  %v4769_v24 = vadd.f32 %v4768_v45, %v14365_v15 }
 0x269   : > { %v5069_v22 = vshrl.u32 %v10303_v1, 16  ;;  %v5072_v62 = vshll.u32 %v10303_v1, 16  ;;  %v10301_v36 = vpack.c.bf16 %v4868_v27, %v4868_v27  ;;  %v4871_v58 = vmax.f32 %v4777_v26, 0.0  ;;  %v5355_v1 = vld [vmem:[#allocation2 + $0x58] sm:$0xf] }
 0x26a   : > { %v5350_v0 = vsel %vm12409_vm6, %v5050_v4, %v5349_v31  ;;  %v5353_v50 = vsel %vm12383_vm2, %v5051_v59, %v5352_v51  ;;  %v5034_v17 = vor.u32 %v5032_v5, %v5031_v32  ;;  %v5035_v56 = vrot.slane %v5031_v32, 4  ;;  %v11302_v20 = vpop.f32.mrf.mxu0  ;;  %v14458_v5 = vpop.f32.mrf.mxu1  ;;  %v5358_v54 = vld [vmem:[#allocation2 + $0x5c] sm:$0x1]  ;;  %v5373_v32 = vld [vmem:[#allocation2 + $0x70] sm:$0xf] }
 0x26b   : > { %5351 = vst [vmem:[#allocation2 + $0x40] sm:$0xf] %v5350_v0  ;;  %5354 = vst [vmem:[#allocation2 + $0x44] sm:$0x1] %v5353_v50  ;;  %v5071_v35 = vrot.slane %v5069_v22, 7  ;;  %v5053_v2 = vshrl.u32 %v10301_v36, 16  ;;  %v10304_v53 = vpack.c.bf16 %v4871_v58, %v4871_v58  ;;  %v4790_v12 = vadd.f32 %v11301_v14, %v14385_v8 }
 0x26c   : > { %v5056_v55 = vshll.u32 %v10301_v36, 16  ;;  %v5338_v38 = vsel %vm12409_vm6, %v5034_v17, %v5337_v3  ;;  %v5341_v15 = vsel %vm12383_vm2, %v5035_v56, %v5340_v34  ;;  %v4869_v45 = vmax.f32 %v4769_v24, 0.0  ;;  %v5361_v58 = vld [vmem:[#allocation2 + $0x60] sm:$0xf]  ;;  %v14470_v50 = vpop.f32.mrf.mxu1 }
 0x26d   : > { %5342 = vst [vmem:[#allocation2 + $0x34] sm:$0x1] %v5341_v15  ;;  %5339 = vst [vmem:[#allocation2 + $0x30] sm:$0xf] %v5338_v38  ;;  %v5074_v6 = vor.u32 %v5072_v62, %v5071_v35  ;;  %v5075_v33 = vrot.slane %v5071_v35, 4  ;;  %v5055_v29 = vrot.slane %v5053_v2, 7  ;;  %v4782_v27 = vadd.f32 %v4781_v60, %v14373_v25  ;;  %v4784_v62 = vpop.f32.mrf.mxu0 }
 0x26e   : > { %v5077_v52 = vshrl.u32 %v10304_v53, 16  ;;  %v5080_v41 = vshll.u32 %v10304_v53, 16  ;;  %v10302_v31 = vpack.c.bf16 %v4869_v45, %v4869_v45  ;;  %v4874_v51 = vmax.f32 %v4790_v12, 0.0  ;;  %v5376_v60 = vld [vmem:[#allocation2 + $0x74] sm:$0x1] }
 0x26f   : > { %v5368_v26 = vsel %vm12409_vm6, %v5074_v6, %v5367_v46  ;;  %v5371_v8 = vsel %vm12383_vm2, %v5075_v33, %v5370_v37  ;;  %v5058_v14 = vor.u32 %v5056_v55, %v5055_v29  ;;  %v5059_v4 = vrot.slane %v5055_v29, 4  ;;  %v5364_v2 = vld [vmem:[#allocation2 + $0x64] sm:$0x1]  ;;  %v14473_v37 = vld [vmem:[#allocation2 + $0x8] sm:$0xf] }
 0x270   : > { %5372 = vst [vmem:[#allocation2 + $0x6c] sm:$0x1] %v5371_v8  ;;  %5369 = vst [vmem:[#allocation2 + $0x68] sm:$0xf] %v5368_v26  ;;  %v5079_v59 = vrot.slane %v5077_v52, 7  ;;  %v5061_v22 = vshrl.u32 %v10302_v31, 16  ;;  %v10307_v34 = vpack.c.bf16 %v4874_v51, %v4874_v51  ;;  %v4793_v0 = vadd.f32 %v11302_v20, %v14388_v9 }
 0x271   : > { %v5064_v3 = vshll.u32 %v10302_v31, 16  ;;  %v5356_v36 = vsel %vm12409_vm6, %v5058_v14, %v5355_v1  ;;  %v5359_v25 = vsel %vm12383_vm2, %v5059_v4, %v5358_v54  ;;  %v4872_v24 = vmax.f32 %v4782_v27, 0.0  ;;  %v5627_v45 = vld [vmem:[#allocation2 + $0xc] sm:$0x1]  ;;  %v14479_v33 = vld [vmem:[#allocation2 + $0x10] sm:$0xf] }
 0x272   : > { %5357 = vst [vmem:[#allocation2 + $0x58] sm:$0xf] %v5356_v36  ;;  %5360 = vst [vmem:[#allocation2 + $0x5c] sm:$0x1] %v5359_v25  ;;  %v5082_v17 = vor.u32 %v5080_v41, %v5079_v59  ;;  %v5083_v56 = vrot.slane %v5079_v59, 4  ;;  %v5063_v35 = vrot.slane %v5061_v22, 7  ;;  %v4785_v46 = vadd.f32 %v4784_v62, %v14378_v63  ;;  %v14481_v41 = vpop.f32.mrf.mxu1 }
 0x273   : > { %v5101_v55 = vshrl.u32 %v10307_v34, 16  ;;  %v5104_v53 = vshll.u32 %v10307_v34, 16  ;;  %v10305_v38 = vpack.c.bf16 %v4872_v24, %v4872_v24  ;;  %v4875_v15 = vmax.f32 %v4793_v0, 0.0  ;;  %v5628_v63 = vld [vmem:[#allocation2 + $0x14] sm:$0x1] }
 0x274   : > { %v5374_v9 = vsel %vm12409_vm6, %v5082_v17, %v5373_v32  ;;  %v5377_v12 = vsel %vm12383_vm2, %v5083_v56, %v5376_v60  ;;  %v5066_v20 = vor.u32 %v5064_v3, %v5063_v35  ;;  %v5067_v6 = vrot.slane %v5063_v35, 4  ;;  %v5391_v27 = vld [vmem:[#allocation2 + $0x88] sm:$0xf]  ;;  %v5394_v26 = vld [vmem:[#allocation2 + $0x8c] sm:$0x1]  ;;  %v11305_v3 = vpop.f32.mrf.mxu0 }
 0x275   : > { %5378 = vst [vmem:[#allocation2 + $0x74] sm:$0x1] %v5377_v12  ;;  %5375 = vst [vmem:[#allocation2 + $0x70] sm:$0xf] %v5374_v9  ;;  %v5103_v29 = vrot.slane %v5101_v55, 7  ;;  %v5085_v52 = vshrl.u32 %v10305_v38, 16  ;;  %v10308_v54 = vpack.c.bf16 %v4875_v15, %v4875_v15  ;;  %v9909_v14 = vcombine.low %v14473_v37, %v5627_v45 }
 0x276   : > { %v5088_v1 = vshll.u32 %v10305_v38, 16  ;;  %v5362_v31 = vsel %vm12409_vm6, %v5066_v20, %v5361_v58  ;;  %v5365_v51 = vsel %vm12383_vm2, %v5067_v6, %v5364_v2  ;;  %v4873_v8 = vmax.f32 %v4785_v46, 0.0  ;;  %v5379_v34 = vld [vmem:[#allocation2 + $0x78] sm:$0xf]  ;;  %v5382_v62 = vld [vmem:[#allocation2 + $0x7c] sm:$0x1]  ;;  %v14495_v2 = vpop.f32.mrf.mxu1 }
 0x277   : > { %5366 = vst [vmem:[#allocation2 + $0x64] sm:$0x1] %v5365_v51  ;;  %5363 = vst [vmem:[#allocation2 + $0x60] sm:$0xf] %v5362_v31  ;;  %v5106_v4 = vor.u32 %v5104_v53, %v5103_v29  ;;  %v5107_v59 = vrot.slane %v5103_v29, 4  ;;  %v5087_v32 = vrot.slane %v5085_v52, 7  ;;  %v9910_v60 = vcombine.low %v14479_v33, %v5628_v63  ;;  %v4797_v52 = vpop.f32.mrf.mxu0 }
 0x278   : > { %v5109_v22 = vshrl.u32 %v10308_v54, 16  ;;  %v5112_v36 = vshll.u32 %v10308_v54, 16  ;;  %v10306_v25 = vpack.c.bf16 %v4873_v8, %v4873_v8  ;;  %v6460_v58 = vshrl.u32 %v9909_v14, 16  ;;  %v14493_v35 = vld [vmem:[#allocation2 + $0xc] sm:$0x1] }
 0x279   : > { %v5392_v24 = vsel %vm12409_vm6, %v5106_v4, %v5391_v27  ;;  %v5395_v0 = vsel %vm12383_vm2, %v5107_v59, %v5394_v26  ;;  %v5090_v17 = vor.u32 %v5088_v1, %v5087_v32  ;;  %v5091_v56 = vrot.slane %v5087_v32, 4  ;;  %v5564_v46 = vld [vmem:[#allocation2 + $0x8] sm:$0xe]  ;;  %v5397_v12 = vld [vmem:[#allocation2 + $0x90] sm:$0xf]  ;;  %v14505_v59 = vpop.f32.mrf.mxu1 }
 0x27a   : > { %5396 = vst [vmem:[#allocation2 + $0x8c] sm:$0x1] %v5395_v0  ;;  %5393 = vst [vmem:[#allocation2 + $0x88] sm:$0xf] %v5392_v24  ;;  %v5111_v55 = vrot.slane %v5109_v22, 7  ;;  %v5093_v53 = vshrl.u32 %v10306_v25, 16  ;;  %v10041_v8 = vcombine.low %v14473_v37, %v14479_v33  ;;  %v4806_v4 = vadd.f32 %v11305_v3, %v14405_v61  ;;  %v11306_v3 = vpop.f32.mrf.mxu0 }
 0x27b   : > { %v5096_v38 = vshll.u32 %v10306_v25, 16  ;;  %v6462_v15 = vshll.u32 %v9909_v14, 16  ;;  %v5380_v45 = vsel %vm12409_vm6, %v5090_v17, %v5379_v34  ;;  %v5383_v9 = vsel %vm12383_vm2, %v5091_v56, %v5382_v62  ;;  %v5400_v20 = vld [vmem:[#allocation2 + $0x94] sm:$0x1]  ;;  %v5385_v51 = vld [vmem:[#allocation2 + $0x80] sm:$0xf] }
 0x27c   : > { %v6467_v6 = vshrl.u32 %v9910_v60, 16  ;;  %v6469_v29 = vshll.u32 %v9910_v60, 16  ;;  %5384 = vst [vmem:[#allocation2 + $0x7c] sm:$0x1] %v5383_v9  ;;  %5381 = vst [vmem:[#allocation2 + $0x78] sm:$0xf] %v5380_v45  ;;  %v5114_v1 = vor.u32 %v5112_v36, %v5111_v55  ;;  %v9878_v14 = vcombine.low %v5564_v46, %v14493_v35  ;;  %8579 = vmatprep.mubr.bf16.mxu0 %v10041_v8 }
 0x27d   : > { %v5115_v54 = vrot.slane %v5111_v55, 4  ;;  %v5095_v63 = vrot.slane %v5093_v53, 7  ;;  %v6464_v31 = vrot.slane %v6462_v15, 1  ;;  %v5388_v27 = vld [vmem:[#allocation2 + $0x84] sm:$0x1]  ;;  %v4878_v33 = vmax.f32 %v4806_v4, 0.0 }
 0x27e   : > { %v6471_v26 = vrot.slane %v6469_v29, 1  ;;  %v5398_v32 = vsel %vm12409_vm6, %v5114_v1, %v5397_v12  ;;  %v6268_v37 = vrot.slane %v9878_v14, 1  ;;  %v5598_v61 = vld [vmem:[#allocation2 + $0x20] sm:$0xf]  ;;  %v14521_v56 = vld [vmem:[#allocation2 + $0x8] sm:$0xf]  ;;  %v14538_v12 = vadd.f32 %v14339_v48, %v14316_v7 }
 0x27f   : > { %v5401_v22 = vsel %vm12383_vm2, %v5115_v54, %v5400_v20  ;;  %v5098_v34 = vor.u32 %v5096_v38, %v5095_v63  ;;  %v5099_v62 = vrot.slane %v5095_v63, 4  ;;  %5399 = vst [vmem:[#allocation2 + $0x90] sm:$0xf] %v5398_v32  ;;  %v14511_v36 = vor.u32 %v6464_v31, %v6460_v58  ;;  %v16954_v0 = vld [vmem:[#allocation34_spill] sm:$0xff]  ;;  %v16955_v58 = vld [vmem:[#allocation11_spill] sm:$0xff]  ;;  %v11833_v53 = vld [vmem:[%s16690_s2 + $0x1b8] sm:$0xff]   ;;  %v14540_v20 = vpop.f32.mrf.mxu1 }
 0x280   : > { %5402 = vst [vmem:[#allocation2 + $0x94] sm:$0x1] %v5401_v22  ;;  %v14513_v25 = vor.u32 %v6471_v26, %v6467_v6  ;;  %v4637_v17 = vadd.f32 %v14382_v43, %v16954_v0  ;;  %v4640_v55 = vadd.f32 %v14394_v21, %v16955_v58  ;;  %v10040_v15 = vcombine.low %v14375_v23, %v6268_v37  ;;  %v5597_v45 = vld [vmem:[#allocation2 + $0x18] sm:$0xf]  ;;  %v11850_v21 = vld [vmem:[%s16690_s2 + $0x1f0] sm:$0xff]   ;;  %v16957_v23 = vld [vmem:[#allocation19_spill] sm:$0xff] }
 0x281   : > { %16952 = vst [vmem:[#allocation35_spill] sm:$0xff] %v14511_v36  ;;  %v5386_v60 = vsel %vm12409_vm6, %v5098_v34, %v5385_v51  ;;  %v5389_v24 = vsel %vm12383_vm2, %v5099_v62, %v5388_v27  ;;  %v10311_v46 = vpack.c.bf16 %v4878_v33, %v4878_v33  ;;  %v16956_v9 = vld [vmem:[#allocation9_spill] sm:$0xff]  ;;  %v10050_v6 = vcombine.low %v5597_v45, %v5598_v61  ;;  %v4800_v27 = vpop.f32.mrf.mxu0  ;;  %v14560_v26 = vld [vmem:[#allocation2 + $0x10] sm:$0xf]  ;;  %v14562_v8 = vld [vmem:[#allocation2 + $0x14] sm:$0x1]  ;;  %v14573_v22 = vpop.f32.mrf.mxu1 }
 0x282   : > { %16953 = vst [vmem:[#allocation36_spill] sm:$0xff] %v14513_v25  ;;  %5390 = vst [vmem:[#allocation2 + $0x84] sm:$0x1] %v5389_v24  ;;  %v4648_v43 = vadd.f32 %v14398_v13, %v16956_v9  ;;  %v14542_v29 = vld [vmem:[#allocation2 + $0x18] sm:$0xf]  ;;  %v14548_v54 = vadd.f32 %v14407_v57, %v16957_v23  ;;  %v16958_v13 = vld [vmem:[#allocation18_spill] sm:$0xff]  ;;  %v14556_v31 = vadd.f32 %v14439_v18, %v14424_v30  ;;  %8580 = vmatmul.mubr.bf16.vlgmr.msra.gmra.mxu0 %v10040_v15 }
 0x283   : > { %5387 = vst [vmem:[#allocation2 + $0x80] sm:$0xf] %v5386_v60  ;;  %v14544_v1 = vld [vmem:[#allocation2 + $0x1c] sm:$0x1]  ;;  %v14552_v63 = vadd.f32 %v14402_v39, %v16958_v13  ;;  %v5133_v7 = vshrl.u32 %v10311_v46, 16  ;;  %v4798_v48 = vadd.f32 %v4797_v52, %v4637_v17  ;;  %v9846_v51 = vcombine.low %v14521_v56, %v14493_v35  ;;  %8587 = vmatprep.mubr.bf16.mxu0 %v10050_v6  ;;  %v11853_v35 = vld [vmem:[%s16690_s2 + $0x1b0] sm:$0xff]   ;;  %v14589_v6 = vpop.f32.mrf.mxu1 }
 0x284   : > { %v14566_v57 = vadd.f32 %v14458_v5, %v14447_v10  ;;  %v5136_v39 = vshll.u32 %v10311_v46, 16  ;;  %v10038_v30 = vcombine.low %v14296_v47, %v14521_v56  ;;  %v4809_v18 = vadd.f32 %v11306_v3, %v4648_v43  ;;  %11136 = vmatpush3.bf16.msra.mxu0 %v11833_v53  ;;  %v5415_v10 = vld [vmem:[#allocation2 + $0xb8] sm:$0xf]  ;;  %v5418_v5 = vld [vmem:[#allocation2 + $0xbc] sm:$0x1]  ;;  %v11870_v61 = vld [vmem:[%s16690_s2 + $0x1e8] sm:$0xff]  }
 0x285   : > { %v5135_v52 = vrot.slane %v5133_v7, 7  ;;  %v4876_v14 = vmax.f32 %v4798_v48, 0.0  ;;  %v5955_v4 = vshrl.u32 %v9846_v51, 16  ;;  %v5957_v32 = vshll.u32 %v9846_v51, 16  ;;  %11137 = vmatprep.subr.bf16.mxu0 %v11850_v21  ;;  %v11309_v21 = vpop.f32.mrf.mxu0  ;;  %v5403_v23 = vld [vmem:[#allocation2 + $0xa8] sm:$0xf] }
 0x286   : > { %v4879_v34 = vmax.f32 %v4809_v18, 0.0  ;;  %v4801_v62 = vadd.f32 %v4800_v27, %v4640_v55  ;;  %v9847_v37 = vcombine.low %v14560_v26, %v14562_v8  ;;  %v9848_v33 = vcombine.low %v14542_v29, %v14544_v1  ;;  %v11873_v55 = vld [vmem:[%s16690_s2 + $0x1a8] sm:$0xff]   ;;  %v5421_v18 = vld [vmem:[#allocation2 + $0xc0] sm:$0xf]  ;;  %v5575_v40 = vld [vmem:[#allocation2 + $0x70] sm:$0xe] }
 0x287   : > { %v5138_v3 = vor.u32 %v5136_v39, %v5135_v52  ;;  %v5139_v60 = vrot.slane %v5135_v52, 4  ;;  %v10309_v24 = vpack.c.bf16 %v4876_v14, %v4876_v14  ;;  %v5959_v0 = vrot.slane %v5957_v32, 1  ;;  %v5406_v13 = vld [vmem:[#allocation2 + $0xac] sm:$0x1]  ;;  %v5565_v32 = vld [vmem:[#allocation2 + $0x10] sm:$0xe] }
 0x288   : > { %v10312_v17 = vpack.c.bf16 %v4879_v34, %v4879_v34  ;;  %v4877_v58 = vmax.f32 %v4801_v62, 0.0  ;;  %v5962_v53 = vshrl.u32 %v9847_v37, 16  ;;  %v5964_v15 = vshll.u32 %v9847_v37, 16  ;;  %11138 = vmatpush3.bf16.msra.mxu0 %v11853_v35 }
 0x289   : > { %v5416_v46 = vsel %vm12409_vm6, %v5138_v3, %v5415_v10  ;;  %v5419_v45 = vsel %vm12383_vm2, %v5139_v60, %v5418_v5  ;;  %v5117_v9 = vshrl.u32 %v10309_v24, 16  ;;  %v5120_v43 = vshll.u32 %v10309_v24, 16  ;;  %11139 = vmatprep.subr.bf16.mxu0 %v11870_v61  ;;  %v11765_v5 = vld [vmem:[%s16690_s2 + $0x138] sm:$0xff]   ;;  %v5424_v60 = vld [vmem:[#allocation2 + $0xc4] sm:$0x1] }
 0x28a   : > { %5420 = vst [vmem:[#allocation2 + $0xbc] sm:$0x1] %v5419_v45  ;;  %5417 = vst [vmem:[#allocation2 + $0xb8] sm:$0xf] %v5416_v46  ;;  %v5960_v7 = vor.u32 %v5959_v0, %v5955_v4  ;;  %v5141_v48 = vshrl.u32 %v10312_v17, 16  ;;  %v5144_v51 = vshll.u32 %v10312_v17, 16  ;;  %v10310_v27 = vpack.c.bf16 %v4877_v58, %v4877_v58  ;;  %v4813_v17 = vpop.f32.mrf.mxu0 }
 0x28b   : > { %v5119_v39 = vrot.slane %v5117_v9, 7  ;;  %v5966_v35 = vrot.slane %v5964_v15, 1  ;;  %v5969_v52 = vshrl.u32 %v9848_v33, 16  ;;  %v5971_v14 = vshll.u32 %v9848_v33, 16  ;;  %v5566_v61 = vld [vmem:[#allocation2 + $0x18] sm:$0xe] }
 0x28c   : > { %v10039_v10 = vcombine.low %v14390_v19, %v5960_v7  ;;  %v5143_v34 = vrot.slane %v5141_v48, 7  ;;  %v5125_v62 = vshrl.u32 %v10310_v27, 16  ;;  %v5128_v37 = vshll.u32 %v10310_v27, 16  ;;  %11140 = vmatpush3.bf16.msra.mxu0 %v11873_v55  ;;  %v11781_v33 = vld [vmem:[%s16690_s2 + $0x170] sm:$0xff]   ;;  %v14598_v19 = vpop.f32.mrf.mxu1 }
 0x28d   : > { %v5122_v4 = vor.u32 %v5120_v43, %v5119_v39  ;;  %v5123_v3 = vrot.slane %v5119_v39, 4  ;;  %v5967_v24 = vor.u32 %v5966_v35, %v5962_v53  ;;  %v5973_v0 = vrot.slane %v5971_v14, 1  ;;  %v5409_v45 = vld [vmem:[#allocation2 + $0xb0] sm:$0xf]  ;;  %v5412_v43 = vld [vmem:[#allocation2 + $0xb4] sm:$0x1] }
 0x28e   : > { %8418 = vmatprep.mubr.bf16.mxu1 %v10039_v10  ;;  %v5146_v58 = vor.u32 %v5144_v51, %v5143_v34  ;;  %v5147_v15 = vrot.slane %v5143_v34, 4  ;;  %v5127_v46 = vrot.slane %v5125_v62, 7  ;;  %v9879_v9 = vcombine.low %v5565_v32, %v14562_v8  ;;  %v11783_v51 = vld [vmem:[%s16690_s2 + $0x130] sm:$0xff]   ;;  %v11310_v32 = vpop.f32.mrf.mxu0  ;;  %v11799_v10 = vld [vmem:[%s16690_s2 + $0x168] sm:$0xff]   ;;  %v14632_v34 = vpop.f32.mrf.mxu1 }
 0x28f   : > { %v5404_v55 = vsel %vm12409_vm6, %v5122_v4, %v5403_v23  ;;  %v5407_v53 = vsel %vm12383_vm2, %v5123_v3, %v5406_v13  ;;  %8419 = vmatmul.mubr.bf16.vlgmr.msra.gmra.mxu1 %v10038_v30  ;;  %v5974_v7 = vor.u32 %v5973_v0, %v5969_v52  ;;  %v9880_v48 = vcombine.low %v5566_v61, %v14544_v1  ;;  %v14612_v27 = vld [vmem:[#allocation2 + $0x50] sm:$0xf]  ;;  %v14618_v23 = vld [vmem:[#allocation2 + $0x54] sm:$0x1]  ;;  %v11888_v1 = vld [vmem:[%s16690_s2 + $0x1e0] sm:$0xff]  }
 0x290   : > { %5405 = vst [vmem:[#allocation2 + $0xa8] sm:$0xf] %v5404_v55  ;;  %5408 = vst [vmem:[#allocation2 + $0xac] sm:$0x1] %v5407_v53  ;;  %11024 = vmatpush3.bf16.msra.mxu1 %v11765_v5  ;;  %v5422_v8 = vsel %vm12409_vm6, %v5146_v58, %v5421_v18  ;;  %v5425_v47 = vsel %vm12383_vm2, %v5147_v15, %v5424_v60  ;;  %v5130_v56 = vor.u32 %v5128_v37, %v5127_v46  ;;  %v11891_v13 = vld [vmem:[%s16690_s2 + $0x1a0] sm:$0xff]   ;;  %v4816_v53 = vpop.f32.mrf.mxu0 }
 0x291   : > { %v5131_v30 = vrot.slane %v5127_v46, 4  ;;  %5426 = vst [vmem:[#allocation2 + $0xc4] sm:$0x1] %v5425_v47  ;;  %5423 = vst [vmem:[#allocation2 + $0xc0] sm:$0xf] %v5422_v8  ;;  %v10048_v39 = vcombine.low %v5967_v24, %v5974_v7  ;;  %v6269_v35 = vrot.slane %v9879_v9, 1  ;;  %v4822_v52 = vadd.f32 %v11309_v21, %v14548_v54  ;;  %11025 = vmatprep.subr.bf16.mxu1 %v11781_v33  ;;  %v14680_v7 = vpop.f32.mrf.mxu1 }
 0x292   : > { %v6270_v18 = vrot.slane %v9880_v48, 1  ;;  %v5600_v14 = vld [vmem:[#allocation2 + $0x30] sm:$0xf]  ;;  %v10759_v5 = vadd.f32 %v14505_v59, %v14495_v2  ;;  %v5410_v62 = vsel %vm12409_vm6, %v5130_v56, %v5409_v45  ;;  %v14638_v61 = vld [vmem:[#allocation2 + $0x28] sm:$0xf]  ;;  %v16959_v4 = vld [vmem:[#allocation10_spill] sm:$0xff]  ;;  %11141 = vmatprep.subr.bf16.mxu0 %v11888_v1  ;;  %v4814_v60 = vadd.f32 %v4813_v17, %v14552_v63 }
 0x293   : > { %v5413_v37 = vsel %vm12383_vm2, %v5131_v30, %v5412_v43  ;;  %v14640_v54 = vld [vmem:[#allocation2 + $0x20] sm:$0xf]  ;;  %v14642_v21 = vld [vmem:[#allocation2 + $0x24] sm:$0x1]  ;;  %v4656_v3 = vadd.f32 %v14538_v12, %v16959_v4  ;;  %5411 = vst [vmem:[#allocation2 + $0xb0] sm:$0xf] %v5410_v62  ;;  %8426 = vmatprep.mubr.bf16.mxu1 %v10048_v39  ;;  %11142 = vmatpush3.bf16.msra.mxu0 %v11891_v13 }
 0x294   : > { %5414 = vst [vmem:[#allocation2 + $0xb4] sm:$0x1] %v5413_v37  ;;  %v10049_v2 = vcombine.low %v6269_v35, %v6270_v18  ;;  %v4882_v59 = vmax.f32 %v4822_v52, 0.0  ;;  %v16960_v24 = vld [vmem:[#allocation23_spill] sm:$0xff]  ;;  %v11894_v12 = vld [vmem:[%s16690_s2 + $0x1d8] sm:$0xff]   ;;  %v14658_v15 = vadd.f32 %v14481_v41, %v14470_v50  ;;  %v10059_v46 = vcombine.low %v14638_v61, %v5600_v14  ;;  %v16961_v45 = vld [vmem:[#allocation14_spill] sm:$0xff]  ;;  %11026 = vmatpush3.bf16.msra.mxu1 %v11783_v51  ;;  %v11313_v37 = vpop.f32.mrf.mxu0 }
 0x295   : > { %v4664_v0 = vadd.f32 %v14556_v31, %v16960_v24  ;;  %v14649_v33 = vld [vmem:[#allocation2 + $0x28] sm:$0xf]  ;;  %v14651_v58 = vld [vmem:[#allocation2 + $0x2c] sm:$0x1]  ;;  %v14663_v63 = vadd.f32 %v14566_v57, %v16961_v45  ;;  %v14667_v31 = vcombine.low %v14612_v27, %v14618_v23  ;;  %v11898_v50 = vld [vmem:[%s16690_s2 + $0x198] sm:$0xff]   ;;  %v4880_v9 = vmax.f32 %v4814_v60, 0.0  ;;  %11027 = vmatprep.subr.bf16.mxu1 %v11799_v10  ;;  %11143 = vmatprep.subr.bf16.mxu0 %v11894_v12 }
 0x296   : > { %v11801_v17 = vld [vmem:[%s16690_s2 + $0x128] sm:$0xff]   ;;  %8588 = vmatmul.mubr.bf16.gmra.mxu0 %v10049_v2  ;;  %v10315_v41 = vpack.c.bf16 %v4882_v59, %v4882_v59  ;;  %v10047_v57 = vcombine.low %v14560_v26, %v14542_v29  ;;  %v11817_v43 = vld [vmem:[%s16690_s2 + $0x160] sm:$0xff]   ;;  %v9849_v48 = vcombine.low %v14640_v54, %v14642_v21  ;;  %v9850_v51 = vcombine.low %v14649_v33, %v14651_v58  ;;  %v16962_v8 = vld [vmem:[#allocation28_spill] sm:$0xff]  ;;  %v10769_v59 = vpop.f32.mrf.mxu1 }
 0x297   : > { %v4825_v55 = vadd.f32 %v11310_v32, %v4664_v0  ;;  %8595 = vmatprep.mubr.bf16.mxu0 %v10059_v46  ;;  %v14687_v47 = vadd.f32 %v10759_v5, %v16962_v8  ;;  %v10313_v56 = vpack.c.bf16 %v4880_v9, %v4880_v9  ;;  %v14689_v1 = vld [vmem:[#allocation2 + $0x20] sm:$0xe]  ;;  %11144 = vmatpush3.bf16.msra.mxu0 %v11898_v50  ;;  %v5439_v13 = vld [vmem:[#allocation2 + $0xd8] sm:$0xf]  ;;  %v11902_v2 = vld [vmem:[%s16690_s2 + $0x1d0] sm:$0xff]  }
 0x298   : > { %v5165_v29 = vshrl.u32 %v10315_v41, 16  ;;  %v5168_v26 = vshll.u32 %v10315_v41, 16  ;;  %8427 = vmatmul.mubr.bf16.gmra.mxu1 %v10047_v57  ;;  %v5976_v39 = vshrl.u32 %v9849_v48, 16  ;;  %v5978_v35 = vshll.u32 %v9849_v48, 16  ;;  %v11819_v14 = vld [vmem:[%s16690_s2 + $0x120] sm:$0xff]   ;;  %v11837_v4 = vld [vmem:[%s16690_s2 + $0x158] sm:$0xff]   ;;  %11145 = vmatprep.subr.bf16.mxu0 %v11902_v2 }
 0x299   : > { %v4883_v30 = vmax.f32 %v4825_v55, 0.0  ;;  %v5983_v18 = vshrl.u32 %v9850_v51, 16  ;;  %v5985_v52 = vshll.u32 %v9850_v51, 16  ;;  %11028 = vmatpush3.bf16.msra.mxu1 %v11801_v17  ;;  %v5149_v10 = vshrl.u32 %v10313_v56, 16  ;;  %v5442_v60 = vld [vmem:[#allocation2 + $0xdc] sm:$0x1] }
 0x29a   : > { %v5167_v32 = vrot.slane %v5165_v29, 7  ;;  %v5152_v5 = vshll.u32 %v10313_v56, 16  ;;  %11029 = vmatprep.subr.bf16.mxu1 %v11817_v43  ;;  %v5427_v24 = vld [vmem:[#allocation2 + $0xc8] sm:$0xf]  ;;  %v5980_v0 = vrot.slane %v5978_v35, 1  ;;  %v4817_v46 = vadd.f32 %v4816_v53, %v4656_v3  ;;  %v11905_v55 = vld [vmem:[%s16690_s2 + $0x190] sm:$0xff]   ;;  %v10770_v35 = vpop.f32.mrf.mxu1 }
 0x29b   : > { %v10316_v62 = vpack.c.bf16 %v4883_v30, %v4883_v30  ;;  %v5987_v12 = vrot.slane %v5985_v52, 1  ;;  %v9881_v45 = vcombine.low %v14689_v1, %v14642_v21  ;;  %v5151_v41 = vrot.slane %v5149_v10, 7  ;;  %v5568_v57 = vld [vmem:[#allocation2 + $0x28] sm:$0xe]  ;;  %v5430_v43 = vld [vmem:[#allocation2 + $0xcc] sm:$0x1]  ;;  %v14712_v30 = vpop.f32.mrf.mxu0  ;;  %11146 = vmatpush3.bf16.msra.mxu0 %v11905_v55 }
 0x29c   : > { %v5170_v17 = vor.u32 %v5168_v26, %v5167_v32  ;;  %v5171_v50 = vrot.slane %v5167_v32, 4  ;;  %v5981_v51 = vor.u32 %v5980_v0, %v5976_v39  ;;  %v4881_v29 = vmax.f32 %v4817_v46, 0.0  ;;  %v11839_v21 = vld [vmem:[%s16690_s2 + $0x118] sm:$0xff]   ;;  %v11857_v1 = vld [vmem:[%s16690_s2 + $0x150] sm:$0xff]   ;;  %v11908_v39 = vld [vmem:[%s16690_s2 + $0x1c8] sm:$0xff]  }
 0x29d   : > { %v5173_v9 = vshrl.u32 %v10316_v62, 16  ;;  %v5176_v48 = vshll.u32 %v10316_v62, 16  ;;  %v5988_v8 = vor.u32 %v5987_v12, %v5983_v18  ;;  %11030 = vmatpush3.bf16.msra.mxu1 %v11819_v14  ;;  %v5154_v26 = vor.u32 %v5152_v5, %v5151_v41  ;;  %v11909_v32 = vld [vmem:[%s16690_s2 + $0x188] sm:$0xff]   ;;  %v5445_v62 = vld [vmem:[#allocation2 + $0xe0] sm:$0xf]  ;;  %11147 = vmatprep.subr.bf16.mxu0 %v11908_v39 }
 0x29e   : > { %v5440_v3 = vsel %vm12409_vm6, %v5170_v17, %v5439_v13  ;;  %v5443_v53 = vsel %vm12383_vm2, %v5171_v50, %v5442_v60  ;;  %v5155_v56 = vrot.slane %v5151_v41, 4  ;;  %11031 = vmatprep.subr.bf16.mxu1 %v11837_v4  ;;  %v10314_v52 = vpack.c.bf16 %v4881_v29, %v4881_v29  ;;  %v5448_v4 = vld [vmem:[#allocation2 + $0xe4] sm:$0x1]  ;;  %v14735_v17 = vld [vmem:[#allocation2 + $0x50] sm:$0xe] }
 0x29f   : > { %5444 = vst [vmem:[#allocation2 + $0xdc] sm:$0x1] %v5443_v53  ;;  %5441 = vst [vmem:[#allocation2 + $0xd8] sm:$0xf] %v5440_v3  ;;  %v5175_v13 = vrot.slane %v5173_v9, 7  ;;  %v10057_v18 = vcombine.low %v5981_v51, %v5988_v8  ;;  %v9882_v14 = vcombine.low %v5568_v57, %v14651_v58  ;;  %v5428_v10 = vsel %vm12409_vm6, %v5154_v26, %v5427_v24  ;;  %v11914_v58 = vld [vmem:[%s16690_s2 + $0x1c0] sm:$0xff]  }
 0x2a0   : > { %v5431_v5 = vsel %vm12383_vm2, %v5155_v56, %v5430_v43  ;;  %v4838_v2 = vadd.f32 %v11313_v37, %v14687_v47  ;;  %v6006_v60 = vshll.u32 %v14667_v31, 16  ;;  %v10762_v0 = vadd.f32 %v14573_v22, %v14540_v20  ;;  %5429 = vst [vmem:[#allocation2 + $0xc8] sm:$0xf] %v5428_v10  ;;  %v11859_v47 = vld [vmem:[%s16690_s2 + $0x110] sm:$0xff]   ;;  %v14740_v55 = vld [vmem:[#allocation2 + $0x40] sm:$0xf]  ;;  %v11314_v20 = vpop.f32.mrf.mxu0  ;;  %11148 = vmatpush3.bf16.msra.mxu0 %v11909_v32 }
 0x2a1   : > { %5432 = vst [vmem:[#allocation2 + $0xcc] sm:$0x1] %v5431_v5  ;;  %v5178_v24 = vor.u32 %v5176_v48, %v5175_v13  ;;  %v5179_v12 = vrot.slane %v5175_v13, 4  ;;  %8434 = vmatprep.mubr.bf16.mxu1 %v10057_v18  ;;  %v5157_v46 = vshrl.u32 %v10314_v52, 16  ;;  %11032 = vmatpush3.bf16.msra.mxu1 %v11839_v21  ;;  %v10771_v37 = vadd.f32 %v10770_v35, %v10769_v59  ;;  %v5433_v50 = vld [vmem:[#allocation2 + $0xd0] sm:$0xf] }
 0x2a2   : > { %v6271_v41 = vrot.slane %v9881_v45, 1  ;;  %v6272_v9 = vrot.slane %v9882_v14, 1  ;;  %v4886_v57 = vmax.f32 %v4838_v2, 0.0  ;;  %11033 = vmatprep.subr.bf16.mxu1 %v11857_v1  ;;  %v11877_v22 = vld [vmem:[%s16690_s2 + $0x148] sm:$0xff]   ;;  %v5160_v51 = vshll.u32 %v10314_v52, 16  ;;  %11149 = vmatprep.subr.bf16.mxu0 %v11914_v58  ;;  %v11917_v8 = vld [vmem:[%s16690_s2 + $0x180] sm:$0xff]  }
 0x2a3   : > { %v5446_v43 = vsel %vm12409_vm6, %v5178_v24, %v5445_v62  ;;  %v5449_v48 = vsel %vm12383_vm2, %v5179_v12, %v5448_v4  ;;  %v5159_v59 = vrot.slane %v5157_v46, 7  ;;  %v5436_v45 = vld [vmem:[#allocation2 + $0xd4] sm:$0x1]  ;;  %v14752_v3 = vld [vmem:[#allocation2 + $0x38] sm:$0xf]  ;;  %v16963_v56 = vld [vmem:[#allocation26_spill] sm:$0xff]  ;;  %v9885_v39 = vcombine.low %v14735_v17, %v14618_v23  ;;  %v4832_v62 = vpop.f32.mrf.mxu0 }
 0x2a4   : > { %5447 = vst [vmem:[#allocation2 + $0xe0] sm:$0xf] %v5446_v43  ;;  %5450 = vst [vmem:[#allocation2 + $0xe4] sm:$0x1] %v5449_v48  ;;  %v10058_v29 = vcombine.low %v6271_v41, %v6272_v9  ;;  %v10319_v21 = vpack.c.bf16 %v4886_v57, %v4886_v57  ;;  %v14754_v53 = vld [vmem:[#allocation2 + $0x30] sm:$0xf]  ;;  %v4672_v1 = vadd.f32 %v14658_v15, %v16963_v56  ;;  %11150 = vmatpush3.bf16.msra.mxu0 %v11917_v8 }
 0x2a5   : > { %v14756_v26 = vld [vmem:[#allocation2 + $0x38] sm:$0xf]  ;;  %v5162_v35 = vor.u32 %v5160_v51, %v5159_v59  ;;  %v5163_v13 = vrot.slane %v5159_v59, 4  ;;  %v10068_v18 = vcombine.low %v14752_v3, %v14740_v55  ;;  %v4680_v52 = vadd.f32 %v10762_v0, %v14287_v16  ;;  %v5537_v14 = vld [vmem:[#allocation2 + $0x34] sm:$0x1]  ;;  %11034 = vmatpush3.bf16.msra.mxu1 %v11859_v47  ;;  %v11879_v16 = vld [vmem:[%s16690_s2 + $0x108] sm:$0xff]  }
 0x2a6   : > { %v5538_v32 = vld [vmem:[#allocation2 + $0x3c] sm:$0x1]  ;;  %v14767_v10 = vadd.f32 %v14598_v19, %v14589_v6  ;;  %8596 = vmatmul.mubr.bf16.gmra.mxu0 %v10058_v29  ;;  %v5197_v5 = vshrl.u32 %v10319_v21, 16  ;;  %v4830_v15 = vadd.f32 %v14712_v30, %v14663_v63  ;;  %v5569_v4 = vld [vmem:[#allocation2 + $0x30] sm:$0xe]  ;;  %v4693_v58 = vadd.f32 %v10771_v37, %v14324_v49  ;;  %11035 = vmatprep.subr.bf16.mxu1 %v11877_v22  ;;  %v11899_v49 = vld [vmem:[%s16690_s2 + $0x140] sm:$0xff]   ;;  %v11317_v29 = vpop.f32.mrf.mxu0 }
 0x2a7   : > { %v5570_v2 = vld [vmem:[#allocation2 + $0x38] sm:$0xe]  ;;  %v5434_v0 = vsel %vm12409_vm6, %v5162_v35, %v5433_v50  ;;  %v5437_v6 = vsel %vm12383_vm2, %v5163_v13, %v5436_v45  ;;  %v5200_v19 = vshll.u32 %v10319_v21, 16  ;;  %8603 = vmatprep.mubr.bf16.mxu0 %v10068_v18  ;;  %v10056_v63 = vcombine.low %v14640_v54, %v14649_v33  ;;  %v5463_v47 = vld [vmem:[#allocation2 + $0x108] sm:$0xf]  ;;  %v11901_v48 = vld [vmem:[%s16690_s2 + $0x100] sm:$0xff]  }
 0x2a8   : > { %5438 = vst [vmem:[#allocation2 + $0xd4] sm:$0x1] %v5437_v6  ;;  %5435 = vst [vmem:[#allocation2 + $0xd0] sm:$0xf] %v5434_v0  ;;  %v5199_v30 = vrot.slane %v5197_v5, 7  ;;  %v4884_v24 = vmax.f32 %v4830_v15, 0.0  ;;  %v4841_v12 = vadd.f32 %v11314_v20, %v4680_v52  ;;  %v9851_v46 = vcombine.low %v14754_v53, %v5537_v14  ;;  %v10772_v20 = vpop.f32.mrf.mxu1 }
 0x2a9   : > { %v5466_v37 = vld [vmem:[#allocation2 + $0x10c] sm:$0x1]  ;;  %8435 = vmatmul.mubr.bf16.gmra.mxu1 %v10056_v63  ;;  %v9852_v50 = vcombine.low %v14756_v26, %v5538_v32  ;;  %v4833_v41 = vadd.f32 %v4832_v62, %v4672_v1  ;;  %v9883_v9 = vcombine.low %v5569_v4, %v5537_v14  ;;  %v9884_v54 = vcombine.low %v5570_v2, %v5538_v32  ;;  %v11922_v21 = vld [vmem:[%s16690_s2 + $0x238] sm:$0xff]  }
 0x2aa   : > { %v5202_v33 = vor.u32 %v5200_v19, %v5199_v30  ;;  %v5203_v57 = vrot.slane %v5199_v30, 4  ;;  %v10317_v22 = vpack.c.bf16 %v4884_v24, %v4884_v24  ;;  %v4887_v43 = vmax.f32 %v4841_v12, 0.0  ;;  %11036 = vmatpush3.bf16.msra.mxu1 %v11879_v16  ;;  %v10773_v16 = vpop.f32.mrf.mxu1  ;;  %v5451_v0 = vld [vmem:[#allocation2 + $0xf8] sm:$0xf]  ;;  %v5454_v6 = vld [vmem:[#allocation2 + $0xfc] sm:$0x1]  ;;  %v4845_v30 = vpop.f32.mrf.mxu0 }
 0x2ab   : > { %v5990_v59 = vshrl.u32 %v9851_v46, 16  ;;  %v5992_v51 = vshll.u32 %v9851_v46, 16  ;;  %v5997_v45 = vshrl.u32 %v9852_v50, 16  ;;  %v5999_v8 = vshll.u32 %v9852_v50, 16  ;;  %11037 = vmatprep.subr.bf16.mxu1 %v11899_v49 }
 0x2ac   : > { %v5464_v56 = vsel %vm12409_vm6, %v5202_v33, %v5463_v47  ;;  %v5467_v1 = vsel %vm12383_vm2, %v5203_v57, %v5466_v37  ;;  %v5181_v35 = vshrl.u32 %v10317_v22, 16  ;;  %v5184_v13 = vshll.u32 %v10317_v22, 16  ;;  %v5469_v33 = vld [vmem:[#allocation2 + $0x110] sm:$0xf]  ;;  %v5472_v57 = vld [vmem:[#allocation2 + $0x114] sm:$0x1] }
 0x2ad   : > { %5468 = vst [vmem:[#allocation2 + $0x10c] sm:$0x1] %v5467_v1  ;;  %5465 = vst [vmem:[#allocation2 + $0x108] sm:$0xf] %v5464_v56  ;;  %v10320_v18 = vpack.c.bf16 %v4887_v43, %v4887_v43  ;;  %v5994_v52 = vrot.slane %v5992_v51, 1  ;;  %v6001_v14 = vrot.slane %v5999_v8, 1  ;;  %v4854_v4 = vadd.f32 %v11317_v29, %v4693_v58 }
 0x2ae   : > { %v4885_v32 = vmax.f32 %v4833_v41, 0.0  ;;  %v5183_v5 = vrot.slane %v5181_v35, 7  ;;  %v6273_v15 = vrot.slane %v9883_v9, 1  ;;  %v6274_v62 = vrot.slane %v9884_v54, 1  ;;  %11038 = vmatpush3.bf16.msra.mxu1 %v11901_v48  ;;  %v14798_v9 = vld [vmem:[#allocation2 + $0x60] sm:$0xf] }
 0x2af   : > { %v10768_v2 = vadd.f32 %v14680_v7, %v14632_v34  ;;  %v5205_v19 = vshrl.u32 %v10320_v18, 16  ;;  %v5995_v63 = vor.u32 %v5994_v52, %v5990_v59  ;;  %v6002_v49 = vor.u32 %v6001_v14, %v5997_v45  ;;  %11319 = vmatprep.subr.bf16.mxu1 %v11922_v21  ;;  %v5457_v59 = vld [vmem:[#allocation2 + $0x100] sm:$0xf]  ;;  %v14804_v45 = vld [vmem:[#allocation2 + $0x58] sm:$0xf] }
 0x2b0   : > { %v5186_v24 = vor.u32 %v5184_v13, %v5183_v5  ;;  %v5187_v12 = vrot.slane %v5183_v5, 4  ;;  %v10318_v46 = vpack.c.bf16 %v4885_v32, %v4885_v32  ;;  %v10067_v47 = vcombine.low %v6273_v15, %v6274_v62  ;;  %v5460_v56 = vld [vmem:[#allocation2 + $0x104] sm:$0x1]  ;;  %v14817_v32 = vld [vmem:[#allocation2 + $0x58] sm:$0xf] }
 0x2b1   : > { %v5207_v37 = vrot.slane %v5205_v19, 7  ;;  %v5208_v50 = vshll.u32 %v10320_v18, 16  ;;  %v10066_v41 = vcombine.low %v5995_v63, %v6002_v49  ;;  %v4890_v58 = vmax.f32 %v4854_v4, 0.0  ;;  %v5540_v5 = vld [vmem:[#allocation2 + $0x5c] sm:$0x1] }
 0x2b2   : > { %v10774_v54 = vadd.f32 %v10773_v16, %v10772_v20  ;;  %v5452_v34 = vsel %vm12409_vm6, %v5186_v24, %v5451_v0  ;;  %v5455_v7 = vsel %vm12383_vm2, %v5187_v12, %v5454_v6  ;;  %v5189_v22 = vshrl.u32 %v10318_v46, 16  ;;  %8604 = vmatmul.mubr.bf16.gmra.mxu0 %v10067_v47  ;;  %v11318_v20 = vpop.f32.mrf.mxu0  ;;  %v5487_v63 = vld [vmem:[#allocation2 + $0x128] sm:$0xf]  ;;  %v5490_v49 = vld [vmem:[#allocation2 + $0x12c] sm:$0x1] }
 0x2b3   : > { %5453 = vst [vmem:[#allocation2 + $0xf8] sm:$0xf] %v5452_v34  ;;  %5456 = vst [vmem:[#allocation2 + $0xfc] sm:$0x1] %v5455_v7  ;;  %v5210_v43 = vor.u32 %v5208_v50, %v5207_v37  ;;  %v5211_v48 = vrot.slane %v5207_v37, 4  ;;  %8442 = vmatprep.mubr.bf16.mxu1 %v10066_v41  ;;  %v10323_v51 = vpack.c.bf16 %v4890_v58, %v4890_v58  ;;  %v6004_v8 = vshrl.u32 %v14667_v31, 16 }
 0x2b4   : > { %v5191_v29 = vrot.slane %v5189_v22, 7  ;;  %v5192_v21 = vshll.u32 %v10318_v46, 16  ;;  %v10077_v1 = vcombine.low %v14804_v45, %v14798_v9  ;;  %v6008_v35 = vrot.slane %v6006_v60, 1  ;;  %v4848_v19 = vpop.f32.mrf.mxu0  ;;  %v5572_v12 = vld [vmem:[#allocation2 + $0x58] sm:$0xe] }
 0x2b5   : > { %v5470_v13 = vsel %vm12409_vm6, %v5210_v43, %v5469_v33  ;;  %v5473_v18 = vsel %vm12383_vm2, %v5211_v48, %v5472_v57  ;;  %v5229_v52 = vshrl.u32 %v10323_v51, 16  ;;  %v4685_v14 = vadd.f32 %v14767_v10, %v14292_v11  ;;  %v5478_v22 = vld [vmem:[#allocation2 + $0x11c] sm:$0x1] }
 0x2b6   : > { %5474 = vst [vmem:[#allocation2 + $0x114] sm:$0x1] %v5473_v18  ;;  %5471 = vst [vmem:[#allocation2 + $0x110] sm:$0xf] %v5470_v13  ;;  %v5194_v15 = vor.u32 %v5192_v21, %v5191_v29  ;;  %v5195_v62 = vrot.slane %v5191_v29, 4  ;;  %8611 = vmatprep.mubr.bf16.mxu0 %v10077_v1  ;;  %v4696_v31 = vadd.f32 %v10774_v54, %v14352_v44  ;;  %v5232_v16 = vshll.u32 %v10323_v51, 16 }
 0x2b7   : > { %v4688_v60 = vadd.f32 %v10768_v2, %v14305_v28  ;;  %v5231_v4 = vrot.slane %v5229_v52, 7  ;;  %v4846_v0 = vadd.f32 %v4845_v30, %v4685_v14  ;;  %v10065_v6 = vcombine.low %v14754_v53, %v14756_v26  ;;  %v5496_v29 = vld [vmem:[#allocation2 + $0x134] sm:$0x1]  ;;  %v14837_v52 = vld [vmem:[#allocation2 + $0x68] sm:$0xf] }
 0x2b8   : > { %v5458_v11 = vsel %vm12409_vm6, %v5194_v15, %v5457_v59  ;;  %v5461_v10 = vsel %vm12383_vm2, %v5195_v62, %v5460_v56  ;;  %v4857_v24 = vadd.f32 %v11318_v20, %v4696_v31  ;;  %v9854_v44 = vcombine.low %v14817_v32, %v5540_v5  ;;  %v14835_v56 = vld [vmem:[#allocation2 + $0x70] sm:$0xf]  ;;  %v14839_v14 = vld [vmem:[#allocation2 + $0x60] sm:$0xf]  ;;  %v5541_v31 = vld [vmem:[#allocation2 + $0x64] sm:$0x1] }
 0x2b9   : > { %5462 = vst [vmem:[#allocation2 + $0x104] sm:$0x1] %v5461_v10  ;;  %5459 = vst [vmem:[#allocation2 + $0x100] sm:$0xf] %v5458_v11  ;;  %v5234_v28 = vor.u32 %v5232_v16, %v5231_v4  ;;  %v5235_v2 = vrot.slane %v5231_v4, 4  ;;  %v4888_v30 = vmax.f32 %v4846_v0, 0.0  ;;  %8443 = vmatmul.mubr.bf16.gmra.mxu1 %v10065_v6  ;;  %v6009_v46 = vor.u32 %v6008_v35, %v6004_v8 }
 0x2ba   : > { %v6275_v53 = vrot.slane %v9885_v39, 1  ;;  %v4891_v26 = vmax.f32 %v4857_v24, 0.0  ;;  %v6013_v47 = vshll.u32 %v9854_v44, 16  ;;  %v4849_v37 = vadd.f32 %v4848_v19, %v4688_v60  ;;  %v5475_v39 = vld [vmem:[#allocation2 + $0x118] sm:$0xf] }
 0x2bb   : > { %v5488_v50 = vsel %vm12409_vm6, %v5234_v28, %v5487_v63  ;;  %v5491_v41 = vsel %vm12383_vm2, %v5235_v2, %v5490_v49  ;;  %v10321_v58 = vpack.c.bf16 %v4888_v30, %v4888_v30  ;;  %v9886_v54 = vcombine.low %v5572_v12, %v5540_v5  ;;  %v5493_v8 = vld [vmem:[#allocation2 + $0x130] sm:$0xf]  ;;  %v14841_v5 = vld [vmem:[#allocation2 + $0x68] sm:$0xf]  ;;  %v5542_v60 = vld [vmem:[#allocation2 + $0x6c] sm:$0x1] }
 0x2bc   : > { %5492 = vst [vmem:[#allocation2 + $0x12c] sm:$0x1] %v5491_v41  ;;  %5489 = vst [vmem:[#allocation2 + $0x128] sm:$0xf] %v5488_v50  ;;  %v10324_v34 = vpack.c.bf16 %v4891_v26, %v4891_v26  ;;  %v6011_v7 = vshrl.u32 %v9854_v44, 16  ;;  %v6015_v33 = vrot.slane %v6013_v47, 1  ;;  %v10086_v24 = vcombine.low %v14837_v52, %v14835_v56 }
 0x2bd   : > { %v4889_v57 = vmax.f32 %v4849_v37, 0.0  ;;  %v5213_v23 = vshrl.u32 %v10321_v58, 16  ;;  %v6276_v17 = vrot.slane %v9886_v54, 1  ;;  %v5216_v20 = vshll.u32 %v10321_v58, 16  ;;  %v5573_v19 = vld [vmem:[#allocation2 + $0x60] sm:$0xe] }
 0x2be   : > { %v5237_v43 = vshrl.u32 %v10324_v34, 16  ;;  %v6016_v48 = vor.u32 %v6015_v33, %v6011_v7  ;;  %v5240_v35 = vshll.u32 %v10324_v34, 16  ;;  %v5481_v63 = vld [vmem:[#allocation2 + $0x120] sm:$0xf]  ;;  %v5484_v49 = vld [vmem:[#allocation2 + $0x124] sm:$0x1]  ;;  %v10074_v44 = vcombine.low %v14612_v27, %v14817_v32 }
 0x2bf   : > { %v10322_v59 = vpack.c.bf16 %v4889_v57, %v4889_v57  ;;  %v5215_v51 = vrot.slane %v5213_v23, 7  ;;  %v10076_v21 = vcombine.low %v6275_v53, %v6276_v17  ;;  %v5574_v12 = vld [vmem:[#allocation2 + $0x68] sm:$0xe]  ;;  %v9855_v26 = vcombine.low %v14839_v14, %v5541_v31  ;;  %v14861_v50 = vld [vmem:[#allocation2 + $0x70] sm:$0xf] }
 0x2c0   : > { %v5239_v1 = vrot.slane %v5237_v43, 7  ;;  %v10075_v13 = vcombine.low %v6009_v46, %v6016_v48  ;;  %v9856_v46 = vcombine.low %v14841_v5, %v5542_v60  ;;  %v9887_v27 = vcombine.low %v5573_v19, %v5541_v31  ;;  %v14863_v54 = vld [vmem:[#allocation2 + $0x78] sm:$0xf]  ;;  %v5543_v34 = vld [vmem:[#allocation2 + $0x74] sm:$0x1] }
 0x2c1   : > { %v5221_v18 = vshrl.u32 %v10322_v59, 16  ;;  %v5218_v15 = vor.u32 %v5216_v20, %v5215_v51  ;;  %v5219_v62 = vrot.slane %v5215_v51, 4  ;;  %8612 = vmatmul.mubr.bf16.gmra.mxu0 %v10076_v21  ;;  %v5224_v6 = vshll.u32 %v10322_v59, 16  ;;  %v5544_v7 = vld [vmem:[#allocation2 + $0x7c] sm:$0x1] }
 0x2c2   : > { %v5242_v4 = vor.u32 %v5240_v35, %v5239_v1  ;;  %v5243_v16 = vrot.slane %v5239_v1, 4  ;;  %8450 = vmatprep.mubr.bf16.mxu1 %v10075_v13  ;;  %8619 = vmatprep.mubr.bf16.mxu0 %v10086_v24  ;;  %v9888_v37 = vcombine.low %v5574_v12, %v5542_v60  ;;  %v6020_v41 = vshll.u32 %v9855_v26, 16  ;;  %v14865_v23 = vld [vmem:[#allocation2 + $0x80] sm:$0xf]  ;;  %v5576_v43 = vld [vmem:[#allocation2 + $0x78] sm:$0xe] }
 0x2c3   : > { %v5223_v0 = vrot.slane %v5221_v18, 7  ;;  %v5476_v11 = vsel %vm12409_vm6, %v5218_v15, %v5475_v39  ;;  %v5479_v10 = vsel %vm12383_vm2, %v5219_v62, %v5478_v22  ;;  %8451 = vmatmul.mubr.bf16.gmra.mxu1 %v10074_v44  ;;  %v6027_v58 = vshll.u32 %v9856_v46, 16  ;;  %v14867_v59 = vld [vmem:[#allocation2 + $0x78] sm:$0xf]  ;;  %v14873_v15 = vld [vmem:[#allocation2 + $0x80] sm:$0xf] }
 0x2c4   : > { %5480 = vst [vmem:[#allocation2 + $0x11c] sm:$0x1] %v5479_v10  ;;  %5477 = vst [vmem:[#allocation2 + $0x118] sm:$0xf] %v5476_v11  ;;  %v5494_v28 = vsel %vm12409_vm6, %v5242_v4, %v5493_v8  ;;  %v5497_v2 = vsel %vm12383_vm2, %v5243_v16, %v5496_v29  ;;  %v6277_v33 = vrot.slane %v9887_v27, 1  ;;  %v6278_v57 = vrot.slane %v9888_v37, 1 }
 0x2c5   : > { %v5226_v30 = vor.u32 %v5224_v6, %v5223_v0  ;;  %v5227_v53 = vrot.slane %v5223_v0, 4  ;;  %5495 = vst [vmem:[#allocation2 + $0x130] sm:$0xf] %v5494_v28  ;;  %5498 = vst [vmem:[#allocation2 + $0x134] sm:$0x1] %v5497_v2  ;;  %v6018_v17 = vshrl.u32 %v9855_v26, 16  ;;  %v10095_v8 = vcombine.low %v14867_v59, %v14865_v23 }
 0x2c6   : > { %v6022_v39 = vrot.slane %v6020_v41, 1  ;;  %v6025_v42 = vshrl.u32 %v9856_v46, 16  ;;  %v6029_v22 = vrot.slane %v6027_v58, 1  ;;  %v10085_v48 = vcombine.low %v6277_v33, %v6278_v57  ;;  %v14875_v62 = vld [vmem:[#allocation2 + $0x88] sm:$0xf] }
 0x2c7   : > { %v5482_v32 = vsel %vm12409_vm6, %v5226_v30, %v5481_v63  ;;  %v5485_v47 = vsel %vm12383_vm2, %v5227_v53, %v5484_v49  ;;  %v9857_v29 = vcombine.low %v14861_v50, %v5543_v34  ;;  %v9858_v21 = vcombine.low %v14863_v54, %v5544_v7  ;;  %v5545_v16 = vld [vmem:[#allocation2 + $0x84] sm:$0x1]  ;;  %v5546_v0 = vld [vmem:[#allocation2 + $0x8c] sm:$0x1]  ;;  %v5577_v10 = vld [vmem:[#allocation2 + $0x80] sm:$0xe] }
 0x2c8   : > { %5486 = vst [vmem:[#allocation2 + $0x124] sm:$0x1] %v5485_v47  ;;  %5483 = vst [vmem:[#allocation2 + $0x120] sm:$0xf] %v5482_v32  ;;  %v6023_v51 = vor.u32 %v6022_v39, %v6018_v17  ;;  %v6030_v20 = vor.u32 %v6029_v22, %v6025_v42  ;;  %v9889_v1 = vcombine.low %v5575_v40, %v5543_v34  ;;  %v14879_v24 = vld [vmem:[#allocation2 + $0x90] sm:$0xf] }
 0x2c9   : > { %8620 = vmatmul.mubr.bf16.gmra.mxu0 %v10085_v48  ;;  %v9890_v35 = vcombine.low %v5576_v43, %v5544_v7  ;;  %v6034_v18 = vshll.u32 %v9857_v29, 16  ;;  %v10083_v31 = vcombine.low %v14839_v14, %v14841_v5  ;;  %v6041_v60 = vshll.u32 %v9858_v21, 16  ;;  %v5578_v44 = vld [vmem:[#allocation2 + $0x88] sm:$0xe]  ;;  %v14887_v47 = vld [vmem:[#allocation2 + $0xa0] sm:$0xf] }
 0x2ca   : > { %v10084_v13 = vcombine.low %v6023_v51, %v6030_v20  ;;  %8627 = vmatprep.mubr.bf16.mxu0 %v10095_v8  ;;  %v6032_v6 = vshrl.u32 %v9857_v29, 16  ;;  %v6279_v11 = vrot.slane %v9889_v1, 1  ;;  %v6039_v63 = vshrl.u32 %v9858_v21, 16  ;;  %v14881_v30 = vld [vmem:[#allocation2 + $0x88] sm:$0xf] }
 0x2cb   : > { %v6280_v4 = vrot.slane %v9890_v35, 1  ;;  %v6036_v19 = vrot.slane %v6034_v18, 1  ;;  %v6043_v49 = vrot.slane %v6041_v60, 1  ;;  %v9859_v14 = vcombine.low %v14873_v15, %v5545_v16  ;;  %v5547_v58 = vld [vmem:[#allocation2 + $0xa4] sm:$0x1] }
 0x2cc   : > { %8458 = vmatprep.mubr.bf16.mxu1 %v10084_v13  ;;  %v9860_v5 = vcombine.low %v14875_v62, %v5546_v0  ;;  %v9891_v53 = vcombine.low %v5577_v10, %v5545_v16  ;;  %v10104_v26 = vcombine.low %v14881_v30, %v14879_v24  ;;  %v9892_v46 = vcombine.low %v5578_v44, %v5546_v0  ;;  %v5579_v34 = vld [vmem:[#allocation2 + $0xa0] sm:$0xe]  ;;  %v14891_v40 = vld [vmem:[#allocation2 + $0xa8] sm:$0xf]  ;;  %v5548_v17 = vld [vmem:[#allocation2 + $0xac] sm:$0x1] }
 0x2cd   : > { %8459 = vmatmul.mubr.bf16.gmra.mxu1 %v10083_v31  ;;  %v6037_v12 = vor.u32 %v6036_v19, %v6032_v6  ;;  %v10094_v28 = vcombine.low %v6279_v11, %v6280_v4  ;;  %v6044_v2 = vor.u32 %v6043_v49, %v6039_v63  ;;  %v6048_v32 = vshll.u32 %v9859_v14, 16  ;;  %v5580_v43 = vld [vmem:[#allocation2 + $0xa8] sm:$0xe]  ;;  %v14893_v51 = vld [vmem:[#allocation2 + $0xb0] sm:$0xf] }
 0x2ce   : > { %v6055_v37 = vshll.u32 %v9860_v5, 16  ;;  %v6281_v41 = vrot.slane %v9891_v53, 1  ;;  %v10092_v7 = vcombine.low %v14861_v50, %v14863_v54  ;;  %v6046_v33 = vshrl.u32 %v9859_v14, 16  ;;  %v14897_v50 = vld [vmem:[#allocation2 + $0xa8] sm:$0xf] }
 0x2cf   : > { %v10093_v27 = vcombine.low %v6037_v12, %v6044_v2  ;;  %v6050_v57 = vrot.slane %v6048_v32, 1  ;;  %v6053_v39 = vshrl.u32 %v9860_v5, 16  ;;  %v6282_v22 = vrot.slane %v9892_v46, 1  ;;  %v14901_v4 = vld [vmem:[#allocation2 + $0xb8] sm:$0xf] }
 0x2d0   : > { %v6057_v42 = vrot.slane %v6055_v37, 1  ;;  %v9861_v20 = vcombine.low %v14887_v47, %v5547_v58  ;;  %v9862_v21 = vcombine.low %v14891_v40, %v5548_v17  ;;  %v9893_v35 = vcombine.low %v5579_v34, %v5547_v58  ;;  %v5550_v16 = vld [vmem:[#allocation2 + $0xbc] sm:$0x1]  ;;  %v14903_v6 = vld [vmem:[#allocation2 + $0xb0] sm:$0xf] }
 0x2d1   : > { %8628 = vmatmul.mubr.bf16.gmra.mxu0 %v10094_v28  ;;  %8466 = vmatprep.mubr.bf16.mxu1 %v10093_v27  ;;  %v6051_v48 = vor.u32 %v6050_v57, %v6046_v33  ;;  %v10103_v29 = vcombine.low %v6281_v41, %v6282_v22  ;;  %v9894_v13 = vcombine.low %v5580_v43, %v5548_v17  ;;  %v5549_v19 = vld [vmem:[#allocation2 + $0xb4] sm:$0x1]  ;;  %v5581_v5 = vld [vmem:[#allocation2 + $0xb0] sm:$0xe]  ;;  %v14909_v53 = vld [vmem:[#allocation2 + $0x1c] sm:$0x1] }
 0x2d2   : > { %8635 = vmatprep.mubr.bf16.mxu0 %v10104_v26  ;;  %v6058_v8 = vor.u32 %v6057_v42, %v6053_v39  ;;  %v6060_v54 = vshrl.u32 %v9861_v20, 16  ;;  %v6062_v1 = vshll.u32 %v9861_v20, 16  ;;  %v10113_v31 = vcombine.low %v14897_v50, %v14893_v51  ;;  %v14911_v26 = vld [vmem:[#allocation2 + $0x24] sm:$0x1]  ;;  %v14913_v46 = vld [vmem:[#allocation2 + $0xc0] sm:$0xf] }
 0x2d3   : > { %v6069_v60 = vshll.u32 %v9862_v21, 16  ;;  %v6067_v11 = vshrl.u32 %v9862_v21, 16  ;;  %v10101_v63 = vcombine.low %v14873_v15, %v14875_v62  ;;  %v6283_v44 = vrot.slane %v9893_v35, 1  ;;  %v14915_v32 = vld [vmem:[#allocation2 + $0xb8] sm:$0xf] }
 0x2d4   : > { %v10102_v18 = vcombine.low %v6051_v48, %v6058_v8  ;;  %v6064_v0 = vrot.slane %v6062_v1, 1  ;;  %v6284_v12 = vrot.slane %v9894_v13, 1  ;;  %v9863_v2 = vcombine.low %v14903_v6, %v5549_v19  ;;  %v5582_v62 = vld [vmem:[#allocation2 + $0xb8] sm:$0xe]  ;;  %v14917_v34 = vld [vmem:[#allocation2 + $0xc0] sm:$0xf] }
 0x2d5   : > { %8467 = vmatmul.mubr.bf16.gmra.mxu1 %v10092_v7  ;;  %v6071_v10 = vrot.slane %v6069_v60, 1  ;;  %v9864_v14 = vcombine.low %v14901_v4, %v5550_v16  ;;  %v9895_v58 = vcombine.low %v5581_v5, %v5549_v19  ;;  %v14919_v7 = vld [vmem:[#allocation2 + $0xc4] sm:$0x1]  ;;  %v12091_v33 = vld [vmem:[#allocation2 + $0x18] sm:$0xf]  ;;  %v10122_v17 = vcombine.low %v14915_v32, %v14913_v46 }
 0x2d6   : > { %8474 = vmatprep.mubr.bf16.mxu1 %v10102_v18  ;;  %v6065_v49 = vor.u32 %v6064_v0, %v6060_v54  ;;  %v6076_v15 = vshll.u32 %v9863_v2, 16  ;;  %v10112_v37 = vcombine.low %v6283_v44, %v6284_v12  ;;  %v14922_v57 = vcombine.low %v12091_v33, %v14909_v53  ;;  %v14926_v22 = vld [vmem:[#allocation2 + $0xc8] sm:$0xf]  ;;  %v5552_v43 = vld [vmem:[#allocation2 + $0xcc] sm:$0x1] }
 0x2d7   : > { %v6072_v28 = vor.u32 %v6071_v10, %v6067_v11  ;;  %v6083_v41 = vshll.u32 %v9864_v14, 16  ;;  %v6074_v39 = vshrl.u32 %v9863_v2, 16  ;;  %v6081_v48 = vshrl.u32 %v9864_v14, 16  ;;  %v14933_v35 = vld [vmem:[#allocation2 + $0x2c] sm:$0x1] }
 0x2d8   : > { %v6078_v42 = vrot.slane %v6076_v15, 1  ;;  %v9896_v8 = vcombine.low %v5582_v62, %v5550_v16  ;;  %v9865_v1 = vcombine.low %v14917_v34, %v14919_v7  ;;  %16964 = vst [vmem:[#allocation20_spill] sm:$0xff] %v14933_v35  ;;  %v10110_v13 = vcombine.low %v14887_v47, %v14891_v40  ;;  %v5583_v19 = vld [vmem:[#allocation2 + $0xc0] sm:$0xe]  ;;  %v5584_v11 = vld [vmem:[#allocation2 + $0xc8] sm:$0xe] }
 0x2d9   : > { %8636 = vmatmul.mubr.bf16.gmra.mxu0 %v10103_v29  ;;  %v10111_v27 = vcombine.low %v6065_v49, %v6072_v28  ;;  %v6085_v20 = vrot.slane %v6083_v41, 1  ;;  %v12092_v29 = vld [vmem:[#allocation2 + $0x20] sm:$0xf]  ;;  %v9866_v60 = vcombine.low %v14926_v22, %v5552_v43  ;;  %v6476_v16 = vshll.u32 %v14922_v57, 16  ;;  %v14939_v10 = vld [vmem:[#allocation2 + $0xd8] sm:$0xf] }
 0x2da   : > { %8643 = vmatprep.mubr.bf16.mxu0 %v10113_v31  ;;  %v14929_v21 = vcombine.low %v12092_v29, %v14911_v26  ;;  %v6079_v54 = vor.u32 %v6078_v42, %v6074_v39  ;;  %v6285_v31 = vrot.slane %v9895_v58, 1  ;;  %v6090_v0 = vshll.u32 %v9865_v1, 16  ;;  %v14941_v44 = vld [vmem:[#allocation2 + $0xd0] sm:$0xf]  ;;  %v14943_v28 = vld [vmem:[#allocation2 + $0xdc] sm:$0x1] }
 0x2db   : > { %v6086_v18 = vor.u32 %v6085_v20, %v6081_v48  ;;  %v6286_v49 = vrot.slane %v9896_v8, 1  ;;  %v6097_v12 = vshll.u32 %v9866_v60, 16  ;;  %v14948_v40 = vcombine.low %v14638_v61, %v14933_v35  ;;  %v14950_v14 = vld [vmem:[#allocation2 + $0xd0] sm:$0xf]  ;;  %v14952_v5 = vld [vmem:[#allocation2 + $0xd4] sm:$0x1] }
 0x2dc   : > { %v6483_v47 = vshll.u32 %v14929_v21, 16  ;;  %v6092_v2 = vrot.slane %v6090_v0, 1  ;;  %v14956_v62 = vld [vmem:[#allocation2 + $0xc8] sm:$0xf]  ;;  %v9898_v58 = vcombine.low %v5584_v11, %v5552_v43  ;;  %v6088_v39 = vshrl.u32 %v9865_v1, 16 }
 0x2dd   : > { %8475 = vmatmul.mubr.bf16.gmra.mxu1 %v10101_v63  ;;  %v10120_v63 = vcombine.low %v6079_v54, %v6086_v18  ;;  %v10121_v15 = vcombine.low %v6285_v31, %v6286_v49  ;;  %v6099_v41 = vrot.slane %v6097_v12, 1  ;;  %v10131_v61 = vcombine.low %v14956_v62, %v14941_v44  ;;  %v12093_v54 = vld [vmem:[#allocation2 + $0x30] sm:$0xf]  ;;  %v14974_v18 = vld [vmem:[#allocation2 + $0x3c] sm:$0x1] }
 0x2de   : > { %8482 = vmatprep.mubr.bf16.mxu1 %v10111_v27  ;;  %v14954_v27 = vld [vmem:[#allocation2 + $0x34] sm:$0x1]  ;;  %v9897_v48 = vcombine.low %v5583_v19, %v14919_v7  ;;  %v9867_v20 = vcombine.low %v14950_v14, %v14952_v5  ;;  %v9868_v8 = vcombine.low %v14939_v10, %v14943_v28  ;;  %v14967_v29 = vrot.slane %v6476_v16, 1  ;;  %16966 = vst [vmem:[#allocation25_spill] sm:$0xff] %v14974_v18  ;;  %v14976_v31 = vld [vmem:[#allocation2 + $0xf0] sm:$0xf] }
 0x2df   : > { %16965 = vst [vmem:[#allocation17_spill] sm:$0xff] %v14954_v27  ;;  %v14969_v43 = vrot.slane %v6483_v47, 1  ;;  %v6093_v1 = vor.u32 %v6092_v2, %v6088_v39  ;;  %v6288_v0 = vrot.slane %v9898_v58, 1  ;;  %v14981_v19 = vld [vmem:[#allocation2 + $0xf4] sm:$0x1]  ;;  %v6490_v11 = vshll.u32 %v14948_v40, 16 }
 0x2e0   : > { %v6104_v16 = vshll.u32 %v9867_v20, 16  ;;  %v14986_v12 = vld [vmem:[#allocation2 + $0xe0] sm:$0xf]  ;;  %v6111_v47 = vshll.u32 %v9868_v8, 16  ;;  %v5585_v2 = vld [vmem:[#allocation2 + $0xd0] sm:$0xe]  ;;  %v9869_v38 = vcombine.low %v14976_v31, %v14981_v19 }
 0x2e1   : > { %8644 = vmatmul.mubr.bf16.gmra.mxu0 %v10112_v37  ;;  %v6095_v37 = vshrl.u32 %v9866_v60, 16  ;;  %v10119_v60 = vcombine.low %v14903_v6, %v14901_v4  ;;  %16968 = vst [vmem:[#allocation32_spill] sm:$0xff] %v14986_v12  ;;  %v6102_v58 = vshrl.u32 %v9867_v20, 16  ;;  %v15028_v33 = vld [vmem:[#allocation2 + $0x10c] sm:$0x1] }
 0x2e2   : > { %8651 = vmatprep.mubr.bf16.mxu0 %v10122_v17  ;;  %v6113_v39 = vrot.slane %v6111_v47, 1  ;;  %v6109_v47 = vshrl.u32 %v9868_v8, 16  ;;  %v5587_v17 = vld [vmem:[#allocation2 + $0xf0] sm:$0xe] }
 0x2e3   : > { %v6100_v42 = vor.u32 %v6099_v41, %v6095_v37  ;;  %v6106_v37 = vrot.slane %v6104_v16, 1  ;;  %v14988_v41 = vld [vmem:[#allocation2 + $0xf8] sm:$0xf]  ;;  %v9899_v16 = vcombine.low %v5585_v2, %v14952_v5  ;;  %v6118_v2 = vshll.u32 %v9869_v38, 16 }
 0x2e5   : > { %8483 = vmatmul.mubr.bf16.gmra.mxu1 %v10110_v13  ;;  %v14972_v13 = vcombine.low %v12093_v54, %v14954_v27  ;;  %v10129_v49 = vcombine.low %v6093_v1, %v6100_v42  ;;  %v5586_v54 = vld [vmem:[#allocation2 + $0xd8] sm:$0xe]  ;;  %v14996_v42 = vcombine.low %v14752_v3, %v14974_v18  ;;  %v14998_v1 = vld [vmem:[#allocation2 + $0x5c] sm:$0x1]  ;;  %v6107_v20 = vor.u32 %v6106_v37, %v6102_v58  ;;  %v15024_v37 = vld [vmem:[#allocation2 + $0x6c] sm:$0x1] }
 0x2e6   : > { %8490 = vmatprep.mubr.bf16.mxu1 %v10120_v63  ;;  %v14984_v63 = vld [vmem:[#allocation2 + $0x44] sm:$0x1]  ;;  %16969 = vst [vmem:[#allocation33_spill] sm:$0xff] %v14998_v1  ;;  %v15009_v3 = vrot.slane %v6490_v11, 1  ;;  %v9900_v5 = vcombine.low %v5586_v54, %v14943_v28  ;;  %v15022_v8 = vcombine.low %v14804_v45, %v14998_v1  ;;  %16972 = vst [vmem:[#allocation22_spill] sm:$0xff] %v15024_v37  ;;  %v6116_v18 = vshrl.u32 %v9869_v38, 16 }
 0x2e7   : > { %16967 = vst [vmem:[#allocation27_spill] sm:$0xff] %v14984_v63  ;;  %v6497_v6 = vshll.u32 %v14972_v13, 16  ;;  %v6114_v11 = vor.u32 %v6113_v39, %v6109_v47  ;;  %v10128_v28 = vcombine.low %v14917_v34, %v14926_v22  ;;  %v15033_v54 = vld [vmem:[#allocation2 + $0x100] sm:$0xf]  ;;  %v15035_v45 = vld [vmem:[#allocation2 + $0x104] sm:$0x1] }
 0x2e8   : > { %16971 = vst [vmem:[#allocation21_spill] sm:$0xff] %v15022_v8  ;;  %v5588_v47 = vld [vmem:[#allocation2 + $0xf8] sm:$0xe]  ;;  %v6290_v34 = vrot.slane %v9900_v5, 1  ;;  %v15043_v22 = vld [vmem:[#allocation2 + $0x100] sm:$0xf]  ;;  %v9871_v38 = vcombine.low %v15033_v54, %v15035_v45 }
 0x2e9   : > { %8652 = vmatmul.mubr.bf16.gmra.mxu0 %v10121_v15  ;;  %v6287_v15 = vrot.slane %v9897_v48, 1  ;;  %v15018_v7 = vrot.slane %v6497_v6, 1  ;;  %v6289_v6 = vrot.slane %v9899_v16, 1  ;;  %v10138_v1 = vcombine.low %v6107_v20, %v6114_v11  ;;  %16973 = vst [vmem:[#allocation30_spill] sm:$0xff] %v15043_v22  ;;  %v15052_v11 = vld [vmem:[#allocation2 + $0x74] sm:$0x1] }
 0x2ea   : > { %8659 = vmatprep.mubr.bf16.mxu0 %v10131_v61  ;;  %v14990_v61 = vld [vmem:[#allocation2 + $0xfc] sm:$0x1]  ;;  %v6518_v16 = vshll.u32 %v15022_v8, 16  ;;  %16974 = vst [vmem:[#allocation29_spill] sm:$0xff] %v15052_v11  ;;  %v6132_v27 = vshll.u32 %v9871_v38, 16 }
 0x2eb   : > { %v10130_v48 = vcombine.low %v6287_v15, %v6288_v0  ;;  %v9870_v4 = vcombine.low %v14988_v41, %v14990_v61  ;;  %v15013_v0 = vcombine.low %v14740_v55, %v14984_v63  ;;  %v15015_v15 = vld [vmem:[#allocation2 + $0x64] sm:$0x1]  ;;  %v15026_v55 = vld [vmem:[#allocation2 + $0x108] sm:$0xf]  ;;  %v6504_v63 = vshll.u32 %v14996_v42, 16 }
 0x2ec   : > { %16970 = vst [vmem:[#allocation12_spill] sm:$0xff] %v15015_v15  ;;  %v10139_v5 = vcombine.low %v6289_v6, %v6290_v34 }
 0x2ed   : > { %8491 = vmatmul.mubr.bf16.gmra.mxu1 %v10119_v60  ;;  %v15000_v60 = vld [vmem:[#allocation2 + $0xd8] sm:$0xf]  ;;  %v6125_v58 = vshll.u32 %v9870_v4, 16  ;;  %v6511_v35 = vshll.u32 %v15013_v0, 16  ;;  %v6123_v20 = vshrl.u32 %v9870_v4, 16  ;;  %v9902_v4 = vcombine.low %v5588_v47, %v14990_v61 }
 0x2ee   : > { %8498 = vmatprep.mubr.bf16.mxu1 %v10129_v49  ;;  %v10140_v49 = vcombine.low %v15000_v60, %v14986_v12  ;;  %v15066_v12 = vrot.slane %v6504_v63, 1  ;;  %v15077_v61 = vcombine.low %v14835_v56, %v15052_v11  ;;  %v10137_v47 = vcombine.low %v14950_v14, %v14939_v10  ;;  %v5589_v11 = vld [vmem:[#allocation2 + $0x100] sm:$0xe]  ;;  %v15101_v10 = vld [vmem:[#allocation2 + $0x110] sm:$0xf] }
 0x2ef   : > { %v6127_v39 = vrot.slane %v6125_v58, 1  ;;  %v15058_v58 = vld [vmem:[#allocation2 + $0xf8] sm:$0xf]  ;;  %v15091_v56 = vrot.slane %v6518_v16, 1  ;;  %16982 = vst [vmem:[#allocation6_spill] sm:$0xff] %v15101_v10 }
 0x2f0   : > { %16976 = vst [vmem:[#allocation16_spill] sm:$0xff] %v15058_v58  ;;  %16978 = vst [vmem:[#allocation13_spill] sm:$0xff] %v15077_v61  ;;  %v6539_v16 = vshll.u32 %v15077_v61, 16  ;;  %v15159_v61 = vld [vmem:[#allocation2 + $0x18] sm:$0xf] }
 0x2f1   : > { %8660 = vmatmul.mubr.bf16.gmra.mxu0 %v10130_v48  ;;  %v15041_v48 = vcombine.low %v14798_v9, %v15015_v15  ;;  %v15056_v9 = vcombine.low %v14837_v52, %v15024_v37  ;;  %v10149_v15 = vcombine.low %v15058_v58, %v15043_v22  ;;  %v6128_v36 = vor.u32 %v6127_v39, %v6123_v20  ;;  %v15120_v58 = vld [vmem:[#allocation2 + $0x108] sm:$0xf] }
 0x2f2   : > { %8667 = vmatprep.mubr.bf16.mxu0 %v10140_v49  ;;  %v6120_v49 = vrot.slane %v6118_v2, 1  ;;  %v15050_v2 = vcombine.low %v15026_v55, %v15028_v33  ;;  %v15069_v37 = vrot.slane %v6511_v35, 1  ;;  %v15084_v35 = vld [vmem:[#allocation2 + $0x11c] sm:$0x1]  ;;  %v6292_v20 = vrot.slane %v9902_v4, 1  ;;  %16986 = vst [vmem:[#allocation19_spill] sm:$0xff] %v15120_v58 }
 0x2f3   : > { %16975 = vst [vmem:[#allocation31_spill] sm:$0xff] %v15056_v9  ;;  %v6525_v6 = vshll.u32 %v15041_v48, 16  ;;  %v6532_v39 = vshll.u32 %v15056_v9, 16  ;;  %v6134_v52 = vrot.slane %v6132_v27, 1  ;;  %v5590_v27 = vld [vmem:[#allocation2 + $0x108] sm:$0xe] }
 0x2f4   : > { %v6121_v25 = vor.u32 %v6120_v49, %v6116_v18  ;;  %v15079_v18 = vld [vmem:[#allocation2 + $0x84] sm:$0x1]  ;;  %v6139_v63 = vshll.u32 %v15050_v2, 16  ;;  %v15082_v49 = vld [vmem:[#allocation2 + $0x118] sm:$0xf] }
 0x2f5   : > { %8499 = vmatmul.mubr.bf16.gmra.mxu1 %v10128_v28  ;;  %v9901_v28 = vcombine.low %v5587_v17, %v14981_v19  ;;  %v15072_v17 = vld [vmem:[#allocation2 + $0x110] sm:$0xf]  ;;  %16979 = vst [vmem:[#allocation7_spill] sm:$0xff] %v15079_v18  ;;  %v15094_v22 = vrot.slane %v6525_v6, 1  ;;  %v15105_v14 = vcombine.low %v15082_v49, %v15084_v35  ;;  %v15112_v4 = vrot.slane %v6532_v39, 1 }
 0x2f6   : > { %8506 = vmatprep.mubr.bf16.mxu1 %v10138_v1  ;;  %v15062_v1 = vld [vmem:[#allocation2 + $0x7c] sm:$0x1]  ;;  %v15118_v6 = vld [vmem:[#allocation2 + $0x8c] sm:$0x1]  ;;  %v6137_v39 = vshrl.u32 %v15050_v2, 16 }
 0x2f7   : > { %16977 = vst [vmem:[#allocation24_spill] sm:$0xff] %v15062_v1  ;;  %v6291_v34 = vrot.slane %v9901_v28, 1  ;;  %16980 = vst [vmem:[#allocation15_spill] sm:$0xff] %v15094_v22  ;;  %v15099_v8 = vcombine.low %v14867_v59, %v15062_v1  ;;  %v15116_v59 = vcombine.low %v14865_v23, %v15079_v18  ;;  %v6153_v1 = vshll.u32 %v15105_v14, 16  ;;  %v15143_v23 = vld [vmem:[#allocation2 + $0x10] sm:$0xf] }
 0x2f8   : > { %16983 = vst [vmem:[#allocation34_spill] sm:$0xff] %v15112_v4  ;;  %16985 = vst [vmem:[#allocation9_spill] sm:$0xff] %v15118_v6  ;;  %v5724_v4 = vld [vmem:[#allocation2 + $0x1c] sm:$0x1]  ;;  %v5591_v9 = vld [vmem:[#allocation2 + $0x110] sm:$0xe] }
 0x2f9   : > { %8668 = vmatmul.mubr.bf16.gmra.mxu0 %v10139_v5  ;;  %v15089_v5 = vld [vmem:[#allocation2 + $0x114] sm:$0x1]  ;;  %16981 = vst [vmem:[#allocation8_spill] sm:$0xff] %v15099_v8  ;;  %16984 = vst [vmem:[#allocation11_spill] sm:$0xff] %v15116_v59  ;;  %v6546_v18 = vshll.u32 %v15099_v8, 16  ;;  %v6151_v8 = vshrl.u32 %v15105_v14, 16 }
 0x2fa   : > { %8675 = vmatprep.mubr.bf16.mxu0 %v10149_v15  ;;  %v10147_v15 = vcombine.low %v6121_v25, %v6128_v36  ;;  %v6130_v36 = vshrl.u32 %v9871_v38, 16  ;;  %v6141_v25 = vrot.slane %v6139_v63, 1  ;;  %v15110_v28 = vcombine.low %v15072_v17, %v15089_v5  ;;  %v15123_v38 = vld [vmem:[#allocation2 + $0x94] sm:$0x1]  ;;  %v5757_v22 = vld [vmem:[#allocation2 + $0x20] sm:$0xe] }
 0x2fb   : > { %16987 = vst [vmem:[#allocation18_spill] sm:$0xff] %v15123_v38  ;;  %v10158_v63 = vcombine.low %v15120_v58, %v15101_v10  ;;  %v5723_v10 = vld [vmem:[#allocation2 + $0x14] sm:$0x1]  ;;  %v15148_v58 = vld [vmem:[#allocation2 + $0x128] sm:$0xf] }
 0x2fc   : > { %v6135_v19 = vor.u32 %v6134_v52, %v6130_v36  ;;  %v15140_v52 = vcombine.low %v14881_v30, %v15118_v6  ;;  %v6142_v2 = vor.u32 %v6141_v25, %v6137_v39  ;;  %v6146_v36 = vshll.u32 %v15110_v28, 16  ;;  %v15153_v6 = vld [vmem:[#allocation2 + $0xac] sm:$0x1]  ;;  %v5592_v39 = vld [vmem:[#allocation2 + $0x118] sm:$0xe] }
 0x2fd   : > { %8507 = vmatmul.mubr.bf16.gmra.mxu1 %v10137_v47  ;;  %v10148_v47 = vcombine.low %v6291_v34, %v6292_v20  ;;  %v9904_v34 = vcombine.low %v5590_v27, %v15028_v33  ;;  %v15132_v20 = vld [vmem:[#allocation2 + $0x120] sm:$0xf]  ;;  %v10146_v33 = vcombine.low %v14976_v31, %v14988_v41  ;;  %16989 = vst [vmem:[#allocation23_spill] sm:$0xff] %v15153_v6  ;;  %v15161_v31 = vrot.slane %v6546_v18, 1 }
 0x2fe   : > { %8514 = vmatprep.mubr.bf16.mxu1 %v10147_v15  ;;  %v9903_v15 = vcombine.low %v5589_v11, %v15035_v45  ;;  %v15134_v45 = vld [vmem:[#allocation2 + $0x124] sm:$0x1]  ;;  %v15136_v11 = vrot.slane %v6539_v16, 1  ;;  %v15150_v16 = vld [vmem:[#allocation2 + $0x12c] sm:$0x1]  ;;  %v10156_v25 = vcombine.low %v6135_v19, %v6142_v2  ;;  %v6148_v2 = vrot.slane %v6146_v36, 1 }
 0x2ff   : > { %16990 = vst [vmem:[#allocation14_spill] sm:$0xff] %v15161_v31  ;;  %v6294_v30 = vrot.slane %v9904_v34, 1  ;;  %v15168_v19 = vld [vmem:[#allocation2 + $0x120] sm:$0xf]  ;;  %v15174_v18 = vcombine.low %v15148_v58, %v15150_v16  ;;  %v9906_v34 = vcombine.low %v5592_v39, %v15084_v35  ;;  %v6144_v14 = vshrl.u32 %v15110_v28, 16 }
 0x300   : > { %16988 = vst [vmem:[#allocation10_spill] sm:$0xff] %v15136_v11  ;;  %v6293_v27 = vrot.slane %v9903_v15, 1  ;;  %v15157_v11 = vcombine.low %v15132_v20, %v15134_v45  ;;  %v15166_v15 = vcombine.low %v14879_v24, %v15123_v38  ;;  %16992 = vst [vmem:[#allocation26_spill] sm:$0xff] %v15168_v19  ;;  %v15178_v24 = vld [vmem:[#allocation2 + $0x118] sm:$0xf]  ;;  %v15193_v35 = vcombine.low %v14897_v50, %v15153_v6 }
 0x301   : > { %8676 = vmatmul.mubr.bf16.gmra.mxu0 %v10148_v47  ;;  %v6553_v47 = vshll.u32 %v15116_v59, 16  ;;  %16993 = vst [vmem:[#allocation37_spill] sm:$0xff] %v15178_v24  ;;  %v10167_v36 = vcombine.low %v15178_v24, %v15168_v19  ;;  %v5725_v31 = vld [vmem:[#allocation2 + $0x24] sm:$0x1]  ;;  %v5726_v28 = vld [vmem:[#allocation2 + $0x2c] sm:$0x1]  ;;  %v6149_v39 = vor.u32 %v6148_v2, %v6144_v14  ;;  %v10155_v50 = vcombine.low %v15033_v54, %v15026_v55 }
 0x302   : > { %8683 = vmatprep.mubr.bf16.mxu0 %v10158_v63  ;;  %v6155_v63 = vrot.slane %v6153_v1, 1  ;;  %16991 = vst [vmem:[#allocation28_spill] sm:$0xff] %v15166_v15  ;;  %v6560_v1 = vshll.u32 %v15140_v52, 16  ;;  %v10157_v59 = vcombine.low %v6293_v27, %v6294_v30  ;;  %v6160_v38 = vshll.u32 %v15157_v11, 16  ;;  %v15189_v27 = vld [vmem:[#allocation2 + $0xb4] sm:$0x1] }
 0x303   : > { %v15176_v41 = vrot.slane %v6553_v47, 1  ;;  %16994 = vst [vmem:[#allocation38_spill] sm:$0xff] %v15189_v27  ;;  %v15197_v30 = vcombine.low %v15159_v61, %v5724_v4  ;;  %v6167_v47 = vshll.u32 %v15174_v18, 16  ;;  %v5758_v19 = vld [vmem:[#allocation2 + $0x28] sm:$0xe]  ;;  %v6296_v6 = vrot.slane %v9906_v34, 1 }
 0x304   : > { %v10007_v4 = vcombine.low %v5757_v22, %v5725_v31  ;;  %v15213_v14 = vld [vmem:[#allocation2 + $0x28] sm:$0xf]  ;;  %v15223_v24 = vld [vmem:[#allocation2 + $0x20] sm:$0xf] }
 0x305   : > { %8515 = vmatmul.mubr.bf16.gmra.mxu1 %v10146_v33  ;;  %v15182_v33 = vcombine.low %v15143_v23, %v5723_v10  ;;  %v9905_v10 = vcombine.low %v5591_v9, %v15089_v5  ;;  %v5593_v9 = vld [vmem:[#allocation2 + $0x120] sm:$0xe]  ;;  %v15216_v54 = vld [vmem:[#allocation2 + $0x128] sm:$0xf]  ;;  %v6981_v34 = vshll.u32 %v15197_v30, 16 }
 0x306   : > { %8522 = vmatprep.mubr.bf16.mxu1 %v10156_v25  ;;  %v6156_v25 = vor.u32 %v6155_v63, %v6151_v8  ;;  %v15199_v8 = vrot.slane %v6560_v1, 1  ;;  %v6567_v1 = vshll.u32 %v15166_v15, 16  ;;  %v15211_v63 = vcombine.low %v14893_v51, %v15189_v27  ;;  %16997 = vst [vmem:[#allocation41_spill] sm:$0xff] %v15216_v54 }
 0x307   : > { %v6974_v5 = vshll.u32 %v15182_v33, 16  ;;  %v6295_v55 = vrot.slane %v9905_v10, 1  ;;  %v6158_v51 = vshrl.u32 %v15157_v11, 16  ;;  %v6169_v27 = vrot.slane %v6167_v47, 1  ;;  %v15235_v47 = vld [vmem:[#allocation2 + $0xbc] sm:$0x1] }
 0x308   : > { %16995 = vst [vmem:[#allocation39_spill] sm:$0xff] %v15199_v8  ;;  %v10165_v2 = vcombine.low %v6149_v39, %v6156_v25  ;;  %v10008_v8 = vcombine.low %v5758_v19, %v5726_v28  ;;  %v5594_v25 = vld [vmem:[#allocation2 + $0x128] sm:$0xe]  ;;  %v15225_v10 = vrot.slane %v10007_v4, 1  ;;  %v10164_v19 = vcombine.low %v15072_v17, %v15082_v49  ;;  %17000 = vst [vmem:[#allocation44_spill] sm:$0xff] %v15235_v47 }
 0x309   : > { %8684 = vmatmul.mubr.bf16.gmra.mxu0 %v10157_v59  ;;  %v15205_v59 = vld [vmem:[#allocation2 + $0x130] sm:$0xf]  ;;  %v10166_v39 = vcombine.low %v6295_v55, %v6296_v6  ;;  %v6976_v15 = vrot.slane %v6974_v5, 1  ;;  %v15233_v11 = vcombine.low %v15213_v14, %v5726_v28  ;;  %v15237_v6 = vld [vmem:[#allocation2 + $0xc4] sm:$0x1]  ;;  %v6979_v5 = vshrl.u32 %v15197_v30, 16 }
 0x30a   : > { %8691 = vmatprep.mubr.bf16.mxu0 %v10167_v36  ;;  %16996 = vst [vmem:[#allocation40_spill] sm:$0xff] %v15205_v59  ;;  %v6162_v36 = vrot.slane %v6160_v38, 1  ;;  %v10176_v22 = vcombine.low %v15216_v54, %v15205_v59  ;;  %v9907_v38 = vcombine.low %v5593_v9, %v15134_v45  ;;  %16998 = vst [vmem:[#allocation42_spill] sm:$0xff] %v15225_v10  ;;  %v6165_v59 = vshrl.u32 %v15174_v18, 16  ;;  %v5660_v54 = vld [vmem:[#allocation2 + $0x10] sm:$0xe] }
 0x30b   : > { %17001 = vst [vmem:[#allocation45_spill] sm:$0xff] %v15237_v6  ;;  %v9908_v45 = vcombine.low %v5594_v25, %v15150_v16  ;;  %v6983_v9 = vrot.slane %v6981_v34, 1  ;;  %v5659_v28 = vld [vmem:[#allocation2 + $0x8] sm:$0xe]  ;;  %v15245_v4 = vcombine.low %v15223_v24, %v5725_v31  ;;  %v12094_v55 = vld [vmem:[#allocation2 + $0x14] sm:$0x1]  ;;  %v15263_v31 = vcombine.low %v14913_v46, %v15237_v6 }
 0x30c   : > { %v6170_v49 = vor.u32 %v6169_v27, %v6165_v59  ;;  %v6297_v18 = vrot.slane %v9907_v38, 1  ;;  %v17002_v16 = vshrl.u32 %v14922_v57, 16  ;;  %v17003_v34 = vshrl.u32 %v14929_v21, 16  ;;  %v12095_v59 = vld [vmem:[#allocation2 + $0xc] sm:$0x1]  ;;  %v17026_v10 = vld [vmem:[#allocation34_spill] sm:$0xff] }
 0x30d   : > { %8523 = vmatmul.mubr.bf16.gmra.mxu1 %v10155_v50  ;;  %v15227_v50 = vrot.slane %v10008_v8, 1  ;;  %v6972_v8 = vshrl.u32 %v15182_v33, 16  ;;  %v15259_v27 = vcombine.low %v14915_v32, %v15235_v47  ;;  %v6995_v30 = vshll.u32 %v15233_v11, 16  ;;  %v15266_v21 = vld [vmem:[#allocation2 + $0x30] sm:$0xf]  ;;  %v17024_v25 = vld [vmem:[#allocation31_spill] sm:$0xff] }
 0x30e   : > { %8530 = vmatprep.mubr.bf16.mxu1 %v10165_v2  ;;  %v6163_v2 = vor.u32 %v6162_v36, %v6158_v51  ;;  %v9942_v51 = vcombine.low %v5660_v54, %v12094_v55  ;;  %v15250_v33 = vor.u32 %v14967_v29, %v17002_v16  ;;  %v6298_v57 = vrot.slane %v9908_v45, 1  ;;  %v5729_v17 = vld [vmem:[#allocation2 + $0x44] sm:$0x1]  ;;  %v15398_v38 = vld [vmem:[#allocation2 + $0xfc] sm:$0x1] }
 0x30f   : > { %16999 = vst [vmem:[#allocation43_spill] sm:$0xff] %v15227_v50  ;;  %v6977_v36 = vor.u32 %v6976_v15, %v6972_v8  ;;  %v6984_v29 = vor.u32 %v6983_v9, %v6979_v5  ;;  %v9941_v54 = vcombine.low %v5659_v28, %v12095_v59  ;;  %v15270_v32 = vrot.slane %v6567_v1, 1  ;;  %v15276_v9 = vld [vmem:[#allocation2 + $0x38] sm:$0xf]  ;;  %v17048_v47 = vld [vmem:[#allocation39_spill] sm:$0xff] }
 0x310   : > { %v10174_v15 = vcombine.low %v6163_v2, %v6170_v49  ;;  %v10175_v2 = vcombine.low %v6297_v18, %v6298_v57  ;;  %v6780_v8 = vrot.slane %v9942_v51, 1  ;;  %v5728_v49 = vld [vmem:[#allocation2 + $0x3c] sm:$0x1]  ;;  %v6997_v5 = vrot.slane %v6995_v30, 1  ;;  %v5662_v57 = vld [vmem:[#allocation2 + $0x20] sm:$0xe] }
 0x311   : > { %8692 = vmatmul.mubr.bf16.gmra.mxu0 %v10166_v39  ;;  %v6988_v39 = vshll.u32 %v15245_v4, 16  ;;  %v10045_v45 = vcombine.low %v6977_v36, %v6984_v29  ;;  %v17004_v1 = vshrl.u32 %v14948_v40, 16  ;;  %v17005_v16 = vshrl.u32 %v14972_v13, 16  ;;  %v5661_v29 = vld [vmem:[#allocation2 + $0x18] sm:$0xe] }
 0x312   : > { %8699 = vmatprep.mubr.bf16.mxu0 %v10176_v22  ;;  %v15255_v22 = vor.u32 %v14969_v43, %v17003_v34  ;;  %v5727_v43 = vld [vmem:[#allocation2 + $0x34] sm:$0x1]  ;;  %v17006_v18 = vshll.u32 %v15193_v35, 16  ;;  %v6588_v51 = vshll.u32 %v15259_v27, 16  ;;  %v6779_v30 = vrot.slane %v9941_v54, 1 }
 0x313   : > { %v15279_v28 = vcombine.low %v15266_v21, %v5727_v43  ;;  %v15284_v55 = vor.u32 %v15009_v3, %v17004_v1  ;;  %v15289_v34 = vor.u32 %v15018_v7, %v17005_v16  ;;  %v6990_v40 = vrot.slane %v6988_v39, 1  ;;  %v15306_v1 = vld [vmem:[#allocation2 + $0xcc] sm:$0x1]  ;;  %v17022_v43 = vld [vmem:[#allocation20_spill] sm:$0xff] }
 0x314   : > { %v15293_v36 = vrot.slane %v17006_v18, 1  ;;  %v6993_v3 = vshrl.u32 %v15233_v11, 16  ;;  %v15299_v13 = vcombine.low %v15276_v9, %v5728_v49  ;;  %17007 = vst [vmem:[#allocation46_spill] sm:$0xff] %v15306_v1  ;;  %v10173_v54 = vcombine.low %v15132_v20, %v15148_v58  ;;  %v15313_v11 = vld [vmem:[#allocation2 + $0xe4] sm:$0x1] }
 0x315   : > { %8531 = vmatmul.mubr.bf16.gmra.mxu1 %v10164_v19  ;;  %v6581_v19 = vshll.u32 %v15211_v63, 16  ;;  %v6986_v39 = vshrl.u32 %v15245_v4, 16  ;;  %17009 = vst [vmem:[#allocation48_spill] sm:$0xff] %v15313_v11  ;;  %v9944_v16 = vcombine.low %v5662_v57, %v14911_v26  ;;  %v15317_v18 = vld [vmem:[#allocation2 + $0x40] sm:$0xf]  ;;  %v9943_v58 = vcombine.low %v5661_v29, %v14909_v53 }
 0x316   : > { %8538 = vmatprep.mubr.bf16.mxu1 %v10174_v15  ;;  %v6595_v15 = vshll.u32 %v15263_v31, 16  ;;  %v6998_v49 = vor.u32 %v6997_v5, %v6993_v3  ;;  %v15321_v20 = vld [vmem:[#allocation2 + $0x48] sm:$0xf]  ;;  %v5730_v4 = vld [vmem:[#allocation2 + $0x4c] sm:$0x1]  ;;  %v17010_v46 = vshrl.u32 %v14996_v42, 16  ;;  %v15342_v42 = vcombine.low %v14956_v62, %v15306_v1 }
 0x317   : > { %v15303_v59 = vrot.slane %v6581_v19, 1  ;;  %v7002_v19 = vshll.u32 %v15279_v28, 16  ;;  %v17011_v26 = vshrl.u32 %v15013_v0, 16  ;;  %v15337_v3 = vld [vmem:[#allocation2 + $0xd4] sm:$0x1]  ;;  %v6991_v53 = vor.u32 %v6990_v40, %v6986_v39 }
 0x318   : > { %v15335_v57 = vrot.slane %v6595_v15, 1  ;;  %17012 = vst [vmem:[#allocation49_spill] sm:$0xff] %v15337_v3  ;;  %v7009_v29 = vshll.u32 %v15299_v13, 16  ;;  %v15347_v0 = vcombine.low %v15317_v18, %v5729_v17  ;;  %v15352_v40 = vcombine.low %v15321_v20, %v5730_v4  ;;  %v5732_v7 = vld [vmem:[#allocation2 + $0x6c] sm:$0x1] }
 0x319   : > { %8700 = vmatmul.mubr.bf16.gmra.mxu0 %v10175_v2  ;;  %v15311_v2 = vld [vmem:[#allocation2 + $0xdc] sm:$0x1]  ;;  %v15331_v5 = vor.u32 %v15069_v37, %v17011_v26  ;;  %v7004_v15 = vrot.slane %v7002_v19, 1  ;;  %v15356_v62 = vcombine.low %v14941_v44, %v15337_v3  ;;  %v6781_v39 = vrot.slane %v9943_v58, 1 }
 0x31a   : > { %8901 = vmatprep.mubr.bf16.mxu0 %v10045_v45  ;;  %17008 = vst [vmem:[#allocation47_spill] sm:$0xff] %v15311_v2  ;;  %v10043_v45 = vcombine.low %v6779_v30, %v6780_v8  ;;  %v15326_v8 = vor.u32 %v15066_v12, %v17010_v46  ;;  %v15333_v30 = vrot.slane %v6588_v51, 1  ;;  %v10044_v12 = vcombine.low %v15143_v23, %v15159_v61  ;;  %v17013_v23 = vld [vmem:[#allocation32_spill] sm:$0xff]  ;;  %v17014_v19 = vld [vmem:[#allocation21_spill] sm:$0xff] }
 0x31b   : > { %v10054_v46 = vcombine.low %v6991_v53, %v6998_v49  ;;  %v6782_v51 = vrot.slane %v9944_v16, 1  ;;  %v15360_v61 = vcombine.low %v15000_v60, %v15311_v2  ;;  %v15364_v17 = vcombine.low %v17013_v23, %v15313_v11  ;;  %v5663_v16 = vld [vmem:[#allocation2 + $0x28] sm:$0xe]  ;;  %v17018_v58 = vld [vmem:[#allocation17_spill] sm:$0xff]  ;;  %v17020_v23 = vld [vmem:[#allocation36_spill] sm:$0xff]  ;;  %17023 = vst [vmem:[#allocation32_spill] sm:$0xff] %v15398_v38 }
 0x31c   : > { %v7011_v49 = vrot.slane %v7009_v29, 1  ;;  %v17015_v4 = vshrl.u32 %v17014_v19, 16  ;;  %v17016_v26 = vshrl.u32 %v15041_v48, 16  ;;  %v17017_v60 = vld [vmem:[#allocation15_spill] sm:$0xff]  ;;  %v11933_v29 = vld [vmem:[%s16690_s2 + $0x230] sm:$0xff]   ;;  %v17025_v50 = vshrl.u32 %v17024_v25, 16 }
 0x31d   : > { %8539 = vmatmul.mubr.bf16.gmra.mxu1 %v10173_v54  ;;  %v5664_v54 = vld [vmem:[#allocation2 + $0x30] sm:$0xe]  ;;  %v10052_v19 = vcombine.low %v6781_v39, %v6782_v51  ;;  %v15385_v48 = vld [vmem:[#allocation2 + $0x60] sm:$0xf]  ;;  %v9945_v51 = vcombine.low %v5663_v16, %v17022_v43  ;;  %v6616_v39 = vshll.u32 %v15360_v61, 16  ;;  %v11944_v43 = vld [vmem:[%s16690_s2 + $0x228] sm:$0xff]  }
 0x31e   : > { %8740 = vmatprep.mubr.bf16.mxu1 %v10043_v45  ;;  %v7000_v45 = vshrl.u32 %v15279_v28, 16  ;;  %v15370_v44 = vor.u32 %v15091_v56, %v17015_v4  ;;  %v15375_v53 = vor.u32 %v17017_v60, %v17016_v26  ;;  %v7016_v28 = vshll.u32 %v15347_v0, 16  ;;  %v12096_v26 = vld [vmem:[%s16690_s2 + $0x238] sm:$0xff]   ;;  %v17029_v11 = vld [vmem:[#allocation10_spill] sm:$0xff]  ;;  %v17031_v25 = vld [vmem:[#allocation16_spill] sm:$0xff] }
 0x31f   : > { %v7023_v4 = vshll.u32 %v15352_v40, 16  ;;  %v6602_v60 = vshll.u32 %v15342_v42, 16  ;;  %v15413_v2 = vor.u32 %v17026_v10, %v17025_v50  ;;  %v15428_v3 = vcombine.low %v17031_v25, %v15398_v38 }
 0x320   : > { %v7005_v56 = vor.u32 %v7004_v15, %v7000_v45  ;;  %v5731_v15 = vld [vmem:[#allocation2 + $0x64] sm:$0x1]  ;;  %v6623_v45 = vshll.u32 %v15364_v17, 16  ;;  %v7018_v16 = vrot.slane %v7016_v28, 1  ;;  %v5666_v28 = vld [vmem:[#allocation2 + $0x40] sm:$0xe] }
 0x321   : > { %8902 = vmatmul.mubr.bf16.vlgmr.msra.gmra.mxu0 %v10044_v12  ;;  %v7007_v12 = vshrl.u32 %v15299_v13, 16  ;;  %v10053_v13 = vcombine.low %v15223_v24, %v15213_v14  ;;  %v15420_v14 = vld [vmem:[#allocation2 + $0x104] sm:$0x1]  ;;  %v15424_v1 = vcombine.low %v15385_v48, %v5731_v15  ;;  %v6783_v10 = vrot.slane %v9945_v51, 1 }
 0x322   : > { %8909 = vmatprep.mubr.bf16.mxu0 %v10054_v46  ;;  %v9946_v46 = vcombine.low %v5664_v54, %v17018_v58  ;;  %v6609_v54 = vshll.u32 %v15356_v62, 16  ;;  %v17019_v58 = vld [vmem:[#allocation35_spill] sm:$0xff]  ;;  %17030 = vst [vmem:[#allocation21_spill] sm:$0xff] %v15420_v14  ;;  %v7014_v50 = vshrl.u32 %v15347_v0, 16  ;;  %v17032_v15 = vld [vmem:[#allocation30_spill] sm:$0xff]  ;;  %v15467_v38 = vrot.slane %v6623_v45, 1 }
 0x323   : > { %v17021_v37 = vcombine.low %v17019_v58, %v17020_v23  ;;  %v7012_v23 = vor.u32 %v7011_v49, %v7007_v12  ;;  %v15408_v58 = vld [vmem:[#allocation2 + $0x68] sm:$0xf]  ;;  %v7021_v12 = vshrl.u32 %v15352_v40, 16  ;;  %v17037_v40 = vld [vmem:[#allocation14_spill] sm:$0xff]  ;;  %v17047_v6 = vshrl.u32 %v15140_v52, 16 }
 0x324   : > { %v7019_v0 = vor.u32 %v7018_v16, %v7014_v50  ;;  %v17039_v16 = vld [vmem:[#allocation11_spill] sm:$0xff]  ;;  %v15464_v50 = vrot.slane %v6616_v39, 1 }
 0x325   : > { %8741 = vmatmul.mubr.bf16.vlgmr.msra.gmra.mxu1 %v17021_v37  ;;  %v6784_v37 = vrot.slane %v9946_v46, 1  ;;  %v10063_v49 = vcombine.low %v7005_v56, %v7012_v23  ;;  %v7025_v46 = vrot.slane %v7023_v4, 1  ;;  %v15435_v56 = vrot.slane %v6609_v54, 1  ;;  %v5665_v23 = vld [vmem:[#allocation2 + $0x38] sm:$0xe] }
 0x326   : > { %11320 = vmatpush3.bf16.msra.mxu1 %v12096_v26  ;;  %8748 = vmatprep.mubr.bf16.mxu1 %v10052_v19  ;;  %v17027_v19 = vld [vmem:[#allocation13_spill] sm:$0xff]  ;;  %v15439_v4 = vcombine.low %v15408_v58, %v5732_v7  ;;  %v15449_v54 = vld [vmem:[#allocation2 + $0x10c] sm:$0x1]  ;;  %v7030_v7 = vshll.u32 %v15424_v1, 16 }
 0x327   : > { %11321 = vmatprep.subr.bf16.mxu1 %v11933_v29  ;;  %v17028_v26 = vshrl.u32 %v17027_v19, 16  ;;  %v15433_v19 = vrot.slane %v6602_v60, 1  ;;  %v10061_v51 = vcombine.low %v6783_v10, %v6784_v37  ;;  %v11955_v60 = vld [vmem:[%s16690_s2 + $0x220] sm:$0xff]   ;;  %17034 = vst [vmem:[#allocation15_spill] sm:$0xff] %v15449_v54  ;;  %v17040_v10 = vshrl.u32 %v17039_v16, 16 }
 0x328   : > { %v7037_v39 = vshll.u32 %v15439_v4, 16  ;;  %v7032_v45 = vrot.slane %v7030_v7, 1  ;;  %v15512_v7 = vld [vmem:[#allocation2 + $0x11c] sm:$0x1] }
 0x329   : > { %v15418_v24 = vor.u32 %v17029_v11, %v17028_v26  ;;  %8910 = vmatmul.mubr.bf16.gmra.mxu0 %v10053_v13  ;;  %v15443_v13 = vcombine.low %v17032_v15, %v15420_v14  ;;  %v17033_v26 = vld [vmem:[#allocation27_spill] sm:$0xff]  ;;  %v17035_v11 = vld [vmem:[#allocation8_spill] sm:$0xff]  ;;  %17053 = vst [vmem:[#allocation34_spill] sm:$0xff] %v15512_v7 }
 0x32a   : > { %8917 = vmatprep.mubr.bf16.mxu0 %v10063_v49  ;;  %11322 = vmatpush3.bf16.msra.mxu1 %v11933_v29  ;;  %v9948_v25 = vcombine.low %v5666_v28, %v17033_v26  ;;  %v7026_v29 = vor.u32 %v7025_v46, %v7021_v12  ;;  %v15452_v49 = vld [vmem:[#allocation2 + $0x78] sm:$0xf]  ;;  %v17036_v15 = vshrl.u32 %v17035_v11, 16  ;;  %v15462_v28 = vor.u32 %v15176_v41, %v17040_v10  ;;  %v5734_v11 = vld [vmem:[#allocation2 + $0x7c] sm:$0x1] }
 0x32b   : > { %11323 = vmatprep.subr.bf16.mxu1 %v11944_v43  ;;  %v6630_v12 = vshll.u32 %v15428_v3, 16  ;;  %v17042_v46 = vcombine.low %v15250_v33, %v15255_v22  ;;  %v17044_v41 = vld [vmem:[#allocation25_spill] sm:$0xff]  ;;  %v15478_v10 = vld [vmem:[#allocation2 + $0x70] sm:$0xf]  ;;  %v6637_v33 = vshll.u32 %v15443_v13, 16  ;;  %v17045_v22 = vld [vmem:[#allocation19_spill] sm:$0xff]  ;;  %v15494_v26 = vcombine.low %v15452_v49, %v5734_v11 }
 0x32c   : > { %v15457_v37 = vor.u32 %v17037_v40, %v17036_v15  ;;  %17041 = vst [vmem:[#allocation35_spill] sm:$0xff] %v15462_v28  ;;  %v15474_v15 = vld [vmem:[#allocation2 + $0x114] sm:$0x1]  ;;  %v9947_v16 = vcombine.low %v5665_v23, %v17044_v41  ;;  %v10072_v41 = vcombine.low %v7019_v0, %v7026_v29  ;;  %v6786_v40 = vrot.slane %v9948_v25, 1 }
 0x32d   : > { %8749 = vmatmul.mubr.bf16.gmra.mxu1 %v17042_v46  ;;  %17043 = vst [vmem:[#allocation36_spill] sm:$0xff] %v15474_v15  ;;  %v15486_v46 = vcombine.low %v17045_v22, %v15449_v54  ;;  %v5733_v23 = vld [vmem:[#allocation2 + $0x74] sm:$0x1]  ;;  %v15496_v14 = vrot.slane %v6630_v12, 1  ;;  %v17046_v22 = vld [vmem:[#allocation6_spill] sm:$0xff]  ;;  %v15505_v28 = vor.u32 %v17048_v47, %v17047_v6  ;;  %v7028_v11 = vshrl.u32 %v15424_v1, 16 }
 0x32e   : > { %17038 = vst [vmem:[#allocation17_spill] sm:$0xff] %v15457_v37  ;;  %8756 = vmatprep.mubr.bf16.mxu1 %v10061_v51  ;;  %11324 = vmatpush3.bf16.msra.mxu1 %v11944_v43  ;;  %v10062_v51 = vcombine.low %v15266_v21, %v15276_v9  ;;  %v11966_v43 = vld [vmem:[%s16690_s2 + $0x218] sm:$0xff]   ;;  %v15500_v54 = vcombine.low %v17046_v22, %v15474_v15  ;;  %v5668_v9 = vld [vmem:[#allocation2 + $0x60] sm:$0xe]  ;;  %v17050_v0 = vld [vmem:[#allocation28_spill] sm:$0xff]  ;;  %v6785_v12 = vrot.slane %v9947_v16, 1 }
 0x32f   : > { %11325 = vmatprep.subr.bf16.mxu1 %v11955_v60  ;;  %v5667_v21 = vld [vmem:[#allocation2 + $0x58] sm:$0xe]  ;;  %17049 = vst [vmem:[#allocation20_spill] sm:$0xff] %v15505_v28  ;;  %v17051_v25 = vshrl.u32 %v17050_v0, 16  ;;  %v7039_v22 = vrot.slane %v7037_v39, 1  ;;  %v15518_v52 = vrot.slane %v6637_v33, 1  ;;  %v7033_v39 = vor.u32 %v7032_v45, %v7028_v11 }
 0x330   : > { %v15521_v6 = vld [vmem:[#allocation2 + $0x124] sm:$0x1]  ;;  %v11977_v1 = vld [vmem:[%s16690_s2 + $0x210] sm:$0xff]   ;;  %v10070_v16 = vcombine.low %v6785_v12, %v6786_v40  ;;  %v7051_v33 = vshll.u32 %v15494_v26, 16  ;;  %v6651_v47 = vshll.u32 %v15500_v54, 16  ;;  %v17056_v0 = vld [vmem:[#allocation37_spill] sm:$0xff]  ;;  %v17057_v40 = vcombine.low %v15284_v55, %v15289_v34 }
 0x331   : > { %8918 = vmatmul.mubr.bf16.gmra.mxu0 %v10062_v51  ;;  %v15510_v29 = vor.u32 %v15270_v32, %v17051_v25  ;;  %v15516_v51 = vcombine.low %v15478_v10, %v5733_v23  ;;  %17054 = vst [vmem:[#allocation13_spill] sm:$0xff] %v15521_v6  ;;  %v7035_v32 = vshrl.u32 %v15439_v4, 16  ;;  %v17055_v23 = vld [vmem:[#allocation12_spill] sm:$0xff]  ;;  %v15533_v25 = vld [vmem:[#allocation2 + $0x84] sm:$0x1]  ;;  %v6644_v4 = vshll.u32 %v15486_v46, 16 }
 0x332   : > { %8925 = vmatprep.mubr.bf16.mxu0 %v10072_v41  ;;  %11326 = vmatpush3.bf16.msra.mxu1 %v11955_v60  ;;  %v9950_v60 = vcombine.low %v5668_v9, %v17055_v23  ;;  %v15531_v41 = vld [vmem:[#allocation2 + $0x80] sm:$0xf]  ;;  %v15539_v15 = vcombine.low %v17056_v0, %v15512_v7  ;;  %v17058_v45 = vld [vmem:[#allocation33_spill] sm:$0xff]  ;;  %v15546_v23 = vld [vmem:[#allocation2 + $0x88] sm:$0xf]  ;;  %v17059_v28 = vshrl.u32 %v15193_v35, 16 }
 0x333   : > { %17052 = vst [vmem:[#allocation31_spill] sm:$0xff] %v15510_v29  ;;  %11327 = vmatprep.subr.bf16.mxu1 %v11966_v43  ;;  %v9949_v9 = vcombine.low %v5667_v21, %v17058_v45  ;;  %v7040_v12 = vor.u32 %v7039_v22, %v7035_v32  ;;  %v7044_v11 = vshll.u32 %v15516_v51, 16  ;;  %v15548_v29 = vld [vmem:[#allocation2 + $0x8c] sm:$0x1]  ;;  %v17060_v0 = vshrl.u32 %v15211_v63, 16  ;;  %v17062_v21 = vld [vmem:[#allocation26_spill] sm:$0xff] }
 0x334   : > { %v15553_v37 = vor.u32 %v15293_v36, %v17059_v28  ;;  %v15563_v22 = vcombine.low %v17062_v21, %v15521_v6  ;;  %v10071_v32 = vcombine.low %v15317_v18, %v15321_v20  ;;  %v15569_v35 = vcombine.low %v15531_v41, %v15533_v25  ;;  %v11988_v63 = vld [vmem:[%s16690_s2 + $0x208] sm:$0xff]   ;;  %v17065_v21 = vld [vmem:[#allocation29_spill] sm:$0xff] }
 0x335   : > { %8757 = vmatmul.mubr.bf16.gmra.mxu1 %v17057_v40  ;;  %v15558_v55 = vor.u32 %v15303_v59, %v17060_v0  ;;  %v10081_v36 = vcombine.low %v7033_v39, %v7040_v12  ;;  %v6788_v59 = vrot.slane %v9950_v60, 1  ;;  %v7053_v28 = vrot.slane %v7051_v33, 1  ;;  %v15586_v39 = vld [vmem:[#allocation2 + $0x12c] sm:$0x1] }
 0x336   : > { %8764 = vmatprep.mubr.bf16.mxu1 %v10070_v16  ;;  %11328 = vmatpush3.bf16.msra.mxu1 %v11966_v43  ;;  %v5670_v43 = vld [vmem:[#allocation2 + $0x70] sm:$0xe]  ;;  %v15576_v40 = vrot.slane %v6644_v4, 1  ;;  %v15578_v45 = vrot.slane %v6651_v47, 1  ;;  %v15583_v20 = vcombine.low %v15546_v23, %v15548_v29  ;;  %v6658_v0 = vshll.u32 %v15539_v15, 16  ;;  %17063 = vst [vmem:[#allocation16_spill] sm:$0xff] %v15586_v39 }
 0x337   : > { %17061 = vst [vmem:[#allocation10_spill] sm:$0xff] %v15558_v55  ;;  %11329 = vmatprep.subr.bf16.mxu1 %v11977_v1  ;;  %v6787_v60 = vrot.slane %v9949_v9, 1  ;;  %v7046_v33 = vrot.slane %v7044_v11, 1  ;;  %v7049_v12 = vshrl.u32 %v15494_v26, 16  ;;  %v15589_v4 = vld [vmem:[#allocation2 + $0x134] sm:$0x1]  ;;  %v9952_v16 = vcombine.low %v5670_v43, %v17065_v21 }
 0x338   : > { %17064 = vst [vmem:[#allocation30_spill] sm:$0xff] %v15589_v4  ;;  %v5669_v47 = vld [vmem:[#allocation2 + $0x68] sm:$0xe]  ;;  %v17066_v18 = vshrl.u32 %v15259_v27, 16  ;;  %v17067_v7 = vshrl.u32 %v15263_v31, 16  ;;  %v11999_v26 = vld [vmem:[%s16690_s2 + $0x200] sm:$0xff]  }
 0x339   : > { %8926 = vmatmul.mubr.bf16.gmra.mxu0 %v10071_v32  ;;  %v7058_v32 = vshll.u32 %v15569_v35, 16  ;;  %v10079_v11 = vcombine.low %v6787_v60, %v6788_v59  ;;  %v7054_v43 = vor.u32 %v7053_v28, %v7049_v12  ;;  %v15608_v27 = vld [vmem:[#allocation2 + $0x90] sm:$0xf]  ;;  %v6665_v31 = vshll.u32 %v15563_v22, 16  ;;  %v15621_v59 = vld [vmem:[#allocation2 + $0x98] sm:$0xf] }
 0x33a   : > { %8933 = vmatprep.mubr.bf16.mxu0 %v10081_v36  ;;  %11330 = vmatpush3.bf16.msra.mxu1 %v11977_v1  ;;  %v15596_v34 = vor.u32 %v15333_v30, %v17066_v18  ;;  %v15601_v9 = vor.u32 %v15335_v57, %v17067_v7  ;;  %v7042_v36 = vshrl.u32 %v15516_v51, 16  ;;  %v15610_v30 = vld [vmem:[#allocation2 + $0x94] sm:$0x1]  ;;  %v17068_v57 = vld [vmem:[#allocation41_spill] sm:$0xff]  ;;  %v17069_v18 = vcombine.low %v15326_v8, %v15331_v5  ;;  %v5672_v28 = vld [vmem:[#allocation2 + $0x80] sm:$0xe] }
 0x33b   : > { %11331 = vmatprep.subr.bf16.mxu1 %v11988_v63  ;;  %v15615_v7 = vcombine.low %v17068_v57, %v15586_v39  ;;  %v7065_v21 = vshll.u32 %v15583_v20, 16  ;;  %v15623_v51 = vld [vmem:[#allocation2 + $0x9c] sm:$0x1]  ;;  %v15627_v60 = vrot.slane %v6658_v0, 1  ;;  %v17070_v12 = vld [vmem:[#allocation40_spill] sm:$0xff]  ;;  %v17071_v39 = vld [vmem:[#allocation22_spill] sm:$0xff]  ;;  %v10080_v5 = vcombine.low %v15385_v48, %v15408_v58 }
 0x33c   : > { %v15631_v1 = vcombine.low %v17070_v12, %v15589_v4  ;;  %v7047_v57 = vor.u32 %v7046_v33, %v7042_v36  ;;  %v9951_v8 = vcombine.low %v5669_v47, %v17071_v39  ;;  %v7060_v6 = vrot.slane %v7058_v32, 1  ;;  %v15644_v33 = vld [vmem:[#allocation2 + $0xb0] sm:$0xf]  ;;  %v15660_v36 = vld [vmem:[#allocation2 + $0xb4] sm:$0x1] }
 0x33d   : > { %8765 = vmatmul.mubr.bf16.gmra.mxu1 %v17069_v18  ;;  %v6790_v18 = vrot.slane %v9952_v16, 1  ;;  %v15638_v55 = vcombine.low %v15608_v27, %v15610_v30  ;;  %v15642_v12 = vcombine.low %v15621_v59, %v15623_v51  ;;  %v17074_v48 = vshrl.u32 %v15356_v62, 16  ;;  %v15671_v4 = vld [vmem:[#allocation2 + $0xbc] sm:$0x1] }
 0x33e   : > { %8772 = vmatprep.mubr.bf16.mxu1 %v10079_v11  ;;  %11332 = vmatpush3.bf16.msra.mxu1 %v11988_v63  ;;  %v10090_v0 = vcombine.low %v7047_v57, %v7054_v43  ;;  %v17072_v63 = vshrl.u32 %v15342_v42, 16  ;;  %v15656_v16 = vrot.slane %v6665_v31, 1  ;;  %v6672_v47 = vshll.u32 %v15615_v7, 16  ;;  %v5671_v57 = vld [vmem:[#allocation2 + $0x78] sm:$0xe] }
 0x33f   : > { %11333 = vmatprep.subr.bf16.mxu1 %v11999_v26  ;;  %v15654_v58 = vor.u32 %v15435_v56, %v17074_v48  ;;  %v7056_v32 = vshrl.u32 %v15569_v35, 16  ;;  %v7067_v11 = vrot.slane %v7065_v21, 1  ;;  %v6789_v62 = vrot.slane %v9951_v8, 1  ;;  %v15669_v21 = vld [vmem:[#allocation2 + $0xb8] sm:$0xf]  ;;  %v17079_v56 = vld [vmem:[#allocation24_spill] sm:$0xff] }
 0x340   : > { %v15649_v39 = vor.u32 %v15433_v19, %v17072_v63  ;;  %v7063_v63 = vshrl.u32 %v15583_v20, 16  ;;  %v7072_v35 = vshll.u32 %v15638_v55, 16  ;;  %v7079_v8 = vshll.u32 %v15642_v12, 16 }
 0x341   : > { %17075 = vst [vmem:[#allocation8_spill] sm:$0xff] %v15654_v58  ;;  %8934 = vmatmul.mubr.bf16.gmra.mxu0 %v10080_v5  ;;  %v7061_v31 = vor.u32 %v7060_v6, %v7056_v32  ;;  %v17076_v5 = vld [vmem:[#allocation7_spill] sm:$0xff]  ;;  %v10088_v19 = vcombine.low %v6789_v62, %v6790_v18  ;;  %v15680_v20 = vrot.slane %v6672_v47, 1  ;;  %v17078_v32 = vcombine.low %v15370_v44, %v15375_v53 }
 0x342   : > { %17073 = vst [vmem:[#allocation27_spill] sm:$0xff] %v15649_v39  ;;  %v10927_v43 = vpop.f32.mrf.mxu0  ;;  %8941 = vmatprep.mubr.bf16.mxu0 %v10090_v0  ;;  %v9954_v48 = vcombine.low %v5672_v28, %v17076_v5  ;;  %11334 = vmatpush3.bf16.msra.mxu1 %v11999_v26  ;;  %v15676_v0 = vcombine.low %v15644_v33, %v15660_v36  ;;  %v6679_v28 = vshll.u32 %v15631_v1, 16  ;;  %v5673_v58 = vld [vmem:[#allocation2 + $0x88] sm:$0xe]  ;;  %v5674_v39 = vld [vmem:[#allocation2 + $0x90] sm:$0xe] }
 0x343   : > { %v7068_v5 = vor.u32 %v7067_v11, %v7063_v63  ;;  %v9953_v26 = vcombine.low %v5671_v57, %v17079_v56  ;;  %v10089_v62 = vcombine.low %v15478_v10, %v15452_v49  ;;  %v15691_v47 = vcombine.low %v15669_v21, %v15671_v4  ;;  %v15706_v56 = vld [vmem:[#allocation2 + $0xc4] sm:$0x1] }
 0x344   : > { %v10928_v42 = vpop.f32.mrf.mxu0  ;;  %v17082_v53 = vshrl.u32 %v15364_v17, 16  ;;  %v6792_v49 = vrot.slane %v9954_v48, 1  ;;  %v7074_v10 = vrot.slane %v7072_v35, 1  ;;  %v7077_v57 = vshrl.u32 %v15642_v12, 16  ;;  %v17084_v48 = vld [vmem:[#allocation18_spill] sm:$0xff] }
 0x345   : > { %v15678_v6 = vadd.f32 %v10928_v42, %v10927_v43  ;;  %8773 = vmatmul.mubr.bf16.gmra.mxu1 %v17078_v32  ;;  %v15693_v43 = vld [vmem:[#allocation2 + $0xc0] sm:$0xf]  ;;  %v17080_v42 = vshrl.u32 %v15360_v61, 16  ;;  %v7081_v32 = vrot.slane %v7079_v8, 1  ;;  %v15709_v61 = vld [vmem:[#allocation2 + $0xc8] sm:$0xf]  ;;  %v9956_v35 = vcombine.low %v5674_v39, %v17084_v48 }
 0x346   : > { %v10930_v18 = vpop.f32.mrf.mxu0  ;;  %8780 = vmatprep.mubr.bf16.mxu1 %v10088_v19  ;;  %v15703_v11 = vor.u32 %v15467_v38, %v17082_v53  ;;  %v10099_v19 = vcombine.low %v7061_v31, %v7068_v5  ;;  %v15717_v17 = vrot.slane %v6679_v28, 1  ;;  %v6791_v31 = vrot.slane %v9953_v26, 1  ;;  %v5675_v5 = vld [vmem:[#allocation2 + $0xa8] sm:$0xe]  ;;  %v5676_v53 = vld [vmem:[#allocation2 + $0xb0] sm:$0xe] }
 0x347   : > { %17077 = vst [vmem:[#allocation14_spill] sm:$0xff] %v15678_v6  ;;  %v15698_v44 = vor.u32 %v15464_v50, %v17080_v42  ;;  %v7086_v6 = vshll.u32 %v15676_v0, 16  ;;  %v15711_v50 = vld [vmem:[#allocation2 + $0xcc] sm:$0x1]  ;;  %v7070_v12 = vshrl.u32 %v15638_v55, 16  ;;  %v7093_v8 = vshll.u32 %v15691_v47, 16 }
 0x348   : > { %17083 = vst [vmem:[#allocation25_spill] sm:$0xff] %v15703_v11  ;;  %v10931_v63 = vpop.f32.mrf.mxu0  ;;  %v17087_v26 = vshrl.u32 %v15443_v13, 16  ;;  %v10097_v39 = vcombine.low %v6791_v31, %v6792_v49  ;;  %v15741_v38 = vcombine.low %v15709_v61, %v15711_v50  ;;  %v17092_v31 = vld [vmem:[#allocation38_spill] sm:$0xff] }
 0x349   : > { %17081 = vst [vmem:[#allocation11_spill] sm:$0xff] %v15698_v44  ;;  %v15713_v42 = vadd.f32 %v10931_v63, %v10930_v18  ;;  %8942 = vmatmul.mubr.bf16.gmra.mxu0 %v10089_v62  ;;  %v15724_v18 = vcombine.low %v15693_v43, %v15706_v56  ;;  %v17085_v63 = vshrl.u32 %v15428_v3, 16  ;;  %v10098_v62 = vcombine.low %v15531_v41, %v15546_v23 }
 0x34a   : > { %8949 = vmatprep.mubr.bf16.mxu0 %v10099_v19  ;;  %v15734_v55 = vor.u32 %v15518_v52, %v17087_v26  ;;  %v17089_v19 = vld [vmem:[#allocation9_spill] sm:$0xff]  ;;  %v7075_v11 = vor.u32 %v7074_v10, %v7070_v12  ;;  %v7082_v3 = vor.u32 %v7081_v32, %v7077_v57  ;;  %v7088_v44 = vrot.slane %v7086_v6, 1 }
 0x34b   : > { %v15729_v28 = vor.u32 %v15496_v14, %v17085_v63  ;;  %v9955_v48 = vcombine.low %v5673_v58, %v17089_v19  ;;  %v15743_v14 = vld [vmem:[#allocation2 + $0xd0] sm:$0xf]  ;;  %v15745_v63 = vld [vmem:[#allocation2 + $0xd4] sm:$0x1]  ;;  %v17090_v52 = vcombine.low %v15413_v2, %v15418_v24  ;;  %v6794_v41 = vrot.slane %v9956_v35, 1  ;;  %v17091_v58 = vld [vmem:[#allocation23_spill] sm:$0xff] }
 0x34c   : > { %17088 = vst [vmem:[#allocation6_spill] sm:$0xff] %v15734_v55  ;;  %v7084_v23 = vshrl.u32 %v15676_v0, 16  ;;  %v9957_v49 = vcombine.low %v5675_v5, %v17091_v58  ;;  %v9958_v10 = vcombine.low %v5676_v53, %v17092_v31  ;;  %v7095_v6 = vrot.slane %v7093_v8, 1  ;;  %v15756_v12 = vld [vmem:[#allocation2 + $0xd8] sm:$0xf] }
 0x34d   : > { %17086 = vst [vmem:[#allocation19_spill] sm:$0xff] %v15729_v28  ;;  %8781 = vmatmul.mubr.bf16.gmra.mxu1 %v17090_v52  ;;  %v7100_v32 = vshll.u32 %v15724_v18, 16  ;;  %v15758_v26 = vld [vmem:[#allocation2 + $0xdc] sm:$0x1]  ;;  %v17093_v19 = vshrl.u32 %v15486_v46, 16  ;;  %v17095_v24 = vshrl.u32 %v15500_v54, 16  ;;  %v10108_v52 = vcombine.low %v7075_v11, %v7082_v3 }
 0x34e   : > { %8788 = vmatprep.mubr.bf16.mxu1 %v10097_v39  ;;  %v6793_v35 = vrot.slane %v9955_v48, 1  ;;  %v7091_v5 = vshrl.u32 %v15691_v47, 16  ;;  %v7107_v8 = vshll.u32 %v15741_v38, 16  ;;  %v15774_v39 = vcombine.low %v15743_v14, %v15745_v63  ;;  %v15780_v58 = vld [vmem:[#allocation2 + $0xe0] sm:$0xf] }
 0x34f   : > { %v10815_v57 = vpop.f32.mrf.mxu1  ;;  %v15763_v2 = vor.u32 %v15576_v40, %v17093_v19  ;;  %v15768_v0 = vor.u32 %v15578_v45, %v17095_v24  ;;  %v15776_v46 = vor.u32 %v7088_v44, %v7084_v23  ;;  %17097 = vst [vmem:[#allocation12_spill] sm:$0xff] %v15780_v58  ;;  %v15782_v54 = vld [vmem:[#allocation2 + $0xe8] sm:$0xf]  ;;  %v10107_v48 = vcombine.low %v15608_v27, %v15621_v59  ;;  %v15794_v11 = vld [vmem:[#allocation2 + $0xe4] sm:$0x1] }
 0x350   : > { %17098 = vst [vmem:[#allocation37_spill] sm:$0xff] %v15782_v54  ;;  %v10106_v47 = vcombine.low %v6793_v35, %v6794_v41  ;;  %v15788_v31 = vrot.slane %v9958_v10, 1  ;;  %v15792_v44 = vcombine.low %v15756_v12, %v15758_v26  ;;  %v15796_v3 = vld [vmem:[#allocation2 + $0xec] sm:$0x1]  ;;  %v7096_v23 = vor.u32 %v7095_v6, %v7091_v5  ;;  %v5677_v27 = vld [vmem:[#allocation2 + $0xb8] sm:$0xe] }
 0x351   : > { %17094 = vst [vmem:[#allocation39_spill] sm:$0xff] %v15763_v2  ;;  %17096 = vst [vmem:[#allocation28_spill] sm:$0xff] %v15768_v0  ;;  %v10816_v53 = vpop.f32.mrf.mxu1  ;;  %8950 = vmatmul.mubr.bf16.gmra.mxu0 %v10098_v62  ;;  %v7102_v41 = vrot.slane %v7100_v32, 1  ;;  %v5678_v59 = vld [vmem:[#allocation2 + $0xc0] sm:$0xe]  ;;  %v7098_v10 = vshrl.u32 %v15724_v18, 16  ;;  %v15810_v5 = vcombine.low %v15780_v58, %v15794_v11  ;;  %v15814_v32 = vcombine.low %v15782_v54, %v15796_v3 }
 0x352   : > { %v15778_v40 = vadd.f32 %v10816_v53, %v10815_v57  ;;  %8957 = vmatprep.mubr.bf16.mxu0 %v10108_v52  ;;  %v15798_v57 = vrot.slane %v9957_v49, 1  ;;  %v7105_v24 = vshrl.u32 %v15741_v38, 16  ;;  %v7109_v35 = vrot.slane %v7107_v8, 1  ;;  %v5680_v49 = vld [vmem:[#allocation2 + $0xd0] sm:$0xe]  ;;  %v17099_v18 = vld [vmem:[#allocation17_spill] sm:$0xff] }
 0x353   : > { %v10818_v19 = vpop.f32.mrf.mxu1  ;;  %v7114_v45 = vshll.u32 %v15774_v39, 16  ;;  %v10117_v52 = vcombine.low %v15776_v46, %v7096_v23  ;;  %v17100_v38 = vld [vmem:[#allocation35_spill] sm:$0xff]  ;;  %v17102_v0 = vld [vmem:[#allocation44_spill] sm:$0xff]  ;;  %v7121_v23 = vshll.u32 %v15792_v44, 16  ;;  %v15824_v28 = vor.u32 %v7102_v41, %v7098_v10 }
 0x354   : > { %v17101_v8 = vcombine.low %v17099_v18, %v17100_v38  ;;  %v10115_v62 = vcombine.low %v15798_v57, %v15788_v31  ;;  %v9959_v46 = vcombine.low %v5677_v27, %v17102_v0  ;;  %v5679_v54 = vld [vmem:[#allocation2 + $0xc8] sm:$0xe]  ;;  %v17104_v18 = vshrl.u32 %v15539_v15, 16 }
 0x355   : > { %v10819_v13 = vpop.f32.mrf.mxu1  ;;  %v17105_v31 = vshrl.u32 %v15563_v22, 16  ;;  %v15838_v57 = vor.u32 %v7109_v35, %v7105_v24  ;;  %v7112_v27 = vshrl.u32 %v15774_v39, 16  ;;  %v7128_v15 = vshll.u32 %v15810_v5, 16  ;;  %v15846_v22 = vld [vmem:[#allocation2 + $0x100] sm:$0xf] }
 0x356   : > { %v10933_v53 = vpop.f32.mrf.mxu0  ;;  %v15806_v6 = vadd.f32 %v10819_v13, %v10818_v19  ;;  %8789 = vmatmul.mubr.bf16.gmra.mxu1 %v17101_v8  ;;  %v17103_v13 = vld [vmem:[#allocation45_spill] sm:$0xff]  ;;  %v15831_v38 = vor.u32 %v15627_v60, %v17104_v18  ;;  %v7135_v60 = vshll.u32 %v15814_v32, 16  ;;  %v5682_v8 = vld [vmem:[#allocation2 + $0xe0] sm:$0xe]  ;;  %v7123_v24 = vrot.slane %v7121_v23, 1 }
 0x357   : > { %v9960_v19 = vcombine.low %v5678_v59, %v17103_v13  ;;  %8796 = vmatprep.mubr.bf16.mxu1 %v10106_v47  ;;  %v15836_v0 = vor.u32 %v15656_v16, %v17105_v31  ;;  %v7116_v47 = vrot.slane %v7114_v45, 1  ;;  %v17107_v59 = vld [vmem:[#allocation49_spill] sm:$0xff]  ;;  %v17108_v39 = vld [vmem:[#allocation46_spill] sm:$0xff]  ;;  %v17109_v18 = vshrl.u32 %v15615_v7, 16  ;;  %v15872_v16 = vld [vmem:[#allocation2 + $0x10c] sm:$0x1] }
 0x358   : > { %v10934_v2 = vpop.f32.mrf.mxu0  ;;  %v10821_v55 = vpop.f32.mrf.mxu1  ;;  %v9961_v45 = vcombine.low %v5679_v54, %v17108_v39  ;;  %v7119_v23 = vshrl.u32 %v15792_v44, 16  ;;  %v17112_v44 = vld [vmem:[#allocation48_spill] sm:$0xff] }
 0x359   : > { %v15826_v58 = vadd.f32 %v10934_v2, %v10933_v53  ;;  %17106 = vst [vmem:[#allocation33_spill] sm:$0xff] %v15836_v0  ;;  %v9962_v2 = vcombine.low %v5680_v49, %v17107_v59  ;;  %8958 = vmatmul.mubr.bf16.gmra.mxu0 %v10107_v48  ;;  %v15851_v49 = vld [vmem:[#allocation2 + $0x108] sm:$0xf]  ;;  %v15858_v31 = vor.u32 %v15680_v20, %v17109_v18  ;;  %v17110_v59 = vshrl.u32 %v15631_v1, 16 }
 0x35a   : > { %v10936_v41 = vpop.f32.mrf.mxu0  ;;  %v10822_v10 = vpop.f32.mrf.mxu1  ;;  %8965 = vmatprep.mubr.bf16.mxu0 %v10117_v52  ;;  %v15865_v48 = vrot.slane %v9959_v46, 1  ;;  %v15867_v54 = vrot.slane %v9960_v19, 1  ;;  %v15874_v7 = vor.u32 %v7116_v47, %v7112_v27  ;;  %v7133_v1 = vshrl.u32 %v15814_v32, 16  ;;  %v17114_v0 = vld [vmem:[#allocation31_spill] sm:$0xff] }
 0x35b   : > { %v15842_v53 = vadd.f32 %v10822_v10, %v10821_v55  ;;  %v15853_v55 = vld [vmem:[#allocation2 + $0x104] sm:$0x1]  ;;  %v15863_v10 = vor.u32 %v15717_v17, %v17110_v59  ;;  %v15876_v20 = vrot.slane %v9962_v2, 1  ;;  %v7130_v52 = vrot.slane %v7128_v15, 1  ;;  %v15883_v59 = vld [vmem:[#allocation2 + $0xd8] sm:$0xe] }
 0x35c   : > { %v10937_v35 = vpop.f32.mrf.mxu0  ;;  %v10824_v13 = vpop.f32.mrf.mxu1  ;;  %v7137_v46 = vrot.slane %v7135_v60, 1  ;;  %v15889_v47 = vor.u32 %v7123_v24, %v7119_v23  ;;  %v15891_v2 = vrot.slane %v9961_v45, 1  ;;  %v15895_v32 = vcombine.low %v15846_v22, %v15853_v55  ;;  %v5767_v60 = vld [vmem:[#allocation2 + $0x80] sm:$0xe]  ;;  %v5769_v23 = vld [vmem:[#allocation2 + $0x90] sm:$0xe] }
 0x35d   : > { %17111 = vst [vmem:[#allocation26_spill] sm:$0xff] %v15863_v10  ;;  %v15870_v39 = vadd.f32 %v10937_v35, %v10936_v41  ;;  %v9964_v41 = vcombine.low %v5682_v8, %v17112_v44  ;;  %v17113_v35 = vld [vmem:[#allocation20_spill] sm:$0xff]  ;;  %v15899_v15 = vcombine.low %v15851_v49, %v15872_v16  ;;  %v10126_v8 = vcombine.low %v15824_v28, %v15838_v57  ;;  %v5779_v10 = vld [vmem:[#allocation2 + $0x100] sm:$0xe] }
 0x35e   : > { %v10825_v18 = vpop.f32.mrf.mxu1  ;;  %v17115_v27 = vcombine.low %v17113_v35, %v17114_v0  ;;  %v10124_v0 = vcombine.low %v15865_v48, %v15867_v54  ;;  %v7126_v45 = vshrl.u32 %v15810_v5, 16  ;;  %v17116_v48 = vld [vmem:[#allocation47_spill] sm:$0xff]  ;;  %v5770_v5 = vld [vmem:[#allocation2 + $0x98] sm:$0xe]  ;;  %v15923_v35 = vor.u32 %v7137_v46, %v7133_v1  ;;  %v5771_v24 = vld [vmem:[#allocation2 + $0xb0] sm:$0xe] }
 0x35f   : > { %v15881_v19 = vadd.f32 %v10825_v18, %v10824_v13  ;;  %v5768_v13 = vld [vmem:[#allocation2 + $0x88] sm:$0xe]  ;;  %v15911_v18 = vld [vmem:[%s16692_s4] ss:$0 sm:$0xff]  ;;  %v10017_v17 = vcombine.low %v5767_v60, %v15533_v25  ;;  %v17117_v28 = vcombine.low %v15644_v33, %v15669_v21  ;;  %v5773_v1 = vld [vmem:[#allocation2 + $0xc0] sm:$0xe]  ;;  %v10020_v21 = vcombine.low %v5770_v5, %v15623_v51 }
 0x360   : > { %8797 = vmatmul.mubr.bf16.gmra.mxu1 %v17115_v27  ;;  %v15921_v44 = vor.u32 %v7130_v52, %v7126_v45  ;;  %v15925_v27 = vrot.slane %v9964_v41, 1  ;;  %v10018_v54 = vcombine.low %v5768_v13, %v15548_v29  ;;  %v10019_v52 = vcombine.low %v5769_v23, %v15610_v30  ;;  %v5774_v46 = vld [vmem:[#allocation2 + $0xc8] sm:$0xe]  ;;  %v5775_v60 = vld [vmem:[#allocation2 + $0xd0] sm:$0xe] }
 0x361   : > { %8804 = vmatprep.mubr.bf16.mxu1 %v10115_v62  ;;  %v5772_v62 = vld [vmem:[#allocation2 + $0xb8] sm:$0xe]  ;;  %8966 = vmatmul.mubr.bf16.gmra.mxu0 %v17117_v28  ;;  %v15937_v25 = vadd.f32 %v15778_v40, %v15911_v18  ;;  %v15941_v41 = vadd.f32 %v15806_v6, %v15911_v18  ;;  %v15943_v33 = vrot.slane %v10017_v17, 1  ;;  %v15954_v23 = vadd.f32 %v15842_v53, %v15911_v18  ;;  %v15956_v6 = vld [vmem:[#allocation2 + $0x114] sm:$0x1] }
 0x362   : > { %8973 = vmatprep.mubr.bf16.mxu0 %v10126_v8  ;;  %v15946_v29 = vrot.slane %v10018_v54, 1  ;;  %v15948_v30 = vrot.slane %v10019_v52, 1  ;;  %v10021_v8 = vcombine.low %v5771_v24, %v15660_v36  ;;  %v10022_v13 = vcombine.low %v5772_v62, %v15671_v4  ;;  %v5776_v40 = vld [vmem:[#allocation2 + $0xd8] sm:$0xe]  ;;  %v5777_v54 = vld [vmem:[#allocation2 + $0xe0] sm:$0xe] }
 0x363   : > { %v15958_v17 = vrot.slane %v10020_v21, 1  ;;  %v10023_v51 = vcombine.low %v5773_v1, %v15706_v56  ;;  %v10024_v28 = vcombine.low %v5774_v46, %v15711_v50  ;;  %v5778_v5 = vld [vmem:[#allocation2 + $0xe8] sm:$0xe]  ;;  %v17120_v52 = vld [vmem:[#allocation10_spill] sm:$0xff]  ;;  %v10025_v21 = vcombine.low %v5775_v60, %v15745_v63  ;;  %v15974_v46 = vld [vmem:[#allocation2 + $0x11c] sm:$0x1] }
 0x364   : > { %17118 = vst [vmem:[#allocation29_spill] sm:$0xff] %v15948_v30  ;;  %v17121_v36 = vcombine.low %v15553_v37, %v17120_v52  ;;  %v15967_v53 = vrot.slane %v10021_v8, 1  ;;  %v15969_v62 = vrot.slane %v10022_v13, 1  ;;  %v5780_v56 = vld [vmem:[#allocation2 + $0x108] sm:$0xe]  ;;  %v10026_v60 = vcombine.low %v5776_v40, %v15758_v26 }
 0x365   : > { %17119 = vst [vmem:[#allocation41_spill] sm:$0xff] %v15958_v17  ;;  %v15978_v52 = vrot.slane %v10023_v51, 1  ;;  %v5781_v8 = vld [vmem:[#allocation2 + $0x110] sm:$0xe]  ;;  %v15982_v24 = vld [vmem:[#allocation2 + $0x124] sm:$0x1]  ;;  %v10028_v17 = vcombine.low %v5778_v5, %v15796_v3  ;;  %v10029_v30 = vcombine.low %v5779_v10, %v15853_v55  ;;  %v17125_v40 = vcombine.low %v15693_v43, %v15709_v61 }
 0x366   : > { %v10939_v45 = vpop.f32.mrf.mxu0  ;;  %17122 = vst [vmem:[#allocation40_spill] sm:$0xff] %v15967_v53  ;;  %17123 = vst [vmem:[#allocation22_spill] sm:$0xff] %v15969_v62  ;;  %v15984_v63 = vld [vmem:[#allocation2 + $0x12c] sm:$0x1]  ;;  %v15992_v51 = vld [vmem:[#allocation2 + $0x134] sm:$0x1]  ;;  %v10031_v57 = vcombine.low %v5781_v8, %v15956_v6  ;;  %v17126_v55 = vcombine.low %v15874_v7, %v15889_v47 }
 0x367   : > { %v5782_v62 = vld [vmem:[#allocation2 + $0x118] sm:$0xe]  ;;  %v5784_v26 = vld [vmem:[#allocation2 + $0x128] sm:$0xe]  ;;  %v5785_v3 = vld [vmem:[#allocation2 + $0x130] sm:$0xe] }
 0x368   : > { %8805 = vmatmul.mubr.bf16.gmra.mxu1 %v17121_v36  ;;  %v10940_v4 = vpop.f32.mrf.mxu0  ;;  %v15980_v36 = vrot.slane %v10024_v28, 1  ;;  %v15994_v28 = vld [vmem:[#allocation2 + $0x13c] sm:$0x1]  ;;  %v16014_v5 = vrot.slane %v10028_v17, 1  ;;  %v16016_v43 = vrot.slane %v10029_v30, 1  ;;  %v10032_v8 = vcombine.low %v5782_v62, %v15974_v46 }
 0x369   : > { %8812 = vmatprep.mubr.bf16.mxu1 %v10124_v0  ;;  %v15972_v50 = vadd.f32 %v10940_v4, %v10939_v45  ;;  %v10827_v1 = vpop.f32.mrf.mxu1  ;;  %v15989_v45 = vrot.slane %v10025_v21, 1  ;;  %v10027_v4 = vcombine.low %v5777_v54, %v15794_v11  ;;  %v10030_v0 = vcombine.low %v5780_v56, %v15872_v16  ;;  %8974 = vmatmul.mubr.bf16.gmra.mxu0 %v17125_v40  ;;  %v5786_v56 = vld [vmem:[#allocation2 + $0x138] sm:$0xe]  ;;  %v16101_v30 = vld [vmem:[#allocation2 + $0x120] sm:$0xf] }
 0x36a   : > { %17124 = vst [vmem:[#allocation7_spill] sm:$0xff] %v15980_v36  ;;  %v10942_v13 = vpop.f32.mrf.mxu0  ;;  %v16004_v21 = vrot.slane %v10026_v60, 1  ;;  %v5783_v36 = vld [vmem:[#allocation2 + $0x120] sm:$0xe]  ;;  %8981 = vmatprep.mubr.bf16.mxu0 %v17126_v55  ;;  %v16025_v7 = vrot.slane %v10031_v57, 1  ;;  %v16038_v57 = vrot.slane %v10032_v8, 1  ;;  %v10035_v62 = vcombine.low %v5785_v3, %v15992_v51 }
 0x36b   : > { %v10828_v37 = vpop.f32.mrf.mxu1  ;;  %v16006_v53 = vrot.slane %v10027_v4, 1  ;;  %v16018_v61 = vrot.slane %v10030_v0, 1  ;;  %v10034_v0 = vcombine.low %v5784_v26, %v15984_v63  ;;  %v16036_v4 = vld [vmem:[#allocation2 + $0x118] sm:$0xf]  ;;  %v10036_v40 = vcombine.low %v5786_v56, %v15994_v28  ;;  %v16059_v56 = vld [vmem:[#allocation2 + $0x110] sm:$0xf] }
 0x36c   : > { %v10829_v11 = vadd.f32 %v10828_v37, %v10827_v1  ;;  %v10943_v54 = vpop.f32.mrf.mxu0  ;;  %v8432_v1 = vadd.f32 %v15881_v19, %v15911_v18  ;;  %v17127_v19 = vcombine.low %v15596_v34, %v15601_v9  ;;  %v17129_v34 = vld [vmem:[#allocation14_spill] sm:$0xff]  ;;  %v16055_v55 = vadd.f32 %v15713_v42, %v15941_v41  ;;  %v17136_v41 = vld [vmem:[#allocation8_spill] sm:$0xff] }
 0x36d   : > { %v16012_v16 = vadd.f32 %v10943_v54, %v10942_v13  ;;  %v10830_v10 = vpop.f32.mrf.mxu1  ;;  %v10033_v13 = vcombine.low %v5783_v36, %v15982_v24  ;;  %v17128_v54 = vcombine.low %v15891_v2, %v15876_v20  ;;  %v16047_v26 = vrot.slane %v10034_v0, 1 }
 0x36e   : > { %v16051_v9 = vadd.f32 %v17129_v34, %v15937_v25  ;;  %v10144_v3 = vcombine.low %v15921_v44, %v15923_v35  ;;  %v16063_v2 = vrot.slane %v10035_v62, 1  ;;  %v16065_v8 = vrot.slane %v10036_v40, 1 }
 0x36f   : > { %v10831_v47 = vpop.f32.mrf.mxu1  ;;  %v16045_v36 = vrot.slane %v10033_v13, 1  ;;  %v17130_v25 = vshll.u32 %v15895_v32, 16  ;;  %v10000_v42 = vcombine.low %v16036_v4, %v15974_v46  ;;  %v16075_v44 = vadd.f32 %v15826_v58, %v15954_v23 }
 0x370   : > { %8813 = vmatmul.mubr.bf16.gmra.mxu1 %v17127_v19  ;;  %v10832_v60 = vadd.f32 %v10831_v47, %v10830_v10  ;;  %v17131_v35 = vcombine.low %v15743_v14, %v15756_v12  ;;  %v17132_v13 = vcombine.low %v15883_v59, %v17116_v48  ;;  %v7140_v19 = vshrl.u32 %v15895_v32, 16  ;;  %v5683_v14 = vld [vmem:[#allocation2 + $0xf8] sm:$0xe] }
 0x371   : > { %8820 = vmatprep.mubr.bf16.mxu1 %v17128_v54  ;;  %v7144_v47 = vrot.slane %v17130_v25, 1  ;;  %v17133_v62 = vshll.u32 %v15899_v15, 16  ;;  %v5684_v54 = vld [vmem:[#allocation2 + $0x100] sm:$0xe]  ;;  %v8437_v58 = vadd.f32 %v10829_v11, %v15911_v18  ;;  %v9999_v12 = vcombine.low %v16059_v56, %v15956_v6 }
 0x372   : > { %v10945_v10 = vpop.f32.mrf.mxu0  ;;  %8982 = vmatmul.mubr.bf16.gmra.mxu0 %v17131_v35  ;;  %v6801_v0 = vrot.slane %v17132_v13, 1  ;;  %v16092_v59 = vadd.f32 %v15870_v39, %v8432_v1  ;;  %v7147_v32 = vshrl.u32 %v15899_v15, 16  ;;  %v17134_v13 = vld [vmem:[#allocation21_spill] sm:$0xff]  ;;  %v7163_v34 = vshll.u32 %v10000_v42, 16 }
 0x373   : > { %v7151_v46 = vrot.slane %v17133_v62, 1  ;;  %8989 = vmatprep.mubr.bf16.mxu0 %v10144_v3  ;;  %v7145_v35 = vor.u32 %v7144_v47, %v7140_v19  ;;  %v9966_v62 = vcombine.low %v5684_v54, %v17134_v13  ;;  %v17135_v3 = vld [vmem:[#allocation27_spill] sm:$0xff]  ;;  %v8440_v39 = vadd.f32 %v10832_v60, %v15911_v18  ;;  %v17140_v19 = vld [vmem:[#allocation12_spill] sm:$0xff] }
 0x374   : > { %v10946_v40 = vpop.f32.mrf.mxu0  ;;  %v10142_v25 = vcombine.low %v6801_v0, %v15925_v27  ;;  %v17137_v11 = vcombine.low %v17135_v3, %v17136_v41  ;;  %v7156_v27 = vshll.u32 %v9999_v12, 16  ;;  %v16105_v47 = vadd.f32 %v15972_v50, %v8437_v58  ;;  %v17139_v0 = vld [vmem:[#allocation37_spill] sm:$0xff]  ;;  %v16109_v41 = vld [vmem:[#allocation2 + $0x128] sm:$0xf]  ;;  %v5686_v3 = vld [vmem:[#allocation2 + $0x110] sm:$0xe] }
 0x375   : > { %v10947_v23 = vadd.f32 %v10946_v40, %v10945_v10  ;;  %v7152_v10 = vor.u32 %v7151_v46, %v7147_v32  ;;  %v17138_v40 = vld [vmem:[#allocation32_spill] sm:$0xff]  ;;  %v10143_v54 = vcombine.low %v17140_v19, %v17139_v0  ;;  %v6804_v32 = vrot.slane %v9966_v62, 1 }
 0x376   : > { %v10948_v48 = vpop.f32.mrf.mxu0  ;;  %v9965_v20 = vcombine.low %v5683_v14, %v17138_v40  ;;  %v7165_v13 = vrot.slane %v7163_v34, 1  ;;  %v7158_v50 = vrot.slane %v7156_v27, 1  ;;  %v7161_v58 = vshrl.u32 %v10000_v42, 16  ;;  %v5685_v34 = vld [vmem:[#allocation2 + $0x108] sm:$0xe]  ;;  %v17141_v62 = vld [vmem:[#allocation36_spill] sm:$0xff] }
 0x377   : > { %v10153_v46 = vcombine.low %v7145_v35, %v7152_v10  ;;  %v10002_v40 = vcombine.low %v16109_v41, %v15984_v63  ;;  %v9968_v10 = vcombine.low %v5686_v3, %v17141_v62  ;;  %v16125_v63 = vld [vmem:[#allocation2 + $0x138] sm:$0xf] }
 0x378   : > { %8821 = vmatmul.mubr.bf16.gmra.mxu1 %v17137_v11  ;;  %v10949_v6 = vpop.f32.mrf.mxu0  ;;  %v6803_v60 = vrot.slane %v9965_v20, 1  ;;  %v7166_v19 = vor.u32 %v7165_v13, %v7161_v58 }
 0x379   : > { %8828 = vmatprep.mubr.bf16.mxu1 %v10142_v25  ;;  %v10833_v15 = vpop.f32.mrf.mxu1  ;;  %v10950_v1 = vadd.f32 %v10949_v6, %v10948_v48  ;;  %v10001_v25 = vcombine.low %v16101_v30, %v15982_v24  ;;  %v16116_v6 = vadd.f32 %v16012_v16, %v8440_v39  ;;  %v7154_v24 = vshrl.u32 %v9999_v12, 16 }
 0x37a   : > { %8990 = vmatmul.mubr.bf16.gmra.mxu0 %v10143_v54  ;;  %v10151_v0 = vcombine.low %v6803_v60, %v6804_v32  ;;  %v17142_v54 = vld [vmem:[#allocation11_spill] sm:$0xff]  ;;  %v7177_v3 = vshll.u32 %v10002_v40, 16  ;;  %v10152_v12 = vcombine.low %v15846_v22, %v15851_v49  ;;  %v6806_v60 = vrot.slane %v9968_v10, 1 }
 0x37b   : > { %v10834_v14 = vpop.f32.mrf.mxu1  ;;  %8997 = vmatprep.mubr.bf16.mxu0 %v10153_v46  ;;  %v17143_v46 = vld [vmem:[#allocation25_spill] sm:$0xff]  ;;  %v7159_v39 = vor.u32 %v7158_v50, %v7154_v24  ;;  %v10004_v50 = vcombine.low %v16125_v63, %v15994_v28  ;;  %v7168_v22 = vshrl.u32 %v10001_v25, 16 }
 0x37c   : > { %v10835_v48 = vadd.f32 %v10834_v14, %v10833_v15  ;;  %v7170_v15 = vshll.u32 %v10001_v25, 16  ;;  %v17144_v27 = vcombine.low %v17142_v54, %v17143_v46  ;;  %v16123_v14 = vld [vmem:[#allocation2 + $0x130] sm:$0xf]  ;;  %v7179_v49 = vrot.slane %v7177_v3, 1  ;;  %v5687_v54 = vld [vmem:[#allocation2 + $0x118] sm:$0xe] }
 0x37d   : > { %v10836_v11 = vpop.f32.mrf.mxu1  ;;  %v10162_v58 = vcombine.low %v7159_v39, %v7166_v19  ;;  %v7175_v19 = vshrl.u32 %v10002_v40, 16  ;;  %v7191_v28 = vshll.u32 %v10004_v50, 16  ;;  %v17150_v25 = vld [vmem:[#allocation34_spill] sm:$0xff] }
 0x37e   : > { %v8445_v35 = vadd.f32 %v10835_v48, %v15911_v18  ;;  %v17145_v48 = vld [vmem:[#allocation15_spill] sm:$0xff]  ;;  %v7172_v62 = vrot.slane %v7170_v15, 1  ;;  %v17146_v15 = vld [vmem:[#allocation13_spill] sm:$0xff]  ;;  %v9969_v3 = vcombine.low %v5687_v54, %v17150_v25 }
 0x37f   : > { %v10837_v20 = vpop.f32.mrf.mxu1  ;;  %v9967_v17 = vcombine.low %v5685_v34, %v17145_v48  ;;  %v7193_v37 = vrot.slane %v7191_v28, 1 }
 0x380   : > { %8829 = vmatmul.mubr.bf16.gmra.mxu1 %v17144_v27  ;;  %v10838_v42 = vadd.f32 %v10837_v20, %v10836_v11  ;;  %v16128_v32 = vadd.f32 %v10947_v23, %v8445_v35  ;;  %v5688_v20 = vld [vmem:[#allocation2 + $0x120] sm:$0xe]  ;;  %v7173_v39 = vor.u32 %v7172_v62, %v7168_v22 }
 0x381   : > { %8836 = vmatprep.mubr.bf16.mxu1 %v10151_v0  ;;  %v10951_v16 = vpop.f32.mrf.mxu0  ;;  %v10003_v0 = vcombine.low %v16123_v14, %v15992_v51  ;;  %v6805_v24 = vrot.slane %v9967_v17, 1  ;;  %v9970_v46 = vcombine.low %v5688_v20, %v17146_v15  ;;  %v7189_v15 = vshrl.u32 %v10004_v50, 16 }
 0x382   : > { %v8448_v13 = vadd.f32 %v10838_v42, %v15911_v18  ;;  %8998 = vmatmul.mubr.bf16.gmra.mxu0 %v10152_v12  ;;  %v17147_v12 = vld [vmem:[#allocation19_spill] sm:$0xff] }
 0x383   : > { %v10952_v11 = vpop.f32.mrf.mxu0  ;;  %9005 = vmatprep.mubr.bf16.mxu0 %v10162_v58  ;;  %v10839_v23 = vpop.f32.mrf.mxu1  ;;  %v10160_v27 = vcombine.low %v6805_v24, %v6806_v60  ;;  %v7184_v48 = vshll.u32 %v10003_v0, 16  ;;  %v10161_v60 = vcombine.low %v16059_v56, %v16036_v4  ;;  %v6808_v20 = vrot.slane %v9970_v46, 1  ;;  %v5689_v4 = vld [vmem:[#allocation2 + $0x128] sm:$0xe] }
 0x384   : > { %v10953_v34 = vadd.f32 %v10952_v11, %v10951_v16  ;;  %v16137_v10 = vadd.f32 %v10950_v1, %v8448_v13  ;;  %v17148_v16 = vld [vmem:[#allocation6_spill] sm:$0xff]  ;;  %v7180_v13 = vor.u32 %v7179_v49, %v7175_v19  ;;  %v7182_v49 = vshrl.u32 %v10003_v0, 16  ;;  %v17155_v0 = vld [vmem:[#allocation16_spill] sm:$0xff] }
 0x385   : > { %v10954_v35 = vpop.f32.mrf.mxu0  ;;  %v10840_v42 = vpop.f32.mrf.mxu1  ;;  %v17149_v58 = vcombine.low %v17147_v12, %v17148_v16  ;;  %v7186_v22 = vrot.slane %v7184_v48, 1  ;;  %v17151_v48 = vld [vmem:[#allocation30_spill] sm:$0xff] }
 0x386   : > { %v10841_v11 = vadd.f32 %v10840_v42, %v10839_v23  ;;  %v10171_v62 = vcombine.low %v7173_v39, %v7180_v13  ;;  %v5690_v42 = vld [vmem:[#allocation2 + $0x130] sm:$0xe]  ;;  %v7194_v39 = vor.u32 %v7193_v37, %v7189_v15 }
 0x387   : > { %v10955_v51 = vpop.f32.mrf.mxu0  ;;  %v10842_v1 = vpop.f32.mrf.mxu1  ;;  %v7187_v46 = vor.u32 %v7186_v22, %v7182_v49  ;;  %v9972_v50 = vcombine.low %v5690_v42, %v17151_v48  ;;  %v5756_v42 = vld [vmem:[#allocation2 + $0x18] sm:$0xe]  ;;  %v12097_v49 = vld [vmem:[#allocation2 + $0x14] sm:$0x1] }
 0x388   : > { %8837 = vmatmul.mubr.bf16.gmra.mxu1 %v17149_v58  ;;  %v10956_v17 = vadd.f32 %v10955_v51, %v10954_v35  ;;  %v8453_v40 = vadd.f32 %v10841_v11, %v15911_v18  ;;  %v6807_v35 = vrot.slane %v9969_v3, 1  ;;  %v17152_v58 = vld [vmem:[#allocation39_spill] sm:$0xff]  ;;  %v17153_v11 = vld [vmem:[#allocation28_spill] sm:$0xff]  ;;  %v9971_v3 = vcombine.low %v5689_v4, %v17155_v0 }
 0x389   : > { %8844 = vmatprep.mubr.bf16.mxu1 %v10160_v27  ;;  %v10843_v24 = vpop.f32.mrf.mxu1  ;;  %v10957_v12 = vpop.f32.mrf.mxu0  ;;  %v17154_v25 = vcombine.low %v17152_v58, %v17153_v11 }
 0x38a   : > { %9006 = vmatmul.mubr.bf16.gmra.mxu0 %v10161_v60  ;;  %v10844_v23 = vadd.f32 %v10843_v24, %v10842_v1  ;;  %v16147_v54 = vadd.f32 %v10953_v34, %v8453_v40  ;;  %v10169_v51 = vcombine.low %v6807_v35, %v6808_v20  ;;  %v10170_v40 = vcombine.low %v16101_v30, %v16109_v41  ;;  %v5755_v24 = vld [vmem:[#allocation2 + $0x10] sm:$0xe] }
 0x38b   : > { %9013 = vmatprep.mubr.bf16.mxu0 %v10171_v62  ;;  %v10958_v27 = vpop.f32.mrf.mxu0  ;;  %v10180_v20 = vcombine.low %v7187_v46, %v7194_v39  ;;  %v6810_v62 = vrot.slane %v9972_v50, 1  ;;  %v17156_v39 = vld [vmem:[#allocation33_spill] sm:$0xff] }
 0x38c   : > { %v8456_v19 = vadd.f32 %v10844_v23, %v15911_v18  ;;  %v10959_v56 = vadd.f32 %v10958_v27, %v10957_v12  ;;  %v17157_v48 = vcombine.low %v15831_v38, %v17156_v39  ;;  %v5761_v39 = vld [vmem:[#allocation2 + $0x40] sm:$0xe] }
 0x38d   : > { %v10845_v28 = vpop.f32.mrf.mxu1  ;;  %v10960_v16 = vpop.f32.mrf.mxu0 }
 0x38e   : > { %v16154_v34 = vadd.f32 %v10956_v17, %v8456_v19  ;;  %v6809_v17 = vrot.slane %v9971_v3, 1  ;;  %v10005_v19 = vcombine.low %v5755_v24, %v12097_v49 }
 0x38f   : > { %v10846_v1 = vpop.f32.mrf.mxu1  ;;  %v10961_v13 = vpop.f32.mrf.mxu0 }
 0x390   : > { %8845 = vmatmul.mubr.bf16.gmra.mxu1 %v17154_v25  ;;  %v10847_v60 = vadd.f32 %v10846_v1, %v10845_v28  ;;  %v10962_v37 = vadd.f32 %v10961_v13, %v10960_v16  ;;  %v10178_v30 = vcombine.low %v6809_v17, %v6810_v62  ;;  %v12098_v28 = vld [vmem:[#allocation2 + $0x1c] sm:$0x1]  ;;  %v10179_v25 = vcombine.low %v16123_v14, %v16125_v63  ;;  %v5759_v1 = vld [vmem:[#allocation2 + $0x30] sm:$0xe] }
 0x391   : > { %8852 = vmatprep.mubr.bf16.mxu1 %v10169_v51  ;;  %v10848_v22 = vpop.f32.mrf.mxu1  ;;  %v10963_v15 = vpop.f32.mrf.mxu0  ;;  %v10006_v16 = vcombine.low %v5756_v42, %v12098_v28 }
 0x392   : > { %9014 = vmatmul.mubr.bf16.gmra.mxu0 %v10170_v40  ;;  %v8461_v12 = vadd.f32 %v10847_v60, %v15911_v18 }
 0x393   : > { %9021 = vmatprep.mubr.bf16.mxu0 %v10180_v20  ;;  %v10849_v23 = vpop.f32.mrf.mxu1  ;;  %v10964_v35 = vpop.f32.mrf.mxu0  ;;  %v7292_v20 = vrot.slane %v10006_v16, 1  ;;  %v5762_v16 = vld [vmem:[#allocation2 + $0x48] sm:$0xe] }
 0x394   : > { %v10850_v27 = vadd.f32 %v10849_v23, %v10848_v22  ;;  %v10965_v51 = vadd.f32 %v10964_v35, %v10963_v15  ;;  %v16160_v41 = vadd.f32 %v10959_v56, %v8461_v12  ;;  %v7291_v56 = vrot.slane %v10005_v19, 1  ;;  %v5760_v22 = vld [vmem:[#allocation2 + $0x38] sm:$0xe]  ;;  %v12099_v15 = vld [vmem:[#allocation2 + $0x34] sm:$0x1] }
 0x395   : > { %v10851_v4 = vpop.f32.mrf.mxu1  ;;  %v10966_v46 = vpop.f32.mrf.mxu0  ;;  %v10009_v12 = vcombine.low %v5759_v1, %v12099_v15 }
 0x396   : > { %v8464_v50 = vadd.f32 %v10850_v27, %v15911_v18  ;;  %v10046_v14 = vcombine.low %v7291_v56, %v7292_v20  ;;  %v12100_v27 = vld [vmem:[#allocation2 + $0x3c] sm:$0x1] }
 0x397   : > { %v10852_v58 = vpop.f32.mrf.mxu1  ;;  %v10967_v11 = vpop.f32.mrf.mxu0  ;;  %v7295_v28 = vrot.slane %v10009_v12, 1 }
 0x398   : > { %8853 = vmatmul.mubr.bf16.gmra.mxu1 %v17157_v48  ;;  %v10853_v0 = vadd.f32 %v10852_v58, %v10851_v4  ;;  %v10968_v3 = vadd.f32 %v10967_v11, %v10966_v46  ;;  %v16168_v13 = vadd.f32 %v10962_v37, %v8464_v50  ;;  %v17158_v37 = vld [vmem:[#allocation26_spill] sm:$0xff] }
 0x399   : > { %8860 = vmatprep.mubr.bf16.mxu1 %v10178_v30  ;;  %v10854_v40 = vpop.f32.mrf.mxu1  ;;  %v10969_v60 = vpop.f32.mrf.mxu0  ;;  %v17159_v49 = vcombine.low %v15858_v31, %v17158_v37  ;;  %v10010_v30 = vcombine.low %v5760_v22, %v12100_v27  ;;  %v17161_v37 = vld [vmem:[#allocation43_spill] sm:$0xff] }
 0x39a   : > { %9022 = vmatmul.mubr.bf16.gmra.mxu0 %v10179_v25  ;;  %v8469_v38 = vadd.f32 %v10853_v0, %v15911_v18  ;;  %v12104_v27 = vld [vmem:[#allocation2 + $0x6c] sm:$0x1] }
 0x39b   : > { %v10855_v62 = vpop.f32.mrf.mxu1  ;;  %v10970_v24 = vpop.f32.mrf.mxu0  ;;  %v7296_v0 = vrot.slane %v10010_v30, 1 }
 0x39c   : > { %v10856_v17 = vadd.f32 %v10855_v62, %v10854_v40  ;;  %v10971_v23 = vadd.f32 %v10970_v24, %v10969_v60  ;;  %v16171_v63 = vadd.f32 %v10965_v51, %v8469_v38  ;;  %v5763_v51 = vld [vmem:[#allocation2 + $0x60] sm:$0xe]  ;;  %v12101_v40 = vld [vmem:[#allocation2 + $0x44] sm:$0x1]  ;;  %v12102_v38 = vld [vmem:[#allocation2 + $0x4c] sm:$0x1] }
 0x39d   : > { %v10857_v35 = vpop.f32.mrf.mxu1  ;;  %v10972_v42 = vpop.f32.mrf.mxu0  ;;  %v10011_v60 = vcombine.low %v5761_v39, %v12101_v40  ;;  %v10012_v20 = vcombine.low %v5762_v16, %v12102_v38  ;;  %v5764_v62 = vld [vmem:[#allocation2 + $0x68] sm:$0xe]  ;;  %v12103_v24 = vld [vmem:[#allocation2 + $0x64] sm:$0x1] }
 0x39e   : > { %v8472_v19 = vadd.f32 %v10856_v17, %v15911_v18  ;;  %v10013_v22 = vcombine.low %v5763_v51, %v12103_v24  ;;  %v10064_v17 = vcombine.low %v7295_v28, %v7296_v0  ;;  %v10014_v30 = vcombine.low %v5764_v62, %v12104_v27  ;;  %v12105_v62 = vld [vmem:[#allocation2 + $0x7c] sm:$0x1] }
 0x39f   : > { %v10858_v4 = vpop.f32.mrf.mxu1  ;;  %v10973_v46 = vpop.f32.mrf.mxu0  ;;  %v7297_v39 = vrot.slane %v10011_v60, 1 }
 0x3a0   : > { %8861 = vmatmul.mubr.bf16.gmra.mxu1 %v17159_v49  ;;  %v10859_v48 = vadd.f32 %v10858_v4, %v10857_v35  ;;  %v10974_v50 = vadd.f32 %v10973_v46, %v10972_v42  ;;  %v16177_v58 = vadd.f32 %v10968_v3, %v8472_v19  ;;  %v17160_v42 = vld [vmem:[#allocation42_spill] sm:$0xff]  ;;  %v7299_v28 = vrot.slane %v10013_v22, 1 }
 0x3a1   : > { %11335 = vmatprep.mubr.bf16.mxu1 %v10046_v14  ;;  %v10860_v11 = vpop.f32.mrf.mxu1  ;;  %v10975_v25 = vpop.f32.mrf.mxu0  ;;  %v17162_v49 = vcombine.low %v17160_v42, %v17161_v37 }
 0x3a2   : > { %v8477_v31 = vadd.f32 %v10859_v48, %v15911_v18  ;;  %v7298_v48 = vrot.slane %v10012_v20, 1 }
 0x3a3   : > { %v10861_v56 = vpop.f32.mrf.mxu1  ;;  %v10976_v1 = vpop.f32.mrf.mxu0 }
 0x3a4   : > { %v10862_v15 = vadd.f32 %v10861_v56, %v10860_v11  ;;  %v10977_v12 = vadd.f32 %v10976_v1, %v10975_v25  ;;  %v16180_v14 = vadd.f32 %v10971_v23, %v8477_v31  ;;  %v5766_v23 = vld [vmem:[#allocation2 + $0x78] sm:$0xe]  ;;  %v7300_v56 = vrot.slane %v10014_v30, 1  ;;  %v5765_v1 = vld [vmem:[#allocation2 + $0x70] sm:$0xe] }
 0x3a5   : > { %v10863_v3 = vpop.f32.mrf.mxu1  ;;  %v10978_v35 = vpop.f32.mrf.mxu0  ;;  %v10073_v24 = vcombine.low %v7297_v39, %v7298_v48 }
 0x3a6   : > { %v8480_v19 = vadd.f32 %v10862_v15, %v15911_v18  ;;  %v10016_v15 = vcombine.low %v5766_v23, %v12105_v62  ;;  %v10082_v20 = vcombine.low %v7299_v28, %v7300_v56 }
 0x3a7   : > { %v10864_v4 = vpop.f32.mrf.mxu1  ;;  %v10979_v46 = vpop.f32.mrf.mxu0 }
 0x3a8   : > { %11336 = vmatmul.mubr.bf16.vlgmr.msra.gmra.mxu1 %v17162_v49  ;;  %v10865_v16 = vadd.f32 %v10864_v4, %v10863_v3  ;;  %v10980_v51 = vadd.f32 %v10979_v46, %v10978_v35  ;;  %v16186_v11 = vadd.f32 %v10974_v50, %v8480_v19  ;;  %v12106_v50 = vld [vmem:[#allocation2 + $0x74] sm:$0x1]  ;;  %v7302_v27 = vrot.slane %v10016_v15, 1 }
 0x3a9   : > { %11339 = vmatprep.mubr.bf16.mxu1 %v10064_v17  ;;  %v10866_v25 = vpop.f32.mrf.mxu1  ;;  %v10981_v31 = vpop.f32.mrf.mxu0  ;;  %v10015_v42 = vcombine.low %v5765_v1, %v12106_v50 }
 0x3aa   : > { %v8485_v0 = vadd.f32 %v10865_v16, %v15911_v18 }
 0x3ab   : > { %v10867_v40 = vpop.f32.mrf.mxu1  ;;  %v10982_v38 = vpop.f32.mrf.mxu0  ;;  %v7301_v16 = vrot.slane %v10015_v42, 1 }
 0x3ac   : > { %v10868_v17 = vadd.f32 %v10867_v40, %v10866_v25  ;;  %v10983_v60 = vadd.f32 %v10982_v38, %v10981_v31  ;;  %v16189_v3 = vadd.f32 %v10977_v12, %v8485_v0 }
 0x3ad   : > { %v10869_v22 = vpop.f32.mrf.mxu1  ;;  %v10984_v35 = vpop.f32.mrf.mxu0  ;;  %v10091_v25 = vcombine.low %v7301_v16, %v7302_v27  ;;  %v17168_v16 = vld [vmem:[#allocation22_spill] sm:$0xff] }
 0x3ae   : > { %v8488_v37 = vadd.f32 %v10868_v17, %v15911_v18 }
 0x3af   : > { %v10870_v49 = vpop.f32.mrf.mxu1  ;;  %v10985_v19 = vpop.f32.mrf.mxu0 }
 0x3b0   : > { %11340 = vmatmul.mubr.bf16.gmra.mxu1 %v10073_v24  ;;  %v10871_v30 = vadd.f32 %v10870_v49, %v10869_v22  ;;  %v10986_v4 = vadd.f32 %v10985_v19, %v10984_v35  ;;  %v16192_v46 = vadd.f32 %v10980_v51, %v8488_v37  ;;  %v17163_v51 = vcombine.low %v15943_v33, %v15946_v29  ;;  %v17164_v33 = vld [vmem:[#allocation29_spill] sm:$0xff] }
 0x3b1   : > { %11343 = vmatprep.mubr.bf16.mxu1 %v10082_v20  ;;  %v10872_v39 = vpop.f32.mrf.mxu1  ;;  %v10987_v48 = vpop.f32.mrf.mxu0  ;;  %v17165_v29 = vld [vmem:[#allocation41_spill] sm:$0xff] }
 0x3b2   : > { %v8493_v12 = vadd.f32 %v10871_v30, %v15911_v18 }
 0x3b3   : > { %v10873_v28 = vpop.f32.mrf.mxu1  ;;  %v10988_v23 = vpop.f32.mrf.mxu0 }
 0x3b4   : > { %v10874_v31 = vadd.f32 %v10873_v28, %v10872_v39  ;;  %v10989_v0 = vadd.f32 %v10988_v23, %v10987_v48  ;;  %v16195_v56 = vadd.f32 %v10983_v60, %v8493_v12  ;;  %v17166_v39 = vcombine.low %v17164_v33, %v17165_v29 }
 0x3b5   : > { %v10875_v1 = vpop.f32.mrf.mxu1  ;;  %v10990_v40 = vpop.f32.mrf.mxu0 }
 0x3b6   : > { %v8496_v38 = vadd.f32 %v10874_v31, %v15911_v18 }
 0x3b7   : > { %v10876_v24 = vpop.f32.mrf.mxu1  ;;  %v10991_v62 = vpop.f32.mrf.mxu0 }
 0x3b8   : > { %11344 = vmatmul.mubr.bf16.gmra.mxu1 %v10091_v25  ;;  %v10877_v15 = vadd.f32 %v10876_v24, %v10875_v1  ;;  %v10992_v17 = vadd.f32 %v10991_v62, %v10990_v40  ;;  %v16201_v20 = vadd.f32 %v10986_v4, %v8496_v38  ;;  %v17167_v4 = vld [vmem:[#allocation40_spill] sm:$0xff] }
 0x3b9   : > { %11347 = vmatprep.mubr.bf16.mxu1 %v17163_v51  ;;  %v10878_v22 = vpop.f32.mrf.mxu1  ;;  %v10993_v35 = vpop.f32.mrf.mxu0  ;;  %v17169_v12 = vcombine.low %v17167_v4, %v17168_v16 }
 0x3ba   : > { %v8501_v60 = vadd.f32 %v10877_v15, %v15911_v18 }
 0x3bb   : > { %v10879_v50 = vpop.f32.mrf.mxu1  ;;  %v10994_v42 = vpop.f32.mrf.mxu0 }
 0x3bc   : > { %v10880_v37 = vadd.f32 %v10879_v50, %v10878_v22  ;;  %v10995_v49 = vadd.f32 %v10994_v42, %v10993_v35  ;;  %v16204_v19 = vadd.f32 %v10989_v0, %v8501_v60  ;;  %v17170_v50 = vld [vmem:[#allocation7_spill] sm:$0xff] }
 0x3bd   : > { %v10881_v27 = vpop.f32.mrf.mxu1  ;;  %v10996_v30 = vpop.f32.mrf.mxu0  ;;  %v17171_v42 = vcombine.low %v15978_v52, %v17170_v50 }
 0x3be   : > { %v8504_v48 = vadd.f32 %v10880_v37, %v15911_v18 }
 0x3bf   : > { %v10882_v28 = vpop.f32.mrf.mxu1  ;;  %v10997_v23 = vpop.f32.mrf.mxu0 }
 0x3c0   : > { %11348 = vmatmul.mubr.bf16.gmra.mxu1 %v17166_v39  ;;  %v10883_v25 = vadd.f32 %v10882_v28, %v10881_v27  ;;  %v10998_v31 = vadd.f32 %v10997_v23, %v10996_v30  ;;  %v16213_v1 = vadd.f32 %v10992_v17, %v8504_v48  ;;  %v17172_v17 = vcombine.low %v15989_v45, %v16004_v21 }
 0x3c1   : > { %11351 = vmatprep.mubr.bf16.mxu1 %v17169_v12  ;;  %v10884_v0 = vpop.f32.mrf.mxu1  ;;  %v10999_v40 = vpop.f32.mrf.mxu0  ;;  %v17173_v45 = vcombine.low %v16006_v53, %v16014_v5 }
 0x3c2   : > { %v8509_v38 = vadd.f32 %v10883_v25, %v15911_v18 }
 0x3c3   : > { %v10885_v51 = vpop.f32.mrf.mxu1  ;;  %v11000_v24 = vpop.f32.mrf.mxu0 }
 0x3c4   : > { %v10886_v62 = vadd.f32 %v10885_v51, %v10884_v0  ;;  %v11001_v15 = vadd.f32 %v11000_v24, %v10999_v40  ;;  %v16216_v22 = vadd.f32 %v10995_v49, %v8509_v38 }
 0x3c5   : > { %v10887_v35 = vpop.f32.mrf.mxu1  ;;  %v11002_v60 = vpop.f32.mrf.mxu0 }
 0x3c6   : > { %v8512_v37 = vadd.f32 %v10886_v62, %v15911_v18 }
 0x3c7   : > { %v10888_v27 = vpop.f32.mrf.mxu1  ;;  %v11003_v30 = vpop.f32.mrf.mxu0 }
 0x3c8   : > { %11352 = vmatmul.mubr.bf16.gmra.mxu1 %v17171_v42  ;;  %v10889_v33 = vadd.f32 %v10888_v27, %v10887_v35  ;;  %v11004_v29 = vadd.f32 %v11003_v30, %v11002_v60  ;;  %v16225_v39 = vadd.f32 %v10998_v31, %v8512_v37  ;;  %v17174_v31 = vcombine.low %v16016_v43, %v16018_v61 }
 0x3c9   : > { %11355 = vmatprep.mubr.bf16.mxu1 %v17172_v17  ;;  %v10890_v49 = vpop.f32.mrf.mxu1  ;;  %v11005_v48 = vpop.f32.mrf.mxu0  ;;  %v17175_v43 = vcombine.low %v16025_v7, %v16038_v57  ;;  %v17176_v30 = vcombine.low %v16045_v36, %v16047_v26  ;;  %v17177_v36 = vcombine.low %v16063_v2, %v16065_v8 }
 0x3ca   : > { %v8517_v4 = vadd.f32 %v10889_v33, %v15911_v18 }
 0x3cb   : > { %v10891_v16 = vpop.f32.mrf.mxu1  ;;  %v11006_v12 = vpop.f32.mrf.mxu0 }
 0x3cc   : > { %v10892_v52 = vadd.f32 %v10891_v16, %v10890_v49  ;;  %v11007_v28 = vadd.f32 %v11006_v12, %v11005_v48  ;;  %v16228_v23 = vadd.f32 %v11001_v15, %v8517_v4 }
 0x3cd   : > { %v10893_v25 = vpop.f32.mrf.mxu1  ;;  %v11008_v0 = vpop.f32.mrf.mxu0 }
 0x3ce   : > { %v8520_v21 = vadd.f32 %v10892_v52, %v15911_v18 }
 0x3cf   : > { %v10894_v40 = vpop.f32.mrf.mxu1  ;;  %v11009_v38 = vpop.f32.mrf.mxu0 }
 0x3d0   : > { %11356 = vmatmul.mubr.bf16.gmra.mxu1 %v17173_v45  ;;  %v10895_v51 = vadd.f32 %v10894_v40, %v10893_v25  ;;  %v11010_v24 = vadd.f32 %v11009_v38, %v11008_v0  ;;  %v16237_v62 = vadd.f32 %v11004_v29, %v8520_v21 }
 0x3d1   : > { %11359 = vmatprep.mubr.bf16.mxu1 %v17174_v31  ;;  %v10896_v15 = vpop.f32.mrf.mxu1  ;;  %v11011_v35 = vpop.f32.mrf.mxu0 }
 0x3d2   : > { %v8525_v60 = vadd.f32 %v10895_v51, %v15911_v18 }
 0x3d3   : > { %v10897_v50 = vpop.f32.mrf.mxu1  ;;  %v11012_v42 = vpop.f32.mrf.mxu0 }
 0x3d4   : > { %v10898_v53 = vadd.f32 %v10897_v50, %v10896_v15  ;;  %v11013_v5 = vadd.f32 %v11012_v42, %v11011_v35  ;;  %v16240_v37 = vadd.f32 %v11007_v28, %v8525_v60 }
 0x3d5   : > { %v10899_v17 = vpop.f32.mrf.mxu1  ;;  %v11014_v27 = vpop.f32.mrf.mxu0 }
 0x3d6   : > { %v8528_v61 = vadd.f32 %v10898_v53, %v15911_v18 }
 0x3d7   : > { %v10900_v33 = vpop.f32.mrf.mxu1  ;;  %v11015_v29 = vpop.f32.mrf.mxu0 }
 0x3d8   : > { %11360 = vmatmul.mubr.bf16.gmra.mxu1 %v17175_v43  ;;  %v10901_v49 = vadd.f32 %v10900_v33, %v10899_v17  ;;  %v11016_v48 = vadd.f32 %v11015_v29, %v11014_v27  ;;  %v16249_v4 = vadd.f32 %v11010_v24, %v8528_v61 }
 0x3d9   : > { %11363 = vmatprep.mubr.bf16.mxu1 %v17176_v30  ;;  %v10902_v16 = vpop.f32.mrf.mxu1  ;;  %v11017_v12 = vpop.f32.mrf.mxu0 }
 0x3da   : > { %v8533_v52 = vadd.f32 %v10901_v49, %v15911_v18 }
 0x3db   : > { %v10903_v28 = vpop.f32.mrf.mxu1  ;;  %v11018_v25 = vpop.f32.mrf.mxu0 }
 0x3dc   : > { %v10904_v7 = vadd.f32 %v10903_v28, %v10902_v16  ;;  %v11019_v57 = vadd.f32 %v11018_v25, %v11017_v12  ;;  %v16252_v0 = vadd.f32 %v11013_v5, %v8533_v52 }
 0x3dd   : > { %v10905_v45 = vpop.f32.mrf.mxu1  ;;  %v11020_v21 = vpop.f32.mrf.mxu0 }
 0x3de   : > { %v8536_v26 = vadd.f32 %v10904_v7, %v15911_v18 }
 0x3df   : > { %v10906_v31 = vpop.f32.mrf.mxu1  ;;  %v11021_v40 = vpop.f32.mrf.mxu0 }
 0x3e0   : > { %11364 = vmatmul.mubr.bf16.gmra.mxu1 %v17177_v36  ;;  %v10907_v38 = vadd.f32 %v10906_v31, %v10905_v45  ;;  %v11022_v51 = vadd.f32 %v11021_v40, %v11020_v21  ;;  %v16258_v24 = vadd.f32 %v11016_v48, %v8536_v26 }
 0x3e1   : > { %v10908_v15 = vpop.f32.mrf.mxu1  ;;  %v11151_v35 = vpop.f32.mrf.mxu0 }
 0x3e2   : > { %v8541_v60 = vadd.f32 %v10907_v38, %v15911_v18 }
 0x3e3   : > { %v10909_v50 = vpop.f32.mrf.mxu1  ;;  %v11152_v42 = vpop.f32.mrf.mxu0 }
 0x3e4   : > { %v10910_v53 = vadd.f32 %v10909_v50, %v10908_v15  ;;  %v11153_v5 = vadd.f32 %v11152_v42, %v11151_v35  ;;  %v16261_v17 = vadd.f32 %v11019_v57, %v8541_v60 }
 0x3e5   : > { %v11039_v2 = vpop.f32.mrf.mxu1  ;;  %v11154_v8 = vpop.f32.mrf.mxu0 }
 0x3e6   : > { %17178 = vst [vmem:[#allocation24_spill] sm:$0xff] %v16261_v17  ;;  %v8544_v27 = vadd.f32 %v10910_v53, %v15911_v18 }
 0x3e7   : > { %v11040_v43 = vpop.f32.mrf.mxu1  ;;  %v11155_v61 = vpop.f32.mrf.mxu0 }
 0x3e8   : > { %v11041_v30 = vadd.f32 %v11040_v43, %v11039_v2  ;;  %v11156_v33 = vadd.f32 %v11155_v61, %v11154_v8  ;;  %v16264_v29 = vadd.f32 %v11022_v51, %v8544_v27 }
 0x3e9   : > { %v11042_v49 = vpop.f32.mrf.mxu1  ;;  %v16266_v48 = vpop.f32.mrf.mxu0 }
 0x3ea   : > { %17179 = vst [vmem:[#allocation18_spill] sm:$0xff] %v16264_v29  ;;  %v8743_v16 = vadd.f32 %v11041_v30, %v16051_v9 }
 0x3eb   : > { %v11043_v12 = vpop.f32.mrf.mxu1  ;;  %v16269_v52 = vpop.f32.mrf.mxu0 }
 0x3ec   : > { %v11044_v28 = vadd.f32 %v11043_v12, %v11042_v49  ;;  %v16271_v25 = vadd.f32 %v11153_v5, %v8743_v16 }
 0x3ed   : > { %v11045_v7 = vpop.f32.mrf.mxu1  ;;  %v16273_v57 = vpop.f32.mrf.mxu0 }
 0x3ee   : > { %v8746_v18 = vadd.f32 %v11044_v28, %v16055_v55 }
 0x3ef   : > { %v11046_v45 = vpop.f32.mrf.mxu1  ;;  %v16276_v21 = vpop.f32.mrf.mxu0 }
 0x3f0   : > { %v11047_v36 = vadd.f32 %v11046_v45, %v11045_v7  ;;  %v16278_v26 = vadd.f32 %v11156_v33, %v8746_v18 }
 0x3f1   : > { %v11048_v31 = vpop.f32.mrf.mxu1  ;;  %v16280_v40 = vpop.f32.mrf.mxu0 }
 0x3f2   : > { %v16283_v9 = vadd.f32 %v11047_v36, %v16075_v44 }
 0x3f3   : > { %v11049_v38 = vpop.f32.mrf.mxu1  ;;  %v16285_v51 = vpop.f32.mrf.mxu0 }
 0x3f4   : > { %v11050_v15 = vadd.f32 %v11049_v38, %v11048_v31 }
 0x3f5   : > { %v11051_v35 = vpop.f32.mrf.mxu1  ;;  %v16287_v60 = vpop.f32.mrf.mxu0 }
 0x3f6   : > { %v16290_v55 = vadd.f32 %v11050_v15, %v16092_v59 }
 0x3f7   : > { %v11052_v50 = vpop.f32.mrf.mxu1  ;;  %v16292_v42 = vpop.f32.mrf.mxu0 }
 0x3f8   : > { %v11053_v53 = vadd.f32 %v11052_v50, %v11051_v35 }
 0x3f9   : > { %v11054_v5 = vpop.f32.mrf.mxu1  ;;  %v16294_v2 = vpop.f32.mrf.mxu0 }
 0x3fa   : > { %v16297_v44 = vadd.f32 %v11053_v53, %v16105_v47 }
 0x3fb   : > { %v11055_v8 = vpop.f32.mrf.mxu1  ;;  %v16299_v27 = vpop.f32.mrf.mxu0 }
 0x3fc   : > { %v11056_v43 = vadd.f32 %v11055_v8, %v11054_v5 }
 0x3fd   : > { %v11057_v61 = vpop.f32.mrf.mxu1  ;;  %v16301_v30 = vpop.f32.mrf.mxu0 }
 0x3fe   : > { %v16304_v59 = vadd.f32 %v11056_v43, %v16116_v6 }
 0x3ff   : > { %v11058_v33 = vpop.f32.mrf.mxu1  ;;  %v16306_v49 = vpop.f32.mrf.mxu0 }
 0x400   : > { %v11059_v16 = vadd.f32 %v11058_v33, %v11057_v61 }
 0x401   : > { %v11060_v12 = vpop.f32.mrf.mxu1  ;;  %v16308_v28 = vpop.f32.mrf.mxu0 }
 0x402   : > { %v16311_v47 = vadd.f32 %v11059_v16, %v16128_v32 }
 0x403   : > { %v11061_v7 = vpop.f32.mrf.mxu1  ;;  %v16313_v18 = vpop.f32.mrf.mxu0 }
 0x404   : > { %v11062_v45 = vadd.f32 %v11061_v7, %v11060_v12 }
 0x405   : > { %v11063_v36 = vpop.f32.mrf.mxu1  ;;  %v16315_v31 = vpop.f32.mrf.mxu0 }
 0x406   : > { %v16318_v6 = vadd.f32 %v11062_v45, %v16137_v10 }
 0x407   : > { %v11064_v38 = vpop.f32.mrf.mxu1  ;;  %v16320_v15 = vpop.f32.mrf.mxu0 }
 0x408   : > { %v11065_v35 = vadd.f32 %v11064_v38, %v11063_v36 }
 0x409   : > { %v11066_v50 = vpop.f32.mrf.mxu1  ;;  %v16322_v53 = vpop.f32.mrf.mxu0 }
 0x40a   : > { %v16325_v32 = vadd.f32 %v11065_v35, %v16147_v54 }
 0x40b   : > { %v11067_v5 = vpop.f32.mrf.mxu1  ;;  %v16327_v8 = vpop.f32.mrf.mxu0 }
 0x40c   : > { %v11068_v43 = vadd.f32 %v11067_v5, %v11066_v50 }
 0x40d   : > { %v11069_v61 = vpop.f32.mrf.mxu1  ;;  %v16329_v33 = vpop.f32.mrf.mxu0 }
 0x40e   : > { %v16332_v10 = vadd.f32 %v11068_v43, %v16154_v34 }
 0x40f   : > { %v11070_v16 = vpop.f32.mrf.mxu1  ;;  %v16334_v12 = vpop.f32.mrf.mxu0 }
 0x410   : > { %17180 = vst [vmem:[#allocation9_spill] sm:$0xff] %v16332_v10  ;;  %v11071_v7 = vadd.f32 %v11070_v16, %v11069_v61 }
 0x411   : > { %v11072_v45 = vpop.f32.mrf.mxu1  ;;  %v16336_v36 = vpop.f32.mrf.mxu0 }
 0x412   : > { %17181 = vst [vmem:[#allocation23_spill] sm:$0xff] %v16336_v36  ;;  %v16339_v54 = vadd.f32 %v11071_v7, %v16160_v41 }
 0x413   : > { %v11073_v38 = vpop.f32.mrf.mxu1  ;;  %v16341_v35 = vpop.f32.mrf.mxu0 }
 0x414   : > { %17182 = vst [vmem:[#allocation38_spill] sm:$0xff] %v16341_v35  ;;  %v11074_v50 = vadd.f32 %v11073_v38, %v11072_v45 }
 0x415   : > { %v16343_v29 = vpop.f32.mrf.mxu0 }
 0x416   : > { %v11075_v5 = vpop.f32.mrf.mxu1  ;;  %17183 = vst [vmem:[#allocation17_spill] sm:$0xff] %v16343_v29  ;;  %v16346_v34 = vadd.f32 %v11074_v50, %v16168_v13 }
 0x417   : > { %v16348_v17 = vpop.f32.mrf.mxu0 }
 0x418   : > { %v11076_v43 = vpop.f32.mrf.mxu1  ;;  %17184 = vst [vmem:[#allocation35_spill] sm:$0xff] %v16348_v17 }
 0x419   : > { %v11077_v61 = vadd.f32 %v11076_v43, %v11075_v5  ;;  %v16350_v10 = vpop.f32.mrf.mxu0 }
 0x41a   : > { %v11078_v16 = vpop.f32.mrf.mxu1 }
 0x41b   : > { %v16353_v41 = vadd.f32 %v11077_v61, %v16171_v63  ;;  %v16355_v36 = vpop.f32.mrf.mxu0 }
 0x41c   : > { %v11079_v7 = vpop.f32.mrf.mxu1 }
 0x41d   : > { %17185 = vst [vmem:[#allocation44_spill] sm:$0xff] %v16353_v41  ;;  %v11080_v45 = vadd.f32 %v11079_v7, %v11078_v16  ;;  %v16357_v35 = vpop.f32.mrf.mxu0 }
 0x41e   : > { %17186 = vst [vmem:[#allocation45_spill] sm:$0xff] %v16357_v35 }
 0x41f   : > { %v16360_v13 = vadd.f32 %v11080_v45, %v16177_v58  ;;  %v16362_v29 = vpop.f32.mrf.mxu0 }
 0x420   : > { %v11081_v38 = vpop.f32.mrf.mxu1  ;;  %17188 = vst [vmem:[#allocation46_spill] sm:$0xff] %v16362_v29 }
 0x421   : > { %17187 = vst [vmem:[#allocation49_spill] sm:$0xff] %v16360_v13  ;;  %v16364_v17 = vpop.f32.mrf.mxu0 }
 0x422   : > { %v11082_v50 = vpop.f32.mrf.mxu1  ;;  %17189 = vst [vmem:[#allocation48_spill] sm:$0xff] %v16364_v17 }
 0x423   : > { %v11083_v5 = vadd.f32 %v11082_v50, %v11081_v38  ;;  %v16369_v41 = vpop.f32.mrf.mxu0 }
 0x424   : > { %v11084_v43 = vpop.f32.mrf.mxu1  ;;  %17190 = vst [vmem:[#allocation20_spill] sm:$0xff] %v16369_v41 }
 0x425   : > { %v16367_v63 = vadd.f32 %v11083_v5, %v16180_v14  ;;  %v16374_v58 = vpop.f32.mrf.mxu0 }
 0x426   : > { %v11085_v61 = vpop.f32.mrf.mxu1  ;;  %17191 = vst [vmem:[#allocation31_spill] sm:$0xff] %v16374_v58 }
 0x427   : > { %v11086_v16 = vadd.f32 %v11085_v61, %v11084_v43  ;;  %v16379_v50 = vpop.f32.mrf.mxu0 }
 0x428   : > { %v11087_v7 = vpop.f32.mrf.mxu1  ;;  %17193 = vst [vmem:[#allocation10_spill] sm:$0xff] %v16379_v50 }
 0x429   : > { %v16372_v35 = vadd.f32 %v11086_v16, %v16186_v11  ;;  %v16384_v43 = vpop.f32.mrf.mxu0 }
 0x42a   : > { %v11088_v45 = vpop.f32.mrf.mxu1 }
 0x42b   : > { %v11089_v13 = vadd.f32 %v11088_v45, %v11087_v7  ;;  %v16389_v7 = vpop.f32.mrf.mxu0 }
 0x42c   : > { %v11090_v29 = vpop.f32.mrf.mxu1 }
 0x42d   : > { %v16377_v38 = vadd.f32 %v11089_v13, %v16189_v3 }
 0x42e   : > { %v11091_v14 = vpop.f32.mrf.mxu1 }
 0x42f   : > { %17192 = vst [vmem:[#allocation47_spill] sm:$0xff] %v16377_v38  ;;  %v11092_v5 = vadd.f32 %v11091_v14, %v11090_v29  ;;  %v16394_v29 = vpop.f32.mrf.mxu0 }
 0x430   : > { %v11093_v17 = vpop.f32.mrf.mxu1 }
 0x431   : > { %v16382_v41 = vadd.f32 %v11092_v5, %v16192_v46 }
 0x432   : > { %v11094_v11 = vpop.f32.mrf.mxu1 }
 0x433   : > { %17194 = vst [vmem:[#allocation14_spill] sm:$0xff] %v16382_v41  ;;  %v11095_v61 = vadd.f32 %v11094_v11, %v11093_v17  ;;  %v16399_v17 = vpop.f32.mrf.mxu0 }
 0x434   : > { %v11096_v16 = vpop.f32.mrf.mxu1 }
 0x435   : > { %v16387_v58 = vadd.f32 %v11095_v61, %v16195_v56 }
 0x436   : > { %v11097_v3 = vpop.f32.mrf.mxu1 }
 0x437   : > { %v11098_v13 = vadd.f32 %v11097_v3, %v11096_v16  ;;  %v16404_v16 = vpop.f32.mrf.mxu0 }
 0x438   : > { %v11099_v45 = vpop.f32.mrf.mxu1 }
 0x439   : > { %v16392_v50 = vadd.f32 %v11098_v13, %v16201_v20 }
 0x43a   : > { %v11100_v46 = vpop.f32.mrf.mxu1 }
 0x43b   : > { %17195 = vst [vmem:[#allocation21_spill] sm:$0xff] %v16392_v50  ;;  %v11101_v14 = vadd.f32 %v11100_v46, %v11099_v45  ;;  %v16409_v45 = vpop.f32.mrf.mxu0 }
 0x43c   : > { %v11102_v5 = vpop.f32.mrf.mxu1 }
 0x43d   : > { %v16397_v41 = vadd.f32 %v11101_v14, %v16204_v19 }
 0x43e   : > { %v11103_v56 = vpop.f32.mrf.mxu1 }
 0x43f   : > { %17196 = vst [vmem:[#allocation27_spill] sm:$0xff] %v16397_v41  ;;  %v11104_v11 = vadd.f32 %v11103_v56, %v11102_v5  ;;  %v16414_v5 = vpop.f32.mrf.mxu0 }
 0x440   : > { %v11105_v61 = vpop.f32.mrf.mxu1 }
 0x441   : > { %v16402_v38 = vadd.f32 %v11104_v11, %v16213_v1 }
 0x442   : > { %v11106_v20 = vpop.f32.mrf.mxu1 }
 0x443   : > { %17197 = vst [vmem:[#allocation8_spill] sm:$0xff] %v16402_v38  ;;  %v11107_v3 = vadd.f32 %v11106_v20, %v11105_v61  ;;  %v16419_v61 = vpop.f32.mrf.mxu0 }
 0x444   : > { %v11108_v13 = vpop.f32.mrf.mxu1 }
 0x445   : > { %v16407_v50 = vadd.f32 %v11107_v3, %v16216_v22 }
 0x446   : > { %v11109_v19 = vpop.f32.mrf.mxu1 }
 0x447   : > { %17198 = vst [vmem:[#allocation32_spill] sm:$0xff] %v16407_v50  ;;  %v11110_v46 = vadd.f32 %v11109_v19, %v11108_v13  ;;  %v16424_v13 = vpop.f32.mrf.mxu0 }
 0x448   : > { %v11111_v14 = vpop.f32.mrf.mxu1 }
 0x449   : > { %v16412_v41 = vadd.f32 %v11110_v46, %v16225_v39 }
 0x44a   : > { %v11112_v1 = vpop.f32.mrf.mxu1 }
 0x44b   : > { %17199 = vst [vmem:[#allocation37_spill] sm:$0xff] %v16412_v41  ;;  %v11113_v56 = vadd.f32 %v11112_v1, %v11111_v14  ;;  %v16429_v14 = vpop.f32.mrf.mxu0 }
 0x44c   : > { %v11114_v11 = vpop.f32.mrf.mxu1 }
 0x44d   : > { %v16417_v38 = vadd.f32 %v11113_v56, %v16228_v23 }
 0x44e   : > { %v11115_v22 = vpop.f32.mrf.mxu1 }
 0x44f   : > { %17200 = vst [vmem:[#allocation12_spill] sm:$0xff] %v16417_v38  ;;  %v11116_v20 = vadd.f32 %v11115_v22, %v11114_v11  ;;  %v16434_v11 = vpop.f32.mrf.mxu0 }
 0x450   : > { %v11117_v3 = vpop.f32.mrf.mxu1 }
 0x451   : > { %v16422_v50 = vadd.f32 %v11116_v20, %v16237_v62 }
 0x452   : > { %v11118_v39 = vpop.f32.mrf.mxu1 }
 0x453   : > { %17201 = vst [vmem:[#allocation36_spill] sm:$0xff] %v16422_v50  ;;  %v11119_v19 = vadd.f32 %v11118_v39, %v11117_v3 }
 0x454   : > { %v11120_v46 = vpop.f32.mrf.mxu1 }
 0x455   : > { %v16427_v41 = vadd.f32 %v11119_v19, %v16240_v37  ;;  %v16439_v37 = vpop.f32.mrf.mxu0 }
 0x456   : > { %v11121_v23 = vpop.f32.mrf.mxu1 }
 0x457   : > { %v11122_v1 = vadd.f32 %v11121_v23, %v11120_v46  ;;  %v16446_v46 = vpop.f32.mrf.mxu0 }
 0x458   : > { %v11123_v56 = vpop.f32.mrf.mxu1 }
 0x459   : > { %v16432_v38 = vadd.f32 %v11122_v1, %v16249_v4 }
 0x45a   : > { %v11124_v62 = vpop.f32.mrf.mxu1 }
 0x45b   : > { %17202 = vst [vmem:[#allocation11_spill] sm:$0xff] %v16432_v38  ;;  %v11125_v22 = vadd.f32 %v11124_v62, %v11123_v56  ;;  %v16454_v56 = vpop.f32.mrf.mxu0  ;;  %v12108_v38 = vld [vmem:[%s12380_s7] sm:$0xff] }
 0x45c   : > { %v11126_v20 = vpop.f32.mrf.mxu1 }
 0x45d   : > { %v16437_v3 = vadd.f32 %v11125_v22, %v16252_v0  ;;  %v11159_v0 = vadd.f32 %v16269_v52, %v16266_v48 }
 0x45e   : > { %v11127_v39 = vpop.f32.mrf.mxu1 }
 0x45f   : > { %17203 = vst [vmem:[#allocation25_spill] sm:$0xff] %v16437_v3  ;;  %v11128_v19 = vadd.f32 %v11127_v39, %v11126_v20  ;;  %v8912_v22 = vadd.f32 %v11159_v0, %v16283_v9  ;;  %v12107_v3 = vld [vmem:[%s12380_s7 + $0x10] sm:$0xff]  ;;  %v11171_v9 = vadd.f32 %v16299_v27, %v16294_v2 }
 0x460   : > { %v16441_v50 = vpop.f32.mrf.mxu1 }
 0x461   : > { %v16444_v4 = vadd.f32 %v11128_v19, %v16258_v24  ;;  %v11162_v24 = vadd.f32 %v16276_v21, %v16273_v57  ;;  %v16464_v19 = vpop.f32.mrf.mxu0 }
 0x462   : > { %v16448_v23 = vpop.f32.mrf.mxu1  ;;  %17207 = vst [vmem:[#allocation6_spill] sm:$0xff] %v16464_v19 }
 0x463   : > { %17204 = vst [vmem:[#allocation15_spill] sm:$0xff] %v16444_v4 }
 0x464   : > { %v16450_v1 = vpop.f32.mrf.mxu1 }
 0x465   : > { %17205 = vst [vmem:[#allocation13_spill] sm:$0xff] %v16450_v1 }
 0x466   : > { %v16456_v62 = vpop.f32.mrf.mxu1 }
 0x467   : > { %17206 = vst [vmem:[#allocation19_spill] sm:$0xff] %v16456_v62  ;;  %v8915_v62 = vadd.f32 %v11162_v24, %v16290_v55  ;;  %v12109_v55 = vld [vmem:[%s12380_s7 + $0x18] sm:$0xff] }
 0x468   : > { %v11337_v20 = vpop.f32.mrf.mxu1 }
 0x469   : > { %v9073_v39 = vadd.f32 %v11337_v20, %v8912_v22  ;;  %v11165_v22 = vadd.f32 %v16285_v51, %v16280_v40  ;;  %v16474_v20 = vpop.f32.mrf.mxu0  ;;  %v11174_v51 = vadd.f32 %v16306_v49, %v16301_v30 }
 0x46a   : > { %v9064_v4 = vpop.f32.mrf.mxu1 }
 0x46b   : > { %v9193_v48 = vadd.f32 %v12107_v3, %v9073_v39  ;;  %v9065_v52 = vadd.f32 %v9064_v4, %v16271_v25  ;;  %v8920_v40 = vadd.f32 %v11165_v22, %v16297_v44  ;;  %v11168_v39 = vadd.f32 %v16292_v42, %v16287_v60  ;;  %v12111_v44 = vld [vmem:[%s12380_s7 + $0x30] sm:$0xff]  ;;  %v12112_v42 = vld [vmem:[%s12380_s7 + $0x20] sm:$0xff] }
 0x46c   : > { %v11338_v1 = vpop.f32.mrf.mxu1  ;;  %v8931_v49 = vadd.f32 %v11174_v51, %v16318_v6  ;;  %v11177_v22 = vadd.f32 %v16313_v18, %v16308_v28  ;;  %v12114_v18 = vld [vmem:[%s12380_s7 + $0x28] sm:$0xff] }
 0x46d   : > { %v9225_v0 = vmax.f32 %v9193_v48, 0.0  ;;  %v9191_v57 = vadd.f32 %v12108_v38, %v9065_v52  ;;  %v9076_v21 = vadd.f32 %v11338_v1, %v8915_v62  ;;  %v8928_v38 = vadd.f32 %v11171_v9, %v16311_v47  ;;  %v12110_v1 = vld [vmem:[%s12380_s7 + $0x8] sm:$0xff]  ;;  %v16489_v48 = vpop.f32.mrf.mxu0 }
 0x46e   : > { %v9067_v19 = vpop.f32.mrf.mxu1  ;;  %v8923_v9 = vadd.f32 %v11168_v39, %v16304_v59  ;;  %v12113_v59 = vld [vmem:[%s12380_s7 + $0x38] sm:$0xff] }
 0x46f   : > { %9257 = vst [vmem:[%s16476_s26 + $0x10] sm:$0xff] %v9225_v0  ;;  %v9223_v25 = vmax.f32 %v9191_v57, 0.0  ;;  %v9194_v2 = vadd.f32 %v12109_v55, %v9076_v21  ;;  %v9068_v27 = vadd.f32 %v9067_v19, %v16278_v26  ;;  %v11183_v0 = vadd.f32 %v16327_v8, %v16322_v53 }
 0x470   : > { %v11341_v3 = vpop.f32.mrf.mxu1 }
 0x471   : > { %9255 = vst [vmem:[%s16476_s26] sm:$0xff] %v9223_v25  ;;  %v9226_v4 = vmax.f32 %v9194_v2, 0.0  ;;  %v9192_v62 = vadd.f32 %v12110_v1, %v9068_v27  ;;  %v9089_v24 = vadd.f32 %v11341_v3, %v8928_v38  ;;  %v16501_v25 = vpop.f32.mrf.mxu0  ;;  %v8944_v8 = vadd.f32 %v11183_v0, %v16339_v54 }
 0x472   : > { %v9080_v26 = vpop.f32.mrf.mxu1  ;;  %v8936_v38 = vadd.f32 %v11177_v22, %v16325_v32  ;;  %v11186_v3 = vadd.f32 %v16334_v12, %v16329_v33  ;;  %v12115_v32 = vld [vmem:[%s12380_s7 + $0x50] sm:$0xff] }
 0x473   : > { %9258 = vst [vmem:[%s16476_s26 + $0x18] sm:$0xff] %v9226_v4  ;;  %v9224_v47 = vmax.f32 %v9192_v62, 0.0  ;;  %v9197_v19 = vadd.f32 %v12111_v44, %v9089_v24  ;;  %v9081_v30 = vadd.f32 %v9080_v26, %v8920_v40  ;;  %v11180_v4 = vadd.f32 %v16320_v15, %v16315_v31  ;;  %v16513_v1 = vpop.f32.mrf.mxu0  ;;  %v17208_v26 = vld [vmem:[#allocation9_spill] sm:$0xff]  ;;  %v12116_v15 = vld [vmem:[%s12380_s7 + $0x40] sm:$0xff]  ;;  %v17211_v22 = vld [vmem:[#allocation44_spill] sm:$0xff] }
 0x474   : > { %v11342_v52 = vpop.f32.mrf.mxu1  ;;  %v8947_v12 = vadd.f32 %v11186_v3, %v16346_v34  ;;  %v11195_v44 = vadd.f32 %v16355_v36, %v16350_v10  ;;  %v17214_v3 = vld [vmem:[#allocation17_spill] sm:$0xff] }
 0x475   : > { %9256 = vst [vmem:[%s16476_s26 + $0x8] sm:$0xff] %v9224_v47  ;;  %v9229_v60 = vmax.f32 %v9197_v19, 0.0  ;;  %v9195_v57 = vadd.f32 %v12112_v42, %v9081_v30  ;;  %v9092_v21 = vadd.f32 %v11342_v52, %v8931_v49  ;;  %v8939_v47 = vadd.f32 %v11180_v4, %v17208_v26  ;;  %v17209_v49 = vld [vmem:[#allocation23_spill] sm:$0xff]  ;;  %v17210_v52 = vld [vmem:[#allocation38_spill] sm:$0xff]  ;;  %v16525_v0 = vpop.f32.mrf.mxu0  ;;  %v12117_v42 = vld [vmem:[%s12380_s7 + $0x58] sm:$0xff] }
 0x476   : > { %v9083_v55 = vpop.f32.mrf.mxu1  ;;  %v8960_v36 = vadd.f32 %v11195_v44, %v16367_v63  ;;  %v12119_v4 = vld [vmem:[%s12380_s7 + $0x70] sm:$0xff] }
 0x477   : > { %9261 = vst [vmem:[%s16476_s26 + $0x30] sm:$0xff] %v9229_v60  ;;  %v9227_v6 = vmax.f32 %v9195_v57, 0.0  ;;  %v9198_v2 = vadd.f32 %v12113_v59, %v9092_v21  ;;  %v9084_v53 = vadd.f32 %v9083_v55, %v8923_v9  ;;  %v11189_v9 = vadd.f32 %v17210_v52, %v17209_v49  ;;  %v17213_v59 = vld [vmem:[#allocation46_spill] sm:$0xff] }
 0x478   : > { %v11345_v27 = vpop.f32.mrf.mxu1 }
 0x479   : > { %9259 = vst [vmem:[%s16476_s26 + $0x20] sm:$0xff] %v9227_v6  ;;  %v9230_v28 = vmax.f32 %v9198_v2, 0.0  ;;  %v9196_v40 = vadd.f32 %v12114_v18, %v9084_v53  ;;  %v9105_v51 = vadd.f32 %v11345_v27, %v8944_v8  ;;  %v8952_v55 = vadd.f32 %v11189_v9, %v17211_v22  ;;  %v17212_v6 = vld [vmem:[#allocation45_spill] sm:$0xff]  ;;  %v12118_v8 = vld [vmem:[%s12380_s7 + $0x48] sm:$0xff] }
 0x47a   : > { %v9096_v62 = vpop.f32.mrf.mxu1  ;;  %v11198_v2 = vadd.f32 %v17213_v59, %v17212_v6  ;;  %v12121_v9 = vld [vmem:[%s12380_s7 + $0x78] sm:$0xff]  ;;  %v17220_v6 = vld [vmem:[#allocation31_spill] sm:$0xff]  ;;  %v17221_v59 = vld [vmem:[#allocation10_spill] sm:$0xff] }
 0x47b   : > { %9262 = vst [vmem:[%s16476_s26 + $0x38] sm:$0xff] %v9230_v28  ;;  %v9228_v54 = vmax.f32 %v9196_v40, 0.0  ;;  %v9201_v24 = vadd.f32 %v12115_v32, %v9105_v51  ;;  %v9097_v33 = vadd.f32 %v9096_v62, %v8936_v38  ;;  %v17215_v28 = vld [vmem:[#allocation35_spill] sm:$0xff]  ;;  %v16537_v40 = vpop.f32.mrf.mxu0 }
 0x47c   : > { %v11346_v39 = vpop.f32.mrf.mxu1  ;;  %v11192_v18 = vadd.f32 %v17215_v28, %v17214_v3  ;;  %v8963_v32 = vadd.f32 %v11198_v2, %v16372_v35  ;;  %v11204_v2 = vadd.f32 %v17221_v59, %v17220_v6  ;;  %v11225_v59 = vadd.f32 %v16454_v56, %v16446_v46  ;;  %v12130_v56 = vld [vmem:[%s12380_s7 + $0xa8] sm:$0xff] }
 0x47d   : > { %9260 = vst [vmem:[%s16476_s26 + $0x28] sm:$0xff] %v9228_v54  ;;  %v9233_v31 = vmax.f32 %v9201_v24, 0.0  ;;  %v9199_v19 = vadd.f32 %v12116_v15, %v9097_v33  ;;  %v9108_v30 = vadd.f32 %v11346_v39, %v8947_v12  ;;  %v17216_v33 = vld [vmem:[#allocation49_spill] sm:$0xff]  ;;  %v11207_v39 = vadd.f32 %v16389_v7, %v16384_v43  ;;  %v17217_v15 = vld [vmem:[#allocation48_spill] sm:$0xff]  ;;  %v16549_v49 = vpop.f32.mrf.mxu0 }
 0x47e   : > { %v9099_v60 = vpop.f32.mrf.mxu1  ;;  %v8955_v12 = vadd.f32 %v11192_v18, %v17216_v33  ;;  %v17223_v18 = vld [vmem:[#allocation14_spill] sm:$0xff] }
 0x47f   : > { %9265 = vst [vmem:[%s16476_s26 + $0x50] sm:$0xff] %v9233_v31  ;;  %v9231_v34 = vmax.f32 %v9199_v19, 0.0  ;;  %v9202_v57 = vadd.f32 %v12117_v42, %v9108_v30  ;;  %v9100_v10 = vadd.f32 %v9099_v60, %v8939_v47  ;;  %v12120_v47 = vld [vmem:[%s12380_s7 + $0x60] sm:$0xff]  ;;  %v17218_v19 = vld [vmem:[#allocation20_spill] sm:$0xff]  ;;  %v8976_v7 = vadd.f32 %v11207_v39, %v16387_v58  ;;  %v17219_v42 = vld [vmem:[#allocation47_spill] sm:$0xff] }
 0x480   : > { %v11349_v21 = vpop.f32.mrf.mxu1  ;;  %v11201_v30 = vadd.f32 %v17218_v19, %v17217_v15  ;;  %v17225_v15 = vld [vmem:[#allocation27_spill] sm:$0xff] }
 0x481   : > { %9263 = vst [vmem:[%s16476_s26 + $0x40] sm:$0xff] %v9231_v34  ;;  %v9234_v53 = vmax.f32 %v9202_v57, 0.0  ;;  %v9200_v27 = vadd.f32 %v12118_v8, %v9100_v10  ;;  %v9121_v38 = vadd.f32 %v11349_v21, %v8960_v36  ;;  %v11210_v10 = vadd.f32 %v16399_v17, %v16394_v29  ;;  %v12122_v21 = vld [vmem:[%s12380_s7 + $0x68] sm:$0xff]  ;;  %v17222_v17 = vld [vmem:[#allocation21_spill] sm:$0xff] }
 0x482   : > { %v9112_v51 = vpop.f32.mrf.mxu1  ;;  %v8968_v57 = vadd.f32 %v11201_v30, %v17219_v42  ;;  %v11222_v30 = vadd.f32 %v16439_v37, %v16434_v11 }
 0x483   : > { %9266 = vst [vmem:[%s16476_s26 + $0x58] sm:$0xff] %v9234_v53  ;;  %v9232_v63 = vmax.f32 %v9200_v27, 0.0  ;;  %v9205_v62 = vadd.f32 %v12119_v4, %v9121_v38  ;;  %v9113_v54 = vadd.f32 %v9112_v51, %v8952_v55  ;;  %v16561_v53 = vpop.f32.mrf.mxu0  ;;  %v12123_v27 = vld [vmem:[%s12380_s7 + $0x90] sm:$0xff]  ;;  %v8979_v3 = vadd.f32 %v11210_v10, %v17222_v17  ;;  %v17226_v10 = vld [vmem:[#allocation37_spill] sm:$0xff] }
 0x484   : > { %v11350_v24 = vpop.f32.mrf.mxu1  ;;  %v8971_v51 = vadd.f32 %v11204_v2, %v17223_v18  ;;  %v8995_v11 = vadd.f32 %v11222_v30, %v17226_v10  ;;  %v11234_v17 = vadd.f32 %v16525_v0, %v16513_v1  ;;  %v17232_v0 = vld [vmem:[#allocation13_spill] sm:$0xff]  ;;  %v17234_v30 = vld [vmem:[#allocation36_spill] sm:$0xff] }
 0x485   : > { %9264 = vst [vmem:[%s16476_s26 + $0x48] sm:$0xff] %v9232_v63  ;;  %v9237_v26 = vmax.f32 %v9205_v62, 0.0  ;;  %v9203_v44 = vadd.f32 %v12120_v47, %v9113_v54  ;;  %v9124_v31 = vadd.f32 %v11350_v24, %v8963_v32  ;;  %v11219_v63 = vadd.f32 %v16429_v14, %v16424_v13  ;;  %v12124_v62 = vld [vmem:[%s12380_s7 + $0x80] sm:$0xff]  ;;  %v16573_v33 = vpop.f32.mrf.mxu0  ;;  %v17224_v14 = vld [vmem:[#allocation32_spill] sm:$0xff] }
 0x486   : > { %v9115_v52 = vpop.f32.mrf.mxu1  ;;  %v11213_v24 = vadd.f32 %v16409_v45, %v16404_v16  ;;  %v12126_v45 = vld [vmem:[%s12380_s7 + $0x88] sm:$0xff] }
 0x487   : > { %9269 = vst [vmem:[%s16476_s26 + $0x70] sm:$0xff] %v9237_v26  ;;  %v9235_v35 = vmax.f32 %v9203_v44, 0.0  ;;  %v9206_v60 = vadd.f32 %v12121_v9, %v9124_v31  ;;  %v9116_v43 = vadd.f32 %v9115_v52, %v8955_v12  ;;  %v12125_v26 = vld [vmem:[%s12380_s7 + $0x98] sm:$0xff]  ;;  %v8992_v44 = vadd.f32 %v11219_v63, %v17224_v14 }
 0x488   : > { %v11353_v34 = vpop.f32.mrf.mxu1  ;;  %v8984_v19 = vadd.f32 %v11213_v24, %v17225_v15  ;;  %v11216_v9 = vadd.f32 %v16419_v61, %v16414_v5  ;;  %v12128_v5 = vld [vmem:[%s12380_s7 + $0xa0] sm:$0xff]  ;;  %v17233_v24 = vld [vmem:[#allocation19_spill] sm:$0xff] }
 0x489   : > { %9267 = vst [vmem:[%s16476_s26 + $0x60] sm:$0xff] %v9235_v35  ;;  %v9238_v36 = vmax.f32 %v9206_v60, 0.0  ;;  %v9204_v22 = vadd.f32 %v12122_v21, %v9116_v43  ;;  %v9137_v55 = vadd.f32 %v11353_v34, %v8976_v7  ;;  %v11241_v60 = vpop.f32.mrf.mxu0  ;;  %v12127_v34 = vld [vmem:[%s12380_s7 + $0xb0] sm:$0xff] }
 0x48a   : > { %v9128_v8 = vpop.f32.mrf.mxu1 }
 0x48b   : > { %9270 = vst [vmem:[%s16476_s26 + $0x78] sm:$0xff] %v9238_v36  ;;  %v9236_v58 = vmax.f32 %v9204_v22, 0.0  ;;  %v9209_v38 = vadd.f32 %v12123_v27, %v9137_v55  ;;  %v9129_v29 = vadd.f32 %v9128_v8, %v8968_v57  ;;  %v17227_v36 = vld [vmem:[#allocation8_spill] sm:$0xff]  ;;  %v11231_v22 = vadd.f32 %v16501_v25, %v16489_v48  ;;  %v11242_v2 = vpop.f32.mrf.mxu0 }
 0x48c   : > { %v11354_v28 = vpop.f32.mrf.mxu1  ;;  %v8987_v21 = vadd.f32 %v11216_v9, %v17227_v36  ;;  %v11131_v8 = vadd.f32 %v16448_v23, %v16441_v50  ;;  %v17228_v23 = vld [vmem:[#allocation12_spill] sm:$0xff]  ;;  %v11243_v14 = vadd.f32 %v11242_v2, %v11241_v60 }
 0x48d   : > { %9268 = vst [vmem:[%s16476_s26 + $0x68] sm:$0xff] %v9236_v58  ;;  %v9241_v4 = vmax.f32 %v9209_v38, 0.0  ;;  %v9207_v54 = vadd.f32 %v12124_v62, %v9129_v29  ;;  %v9140_v32 = vadd.f32 %v11354_v28, %v8979_v3  ;;  %v12129_v38 = vld [vmem:[%s12380_s7 + $0xb8] sm:$0xff]  ;;  %v9008_v25 = vadd.f32 %v11231_v22, %v16427_v41  ;;  %v17230_v62 = vld [vmem:[#allocation24_spill] sm:$0xff] }
 0x48e   : > { %v9131_v12 = vpop.f32.mrf.mxu1  ;;  %v9000_v18 = vadd.f32 %v11225_v59, %v17228_v23  ;;  %v8863_v41 = vadd.f32 %v11131_v8, %v17230_v62 }
 0x48f   : > { %9273 = vst [vmem:[%s16476_s26 + $0x90] sm:$0xff] %v9241_v4  ;;  %v9239_v39 = vmax.f32 %v9207_v54, 0.0  ;;  %v9210_v47 = vadd.f32 %v12125_v26, %v9140_v32  ;;  %v9132_v13 = vadd.f32 %v9131_v12, %v8971_v51  ;;  %v17229_v51 = vld [vmem:[#allocation6_spill] sm:$0xff]  ;;  %v11244_v4 = vpop.f32.mrf.mxu0  ;;  %v17231_v32 = vld [vmem:[#allocation11_spill] sm:$0xff]  ;;  %v11134_v12 = vadd.f32 %v17233_v24, %v17232_v0  ;;  %v12131_v26 = vld [vmem:[%s12380_s7 + $0xd0] sm:$0xff] }
 0x490   : > { %v11357_v31 = vpop.f32.mrf.mxu1  ;;  %v11228_v63 = vadd.f32 %v16474_v20, %v17229_v51  ;;  %v9011_v1 = vadd.f32 %v11234_v17, %v17231_v32  ;;  %v9024_v9 = vadd.f32 %v11243_v14, %v8863_v41 }
 0x491   : > { %9271 = vst [vmem:[%s16476_s26 + $0x80] sm:$0xff] %v9239_v39  ;;  %v9242_v16 = vmax.f32 %v9210_v47, 0.0  ;;  %v9208_v52 = vadd.f32 %v12126_v45, %v9132_v13  ;;  %v9153_v35 = vadd.f32 %v11357_v31, %v8992_v44  ;;  %v12132_v31 = vld [vmem:[%s12380_s7 + $0xc0] sm:$0xff]  ;;  %v11237_v45 = vadd.f32 %v16549_v49, %v16537_v40  ;;  %v12134_v49 = vld [vmem:[%s12380_s7 + $0xc8] sm:$0xff] }
 0x492   : > { %v9144_v43 = vpop.f32.mrf.mxu1 }
 0x493   : > { %9274 = vst [vmem:[%s16476_s26 + $0x98] sm:$0xff] %v9242_v16  ;;  %v9240_v7 = vmax.f32 %v9208_v52, 0.0  ;;  %v9213_v42 = vadd.f32 %v12127_v34, %v9153_v35  ;;  %v9145_v57 = vadd.f32 %v9144_v43, %v8984_v19  ;;  %v9003_v16 = vadd.f32 %v11228_v63, %v17234_v30  ;;  %v11245_v52 = vpop.f32.mrf.mxu0  ;;  %v17235_v43 = vld [vmem:[#allocation18_spill] sm:$0xff]  ;;  %v12133_v34 = vld [vmem:[%s12380_s7 + $0xd8] sm:$0xff] }
 0x494   : > { %v11358_v37 = vpop.f32.mrf.mxu1  ;;  %v11246_v36 = vadd.f32 %v11245_v52, %v11244_v4 }
 0x495   : > { %9272 = vst [vmem:[%s16476_s26 + $0x88] sm:$0xff] %v9240_v7  ;;  %v9245_v55 = vmax.f32 %v9213_v42, 0.0  ;;  %v9211_v61 = vadd.f32 %v12128_v5, %v9145_v57  ;;  %v9156_v6 = vadd.f32 %v11358_v37, %v8995_v11  ;;  %v8866_v7 = vadd.f32 %v11134_v12, %v17235_v43  ;;  %v17236_v11 = vld [vmem:[#allocation25_spill] sm:$0xff] }
 0x496   : > { %v9147_v58 = vpop.f32.mrf.mxu1  ;;  %v9016_v37 = vadd.f32 %v11237_v45, %v17236_v11 }
 0x497   : > { %9277 = vst [vmem:[%s16476_s26 + $0xb0] sm:$0xff] %v9245_v55  ;;  %v9243_v27 = vmax.f32 %v9211_v61, 0.0  ;;  %v9214_v29 = vadd.f32 %v12129_v38, %v9156_v6  ;;  %v9148_v48 = vadd.f32 %v9147_v58, %v8987_v21  ;;  %v11240_v55 = vadd.f32 %v16573_v33, %v16561_v53  ;;  %v12135_v6 = vld [vmem:[%s12380_s7 + $0xf0] sm:$0xff]  ;;  %v12136_v38 = vld [vmem:[%s12380_s7 + $0xe0] sm:$0xff]  ;;  %v17237_v53 = vld [vmem:[#allocation15_spill] sm:$0xff] }
 0x498   : > { %v11361_v3 = vpop.f32.mrf.mxu1  ;;  %v9027_v8 = vadd.f32 %v11246_v36, %v8866_v7 }
 0x499   : > { %9275 = vst [vmem:[%s16476_s26 + $0xa0] sm:$0xff] %v9243_v27  ;;  %v9246_v46 = vmax.f32 %v9214_v29, 0.0  ;;  %v9212_v28 = vadd.f32 %v12130_v56, %v9148_v48  ;;  %v9169_v50 = vadd.f32 %v11361_v3, %v9008_v25  ;;  %v9019_v33 = vadd.f32 %v11240_v55, %v17237_v53  ;;  %v12137_v3 = vld [vmem:[%s12380_s7 + $0xf8] sm:$0xff] }
 0x49a   : > { %v9160_v54 = vpop.f32.mrf.mxu1 }
 0x49b   : > { %9278 = vst [vmem:[%s16476_s26 + $0xb8] sm:$0xff] %v9246_v46  ;;  %v9244_v39 = vmax.f32 %v9212_v28, 0.0  ;;  %v9217_v47 = vadd.f32 %v12131_v26, %v9169_v50  ;;  %v9161_v13 = vadd.f32 %v9160_v54, %v9000_v18  ;;  %v12138_v50 = vld [vmem:[%s12380_s7 + $0xe8] sm:$0xff]  ;;  %s12202_s7 = smov [#allocation3]  }
 0x49c   : > { %v11362_v44 = vpop.f32.mrf.mxu1  ;;  %s12143_s12 = sshll.u32 %s12202_s7, 4  ;;  %s12144_s12 = int_to_ptr.vmem [resolvable:$false] %s12143_s12 }
 0x49d   : > { %9276 = vst [vmem:[%s16476_s26 + $0xa8] sm:$0xff] %v9244_v39  ;;  %v9249_v20 = vmax.f32 %v9217_v47, 0.0  ;;  %v9215_v15 = vadd.f32 %v12132_v31, %v9161_v13  ;;  %v9172_v19 = vadd.f32 %v11362_v44, %v9011_v1  ;;  %s12145_s13 = scalar_lea.vmem %s12144_s12, 8192  ;;  %p12146_p0 = scmp.lt.s32.totalorder %s16642_s6, %s12144_s12 }
 0x49e   : > { %v9163_v35 = vpop.f32.mrf.mxu1  ;;  %p12147_p1 = scmp.lt.s32.totalorder %s12145_s13, %s12139_s11 }
 0x49f   : > { %9281 = vst [vmem:[%s16476_s26 + $0xd0] sm:$0xff] %v9249_v20  ;;  %v9247_v60 = vmax.f32 %v9215_v15, 0.0  ;;  %v9218_v42 = vadd.f32 %v12133_v34, %v9172_v19  ;;  %v9164_v57 = vadd.f32 %v9163_v35, %v9003_v16 }
 0x4a0   : > { %v11365_v10 = vpop.f32.mrf.mxu1  ;;  %p12148_p2 = por %p12147_p1, %p12146_p0 }
 0x4a1   : > { %9279 = vst [vmem:[%s16476_s26 + $0xc0] sm:$0xff] %v9247_v60  ;;  %v9250_v40 = vmax.f32 %v9218_v42, 0.0  ;;  %v9216_v21 = vadd.f32 %v12134_v49, %v9164_v57  ;;  %v9185_v22 = vadd.f32 %v11365_v10, %v9024_v9 }
 0x4a2   : > { %v9176_v5 = vpop.f32.mrf.mxu1  ;;  %p12149_p3 = pnand %p12148_p2, %p12142_p13 }
 0x4a3   : > { %9282 = vst [vmem:[%s16476_s26 + $0xd8] sm:$0xff] %v9250_v40  ;;  %v9248_v61 = vmax.f32 %v9216_v21, 0.0  ;;  %v9221_v59 = vadd.f32 %v12135_v6, %v9185_v22  ;;  %v9177_v2 = vadd.f32 %v9176_v5, %v9016_v37 }
 0x4a4   : > { %v11366_v58 = vpop.f32.mrf.mxu1 }
 0x4a5   : > { %9280 = vst [vmem:[%s16476_s26 + $0xc8] sm:$0xff] %v9248_v61  ;;  %v9253_v27 = vmax.f32 %v9221_v59, 0.0  ;;  %v9219_v29 = vadd.f32 %v12136_v38, %v9177_v2  ;;  %v9188_v48 = vadd.f32 %v11366_v58, %v9027_v8 }
 0x4a6   : > { %v9179_v25 = vpop.f32.mrf.mxu1 }
 0x4a7   : > { %9285 = vst [vmem:[%s16476_s26 + $0xf0] sm:$0xff] %v9253_v27  ;;  %v9251_v17 = vmax.f32 %v9219_v29, 0.0  ;;  %v9222_v46 = vadd.f32 %v12137_v3, %v9188_v48  ;;  %v9180_v56 = vadd.f32 %v9179_v25, %v9019_v33 }
 0x4a9   : > { %9283 = vst [vmem:[%s16476_s26 + $0xe0] sm:$0xff] %v9251_v17  ;;  %v9254_v28 = vmax.f32 %v9222_v46, 0.0  ;;  %v9220_v23 = vadd.f32 %v12138_v50, %v9180_v56 }
 0x4ab   : > { %9286 = vst [vmem:[%s16476_s26 + $0xf8] sm:$0xff] %v9254_v28  ;;  %v9252_v18 = vmax.f32 %v9220_v23, 0.0 }
 0x4ad   : > { %9284 = vst [vmem:[%s16476_s26 + $0xe8] sm:$0xff] %v9252_v18 }
 0x4ae   : > { %12152 = shalt.err (!%p12149_p3)
}
 0x4af   : > { %s12153_s14 = scalar_lea.hbm %s16640_s10, 4096  ;;  %s12157_s17 = scalar_lea.hbm %s16693_s5, 8192 }
 0x4b0   : > { %p12154_p4 = scmp.ne.s32.totalorder %s16640_s10, %s12153_s14  ;;  %p12158_p9 = scmp.lt.s32.totalorder %s16640_s10, %s16693_s5 }
 0x4b1   : > { %p12159_p10 = scmp.lt.s32.totalorder %s12157_s17, %s12153_s14 }
 0x4b2   : > { %p12155_p7 = pnand %p12154_p4, %p12273_p5 }
 0x4b3   : > { %p12160_p11 = por %p12159_p10, %p12158_p9 }
 0x4b4   : > { %p12156_p8 = pneg %p12155_p7 }
 0x4b6   : > { %p12161_p12 = pnand %p12160_p11, %p12156_p8 }
 0x4b8   : > { %12164 = shalt.err (!%p12161_p12)
}
 0x4b9   : > { %s12203_s26 = smov 128   ;;  %s12204_s30 = smov 8  }
 0x4ba   : > { %11367 = dma.vmem_to_hbm [thread:$0]  (%p12273_p5), %s16642_s6, 4096, %s16640_s10, %s16648_s22, %s12203_s26, %s12203_s26, %s12204_s30  }
 0x4bb PF: > { %p11373_p13 = scmp.ge.s32.totalorder %s12199_s21, 2  ;;  %s9317_s8 = sand.u32 1, %s12187_s18  }
 0x4bc   : > { %s9318_s9 = scalar_lea.sflag [#allocation4], %s9317_s8 }
 0x4bd   : > { %p11370_p0 = pnand %p11373_p13, %p12277_p6 }
 0x4bf   : > { %p11371_p1 = pneg %p11370_p0 }
 0x4c1   : > { %12182 = dma.done.wait (%p11371_p1), %s9318_s9, 4096  }
 0x4c2   : > { %12184 = vsyncadd (%p11371_p1), %s9318_s9, 4294963200  ;;  %p15_p2 = scmp.ge.s32.totalorder %s12260_s24, 4   ;;  %s17238_s18 = smov %s12191_s19 }
 0x4c3   : > { %s17239_s19 = smov %s12195_s20  ;;  %s17240_s20 = smov %s12271_s27 }
 0x4c4   : > { %s17241_s21 = smov %s12260_s24  ;;  %17 = sbr.rel (!%p15_p2) target bundleno = 3 (0x3), region = 78 }
 0x4c9   :  { %9323 = vsyncpa [#allocation4], 1 }
 0x4ca   :  { %9325 = vsyncpa [#allocation4 + $0x1], 1 }

</bundles_post_ra>
